<compile_context>
chip_gen: v6e
topology: v6e:2x2x1
jax: 0.10.0
libtpu: 0.0.40
codegen_flags: <defaults>
</compile_context>

<pallas_src>
import functools

import jax
import jax.numpy as jnp
from jax.experimental import pallas as pl
from jax.experimental.pallas import tpu as pltpu

KSIZE = 5
PAD = KSIZE // 2
NEG_SLOPE = 0.2
LAYER_FILTERS = [32, 64, 128, 256]
LANE = 128
VMEM_LIMIT = 32 * 1024 * 1024


def _round_up(v, m):
    return ((v + m - 1) // m) * m


# ----------------------------- Pallas kernels ------------------------------

def _accumulate_taps(act_ref, w_ref, *, stride, wq, l, cin, cout):
    """Accumulate the 25 conv taps as shifted-slab matmuls.

    act_ref: (stride*stride, Hq*Wq, Cin) VMEM scratch (LeakyReLU already applied;
             bf16 for matmul layers, f32 for the Cin==1 layer)
    w_ref  : (25, Cin, Cout) bf16
    Returns (L, Cout) f32 accumulator; row ho*Wq + wo holds output position (ho, wo)
    (rows with wo >= wout are halo garbage, discarded by the caller / masked in the head).
    """
    acc = jnp.zeros((l, cout), jnp.float32)
    for di in range(KSIZE):
        for dj in range(KSIZE):
            p = (di % stride) * stride + (dj % stride)      # space-to-depth phase
            rs = (di // stride) * wq + (dj // stride)        # slab start inside phase
            slab = act_ref[p, rs:rs + l, :]                  # (L, Cin)
            w_t = w_ref[di * KSIZE + dj]                     # (Cin, Cout) bf16
            if cin == 1:
                # Degenerate K=1 contraction -> broadcast multiply-add on the VPU
                acc = acc + slab.astype(jnp.float32) * w_t.astype(jnp.float32)
            else:
                # slab already bf16 -> feed the MXU directly, accumulate in f32
                acc = acc + jnp.dot(slab, w_t, preferred_element_type=jnp.float32)
    return acc


def _conv_kernel(x_ref, w_ref, b_ref, o_ref, act_ref, *,
                 stride, wq, l, cin, cout, act_dtype):
    """LeakyReLU(0.2) -> Conv2d(5x5) for one batch element (grid axis = batch)."""
    xv = x_ref[0].astype(jnp.float32)                        # (s*s, Hq*Wq, Cin)
    act_ref[...] = jnp.where(xv > 0, xv, NEG_SLOPE * xv).astype(act_dtype)
    acc = _accumulate_taps(act_ref, w_ref, stride=stride, wq=wq, l=l, cin=cin, cout=cout)
    o_ref[0] = (acc + b_ref[...]).astype(o_ref.dtype)        # lane-dense (L, Cout) store


def _conv_head_kernel(x_ref, w_ref, b_ref, dw_ref, db_ref, o_ref, act_ref, *,
                      stride, wq, l, cin, cout, hout, wout, act_dtype):
    """Last conv fused with AdaptiveAvgPool2d((1,1)) + Linear(256,1) + Sigmoid."""
    xv = x_ref[0].astype(jnp.float32)
    act_ref[...] = jnp.where(xv > 0, xv, NEG_SLOPE * xv).astype(act_dtype)
    acc = _accumulate_taps(act_ref, w_ref, stride=stride, wq=wq, l=l, cin=cin, cout=cout)
    feat = acc + b_ref[...]                                  # (L, 256) conv4 output (+halo rows)

    # Global average pool over the valid (non-halo) slab rows only.
    row = jax.lax.broadcasted_iota(jnp.int32, (l, 1), 0)
    valid = (row % wq) < wout
    pooled = jnp.sum(jnp.where(valid, feat, 0.0), axis=0, keepdims=True) / float(hout * wout)

    # Linear(256, 1) on the VPU (a width-1 MXU matmul wastes the MXU) + Sigmoid.
    logit = jnp.sum(pooled * dw_ref[...], axis=1, keepdims=True) + db_ref[...]   # (1, 1)
    o_ref[0] = 1.0 / (1.0 + jnp.exp(-logit))


# ------------------------------ layer wrappers ------------------------------

def _prepare_input(x_nhwc, stride, pad):
    """Zero-pad and space-to-depth so every conv tap becomes a contiguous slab."""
    N, H, W, C = x_nhwc.shape
    s = stride
    Hp, Wp = H + 2 * pad, W + 2 * pad
    eh, ew = (-Hp) % s, (-Wp) % s
    xp = jnp.pad(x_nhwc, ((0, 0), (pad, pad + eh), (pad, pad + ew), (0, 0)))
    Hq, Wq = (Hp + eh) // s, (Wp + ew) // s
    x6 = xp.reshape(N, Hq, s, Wq, s, C).transpose(0, 2, 4, 1, 3, 5)   # (N, s, s, Hq, Wq, C)
    x4 = x6.reshape(N, s * s, Hq * Wq, C)                             # flattened phases
    return x4, Hq, Wq


def _conv_geometry(H, W, stride):
    hout = (H + 2 * PAD - KSIZE) // stride + 1
    wout = (W + 2 * PAD - KSIZE) // stride + 1
    return hout, wout


def _compiler_params():
    return pltpu.CompilerParams(dimension_semantics=("parallel",),
                                vmem_limit_bytes=VMEM_LIMIT)


def _leaky_conv_layer(x_nhwc, w, b, stride):
    """LeakyReLU(0.2) -> Conv2d(5x5, pad=2, stride).  w: (25, Cin, Cout) bf16, b: (1, Cout) f32."""
    N, H, W, Cin = x_nhwc.shape
    KK, wcin, Cout = w.shape
    assert wcin == Cin, (wcin, Cin)
    hout, wout = _conv_geometry(H, W, stride)
    x4, Hq, Wq = _prepare_input(x_nhwc, stride, PAD)
    L = (hout - 1) * Wq + wout                                # slab length (valid + halo rows)
    act_dtype = jnp.float32 if Cin == 1 else jnp.bfloat16

    kernel = functools.partial(_conv_kernel, stride=stride, wq=Wq, l=L,
                               cin=Cin, cout=Cout, act_dtype=act_dtype)
    flops = 2 * N * L * KSIZE * KSIZE * Cin * Cout
    bytes_accessed = (x4.size * x4.dtype.itemsize + w.size * 2 + b.size * 4
                      + N * L * Cout * 2)

    out = pl.pallas_call(
        kernel,
        out_shape=jax.ShapeDtypeStruct((N, L, Cout), jnp.bfloat16),
        grid=(N,),
        in_specs=[
            pl.BlockSpec((1, stride * stride, Hq * Wq, Cin), lambda n: (n, 0, 0, 0)),
            pl.BlockSpec(w.shape, lambda n: (0, 0, 0)),       # weights stay VMEM-resident
            pl.BlockSpec(b.shape, lambda n: (0, 0)),
        ],
        out_specs=pl.BlockSpec((1, L, Cout), lambda n: (n, 0, 0)),
        scratch_shapes=[pltpu.VMEM((stride * stride, Hq * Wq, Cin), act_dtype)],
        compiler_params=_compiler_params(),
        cost_estimate=pl.CostEstimate(flops=flops, transcendentals=0,
                                      bytes_accessed=bytes_accessed),
    )(x4, w, b)

    # Drop the halo rows and restore the (N, Hout, Wout, Cout) layout (XLA glue, cheap).
    out = jnp.pad(out, ((0, 0), (0, hout * Wq - L), (0, 0)))
    return out.reshape(N, hout, Wq, Cout)[:, :, :wout, :]


def _leaky_conv_head(x_nhwc, w, b, dw, db, stride):
    """Last conv fused with pool + dense + sigmoid. Returns (N, 1) probabilities."""
    N, H, W, Cin = x_nhwc.shape
    KK, wcin, Cout = w.shape
    assert wcin == Cin, (wcin, Cin)
    hout, wout = _conv_geometry(H, W, stride)
    x4, Hq, Wq = _prepare_input(x_nhwc, stride, PAD)
    L = (hout - 1) * Wq + wout
    act_dtype = jnp.float32 if Cin == 1 else jnp.bfloat16

    kernel = functools.partial(_conv_head_kernel, stride=stride, wq=Wq, l=L,
                               cin=Cin, cout=Cout, hout=hout, wout=wout,
                               act_dtype=act_dtype)
    flops = 2 * N * L * KSIZE * KSIZE * Cin * Cout + 2 * N * Cout
    bytes_accessed = (x4.size * x4.dtype.itemsize + w.size * 2
                      + (b.size + dw.size + db.size) * 4 + N * 4)

    out = pl.pallas_call(
        kernel,
        out_shape=jax.ShapeDtypeStruct((N, 1, 1), jnp.float32),
        grid=(N,),
        in_specs=[
            pl.BlockSpec((1, stride * stride, Hq * Wq, Cin), lambda n: (n, 0, 0, 0)),
            pl.BlockSpec(w.shape, lambda n: (0, 0, 0)),
            pl.BlockSpec(b.shape, lambda n: (0, 0)),
            pl.BlockSpec(dw.shape, lambda n: (0, 0)),
            pl.BlockSpec(db.shape, lambda n: (0, 0)),
        ],
        out_specs=pl.BlockSpec((1, 1, 1), lambda n: (n, 0, 0)),
        scratch_shapes=[pltpu.VMEM((stride * stride, Hq * Wq, Cin), act_dtype)],
        compiler_params=_compiler_params(),
        cost_estimate=pl.CostEstimate(flops=flops, transcendentals=N,
                                      bytes_accessed=bytes_accessed),
    )(x4, w, b, dw, db)
    return out.reshape(N, 1)


# ------------------------------ parameters ------------------------------

def init_params(key, channels=1):
    """Deterministic synthetic parameters (PyTorch default-init style bounds), fp32."""
    convs = []
    cin = channels
    for f in LAYER_FILTERS:
        key, kw_, kb_ = jax.random.split(key, 3)
        fan_in = cin * KSIZE * KSIZE
        bound = 1.0 / (fan_in ** 0.5)
        w = jax.random.uniform(kw_, (KSIZE, KSIZE, cin, f), jnp.float32, -bound, bound)
        b = jax.random.uniform(kb_, (f,), jnp.float32, -bound, bound)
        convs.append((w, b))
        cin = f
    key, kw_, kb_ = jax.random.split(key, 3)
    bound = 1.0 / (LAYER_FILTERS[-1] ** 0.5)
    dw = jax.random.uniform(kw_, (1, LAYER_FILTERS[-1]), jnp.float32, -bound, bound)
    db = jax.random.uniform(kb_, (1, 1), jnp.float32, -bound, bound)
    return {"convs": convs, "dense_w": dw, "dense_b": db}


def prep_params(params, channels=1):
    """Pad channels to the 128-lane width (zeros), reshape conv weights to (25, Cin, Cout)
    and cast matmul weights to bf16 (accumulation stays fp32 in-kernel)."""
    convs = []
    cin_pad = channels                      # raw image channels stay unpadded
    for (w, b) in params["convs"]:
        kh, kw, cin, cout = w.shape
        cout_pad = _round_up(cout, LANE)
        wp = jnp.zeros((kh, kw, cin_pad, cout_pad), jnp.float32)
        wp = wp.at[:, :, :cin, :cout].set(w)
        wp = wp.reshape(kh * kw, cin_pad, cout_pad).astype(jnp.bfloat16)
        bp = jnp.zeros((1, cout_pad), jnp.float32).at[0, :cout].set(b)
        convs.append((wp, bp))
        cin_pad = cout_pad
    dw = params["dense_w"]
    dwp = jnp.zeros((1, cin_pad), jnp.float32).at[:, :dw.shape[1]].set(dw)
    return {"convs": convs, "dense_w": dwp, "dense_b": params["dense_b"]}


# ------------------------------ model ------------------------------

def discriminator_forward(x_nchw, params):
    # NCHW (PyTorch) -> NHWC (kernel layout).  The Sequential applies LeakyReLU(0.2)
    # BEFORE every conv (including on the raw input), which the kernels replicate.
    x = jnp.transpose(x_nchw, (0, 2, 3, 1)).astype(jnp.float32)
    strides = [1 if f == LAYER_FILTERS[-1] else 2 for f in LAYER_FILTERS]
    convs = params["convs"]
    for (w, b), s in zip(convs[:-1], strides[:-1]):
        x = _leaky_conv_layer(x, w, b, s)
    w4, b4 = convs[-1]
    return _leaky_conv_head(x, w4, b4, params["dense_w"], params["dense_b"], strides[-1])


# ------------------------------ main ------------------------------

if __name__ == "__main__":
    key = jax.random.PRNGKey(0)
    key, pkey, xkey = jax.random.split(key, 3)

    params = prep_params(init_params(pkey, channels=1), channels=1)
    x = jax.random.normal(xkey, (2, 1, 16, 16), jnp.float32)   # NCHW input

    fwd = jax.jit(discriminator_forward)
    out = jax.block_until_ready(fwd(x, params))

    assert out.shape == (2, 1), out.shape
    assert bool(jnp.all((out >= 0.0) & (out <= 1.0))), "sigmoid output out of range"
    print("KERNEL_OK")
</pallas_src>

<mosaic_0001>
module attributes {stable_mosaic.version = 11 : i64} {
  func.func @_conv_kernel(%arg0: i32, %arg1: memref<1x4x100x1xf32, #tpu.memory_space<vmem>>, %arg2: memref<25x1x128xbf16, #tpu.memory_space<vmem>>, %arg3: memref<1x128xf32, #tpu.memory_space<vmem>>, %arg4: memref<1x78x128xbf16, #tpu.memory_space<vmem>>, %arg5: memref<4x100x1xf32, #tpu.memory_space<vmem>>) attributes {dimension_semantics = [#tpu.dimension_semantics<parallel>], iteration_bounds = array<i64: 2>, scalar_prefetch = 0 : i64, scratch_operands = 1 : i64, tpu.core_type = #tpu.core_type<tc>, window_params = [{transform_indices = @transform_0, window_bounds = array<i64: 1, 4, 100, 1>}, {pipeline_mode = #tpu.pipeline_mode<synchronous>, transform_indices = @transform_1, window_bounds = array<i64: 25, 1, 128>}, {pipeline_mode = #tpu.pipeline_mode<synchronous>, transform_indices = @transform_2, window_bounds = array<i64: 1, 128>}, {transform_indices = @transform_3, window_bounds = array<i64: 1, 78, 128>}]} {
    %c0 = arith.constant 0 : index
    %c0_0 = arith.constant 0 : index
    %c0_1 = arith.constant 0 : index
    %c0_2 = arith.constant 0 : index
    %0 = vector.load %arg1[%c0, %c0_0, %c0_1, %c0_2] : memref<1x4x100x1xf32, #tpu.memory_space<vmem>>, vector<1x4x100x1xf32>
    %1 = vector.shape_cast %0 : vector<1x4x100x1xf32> to vector<4x100x1xf32>
    %cst = arith.constant 0.000000e+00 : f32
    %2 = vector.broadcast %cst : f32 to vector<4x100x1xf32>
    %3 = arith.cmpf ogt, %1, %2 : vector<4x100x1xf32>
    %cst_3 = arith.constant 2.000000e-01 : f32
    %4 = vector.broadcast %cst_3 : f32 to vector<4x100x1xf32>
    %5 = arith.mulf %4, %1 : vector<4x100x1xf32>
    %6 = arith.select %3, %1, %5 : vector<4x100x1xi1>, vector<4x100x1xf32>
    %c0_4 = arith.constant 0 : index
    %c0_5 = arith.constant 0 : index
    %c0_6 = arith.constant 0 : index
    %7 = vector.load %arg5[%c0_4, %c0_5, %c0_6] : memref<4x100x1xf32, #tpu.memory_space<vmem>>, vector<4x100x1xf32>
    tpu.vector_store %arg5[%c0_4, %c0_5, %c0_6], %6 {strides = array<i32>} : memref<4x100x1xf32, #tpu.memory_space<vmem>>, vector<4x100x1xf32>,
    %cst_7 = arith.constant 0.000000e+00 : f32
    %8 = vector.broadcast %cst_7 : f32 to vector<78x128xf32>
    %c0_8 = arith.constant 0 : index
    %c0_9 = arith.constant 0 : index
    %c0_10 = arith.constant 0 : index
    %9 = vector.load %arg5[%c0_8, %c0_9, %c0_10] : memref<4x100x1xf32, #tpu.memory_space<vmem>>, vector<1x78x1xf32>
    %10 = vector.shape_cast %9 : vector<1x78x1xf32> to vector<78x1xf32>
    %c0_11 = arith.constant 0 : index
    %c0_12 = arith.constant 0 : index
    %c0_13 = arith.constant 0 : index
    %11 = vector.load %arg2[%c0_11, %c0_12, %c0_13] : memref<25x1x128xbf16, #tpu.memory_space<vmem>>, vector<1x1x128xbf16>
    %12 = vector.shape_cast %11 : vector<1x1x128xbf16> to vector<1x128xbf16>
    %13 = arith.extf %12 : vector<1x128xbf16> to vector<1x128xf32>
    %14 = vector.broadcast %10 : vector<78x1xf32> to vector<78x128xf32>
    %15 = vector.broadcast %13 : vector<1x128xf32> to vector<78x128xf32>
    %16 = arith.mulf %14, %15 : vector<78x128xf32>
    %17 = arith.addf %8, %16 : vector<78x128xf32>
    %c1 = arith.constant 1 : index
    %c0_14 = arith.constant 0 : index
    %c0_15 = arith.constant 0 : index
    %18 = vector.load %arg5[%c1, %c0_14, %c0_15] : memref<4x100x1xf32, #tpu.memory_space<vmem>>, vector<1x78x1xf32>
    %19 = vector.shape_cast %18 : vector<1x78x1xf32> to vector<78x1xf32>
    %c1_16 = arith.constant 1 : index
    %c0_17 = arith.constant 0 : index
    %c0_18 = arith.constant 0 : index
    %20 = vector.load %arg2[%c1_16, %c0_17, %c0_18] : memref<25x1x128xbf16, #tpu.memory_space<vmem>>, vector<1x1x128xbf16>
    %21 = vector.shape_cast %20 : vector<1x1x128xbf16> to vector<1x128xbf16>
    %22 = arith.extf %21 : vector<1x128xbf16> to vector<1x128xf32>
    %23 = vector.broadcast %19 : vector<78x1xf32> to vector<78x128xf32>
    %24 = vector.broadcast %22 : vector<1x128xf32> to vector<78x128xf32>
    %25 = arith.mulf %23, %24 : vector<78x128xf32>
    %26 = arith.addf %17, %25 : vector<78x128xf32>
    %c0_19 = arith.constant 0 : index
    %c1_20 = arith.constant 1 : index
    %c0_21 = arith.constant 0 : index
    %27 = vector.load %arg5[%c0_19, %c1_20, %c0_21] : memref<4x100x1xf32, #tpu.memory_space<vmem>>, vector<1x78x1xf32>
    %28 = vector.shape_cast %27 : vector<1x78x1xf32> to vector<78x1xf32>
    %c2 = arith.constant 2 : index
    %c0_22 = arith.constant 0 : index
    %c0_23 = arith.constant 0 : index
    %29 = vector.load %arg2[%c2, %c0_22, %c0_23] : memref<25x1x128xbf16, #tpu.memory_space<vmem>>, vector<1x1x128xbf16>
    %30 = vector.shape_cast %29 : vector<1x1x128xbf16> to vector<1x128xbf16>
    %31 = arith.extf %30 : vector<1x128xbf16> to vector<1x128xf32>
    %32 = vector.broadcast %28 : vector<78x1xf32> to vector<78x128xf32>
    %33 = vector.broadcast %31 : vector<1x128xf32> to vector<78x128xf32>
    %34 = arith.mulf %32, %33 : vector<78x128xf32>
    %35 = arith.addf %26, %34 : vector<78x128xf32>
    %c1_24 = arith.constant 1 : index
    %c1_25 = arith.constant 1 : index
    %c0_26 = arith.constant 0 : index
    %36 = vector.load %arg5[%c1_24, %c1_25, %c0_26] : memref<4x100x1xf32, #tpu.memory_space<vmem>>, vector<1x78x1xf32>
    %37 = vector.shape_cast %36 : vector<1x78x1xf32> to vector<78x1xf32>
    %c3 = arith.constant 3 : index
    %c0_27 = arith.constant 0 : index
    %c0_28 = arith.constant 0 : index
    %38 = vector.load %arg2[%c3, %c0_27, %c0_28] : memref<25x1x128xbf16, #tpu.memory_space<vmem>>, vector<1x1x128xbf16>
    %39 = vector.shape_cast %38 : vector<1x1x128xbf16> to vector<1x128xbf16>
    %40 = arith.extf %39 : vector<1x128xbf16> to vector<1x128xf32>
    %41 = vector.broadcast %37 : vector<78x1xf32> to vector<78x128xf32>
    %42 = vector.broadcast %40 : vector<1x128xf32> to vector<78x128xf32>
    %43 = arith.mulf %41, %42 : vector<78x128xf32>
    %44 = arith.addf %35, %43 : vector<78x128xf32>
    %c0_29 = arith.constant 0 : index
    %c2_30 = arith.constant 2 : index
    %c0_31 = arith.constant 0 : index
    %45 = vector.load %arg5[%c0_29, %c2_30, %c0_31] : memref<4x100x1xf32, #tpu.memory_space<vmem>>, vector<1x78x1xf32>
    %46 = vector.shape_cast %45 : vector<1x78x1xf32> to vector<78x1xf32>
    %c4 = arith.constant 4 : index
    %c0_32 = arith.constant 0 : index
    %c0_33 = arith.constant 0 : index
    %47 = vector.load %arg2[%c4, %c0_32, %c0_33] : memref<25x1x128xbf16, #tpu.memory_space<vmem>>, vector<1x1x128xbf16>
    %48 = vector.shape_cast %47 : vector<1x1x128xbf16> to vector<1x128xbf16>
    %49 = arith.extf %48 : vector<1x128xbf16> to vector<1x128xf32>
    %50 = vector.broadcast %46 : vector<78x1xf32> to vector<78x128xf32>
    %51 = vector.broadcast %49 : vector<1x128xf32> to vector<78x128xf32>
    %52 = arith.mulf %50, %51 : vector<78x128xf32>
    %53 = arith.addf %44, %52 : vector<78x128xf32>
    %c2_34 = arith.constant 2 : index
    %c0_35 = arith.constant 0 : index
    %c0_36 = arith.constant 0 : index
    %54 = vector.load %arg5[%c2_34, %c0_35, %c0_36] : memref<4x100x1xf32, #tpu.memory_space<vmem>>, vector<1x78x1xf32>
    %55 = vector.shape_cast %54 : vector<1x78x1xf32> to vector<78x1xf32>
    %c5 = arith.constant 5 : index
    %c0_37 = arith.constant 0 : index
    %c0_38 = arith.constant 0 : index
    %56 = vector.load %arg2[%c5, %c0_37, %c0_38] : memref<25x1x128xbf16, #tpu.memory_space<vmem>>, vector<1x1x128xbf16>
    %57 = vector.shape_cast %56 : vector<1x1x128xbf16> to vector<1x128xbf16>
    %58 = arith.extf %57 : vector<1x128xbf16> to vector<1x128xf32>
    %59 = vector.broadcast %55 : vector<78x1xf32> to vector<78x128xf32>
    %60 = vector.broadcast %58 : vector<1x128xf32> to vector<78x128xf32>
    %61 = arith.mulf %59, %60 : vector<78x128xf32>
    %62 = arith.addf %53, %61 : vector<78x128xf32>
    %c3_39 = arith.constant 3 : index
    %c0_40 = arith.constant 0 : index
    %c0_41 = arith.constant 0 : index
    %63 = vector.load %arg5[%c3_39, %c0_40, %c0_41] : memref<4x100x1xf32, #tpu.memory_space<vmem>>, vector<1x78x1xf32>
    %64 = vector.shape_cast %63 : vector<1x78x1xf32> to vector<78x1xf32>
    %c6 = arith.constant 6 : index
    %c0_42 = arith.constant 0 : index
    %c0_43 = arith.constant 0 : index
    %65 = vector.load %arg2[%c6, %c0_42, %c0_43] : memref<25x1x128xbf16, #tpu.memory_space<vmem>>, vector<1x1x128xbf16>
    %66 = vector.shape_cast %65 : vector<1x1x128xbf16> to vector<1x128xbf16>
    %67 = arith.extf %66 : vector<1x128xbf16> to vector<1x128xf32>
    %68 = vector.broadcast %64 : vector<78x1xf32> to vector<78x128xf32>
    %69 = vector.broadcast %67 : vector<1x128xf32> to vector<78x128xf32>
    %70 = arith.mulf %68, %69 : vector<78x128xf32>
    %71 = arith.addf %62, %70 : vector<78x128xf32>
    %c2_44 = arith.constant 2 : index
    %c1_45 = arith.constant 1 : index
    %c0_46 = arith.constant 0 : index
    %72 = vector.load %arg5[%c2_44, %c1_45, %c0_46] : memref<4x100x1xf32, #tpu.memory_space<vmem>>, vector<1x78x1xf32>
    %73 = vector.shape_cast %72 : vector<1x78x1xf32> to vector<78x1xf32>
    %c7 = arith.constant 7 : index
    %c0_47 = arith.constant 0 : index
    %c0_48 = arith.constant 0 : index
    %74 = vector.load %arg2[%c7, %c0_47, %c0_48] : memref<25x1x128xbf16, #tpu.memory_space<vmem>>, vector<1x1x128xbf16>
    %75 = vector.shape_cast %74 : vector<1x1x128xbf16> to vector<1x128xbf16>
    %76 = arith.extf %75 : vector<1x128xbf16> to vector<1x128xf32>
    %77 = vector.broadcast %73 : vector<78x1xf32> to vector<78x128xf32>
    %78 = vector.broadcast %76 : vector<1x128xf32> to vector<78x128xf32>
    %79 = arith.mulf %77, %78 : vector<78x128xf32>
    %80 = arith.addf %71, %79 : vector<78x128xf32>
    %c3_49 = arith.constant 3 : index
    %c1_50 = arith.constant 1 : index
    %c0_51 = arith.constant 0 : index
    %81 = vector.load %arg5[%c3_49, %c1_50, %c0_51] : memref<4x100x1xf32, #tpu.memory_space<vmem>>, vector<1x78x1xf32>
    %82 = vector.shape_cast %81 : vector<1x78x1xf32> to vector<78x1xf32>
    %c8 = arith.constant 8 : index
    %c0_52 = arith.constant 0 : index
    %c0_53 = arith.constant 0 : index
    %83 = vector.load %arg2[%c8, %c0_52, %c0_53] : memref<25x1x128xbf16, #tpu.memory_space<vmem>>, vector<1x1x128xbf16>
    %84 = vector.shape_cast %83 : vector<1x1x128xbf16> to vector<1x128xbf16>
    %85 = arith.extf %84 : vector<1x128xbf16> to vector<1x128xf32>
    %86 = vector.broadcast %82 : vector<78x1xf32> to vector<78x128xf32>
    %87 = vector.broadcast %85 : vector<1x128xf32> to vector<78x128xf32>
    %88 = arith.mulf %86, %87 : vector<78x128xf32>
    %89 = arith.addf %80, %88 : vector<78x128xf32>
    %c2_54 = arith.constant 2 : index
    %c2_55 = arith.constant 2 : index
    %c0_56 = arith.constant 0 : index
    %90 = vector.load %arg5[%c2_54, %c2_55, %c0_56] : memref<4x100x1xf32, #tpu.memory_space<vmem>>, vector<1x78x1xf32>
    %91 = vector.shape_cast %90 : vector<1x78x1xf32> to vector<78x1xf32>
    %c9 = arith.constant 9 : index
    %c0_57 = arith.constant 0 : index
    %c0_58 = arith.constant 0 : index
    %92 = vector.load %arg2[%c9, %c0_57, %c0_58] : memref<25x1x128xbf16, #tpu.memory_space<vmem>>, vector<1x1x128xbf16>
    %93 = vector.shape_cast %92 : vector<1x1x128xbf16> to vector<1x128xbf16>
    %94 = arith.extf %93 : vector<1x128xbf16> to vector<1x128xf32>
    %95 = vector.broadcast %91 : vector<78x1xf32> to vector<78x128xf32>
    %96 = vector.broadcast %94 : vector<1x128xf32> to vector<78x128xf32>
    %97 = arith.mulf %95, %96 : vector<78x128xf32>
    %98 = arith.addf %89, %97 : vector<78x128xf32>
    %c0_59 = arith.constant 0 : index
    %c10 = arith.constant 10 : index
    %c0_60 = arith.constant 0 : index
    %99 = vector.load %arg5[%c0_59, %c10, %c0_60] : memref<4x100x1xf32, #tpu.memory_space<vmem>>, vector<1x78x1xf32>
    %100 = vector.shape_cast %99 : vector<1x78x1xf32> to vector<78x1xf32>
    %c10_61 = arith.constant 10 : index
    %c0_62 = arith.constant 0 : index
    %c0_63 = arith.constant 0 : index
    %101 = vector.load %arg2[%c10_61, %c0_62, %c0_63] : memref<25x1x128xbf16, #tpu.memory_space<vmem>>, vector<1x1x128xbf16>
    %102 = vector.shape_cast %101 : vector<1x1x128xbf16> to vector<1x128xbf16>
    %103 = arith.extf %102 : vector<1x128xbf16> to vector<1x128xf32>
    %104 = vector.broadcast %100 : vector<78x1xf32> to vector<78x128xf32>
    %105 = vector.broadcast %103 : vector<1x128xf32> to vector<78x128xf32>
    %106 = arith.mulf %104, %105 : vector<78x128xf32>
    %107 = arith.addf %98, %106 : vector<78x128xf32>
    %c1_64 = arith.constant 1 : index
    %c10_65 = arith.constant 10 : index
    %c0_66 = arith.constant 0 : index
    %108 = vector.load %arg5[%c1_64, %c10_65, %c0_66] : memref<4x100x1xf32, #tpu.memory_space<vmem>>, vector<1x78x1xf32>
    %109 = vector.shape_cast %108 : vector<1x78x1xf32> to vector<78x1xf32>
    %c11 = arith.constant 11 : index
    %c0_67 = arith.constant 0 : index
    %c0_68 = arith.constant 0 : index
    %110 = vector.load %arg2[%c11, %c0_67, %c0_68] : memref<25x1x128xbf16, #tpu.memory_space<vmem>>, vector<1x1x128xbf16>
    %111 = vector.shape_cast %110 : vector<1x1x128xbf16> to vector<1x128xbf16>
    %112 = arith.extf %111 : vector<1x128xbf16> to vector<1x128xf32>
    %113 = vector.broadcast %109 : vector<78x1xf32> to vector<78x128xf32>
    %114 = vector.broadcast %112 : vector<1x128xf32> to vector<78x128xf32>
    %115 = arith.mulf %113, %114 : vector<78x128xf32>
    %116 = arith.addf %107, %115 : vector<78x128xf32>
    %c0_69 = arith.constant 0 : index
    %c11_70 = arith.constant 11 : index
    %c0_71 = arith.constant 0 : index
    %117 = vector.load %arg5[%c0_69, %c11_70, %c0_71] : memref<4x100x1xf32, #tpu.memory_space<vmem>>, vector<1x78x1xf32>
    %118 = vector.shape_cast %117 : vector<1x78x1xf32> to vector<78x1xf32>
    %c12 = arith.constant 12 : index
    %c0_72 = arith.constant 0 : index
    %c0_73 = arith.constant 0 : index
    %119 = vector.load %arg2[%c12, %c0_72, %c0_73] : memref<25x1x128xbf16, #tpu.memory_space<vmem>>, vector<1x1x128xbf16>
    %120 = vector.shape_cast %119 : vector<1x1x128xbf16> to vector<1x128xbf16>
    %121 = arith.extf %120 : vector<1x128xbf16> to vector<1x128xf32>
    %122 = vector.broadcast %118 : vector<78x1xf32> to vector<78x128xf32>
    %123 = vector.broadcast %121 : vector<1x128xf32> to vector<78x128xf32>
    %124 = arith.mulf %122, %123 : vector<78x128xf32>
    %125 = arith.addf %116, %124 : vector<78x128xf32>
    %c1_74 = arith.constant 1 : index
    %c11_75 = arith.constant 11 : index
    %c0_76 = arith.constant 0 : index
    %126 = vector.load %arg5[%c1_74, %c11_75, %c0_76] : memref<4x100x1xf32, #tpu.memory_space<vmem>>, vector<1x78x1xf32>
    %127 = vector.shape_cast %126 : vector<1x78x1xf32> to vector<78x1xf32>
    %c13 = arith.constant 13 : index
    %c0_77 = arith.constant 0 : index
    %c0_78 = arith.constant 0 : index
    %128 = vector.load %arg2[%c13, %c0_77, %c0_78] : memref<25x1x128xbf16, #tpu.memory_space<vmem>>, vector<1x1x128xbf16>
    %129 = vector.shape_cast %128 : vector<1x1x128xbf16> to vector<1x128xbf16>
    %130 = arith.extf %129 : vector<1x128xbf16> to vector<1x128xf32>
    %131 = vector.broadcast %127 : vector<78x1xf32> to vector<78x128xf32>
    %132 = vector.broadcast %130 : vector<1x128xf32> to vector<78x128xf32>
    %133 = arith.mulf %131, %132 : vector<78x128xf32>
    %134 = arith.addf %125, %133 : vector<78x128xf32>
    %c0_79 = arith.constant 0 : index
    %c12_80 = arith.constant 12 : index
    %c0_81 = arith.constant 0 : index
    %135 = vector.load %arg5[%c0_79, %c12_80, %c0_81] : memref<4x100x1xf32, #tpu.memory_space<vmem>>, vector<1x78x1xf32>
    %136 = vector.shape_cast %135 : vector<1x78x1xf32> to vector<78x1xf32>
    %c14 = arith.constant 14 : index
    %c0_82 = arith.constant 0 : index
    %c0_83 = arith.constant 0 : index
    %137 = vector.load %arg2[%c14, %c0_82, %c0_83] : memref<25x1x128xbf16, #tpu.memory_space<vmem>>, vector<1x1x128xbf16>
    %138 = vector.shape_cast %137 : vector<1x1x128xbf16> to vector<1x128xbf16>
    %139 = arith.extf %138 : vector<1x128xbf16> to vector<1x128xf32>
    %140 = vector.broadcast %136 : vector<78x1xf32> to vector<78x128xf32>
    %141 = vector.broadcast %139 : vector<1x128xf32> to vector<78x128xf32>
    %142 = arith.mulf %140, %141 : vector<78x128xf32>
    %143 = arith.addf %134, %142 : vector<78x128xf32>
    %c2_84 = arith.constant 2 : index
    %c10_85 = arith.constant 10 : index
    %c0_86 = arith.constant 0 : index
    %144 = vector.load %arg5[%c2_84, %c10_85, %c0_86] : memref<4x100x1xf32, #tpu.memory_space<vmem>>, vector<1x78x1xf32>
    %145 = vector.shape_cast %144 : vector<1x78x1xf32> to vector<78x1xf32>
    %c15 = arith.constant 15 : index
    %c0_87 = arith.constant 0 : index
    %c0_88 = arith.constant 0 : index
    %146 = vector.load %arg2[%c15, %c0_87, %c0_88] : memref<25x1x128xbf16, #tpu.memory_space<vmem>>, vector<1x1x128xbf16>
    %147 = vector.shape_cast %146 : vector<1x1x128xbf16> to vector<1x128xbf16>
    %148 = arith.extf %147 : vector<1x128xbf16> to vector<1x128xf32>
    %149 = vector.broadcast %145 : vector<78x1xf32> to vector<78x128xf32>
    %150 = vector.broadcast %148 : vector<1x128xf32> to vector<78x128xf32>
    %151 = arith.mulf %149, %150 : vector<78x128xf32>
    %152 = arith.addf %143, %151 : vector<78x128xf32>
    %c3_89 = arith.constant 3 : index
    %c10_90 = arith.constant 10 : index
    %c0_91 = arith.constant 0 : index
    %153 = vector.load %arg5[%c3_89, %c10_90, %c0_91] : memref<4x100x1xf32, #tpu.memory_space<vmem>>, vector<1x78x1xf32>
    %154 = vector.shape_cast %153 : vector<1x78x1xf32> to vector<78x1xf32>
    %c16 = arith.constant 16 : index
    %c0_92 = arith.constant 0 : index
    %c0_93 = arith.constant 0 : index
    %155 = vector.load %arg2[%c16, %c0_92, %c0_93] : memref<25x1x128xbf16, #tpu.memory_space<vmem>>, vector<1x1x128xbf16>
    %156 = vector.shape_cast %155 : vector<1x1x128xbf16> to vector<1x128xbf16>
    %157 = arith.extf %156 : vector<1x128xbf16> to vector<1x128xf32>
    %158 = vector.broadcast %154 : vector<78x1xf32> to vector<78x128xf32>
    %159 = vector.broadcast %157 : vector<1x128xf32> to vector<78x128xf32>
    %160 = arith.mulf %158, %159 : vector<78x128xf32>
    %161 = arith.addf %152, %160 : vector<78x128xf32>
    %c2_94 = arith.constant 2 : index
    %c11_95 = arith.constant 11 : index
    %c0_96 = arith.constant 0 : index
    %162 = vector.load %arg5[%c2_94, %c11_95, %c0_96] : memref<4x100x1xf32, #tpu.memory_space<vmem>>, vector<1x78x1xf32>
    %163 = vector.shape_cast %162 : vector<1x78x1xf32> to vector<78x1xf32>
    %c17 = arith.constant 17 : index
    %c0_97 = arith.constant 0 : index
    %c0_98 = arith.constant 0 : index
    %164 = vector.load %arg2[%c17, %c0_97, %c0_98] : memref<25x1x128xbf16, #tpu.memory_space<vmem>>, vector<1x1x128xbf16>
    %165 = vector.shape_cast %164 : vector<1x1x128xbf16> to vector<1x128xbf16>
    %166 = arith.extf %165 : vector<1x128xbf16> to vector<1x128xf32>
    %167 = vector.broadcast %163 : vector<78x1xf32> to vector<78x128xf32>
    %168 = vector.broadcast %166 : vector<1x128xf32> to vector<78x128xf32>
    %169 = arith.mulf %167, %168 : vector<78x128xf32>
    %170 = arith.addf %161, %169 : vector<78x128xf32>
    %c3_99 = arith.constant 3 : index
    %c11_100 = arith.constant 11 : index
    %c0_101 = arith.constant 0 : index
    %171 = vector.load %arg5[%c3_99, %c11_100, %c0_101] : memref<4x100x1xf32, #tpu.memory_space<vmem>>, vector<1x78x1xf32>
    %172 = vector.shape_cast %171 : vector<1x78x1xf32> to vector<78x1xf32>
    %c18 = arith.constant 18 : index
    %c0_102 = arith.constant 0 : index
    %c0_103 = arith.constant 0 : index
    %173 = vector.load %arg2[%c18, %c0_102, %c0_103] : memref<25x1x128xbf16, #tpu.memory_space<vmem>>, vector<1x1x128xbf16>
    %174 = vector.shape_cast %173 : vector<1x1x128xbf16> to vector<1x128xbf16>
    %175 = arith.extf %174 : vector<1x128xbf16> to vector<1x128xf32>
    %176 = vector.broadcast %172 : vector<78x1xf32> to vector<78x128xf32>
    %177 = vector.broadcast %175 : vector<1x128xf32> to vector<78x128xf32>
    %178 = arith.mulf %176, %177 : vector<78x128xf32>
    %179 = arith.addf %170, %178 : vector<78x128xf32>
    %c2_104 = arith.constant 2 : index
    %c12_105 = arith.constant 12 : index
    %c0_106 = arith.constant 0 : index
    %180 = vector.load %arg5[%c2_104, %c12_105, %c0_106] : memref<4x100x1xf32, #tpu.memory_space<vmem>>, vector<1x78x1xf32>
    %181 = vector.shape_cast %180 : vector<1x78x1xf32> to vector<78x1xf32>
    %c19 = arith.constant 19 : index
    %c0_107 = arith.constant 0 : index
    %c0_108 = arith.constant 0 : index
    %182 = vector.load %arg2[%c19, %c0_107, %c0_108] : memref<25x1x128xbf16, #tpu.memory_space<vmem>>, vector<1x1x128xbf16>
    %183 = vector.shape_cast %182 : vector<1x1x128xbf16> to vector<1x128xbf16>
    %184 = arith.extf %183 : vector<1x128xbf16> to vector<1x128xf32>
    %185 = vector.broadcast %181 : vector<78x1xf32> to vector<78x128xf32>
    %186 = vector.broadcast %184 : vector<1x128xf32> to vector<78x128xf32>
    %187 = arith.mulf %185, %186 : vector<78x128xf32>
    %188 = arith.addf %179, %187 : vector<78x128xf32>
    %c0_109 = arith.constant 0 : index
    %c20 = arith.constant 20 : index
    %c0_110 = arith.constant 0 : index
    %189 = vector.load %arg5[%c0_109, %c20, %c0_110] : memref<4x100x1xf32, #tpu.memory_space<vmem>>, vector<1x78x1xf32>
    %190 = vector.shape_cast %189 : vector<1x78x1xf32> to vector<78x1xf32>
    %c20_111 = arith.constant 20 : index
    %c0_112 = arith.constant 0 : index
    %c0_113 = arith.constant 0 : index
    %191 = vector.load %arg2[%c20_111, %c0_112, %c0_113] : memref<25x1x128xbf16, #tpu.memory_space<vmem>>, vector<1x1x128xbf16>
    %192 = vector.shape_cast %191 : vector<1x1x128xbf16> to vector<1x128xbf16>
    %193 = arith.extf %192 : vector<1x128xbf16> to vector<1x128xf32>
    %194 = vector.broadcast %190 : vector<78x1xf32> to vector<78x128xf32>
    %195 = vector.broadcast %193 : vector<1x128xf32> to vector<78x128xf32>
    %196 = arith.mulf %194, %195 : vector<78x128xf32>
    %197 = arith.addf %188, %196 : vector<78x128xf32>
    %c1_114 = arith.constant 1 : index
    %c20_115 = arith.constant 20 : index
    %c0_116 = arith.constant 0 : index
    %198 = vector.load %arg5[%c1_114, %c20_115, %c0_116] : memref<4x100x1xf32, #tpu.memory_space<vmem>>, vector<1x78x1xf32>
    %199 = vector.shape_cast %198 : vector<1x78x1xf32> to vector<78x1xf32>
    %c21 = arith.constant 21 : index
    %c0_117 = arith.constant 0 : index
    %c0_118 = arith.constant 0 : index
    %200 = vector.load %arg2[%c21, %c0_117, %c0_118] : memref<25x1x128xbf16, #tpu.memory_space<vmem>>, vector<1x1x128xbf16>
    %201 = vector.shape_cast %200 : vector<1x1x128xbf16> to vector<1x128xbf16>
    %202 = arith.extf %201 : vector<1x128xbf16> to vector<1x128xf32>
    %203 = vector.broadcast %199 : vector<78x1xf32> to vector<78x128xf32>
    %204 = vector.broadcast %202 : vector<1x128xf32> to vector<78x128xf32>
    %205 = arith.mulf %203, %204 : vector<78x128xf32>
    %206 = arith.addf %197, %205 : vector<78x128xf32>
    %c0_119 = arith.constant 0 : index
    %c21_120 = arith.constant 21 : index
    %c0_121 = arith.constant 0 : index
    %207 = vector.load %arg5[%c0_119, %c21_120, %c0_121] : memref<4x100x1xf32, #tpu.memory_space<vmem>>, vector<1x78x1xf32>
    %208 = vector.shape_cast %207 : vector<1x78x1xf32> to vector<78x1xf32>
    %c22 = arith.constant 22 : index
    %c0_122 = arith.constant 0 : index
    %c0_123 = arith.constant 0 : index
    %209 = vector.load %arg2[%c22, %c0_122, %c0_123] : memref<25x1x128xbf16, #tpu.memory_space<vmem>>, vector<1x1x128xbf16>
    %210 = vector.shape_cast %209 : vector<1x1x128xbf16> to vector<1x128xbf16>
    %211 = arith.extf %210 : vector<1x128xbf16> to vector<1x128xf32>
    %212 = vector.broadcast %208 : vector<78x1xf32> to vector<78x128xf32>
    %213 = vector.broadcast %211 : vector<1x128xf32> to vector<78x128xf32>
    %214 = arith.mulf %212, %213 : vector<78x128xf32>
    %215 = arith.addf %206, %214 : vector<78x128xf32>
    %c1_124 = arith.constant 1 : index
    %c21_125 = arith.constant 21 : index
    %c0_126 = arith.constant 0 : index
    %216 = vector.load %arg5[%c1_124, %c21_125, %c0_126] : memref<4x100x1xf32, #tpu.memory_space<vmem>>, vector<1x78x1xf32>
    %217 = vector.shape_cast %216 : vector<1x78x1xf32> to vector<78x1xf32>
    %c23 = arith.constant 23 : index
    %c0_127 = arith.constant 0 : index
    %c0_128 = arith.constant 0 : index
    %218 = vector.load %arg2[%c23, %c0_127, %c0_128] : memref<25x1x128xbf16, #tpu.memory_space<vmem>>, vector<1x1x128xbf16>
    %219 = vector.shape_cast %218 : vector<1x1x128xbf16> to vector<1x128xbf16>
    %220 = arith.extf %219 : vector<1x128xbf16> to vector<1x128xf32>
    %221 = vector.broadcast %217 : vector<78x1xf32> to vector<78x128xf32>
    %222 = vector.broadcast %220 : vector<1x128xf32> to vector<78x128xf32>
    %223 = arith.mulf %221, %222 : vector<78x128xf32>
    %224 = arith.addf %215, %223 : vector<78x128xf32>
    %c0_129 = arith.constant 0 : index
    %c22_130 = arith.constant 22 : index
    %c0_131 = arith.constant 0 : index
    %225 = vector.load %arg5[%c0_129, %c22_130, %c0_131] : memref<4x100x1xf32, #tpu.memory_space<vmem>>, vector<1x78x1xf32>
    %226 = vector.shape_cast %225 : vector<1x78x1xf32> to vector<78x1xf32>
    %c24 = arith.constant 24 : index
    %c0_132 = arith.constant 0 : index
    %c0_133 = arith.constant 0 : index
    %227 = vector.load %arg2[%c24, %c0_132, %c0_133] : memref<25x1x128xbf16, #tpu.memory_space<vmem>>, vector<1x1x128xbf16>
    %228 = vector.shape_cast %227 : vector<1x1x128xbf16> to vector<1x128xbf16>
    %229 = arith.extf %228 : vector<1x128xbf16> to vector<1x128xf32>
    %230 = vector.broadcast %226 : vector<78x1xf32> to vector<78x128xf32>
    %231 = vector.broadcast %229 : vector<1x128xf32> to vector<78x128xf32>
    %232 = arith.mulf %230, %231 : vector<78x128xf32>
    %233 = arith.addf %224, %232 : vector<78x128xf32>
    %c0_134 = arith.constant 0 : index
    %c0_135 = arith.constant 0 : index
    %234 = vector.load %arg3[%c0_134, %c0_135] : memref<1x128xf32, #tpu.memory_space<vmem>>, vector<1x128xf32>
    %235 = vector.broadcast %234 : vector<1x128xf32> to vector<78x128xf32>
    %236 = arith.addf %233, %235 : vector<78x128xf32>
    %237 = arith.truncf %236 : vector<78x128xf32> to vector<78x128xbf16>
    %c0_136 = arith.constant 0 : index
    %c0_137 = arith.constant 0 : index
    %c0_138 = arith.constant 0 : index
    %238 = vector.load %arg4[%c0_136, %c0_137, %c0_138] : memref<1x78x128xbf16, #tpu.memory_space<vmem>>, vector<1x78x128xbf16>
    %239 = vector.shape_cast %238 : vector<1x78x128xbf16> to vector<78x128xbf16>
    %240 = vector.shape_cast %237 : vector<78x128xbf16> to vector<1x78x128xbf16>
    tpu.vector_store %arg4[%c0_136, %c0_137, %c0_138], %240 {strides = array<i32>} : memref<1x78x128xbf16, #tpu.memory_space<vmem>>, vector<1x78x128xbf16>,
    return
  }
  func.func @transform_0(%arg0: i32) -> (i32, i32, i32, i32) {
    %c0_i32 = arith.constant 0 : i32
    %c0_i32_0 = arith.constant 0 : i32
    %c0_i32_1 = arith.constant 0 : i32
    %c0_i32_2 = arith.constant 0 : i32
    return %arg0, %c0_i32, %c0_i32_0, %c0_i32_1 : i32, i32, i32, i32
  }
  func.func @transform_1(%arg0: i32) -> (i32, i32, i32) {
    %c0_i32 = arith.constant 0 : i32
    %c0_i32_0 = arith.constant 0 : i32
    %c0_i32_1 = arith.constant 0 : i32
    %c0_i32_2 = arith.constant 0 : i32
    return %c0_i32, %c0_i32_0, %c0_i32_1 : i32, i32, i32
  }
  func.func @transform_2(%arg0: i32) -> (i32, i32) {
    %c0_i32 = arith.constant 0 : i32
    %c0_i32_0 = arith.constant 0 : i32
    %c0_i32_1 = arith.constant 0 : i32
    return %c0_i32, %c0_i32_0 : i32, i32
  }
  func.func @transform_3(%arg0: i32) -> (i32, i32, i32) {
    %c0_i32 = arith.constant 0 : i32
    %c0_i32_0 = arith.constant 0 : i32
    %c0_i32_1 = arith.constant 0 : i32
    return %arg0, %c0_i32, %c0_i32_0 : i32, i32, i32
  }
}

module attributes {stable_mosaic.version = 11 : i64} {
  func.func @_conv_kernel(%arg0: i32, %arg1: memref<1x4x36x128xbf16, #tpu.memory_space<vmem>>, %arg2: memref<25x128x128xbf16, #tpu.memory_space<vmem>>, %arg3: memref<1x128xf32, #tpu.memory_space<vmem>>, %arg4: memref<1x22x128xbf16, #tpu.memory_space<vmem>>, %arg5: memref<4x36x128xbf16, #tpu.memory_space<vmem>>) attributes {dimension_semantics = [#tpu.dimension_semantics<parallel>], iteration_bounds = array<i64: 2>, scalar_prefetch = 0 : i64, scratch_operands = 1 : i64, tpu.core_type = #tpu.core_type<tc>, window_params = [{transform_indices = @transform_0, window_bounds = array<i64: 1, 4, 36, 128>}, {pipeline_mode = #tpu.pipeline_mode<synchronous>, transform_indices = @transform_1, window_bounds = array<i64: 25, 128, 128>}, {pipeline_mode = #tpu.pipeline_mode<synchronous>, transform_indices = @transform_2, window_bounds = array<i64: 1, 128>}, {transform_indices = @transform_3, window_bounds = array<i64: 1, 22, 128>}]} {
    %c0 = arith.constant 0 : index
    %c0_0 = arith.constant 0 : index
    %c0_1 = arith.constant 0 : index
    %c0_2 = arith.constant 0 : index
    %0 = vector.load %arg1[%c0, %c0_0, %c0_1, %c0_2] : memref<1x4x36x128xbf16, #tpu.memory_space<vmem>>, vector<1x4x36x128xbf16>
    %1 = vector.shape_cast %0 : vector<1x4x36x128xbf16> to vector<4x36x128xbf16>
    %2 = arith.extf %1 : vector<4x36x128xbf16> to vector<4x36x128xf32>
    %cst = arith.constant 0.000000e+00 : f32
    %3 = vector.broadcast %cst : f32 to vector<4x36x128xf32>
    %4 = arith.cmpf ogt, %2, %3 : vector<4x36x128xf32>
    %cst_3 = arith.constant 2.000000e-01 : f32
    %5 = vector.broadcast %cst_3 : f32 to vector<4x36x128xf32>
    %6 = arith.mulf %5, %2 : vector<4x36x128xf32>
    %7 = arith.select %4, %2, %6 : vector<4x36x128xi1>, vector<4x36x128xf32>
    %8 = arith.truncf %7 : vector<4x36x128xf32> to vector<4x36x128xbf16>
    %c0_4 = arith.constant 0 : index
    %c0_5 = arith.constant 0 : index
    %c0_6 = arith.constant 0 : index
    %9 = vector.load %arg5[%c0_4, %c0_5, %c0_6] : memref<4x36x128xbf16, #tpu.memory_space<vmem>>, vector<4x36x128xbf16>
    tpu.vector_store %arg5[%c0_4, %c0_5, %c0_6], %8 {strides = array<i32>} : memref<4x36x128xbf16, #tpu.memory_space<vmem>>, vector<4x36x128xbf16>,
    %cst_7 = arith.constant 0.000000e+00 : f32
    %10 = vector.broadcast %cst_7 : f32 to vector<22x128xf32>
    %c0_8 = arith.constant 0 : index
    %c0_9 = arith.constant 0 : index
    %c0_10 = arith.constant 0 : index
    %11 = vector.load %arg5[%c0_8, %c0_9, %c0_10] : memref<4x36x128xbf16, #tpu.memory_space<vmem>>, vector<1x22x128xbf16>
    %12 = vector.shape_cast %11 : vector<1x22x128xbf16> to vector<22x128xbf16>
    %c0_11 = arith.constant 0 : index
    %c0_12 = arith.constant 0 : index
    %c0_13 = arith.constant 0 : index
    %13 = vector.load %arg2[%c0_11, %c0_12, %c0_13] : memref<25x128x128xbf16, #tpu.memory_space<vmem>>, vector<1x128x128xbf16>
    %14 = vector.shape_cast %13 : vector<1x128x128xbf16> to vector<128x128xbf16>
    %cst_14 = arith.constant dense<0.000000e+00> : vector<22x128xf32>
    %15 = tpu.matmul %12, %14, %cst_14 {dimension_numbers = #tpu.dot_dimension_numbers<[1], [0], [0], [1], [0, 0, 1, 1], [], []>} : vector<22x128xbf16>, vector<128x128xbf16>, vector<22x128xf32> -> vector<22x128xf32>
    %16 = arith.addf %10, %15 : vector<22x128xf32>
    %c1 = arith.constant 1 : index
    %c0_15 = arith.constant 0 : index
    %c0_16 = arith.constant 0 : index
    %17 = vector.load %arg5[%c1, %c0_15, %c0_16] : memref<4x36x128xbf16, #tpu.memory_space<vmem>>, vector<1x22x128xbf16>
    %18 = vector.shape_cast %17 : vector<1x22x128xbf16> to vector<22x128xbf16>
    %c1_17 = arith.constant 1 : index
    %c0_18 = arith.constant 0 : index
    %c0_19 = arith.constant 0 : index
    %19 = vector.load %arg2[%c1_17, %c0_18, %c0_19] : memref<25x128x128xbf16, #tpu.memory_space<vmem>>, vector<1x128x128xbf16>
    %20 = vector.shape_cast %19 : vector<1x128x128xbf16> to vector<128x128xbf16>
    %cst_20 = arith.constant dense<0.000000e+00> : vector<22x128xf32>
    %21 = tpu.matmul %18, %20, %cst_20 {dimension_numbers = #tpu.dot_dimension_numbers<[1], [0], [0], [1], [0, 0, 1, 1], [], []>} : vector<22x128xbf16>, vector<128x128xbf16>, vector<22x128xf32> -> vector<22x128xf32>
    %22 = arith.addf %16, %21 : vector<22x128xf32>
    %c0_21 = arith.constant 0 : index
    %c1_22 = arith.constant 1 : index
    %c0_23 = arith.constant 0 : index
    %23 = vector.load %arg5[%c0_21, %c1_22, %c0_23] : memref<4x36x128xbf16, #tpu.memory_space<vmem>>, vector<1x22x128xbf16>
    %24 = vector.shape_cast %23 : vector<1x22x128xbf16> to vector<22x128xbf16>
    %c2 = arith.constant 2 : index
    %c0_24 = arith.constant 0 : index
    %c0_25 = arith.constant 0 : index
    %25 = vector.load %arg2[%c2, %c0_24, %c0_25] : memref<25x128x128xbf16, #tpu.memory_space<vmem>>, vector<1x128x128xbf16>
    %26 = vector.shape_cast %25 : vector<1x128x128xbf16> to vector<128x128xbf16>
    %cst_26 = arith.constant dense<0.000000e+00> : vector<22x128xf32>
    %27 = tpu.matmul %24, %26, %cst_26 {dimension_numbers = #tpu.dot_dimension_numbers<[1], [0], [0], [1], [0, 0, 1, 1], [], []>} : vector<22x128xbf16>, vector<128x128xbf16>, vector<22x128xf32> -> vector<22x128xf32>
    %28 = arith.addf %22, %27 : vector<22x128xf32>
    %c1_27 = arith.constant 1 : index
    %c1_28 = arith.constant 1 : index
    %c0_29 = arith.constant 0 : index
    %29 = vector.load %arg5[%c1_27, %c1_28, %c0_29] : memref<4x36x128xbf16, #tpu.memory_space<vmem>>, vector<1x22x128xbf16>
    %30 = vector.shape_cast %29 : vector<1x22x128xbf16> to vector<22x128xbf16>
    %c3 = arith.constant 3 : index
    %c0_30 = arith.constant 0 : index
    %c0_31 = arith.constant 0 : index
    %31 = vector.load %arg2[%c3, %c0_30, %c0_31] : memref<25x128x128xbf16, #tpu.memory_space<vmem>>, vector<1x128x128xbf16>
    %32 = vector.shape_cast %31 : vector<1x128x128xbf16> to vector<128x128xbf16>
    %cst_32 = arith.constant dense<0.000000e+00> : vector<22x128xf32>
    %33 = tpu.matmul %30, %32, %cst_32 {dimension_numbers = #tpu.dot_dimension_numbers<[1], [0], [0], [1], [0, 0, 1, 1], [], []>} : vector<22x128xbf16>, vector<128x128xbf16>, vector<22x128xf32> -> vector<22x128xf32>
    %34 = arith.addf %28, %33 : vector<22x128xf32>
    %c0_33 = arith.constant 0 : index
    %c2_34 = arith.constant 2 : index
    %c0_35 = arith.constant 0 : index
    %35 = vector.load %arg5[%c0_33, %c2_34, %c0_35] : memref<4x36x128xbf16, #tpu.memory_space<vmem>>, vector<1x22x128xbf16>
    %36 = vector.shape_cast %35 : vector<1x22x128xbf16> to vector<22x128xbf16>
    %c4 = arith.constant 4 : index
    %c0_36 = arith.constant 0 : index
    %c0_37 = arith.constant 0 : index
    %37 = vector.load %arg2[%c4, %c0_36, %c0_37] : memref<25x128x128xbf16, #tpu.memory_space<vmem>>, vector<1x128x128xbf16>
    %38 = vector.shape_cast %37 : vector<1x128x128xbf16> to vector<128x128xbf16>
    %cst_38 = arith.constant dense<0.000000e+00> : vector<22x128xf32>
    %39 = tpu.matmul %36, %38, %cst_38 {dimension_numbers = #tpu.dot_dimension_numbers<[1], [0], [0], [1], [0, 0, 1, 1], [], []>} : vector<22x128xbf16>, vector<128x128xbf16>, vector<22x128xf32> -> vector<22x128xf32>
    %40 = arith.addf %34, %39 : vector<22x128xf32>
    %c2_39 = arith.constant 2 : index
    %c0_40 = arith.constant 0 : index
    %c0_41 = arith.constant 0 : index
    %41 = vector.load %arg5[%c2_39, %c0_40, %c0_41] : memref<4x36x128xbf16, #tpu.memory_space<vmem>>, vector<1x22x128xbf16>
    %42 = vector.shape_cast %41 : vector<1x22x128xbf16> to vector<22x128xbf16>
    %c5 = arith.constant 5 : index
    %c0_42 = arith.constant 0 : index
    %c0_43 = arith.constant 0 : index
    %43 = vector.load %arg2[%c5, %c0_42, %c0_43] : memref<25x128x128xbf16, #tpu.memory_space<vmem>>, vector<1x128x128xbf16>
    %44 = vector.shape_cast %43 : vector<1x128x128xbf16> to vector<128x128xbf16>
    %cst_44 = arith.constant dense<0.000000e+00> : vector<22x128xf32>
    %45 = tpu.matmul %42, %44, %cst_44 {dimension_numbers = #tpu.dot_dimension_numbers<[1], [0], [0], [1], [0, 0, 1, 1], [], []>} : vector<22x128xbf16>, vector<128x128xbf16>, vector<22x128xf32> -> vector<22x128xf32>
    %46 = arith.addf %40, %45 : vector<22x128xf32>
    %c3_45 = arith.constant 3 : index
    %c0_46 = arith.constant 0 : index
    %c0_47 = arith.constant 0 : index
    %47 = vector.load %arg5[%c3_45, %c0_46, %c0_47] : memref<4x36x128xbf16, #tpu.memory_space<vmem>>, vector<1x22x128xbf16>
    %48 = vector.shape_cast %47 : vector<1x22x128xbf16> to vector<22x128xbf16>
    %c6 = arith.constant 6 : index
    %c0_48 = arith.constant 0 : index
    %c0_49 = arith.constant 0 : index
    %49 = vector.load %arg2[%c6, %c0_48, %c0_49] : memref<25x128x128xbf16, #tpu.memory_space<vmem>>, vector<1x128x128xbf16>
    %50 = vector.shape_cast %49 : vector<1x128x128xbf16> to vector<128x128xbf16>
    %cst_50 = arith.constant dense<0.000000e+00> : vector<22x128xf32>
    %51 = tpu.matmul %48, %50, %cst_50 {dimension_numbers = #tpu.dot_dimension_numbers<[1], [0], [0], [1], [0, 0, 1, 1], [], []>} : vector<22x128xbf16>, vector<128x128xbf16>, vector<22x128xf32> -> vector<22x128xf32>
    %52 = arith.addf %46, %51 : vector<22x128xf32>
    %c2_51 = arith.constant 2 : index
    %c1_52 = arith.constant 1 : index
    %c0_53 = arith.constant 0 : index
    %53 = vector.load %arg5[%c2_51, %c1_52, %c0_53] : memref<4x36x128xbf16, #tpu.memory_space<vmem>>, vector<1x22x128xbf16>
    %54 = vector.shape_cast %53 : vector<1x22x128xbf16> to vector<22x128xbf16>
    %c7 = arith.constant 7 : index
    %c0_54 = arith.constant 0 : index
    %c0_55 = arith.constant 0 : index
    %55 = vector.load %arg2[%c7, %c0_54, %c0_55] : memref<25x128x128xbf16, #tpu.memory_space<vmem>>, vector<1x128x128xbf16>
    %56 = vector.shape_cast %55 : vector<1x128x128xbf16> to vector<128x128xbf16>
    %cst_56 = arith.constant dense<0.000000e+00> : vector<22x128xf32>
    %57 = tpu.matmul %54, %56, %cst_56 {dimension_numbers = #tpu.dot_dimension_numbers<[1], [0], [0], [1], [0, 0, 1, 1], [], []>} : vector<22x128xbf16>, vector<128x128xbf16>, vector<22x128xf32> -> vector<22x128xf32>
    %58 = arith.addf %52, %57 : vector<22x128xf32>
    %c3_57 = arith.constant 3 : index
    %c1_58 = arith.constant 1 : index
    %c0_59 = arith.constant 0 : index
    %59 = vector.load %arg5[%c3_57, %c1_58, %c0_59] : memref<4x36x128xbf16, #tpu.memory_space<vmem>>, vector<1x22x128xbf16>
    %60 = vector.shape_cast %59 : vector<1x22x128xbf16> to vector<22x128xbf16>
    %c8 = arith.constant 8 : index
    %c0_60 = arith.constant 0 : index
    %c0_61 = arith.constant 0 : index
    %61 = vector.load %arg2[%c8, %c0_60, %c0_61] : memref<25x128x128xbf16, #tpu.memory_space<vmem>>, vector<1x128x128xbf16>
    %62 = vector.shape_cast %61 : vector<1x128x128xbf16> to vector<128x128xbf16>
    %cst_62 = arith.constant dense<0.000000e+00> : vector<22x128xf32>
    %63 = tpu.matmul %60, %62, %cst_62 {dimension_numbers = #tpu.dot_dimension_numbers<[1], [0], [0], [1], [0, 0, 1, 1], [], []>} : vector<22x128xbf16>, vector<128x128xbf16>, vector<22x128xf32> -> vector<22x128xf32>
    %64 = arith.addf %58, %63 : vector<22x128xf32>
    %c2_63 = arith.constant 2 : index
    %c2_64 = arith.constant 2 : index
    %c0_65 = arith.constant 0 : index
    %65 = vector.load %arg5[%c2_63, %c2_64, %c0_65] : memref<4x36x128xbf16, #tpu.memory_space<vmem>>, vector<1x22x128xbf16>
    %66 = vector.shape_cast %65 : vector<1x22x128xbf16> to vector<22x128xbf16>
    %c9 = arith.constant 9 : index
    %c0_66 = arith.constant 0 : index
    %c0_67 = arith.constant 0 : index
    %67 = vector.load %arg2[%c9, %c0_66, %c0_67] : memref<25x128x128xbf16, #tpu.memory_space<vmem>>, vector<1x128x128xbf16>
    %68 = vector.shape_cast %67 : vector<1x128x128xbf16> to vector<128x128xbf16>
    %cst_68 = arith.constant dense<0.000000e+00> : vector<22x128xf32>
    %69 = tpu.matmul %66, %68, %cst_68 {dimension_numbers = #tpu.dot_dimension_numbers<[1], [0], [0], [1], [0, 0, 1, 1], [], []>} : vector<22x128xbf16>, vector<128x128xbf16>, vector<22x128xf32> -> vector<22x128xf32>
    %70 = arith.addf %64, %69 : vector<22x128xf32>
    %c0_69 = arith.constant 0 : index
    %c6_70 = arith.constant 6 : index
    %c0_71 = arith.constant 0 : index
    %71 = vector.load %arg5[%c0_69, %c6_70, %c0_71] : memref<4x36x128xbf16, #tpu.memory_space<vmem>>, vector<1x22x128xbf16>
    %72 = vector.shape_cast %71 : vector<1x22x128xbf16> to vector<22x128xbf16>
    %c10 = arith.constant 10 : index
    %c0_72 = arith.constant 0 : index
    %c0_73 = arith.constant 0 : index
    %73 = vector.load %arg2[%c10, %c0_72, %c0_73] : memref<25x128x128xbf16, #tpu.memory_space<vmem>>, vector<1x128x128xbf16>
    %74 = vector.shape_cast %73 : vector<1x128x128xbf16> to vector<128x128xbf16>
    %cst_74 = arith.constant dense<0.000000e+00> : vector<22x128xf32>
    %75 = tpu.matmul %72, %74, %cst_74 {dimension_numbers = #tpu.dot_dimension_numbers<[1], [0], [0], [1], [0, 0, 1, 1], [], []>} : vector<22x128xbf16>, vector<128x128xbf16>, vector<22x128xf32> -> vector<22x128xf32>
    %76 = arith.addf %70, %75 : vector<22x128xf32>
    %c1_75 = arith.constant 1 : index
    %c6_76 = arith.constant 6 : index
    %c0_77 = arith.constant 0 : index
    %77 = vector.load %arg5[%c1_75, %c6_76, %c0_77] : memref<4x36x128xbf16, #tpu.memory_space<vmem>>, vector<1x22x128xbf16>
    %78 = vector.shape_cast %77 : vector<1x22x128xbf16> to vector<22x128xbf16>
    %c11 = arith.constant 11 : index
    %c0_78 = arith.constant 0 : index
    %c0_79 = arith.constant 0 : index
    %79 = vector.load %arg2[%c11, %c0_78, %c0_79] : memref<25x128x128xbf16, #tpu.memory_space<vmem>>, vector<1x128x128xbf16>
    %80 = vector.shape_cast %79 : vector<1x128x128xbf16> to vector<128x128xbf16>
    %cst_80 = arith.constant dense<0.000000e+00> : vector<22x128xf32>
    %81 = tpu.matmul %78, %80, %cst_80 {dimension_numbers = #tpu.dot_dimension_numbers<[1], [0], [0], [1], [0, 0, 1, 1], [], []>} : vector<22x128xbf16>, vector<128x128xbf16>, vector<22x128xf32> -> vector<22x128xf32>
    %82 = arith.addf %76, %81 : vector<22x128xf32>
    %c0_81 = arith.constant 0 : index
    %c7_82 = arith.constant 7 : index
    %c0_83 = arith.constant 0 : index
    %83 = vector.load %arg5[%c0_81, %c7_82, %c0_83] : memref<4x36x128xbf16, #tpu.memory_space<vmem>>, vector<1x22x128xbf16>
    %84 = vector.shape_cast %83 : vector<1x22x128xbf16> to vector<22x128xbf16>
    %c12 = arith.constant 12 : index
    %c0_84 = arith.constant 0 : index
    %c0_85 = arith.constant 0 : index
    %85 = vector.load %arg2[%c12, %c0_84, %c0_85] : memref<25x128x128xbf16, #tpu.memory_space<vmem>>, vector<1x128x128xbf16>
    %86 = vector.shape_cast %85 : vector<1x128x128xbf16> to vector<128x128xbf16>
    %cst_86 = arith.constant dense<0.000000e+00> : vector<22x128xf32>
    %87 = tpu.matmul %84, %86, %cst_86 {dimension_numbers = #tpu.dot_dimension_numbers<[1], [0], [0], [1], [0, 0, 1, 1], [], []>} : vector<22x128xbf16>, vector<128x128xbf16>, vector<22x128xf32> -> vector<22x128xf32>
    %88 = arith.addf %82, %87 : vector<22x128xf32>
    %c1_87 = arith.constant 1 : index
    %c7_88 = arith.constant 7 : index
    %c0_89 = arith.constant 0 : index
    %89 = vector.load %arg5[%c1_87, %c7_88, %c0_89] : memref<4x36x128xbf16, #tpu.memory_space<vmem>>, vector<1x22x128xbf16>
    %90 = vector.shape_cast %89 : vector<1x22x128xbf16> to vector<22x128xbf16>
    %c13 = arith.constant 13 : index
    %c0_90 = arith.constant 0 : index
    %c0_91 = arith.constant 0 : index
    %91 = vector.load %arg2[%c13, %c0_90, %c0_91] : memref<25x128x128xbf16, #tpu.memory_space<vmem>>, vector<1x128x128xbf16>
    %92 = vector.shape_cast %91 : vector<1x128x128xbf16> to vector<128x128xbf16>
    %cst_92 = arith.constant dense<0.000000e+00> : vector<22x128xf32>
    %93 = tpu.matmul %90, %92, %cst_92 {dimension_numbers = #tpu.dot_dimension_numbers<[1], [0], [0], [1], [0, 0, 1, 1], [], []>} : vector<22x128xbf16>, vector<128x128xbf16>, vector<22x128xf32> -> vector<22x128xf32>
    %94 = arith.addf %88, %93 : vector<22x128xf32>
    %c0_93 = arith.constant 0 : index
    %c8_94 = arith.constant 8 : index
    %c0_95 = arith.constant 0 : index
    %95 = vector.load %arg5[%c0_93, %c8_94, %c0_95] : memref<4x36x128xbf16, #tpu.memory_space<vmem>>, vector<1x22x128xbf16>
    %96 = vector.shape_cast %95 : vector<1x22x128xbf16> to vector<22x128xbf16>
    %c14 = arith.constant 14 : index
    %c0_96 = arith.constant 0 : index
    %c0_97 = arith.constant 0 : index
    %97 = vector.load %arg2[%c14, %c0_96, %c0_97] : memref<25x128x128xbf16, #tpu.memory_space<vmem>>, vector<1x128x128xbf16>
    %98 = vector.shape_cast %97 : vector<1x128x128xbf16> to vector<128x128xbf16>
    %cst_98 = arith.constant dense<0.000000e+00> : vector<22x128xf32>
    %99 = tpu.matmul %96, %98, %cst_98 {dimension_numbers = #tpu.dot_dimension_numbers<[1], [0], [0], [1], [0, 0, 1, 1], [], []>} : vector<22x128xbf16>, vector<128x128xbf16>, vector<22x128xf32> -> vector<22x128xf32>
    %100 = arith.addf %94, %99 : vector<22x128xf32>
    %c2_99 = arith.constant 2 : index
    %c6_100 = arith.constant 6 : index
    %c0_101 = arith.constant 0 : index
    %101 = vector.load %arg5[%c2_99, %c6_100, %c0_101] : memref<4x36x128xbf16, #tpu.memory_space<vmem>>, vector<1x22x128xbf16>
    %102 = vector.shape_cast %101 : vector<1x22x128xbf16> to vector<22x128xbf16>
    %c15 = arith.constant 15 : index
    %c0_102 = arith.constant 0 : index
    %c0_103 = arith.constant 0 : index
    %103 = vector.load %arg2[%c15, %c0_102, %c0_103] : memref<25x128x128xbf16, #tpu.memory_space<vmem>>, vector<1x128x128xbf16>
    %104 = vector.shape_cast %103 : vector<1x128x128xbf16> to vector<128x128xbf16>
    %cst_104 = arith.constant dense<0.000000e+00> : vector<22x128xf32>
    %105 = tpu.matmul %102, %104, %cst_104 {dimension_numbers = #tpu.dot_dimension_numbers<[1], [0], [0], [1], [0, 0, 1, 1], [], []>} : vector<22x128xbf16>, vector<128x128xbf16>, vector<22x128xf32> -> vector<22x128xf32>
    %106 = arith.addf %100, %105 : vector<22x128xf32>
    %c3_105 = arith.constant 3 : index
    %c6_106 = arith.constant 6 : index
    %c0_107 = arith.constant 0 : index
    %107 = vector.load %arg5[%c3_105, %c6_106, %c0_107] : memref<4x36x128xbf16, #tpu.memory_space<vmem>>, vector<1x22x128xbf16>
    %108 = vector.shape_cast %107 : vector<1x22x128xbf16> to vector<22x128xbf16>
    %c16 = arith.constant 16 : index
    %c0_108 = arith.constant 0 : index
    %c0_109 = arith.constant 0 : index
    %109 = vector.load %arg2[%c16, %c0_108, %c0_109] : memref<25x128x128xbf16, #tpu.memory_space<vmem>>, vector<1x128x128xbf16>
    %110 = vector.shape_cast %109 : vector<1x128x128xbf16> to vector<128x128xbf16>
    %cst_110 = arith.constant dense<0.000000e+00> : vector<22x128xf32>
    %111 = tpu.matmul %108, %110, %cst_110 {dimension_numbers = #tpu.dot_dimension_numbers<[1], [0], [0], [1], [0, 0, 1, 1], [], []>} : vector<22x128xbf16>, vector<128x128xbf16>, vector<22x128xf32> -> vector<22x128xf32>
    %112 = arith.addf %106, %111 : vector<22x128xf32>
    %c2_111 = arith.constant 2 : index
    %c7_112 = arith.constant 7 : index
    %c0_113 = arith.constant 0 : index
    %113 = vector.load %arg5[%c2_111, %c7_112, %c0_113] : memref<4x36x128xbf16, #tpu.memory_space<vmem>>, vector<1x22x128xbf16>
    %114 = vector.shape_cast %113 : vector<1x22x128xbf16> to vector<22x128xbf16>
    %c17 = arith.constant 17 : index
    %c0_114 = arith.constant 0 : index
    %c0_115 = arith.constant 0 : index
    %115 = vector.load %arg2[%c17, %c0_114, %c0_115] : memref<25x128x128xbf16, #tpu.memory_space<vmem>>, vector<1x128x128xbf16>
    %116 = vector.shape_cast %115 : vector<1x128x128xbf16> to vector<128x128xbf16>
    %cst_116 = arith.constant dense<0.000000e+00> : vector<22x128xf32>
    %117 = tpu.matmul %114, %116, %cst_116 {dimension_numbers = #tpu.dot_dimension_numbers<[1], [0], [0], [1], [0, 0, 1, 1], [], []>} : vector<22x128xbf16>, vector<128x128xbf16>, vector<22x128xf32> -> vector<22x128xf32>
    %118 = arith.addf %112, %117 : vector<22x128xf32>
    %c3_117 = arith.constant 3 : index
    %c7_118 = arith.constant 7 : index
    %c0_119 = arith.constant 0 : index
    %119 = vector.load %arg5[%c3_117, %c7_118, %c0_119] : memref<4x36x128xbf16, #tpu.memory_space<vmem>>, vector<1x22x128xbf16>
    %120 = vector.shape_cast %119 : vector<1x22x128xbf16> to vector<22x128xbf16>
    %c18 = arith.constant 18 : index
    %c0_120 = arith.constant 0 : index
    %c0_121 = arith.constant 0 : index
    %121 = vector.load %arg2[%c18, %c0_120, %c0_121] : memref<25x128x128xbf16, #tpu.memory_space<vmem>>, vector<1x128x128xbf16>
    %122 = vector.shape_cast %121 : vector<1x128x128xbf16> to vector<128x128xbf16>
    %cst_122 = arith.constant dense<0.000000e+00> : vector<22x128xf32>
    %123 = tpu.matmul %120, %122, %cst_122 {dimension_numbers = #tpu.dot_dimension_numbers<[1], [0], [0], [1], [0, 0, 1, 1], [], []>} : vector<22x128xbf16>, vector<128x128xbf16>, vector<22x128xf32> -> vector<22x128xf32>
    %124 = arith.addf %118, %123 : vector<22x128xf32>
    %c2_123 = arith.constant 2 : index
    %c8_124 = arith.constant 8 : index
    %c0_125 = arith.constant 0 : index
    %125 = vector.load %arg5[%c2_123, %c8_124, %c0_125] : memref<4x36x128xbf16, #tpu.memory_space<vmem>>, vector<1x22x128xbf16>
    %126 = vector.shape_cast %125 : vector<1x22x128xbf16> to vector<22x128xbf16>
    %c19 = arith.constant 19 : index
    %c0_126 = arith.constant 0 : index
    %c0_127 = arith.constant 0 : index
    %127 = vector.load %arg2[%c19, %c0_126, %c0_127] : memref<25x128x128xbf16, #tpu.memory_space<vmem>>, vector<1x128x128xbf16>
    %128 = vector.shape_cast %127 : vector<1x128x128xbf16> to vector<128x128xbf16>
    %cst_128 = arith.constant dense<0.000000e+00> : vector<22x128xf32>
    %129 = tpu.matmul %126, %128, %cst_128 {dimension_numbers = #tpu.dot_dimension_numbers<[1], [0], [0], [1], [0, 0, 1, 1], [], []>} : vector<22x128xbf16>, vector<128x128xbf16>, vector<22x128xf32> -> vector<22x128xf32>
    %130 = arith.addf %124, %129 : vector<22x128xf32>
    %c0_129 = arith.constant 0 : index
    %c12_130 = arith.constant 12 : index
    %c0_131 = arith.constant 0 : index
    %131 = vector.load %arg5[%c0_129, %c12_130, %c0_131] : memref<4x36x128xbf16, #tpu.memory_space<vmem>>, vector<1x22x128xbf16>
    %132 = vector.shape_cast %131 : vector<1x22x128xbf16> to vector<22x128xbf16>
    %c20 = arith.constant 20 : index
    %c0_132 = arith.constant 0 : index
    %c0_133 = arith.constant 0 : index
    %133 = vector.load %arg2[%c20, %c0_132, %c0_133] : memref<25x128x128xbf16, #tpu.memory_space<vmem>>, vector<1x128x128xbf16>
    %134 = vector.shape_cast %133 : vector<1x128x128xbf16> to vector<128x128xbf16>
    %cst_134 = arith.constant dense<0.000000e+00> : vector<22x128xf32>
    %135 = tpu.matmul %132, %134, %cst_134 {dimension_numbers = #tpu.dot_dimension_numbers<[1], [0], [0], [1], [0, 0, 1, 1], [], []>} : vector<22x128xbf16>, vector<128x128xbf16>, vector<22x128xf32> -> vector<22x128xf32>
    %136 = arith.addf %130, %135 : vector<22x128xf32>
    %c1_135 = arith.constant 1 : index
    %c12_136 = arith.constant 12 : index
    %c0_137 = arith.constant 0 : index
    %137 = vector.load %arg5[%c1_135, %c12_136, %c0_137] : memref<4x36x128xbf16, #tpu.memory_space<vmem>>, vector<1x22x128xbf16>
    %138 = vector.shape_cast %137 : vector<1x22x128xbf16> to vector<22x128xbf16>
    %c21 = arith.constant 21 : index
    %c0_138 = arith.constant 0 : index
    %c0_139 = arith.constant 0 : index
    %139 = vector.load %arg2[%c21, %c0_138, %c0_139] : memref<25x128x128xbf16, #tpu.memory_space<vmem>>, vector<1x128x128xbf16>
    %140 = vector.shape_cast %139 : vector<1x128x128xbf16> to vector<128x128xbf16>
    %cst_140 = arith.constant dense<0.000000e+00> : vector<22x128xf32>
    %141 = tpu.matmul %138, %140, %cst_140 {dimension_numbers = #tpu.dot_dimension_numbers<[1], [0], [0], [1], [0, 0, 1, 1], [], []>} : vector<22x128xbf16>, vector<128x128xbf16>, vector<22x128xf32> -> vector<22x128xf32>
    %142 = arith.addf %136, %141 : vector<22x128xf32>
    %c0_141 = arith.constant 0 : index
    %c13_142 = arith.constant 13 : index
    %c0_143 = arith.constant 0 : index
    %143 = vector.load %arg5[%c0_141, %c13_142, %c0_143] : memref<4x36x128xbf16, #tpu.memory_space<vmem>>, vector<1x22x128xbf16>
    %144 = vector.shape_cast %143 : vector<1x22x128xbf16> to vector<22x128xbf16>
    %c22 = arith.constant 22 : index
    %c0_144 = arith.constant 0 : index
    %c0_145 = arith.constant 0 : index
    %145 = vector.load %arg2[%c22, %c0_144, %c0_145] : memref<25x128x128xbf16, #tpu.memory_space<vmem>>, vector<1x128x128xbf16>
    %146 = vector.shape_cast %145 : vector<1x128x128xbf16> to vector<128x128xbf16>
    %cst_146 = arith.constant dense<0.000000e+00> : vector<22x128xf32>
    %147 = tpu.matmul %144, %146, %cst_146 {dimension_numbers = #tpu.dot_dimension_numbers<[1], [0], [0], [1], [0, 0, 1, 1], [], []>} : vector<22x128xbf16>, vector<128x128xbf16>, vector<22x128xf32> -> vector<22x128xf32>
    %148 = arith.addf %142, %147 : vector<22x128xf32>
    %c1_147 = arith.constant 1 : index
    %c13_148 = arith.constant 13 : index
    %c0_149 = arith.constant 0 : index
    %149 = vector.load %arg5[%c1_147, %c13_148, %c0_149] : memref<4x36x128xbf16, #tpu.memory_space<vmem>>, vector<1x22x128xbf16>
    %150 = vector.shape_cast %149 : vector<1x22x128xbf16> to vector<22x128xbf16>
    %c23 = arith.constant 23 : index
    %c0_150 = arith.constant 0 : index
    %c0_151 = arith.constant 0 : index
    %151 = vector.load %arg2[%c23, %c0_150, %c0_151] : memref<25x128x128xbf16, #tpu.memory_space<vmem>>, vector<1x128x128xbf16>
    %152 = vector.shape_cast %151 : vector<1x128x128xbf16> to vector<128x128xbf16>
    %cst_152 = arith.constant dense<0.000000e+00> : vector<22x128xf32>
    %153 = tpu.matmul %150, %152, %cst_152 {dimension_numbers = #tpu.dot_dimension_numbers<[1], [0], [0], [1], [0, 0, 1, 1], [], []>} : vector<22x128xbf16>, vector<128x128xbf16>, vector<22x128xf32> -> vector<22x128xf32>
    %154 = arith.addf %148, %153 : vector<22x128xf32>
    %c0_153 = arith.constant 0 : index
    %c14_154 = arith.constant 14 : index
    %c0_155 = arith.constant 0 : index
    %155 = vector.load %arg5[%c0_153, %c14_154, %c0_155] : memref<4x36x128xbf16, #tpu.memory_space<vmem>>, vector<1x22x128xbf16>
    %156 = vector.shape_cast %155 : vector<1x22x128xbf16> to vector<22x128xbf16>
    %c24 = arith.constant 24 : index
    %c0_156 = arith.constant 0 : index
    %c0_157 = arith.constant 0 : index
    %157 = vector.load %arg2[%c24, %c0_156, %c0_157] : memref<25x128x128xbf16, #tpu.memory_space<vmem>>, vector<1x128x128xbf16>
    %158 = vector.shape_cast %157 : vector<1x128x128xbf16> to vector<128x128xbf16>
    %cst_158 = arith.constant dense<0.000000e+00> : vector<22x128xf32>
    %159 = tpu.matmul %156, %158, %cst_158 {dimension_numbers = #tpu.dot_dimension_numbers<[1], [0], [0], [1], [0, 0, 1, 1], [], []>} : vector<22x128xbf16>, vector<128x128xbf16>, vector<22x128xf32> -> vector<22x128xf32>
    %160 = arith.addf %154, %159 : vector<22x128xf32>
    %c0_159 = arith.constant 0 : index
    %c0_160 = arith.constant 0 : index
    %161 = vector.load %arg3[%c0_159, %c0_160] : memref<1x128xf32, #tpu.memory_space<vmem>>, vector<1x128xf32>
    %162 = vector.broadcast %161 : vector<1x128xf32> to vector<22x128xf32>
    %163 = arith.addf %160, %162 : vector<22x128xf32>
    %164 = arith.truncf %163 : vector<22x128xf32> to vector<22x128xbf16>
    %c0_161 = arith.constant 0 : index
    %c0_162 = arith.constant 0 : index
    %c0_163 = arith.constant 0 : index
    %165 = vector.load %arg4[%c0_161, %c0_162, %c0_163] : memref<1x22x128xbf16, #tpu.memory_space<vmem>>, vector<1x22x128xbf16>
    %166 = vector.shape_cast %165 : vector<1x22x128xbf16> to vector<22x128xbf16>
    %167 = vector.shape_cast %164 : vector<22x128xbf16> to vector<1x22x128xbf16>
    tpu.vector_store %arg4[%c0_161, %c0_162, %c0_163], %167 {strides = array<i32>} : memref<1x22x128xbf16, #tpu.memory_space<vmem>>, vector<1x22x128xbf16>,
    return
  }
  func.func @transform_0(%arg0: i32) -> (i32, i32, i32, i32) {
    %c0_i32 = arith.constant 0 : i32
    %c0_i32_0 = arith.constant 0 : i32
    %c0_i32_1 = arith.constant 0 : i32
    %c0_i32_2 = arith.constant 0 : i32
    return %arg0, %c0_i32, %c0_i32_0, %c0_i32_1 : i32, i32, i32, i32
  }
  func.func @transform_1(%arg0: i32) -> (i32, i32, i32) {
    %c0_i32 = arith.constant 0 : i32
    %c0_i32_0 = arith.constant 0 : i32
    %c0_i32_1 = arith.constant 0 : i32
    %c0_i32_2 = arith.constant 0 : i32
    return %c0_i32, %c0_i32_0, %c0_i32_1 : i32, i32, i32
  }
  func.func @transform_2(%arg0: i32) -> (i32, i32) {
    %c0_i32 = arith.constant 0 : i32
    %c0_i32_0 = arith.constant 0 : i32
    %c0_i32_1 = arith.constant 0 : i32
    return %c0_i32, %c0_i32_0 : i32, i32
  }
  func.func @transform_3(%arg0: i32) -> (i32, i32, i32) {
    %c0_i32 = arith.constant 0 : i32
    %c0_i32_0 = arith.constant 0 : i32
    %c0_i32_1 = arith.constant 0 : i32
    return %arg0, %c0_i32, %c0_i32_0 : i32, i32, i32
  }
}

module attributes {stable_mosaic.version = 11 : i64} {
  func.func @_conv_kernel(%arg0: i32, %arg1: memref<1x4x16x128xbf16, #tpu.memory_space<vmem>>, %arg2: memref<25x128x128xbf16, #tpu.memory_space<vmem>>, %arg3: memref<1x128xf32, #tpu.memory_space<vmem>>, %arg4: memref<1x6x128xbf16, #tpu.memory_space<vmem>>, %arg5: memref<4x16x128xbf16, #tpu.memory_space<vmem>>) attributes {dimension_semantics = [#tpu.dimension_semantics<parallel>], iteration_bounds = array<i64: 2>, scalar_prefetch = 0 : i64, scratch_operands = 1 : i64, tpu.core_type = #tpu.core_type<tc>, window_params = [{transform_indices = @transform_0, window_bounds = array<i64: 1, 4, 16, 128>}, {pipeline_mode = #tpu.pipeline_mode<synchronous>, transform_indices = @transform_1, window_bounds = array<i64: 25, 128, 128>}, {pipeline_mode = #tpu.pipeline_mode<synchronous>, transform_indices = @transform_2, window_bounds = array<i64: 1, 128>}, {transform_indices = @transform_3, window_bounds = array<i64: 1, 6, 128>}]} {
    %c0 = arith.constant 0 : index
    %c0_0 = arith.constant 0 : index
    %c0_1 = arith.constant 0 : index
    %c0_2 = arith.constant 0 : index
    %0 = vector.load %arg1[%c0, %c0_0, %c0_1, %c0_2] : memref<1x4x16x128xbf16, #tpu.memory_space<vmem>>, vector<1x4x16x128xbf16>
    %1 = vector.shape_cast %0 : vector<1x4x16x128xbf16> to vector<4x16x128xbf16>
    %2 = arith.extf %1 : vector<4x16x128xbf16> to vector<4x16x128xf32>
    %cst = arith.constant 0.000000e+00 : f32
    %3 = vector.broadcast %cst : f32 to vector<4x16x128xf32>
    %4 = arith.cmpf ogt, %2, %3 : vector<4x16x128xf32>
    %cst_3 = arith.constant 2.000000e-01 : f32
    %5 = vector.broadcast %cst_3 : f32 to vector<4x16x128xf32>
    %6 = arith.mulf %5, %2 : vector<4x16x128xf32>
    %7 = arith.select %4, %2, %6 : vector<4x16x128xi1>, vector<4x16x128xf32>
    %8 = arith.truncf %7 : vector<4x16x128xf32> to vector<4x16x128xbf16>
    %c0_4 = arith.constant 0 : index
    %c0_5 = arith.constant 0 : index
    %c0_6 = arith.constant 0 : index
    %9 = vector.load %arg5[%c0_4, %c0_5, %c0_6] : memref<4x16x128xbf16, #tpu.memory_space<vmem>>, vector<4x16x128xbf16>
    tpu.vector_store %arg5[%c0_4, %c0_5, %c0_6], %8 {strides = array<i32>} : memref<4x16x128xbf16, #tpu.memory_space<vmem>>, vector<4x16x128xbf16>,
    %cst_7 = arith.constant 0.000000e+00 : f32
    %10 = vector.broadcast %cst_7 : f32 to vector<6x128xf32>
    %c0_8 = arith.constant 0 : index
    %c0_9 = arith.constant 0 : index
    %c0_10 = arith.constant 0 : index
    %11 = vector.load %arg5[%c0_8, %c0_9, %c0_10] : memref<4x16x128xbf16, #tpu.memory_space<vmem>>, vector<1x6x128xbf16>
    %12 = vector.shape_cast %11 : vector<1x6x128xbf16> to vector<6x128xbf16>
    %c0_11 = arith.constant 0 : index
    %c0_12 = arith.constant 0 : index
    %c0_13 = arith.constant 0 : index
    %13 = vector.load %arg2[%c0_11, %c0_12, %c0_13] : memref<25x128x128xbf16, #tpu.memory_space<vmem>>, vector<1x128x128xbf16>
    %14 = vector.shape_cast %13 : vector<1x128x128xbf16> to vector<128x128xbf16>
    %cst_14 = arith.constant dense<0.000000e+00> : vector<6x128xf32>
    %15 = tpu.matmul %12, %14, %cst_14 {dimension_numbers = #tpu.dot_dimension_numbers<[1], [0], [0], [1], [0, 0, 1, 1], [], []>} : vector<6x128xbf16>, vector<128x128xbf16>, vector<6x128xf32> -> vector<6x128xf32>
    %16 = arith.addf %10, %15 : vector<6x128xf32>
    %c1 = arith.constant 1 : index
    %c0_15 = arith.constant 0 : index
    %c0_16 = arith.constant 0 : index
    %17 = vector.load %arg5[%c1, %c0_15, %c0_16] : memref<4x16x128xbf16, #tpu.memory_space<vmem>>, vector<1x6x128xbf16>
    %18 = vector.shape_cast %17 : vector<1x6x128xbf16> to vector<6x128xbf16>
    %c1_17 = arith.constant 1 : index
    %c0_18 = arith.constant 0 : index
    %c0_19 = arith.constant 0 : index
    %19 = vector.load %arg2[%c1_17, %c0_18, %c0_19] : memref<25x128x128xbf16, #tpu.memory_space<vmem>>, vector<1x128x128xbf16>
    %20 = vector.shape_cast %19 : vector<1x128x128xbf16> to vector<128x128xbf16>
    %cst_20 = arith.constant dense<0.000000e+00> : vector<6x128xf32>
    %21 = tpu.matmul %18, %20, %cst_20 {dimension_numbers = #tpu.dot_dimension_numbers<[1], [0], [0], [1], [0, 0, 1, 1], [], []>} : vector<6x128xbf16>, vector<128x128xbf16>, vector<6x128xf32> -> vector<6x128xf32>
    %22 = arith.addf %16, %21 : vector<6x128xf32>
    %c0_21 = arith.constant 0 : index
    %c1_22 = arith.constant 1 : index
    %c0_23 = arith.constant 0 : index
    %23 = vector.load %arg5[%c0_21, %c1_22, %c0_23] : memref<4x16x128xbf16, #tpu.memory_space<vmem>>, vector<1x6x128xbf16>
    %24 = vector.shape_cast %23 : vector<1x6x128xbf16> to vector<6x128xbf16>
    %c2 = arith.constant 2 : index
    %c0_24 = arith.constant 0 : index
    %c0_25 = arith.constant 0 : index
    %25 = vector.load %arg2[%c2, %c0_24, %c0_25] : memref<25x128x128xbf16, #tpu.memory_space<vmem>>, vector<1x128x128xbf16>
    %26 = vector.shape_cast %25 : vector<1x128x128xbf16> to vector<128x128xbf16>
    %cst_26 = arith.constant dense<0.000000e+00> : vector<6x128xf32>
    %27 = tpu.matmul %24, %26, %cst_26 {dimension_numbers = #tpu.dot_dimension_numbers<[1], [0], [0], [1], [0, 0, 1, 1], [], []>} : vector<6x128xbf16>, vector<128x128xbf16>, vector<6x128xf32> -> vector<6x128xf32>
    %28 = arith.addf %22, %27 : vector<6x128xf32>
    %c1_27 = arith.constant 1 : index
    %c1_28 = arith.constant 1 : index
    %c0_29 = arith.constant 0 : index
    %29 = vector.load %arg5[%c1_27, %c1_28, %c0_29] : memref<4x16x128xbf16, #tpu.memory_space<vmem>>, vector<1x6x128xbf16>
    %30 = vector.shape_cast %29 : vector<1x6x128xbf16> to vector<6x128xbf16>
    %c3 = arith.constant 3 : index
    %c0_30 = arith.constant 0 : index
    %c0_31 = arith.constant 0 : index
    %31 = vector.load %arg2[%c3, %c0_30, %c0_31] : memref<25x128x128xbf16, #tpu.memory_space<vmem>>, vector<1x128x128xbf16>
    %32 = vector.shape_cast %31 : vector<1x128x128xbf16> to vector<128x128xbf16>
    %cst_32 = arith.constant dense<0.000000e+00> : vector<6x128xf32>
    %33 = tpu.matmul %30, %32, %cst_32 {dimension_numbers = #tpu.dot_dimension_numbers<[1], [0], [0], [1], [0, 0, 1, 1], [], []>} : vector<6x128xbf16>, vector<128x128xbf16>, vector<6x128xf32> -> vector<6x128xf32>
    %34 = arith.addf %28, %33 : vector<6x128xf32>
    %c0_33 = arith.constant 0 : index
    %c2_34 = arith.constant 2 : index
    %c0_35 = arith.constant 0 : index
    %35 = vector.load %arg5[%c0_33, %c2_34, %c0_35] : memref<4x16x128xbf16, #tpu.memory_space<vmem>>, vector<1x6x128xbf16>
    %36 = vector.shape_cast %35 : vector<1x6x128xbf16> to vector<6x128xbf16>
    %c4 = arith.constant 4 : index
    %c0_36 = arith.constant 0 : index
    %c0_37 = arith.constant 0 : index
    %37 = vector.load %arg2[%c4, %c0_36, %c0_37] : memref<25x128x128xbf16, #tpu.memory_space<vmem>>, vector<1x128x128xbf16>
    %38 = vector.shape_cast %37 : vector<1x128x128xbf16> to vector<128x128xbf16>
    %cst_38 = arith.constant dense<0.000000e+00> : vector<6x128xf32>
    %39 = tpu.matmul %36, %38, %cst_38 {dimension_numbers = #tpu.dot_dimension_numbers<[1], [0], [0], [1], [0, 0, 1, 1], [], []>} : vector<6x128xbf16>, vector<128x128xbf16>, vector<6x128xf32> -> vector<6x128xf32>
    %40 = arith.addf %34, %39 : vector<6x128xf32>
    %c2_39 = arith.constant 2 : index
    %c0_40 = arith.constant 0 : index
    %c0_41 = arith.constant 0 : index
    %41 = vector.load %arg5[%c2_39, %c0_40, %c0_41] : memref<4x16x128xbf16, #tpu.memory_space<vmem>>, vector<1x6x128xbf16>
    %42 = vector.shape_cast %41 : vector<1x6x128xbf16> to vector<6x128xbf16>
    %c5 = arith.constant 5 : index
    %c0_42 = arith.constant 0 : index
    %c0_43 = arith.constant 0 : index
    %43 = vector.load %arg2[%c5, %c0_42, %c0_43] : memref<25x128x128xbf16, #tpu.memory_space<vmem>>, vector<1x128x128xbf16>
    %44 = vector.shape_cast %43 : vector<1x128x128xbf16> to vector<128x128xbf16>
    %cst_44 = arith.constant dense<0.000000e+00> : vector<6x128xf32>
    %45 = tpu.matmul %42, %44, %cst_44 {dimension_numbers = #tpu.dot_dimension_numbers<[1], [0], [0], [1], [0, 0, 1, 1], [], []>} : vector<6x128xbf16>, vector<128x128xbf16>, vector<6x128xf32> -> vector<6x128xf32>
    %46 = arith.addf %40, %45 : vector<6x128xf32>
    %c3_45 = arith.constant 3 : index
    %c0_46 = arith.constant 0 : index
    %c0_47 = arith.constant 0 : index
    %47 = vector.load %arg5[%c3_45, %c0_46, %c0_47] : memref<4x16x128xbf16, #tpu.memory_space<vmem>>, vector<1x6x128xbf16>
    %48 = vector.shape_cast %47 : vector<1x6x128xbf16> to vector<6x128xbf16>
    %c6 = arith.constant 6 : index
    %c0_48 = arith.constant 0 : index
    %c0_49 = arith.constant 0 : index
    %49 = vector.load %arg2[%c6, %c0_48, %c0_49] : memref<25x128x128xbf16, #tpu.memory_space<vmem>>, vector<1x128x128xbf16>
    %50 = vector.shape_cast %49 : vector<1x128x128xbf16> to vector<128x128xbf16>
    %cst_50 = arith.constant dense<0.000000e+00> : vector<6x128xf32>
    %51 = tpu.matmul %48, %50, %cst_50 {dimension_numbers = #tpu.dot_dimension_numbers<[1], [0], [0], [1], [0, 0, 1, 1], [], []>} : vector<6x128xbf16>, vector<128x128xbf16>, vector<6x128xf32> -> vector<6x128xf32>
    %52 = arith.addf %46, %51 : vector<6x128xf32>
    %c2_51 = arith.constant 2 : index
    %c1_52 = arith.constant 1 : index
    %c0_53 = arith.constant 0 : index
    %53 = vector.load %arg5[%c2_51, %c1_52, %c0_53] : memref<4x16x128xbf16, #tpu.memory_space<vmem>>, vector<1x6x128xbf16>
    %54 = vector.shape_cast %53 : vector<1x6x128xbf16> to vector<6x128xbf16>
    %c7 = arith.constant 7 : index
    %c0_54 = arith.constant 0 : index
    %c0_55 = arith.constant 0 : index
    %55 = vector.load %arg2[%c7, %c0_54, %c0_55] : memref<25x128x128xbf16, #tpu.memory_space<vmem>>, vector<1x128x128xbf16>
    %56 = vector.shape_cast %55 : vector<1x128x128xbf16> to vector<128x128xbf16>
    %cst_56 = arith.constant dense<0.000000e+00> : vector<6x128xf32>
    %57 = tpu.matmul %54, %56, %cst_56 {dimension_numbers = #tpu.dot_dimension_numbers<[1], [0], [0], [1], [0, 0, 1, 1], [], []>} : vector<6x128xbf16>, vector<128x128xbf16>, vector<6x128xf32> -> vector<6x128xf32>
    %58 = arith.addf %52, %57 : vector<6x128xf32>
    %c3_57 = arith.constant 3 : index
    %c1_58 = arith.constant 1 : index
    %c0_59 = arith.constant 0 : index
    %59 = vector.load %arg5[%c3_57, %c1_58, %c0_59] : memref<4x16x128xbf16, #tpu.memory_space<vmem>>, vector<1x6x128xbf16>
    %60 = vector.shape_cast %59 : vector<1x6x128xbf16> to vector<6x128xbf16>
    %c8 = arith.constant 8 : index
    %c0_60 = arith.constant 0 : index
    %c0_61 = arith.constant 0 : index
    %61 = vector.load %arg2[%c8, %c0_60, %c0_61] : memref<25x128x128xbf16, #tpu.memory_space<vmem>>, vector<1x128x128xbf16>
    %62 = vector.shape_cast %61 : vector<1x128x128xbf16> to vector<128x128xbf16>
    %cst_62 = arith.constant dense<0.000000e+00> : vector<6x128xf32>
    %63 = tpu.matmul %60, %62, %cst_62 {dimension_numbers = #tpu.dot_dimension_numbers<[1], [0], [0], [1], [0, 0, 1, 1], [], []>} : vector<6x128xbf16>, vector<128x128xbf16>, vector<6x128xf32> -> vector<6x128xf32>
    %64 = arith.addf %58, %63 : vector<6x128xf32>
    %c2_63 = arith.constant 2 : index
    %c2_64 = arith.constant 2 : index
    %c0_65 = arith.constant 0 : index
    %65 = vector.load %arg5[%c2_63, %c2_64, %c0_65] : memref<4x16x128xbf16, #tpu.memory_space<vmem>>, vector<1x6x128xbf16>
    %66 = vector.shape_cast %65 : vector<1x6x128xbf16> to vector<6x128xbf16>
    %c9 = arith.constant 9 : index
    %c0_66 = arith.constant 0 : index
    %c0_67 = arith.constant 0 : index
    %67 = vector.load %arg2[%c9, %c0_66, %c0_67] : memref<25x128x128xbf16, #tpu.memory_space<vmem>>, vector<1x128x128xbf16>
    %68 = vector.shape_cast %67 : vector<1x128x128xbf16> to vector<128x128xbf16>
    %cst_68 = arith.constant dense<0.000000e+00> : vector<6x128xf32>
    %69 = tpu.matmul %66, %68, %cst_68 {dimension_numbers = #tpu.dot_dimension_numbers<[1], [0], [0], [1], [0, 0, 1, 1], [], []>} : vector<6x128xbf16>, vector<128x128xbf16>, vector<6x128xf32> -> vector<6x128xf32>
    %70 = arith.addf %64, %69 : vector<6x128xf32>
    %c0_69 = arith.constant 0 : index
    %c4_70 = arith.constant 4 : index
    %c0_71 = arith.constant 0 : index
    %71 = vector.load %arg5[%c0_69, %c4_70, %c0_71] : memref<4x16x128xbf16, #tpu.memory_space<vmem>>, vector<1x6x128xbf16>
    %72 = vector.shape_cast %71 : vector<1x6x128xbf16> to vector<6x128xbf16>
    %c10 = arith.constant 10 : index
    %c0_72 = arith.constant 0 : index
    %c0_73 = arith.constant 0 : index
    %73 = vector.load %arg2[%c10, %c0_72, %c0_73] : memref<25x128x128xbf16, #tpu.memory_space<vmem>>, vector<1x128x128xbf16>
    %74 = vector.shape_cast %73 : vector<1x128x128xbf16> to vector<128x128xbf16>
    %cst_74 = arith.constant dense<0.000000e+00> : vector<6x128xf32>
    %75 = tpu.matmul %72, %74, %cst_74 {dimension_numbers = #tpu.dot_dimension_numbers<[1], [0], [0], [1], [0, 0, 1, 1], [], []>} : vector<6x128xbf16>, vector<128x128xbf16>, vector<6x128xf32> -> vector<6x128xf32>
    %76 = arith.addf %70, %75 : vector<6x128xf32>
    %c1_75 = arith.constant 1 : index
    %c4_76 = arith.constant 4 : index
    %c0_77 = arith.constant 0 : index
    %77 = vector.load %arg5[%c1_75, %c4_76, %c0_77] : memref<4x16x128xbf16, #tpu.memory_space<vmem>>, vector<1x6x128xbf16>
    %78 = vector.shape_cast %77 : vector<1x6x128xbf16> to vector<6x128xbf16>
    %c11 = arith.constant 11 : index
    %c0_78 = arith.constant 0 : index
    %c0_79 = arith.constant 0 : index
    %79 = vector.load %arg2[%c11, %c0_78, %c0_79] : memref<25x128x128xbf16, #tpu.memory_space<vmem>>, vector<1x128x128xbf16>
    %80 = vector.shape_cast %79 : vector<1x128x128xbf16> to vector<128x128xbf16>
    %cst_80 = arith.constant dense<0.000000e+00> : vector<6x128xf32>
    %81 = tpu.matmul %78, %80, %cst_80 {dimension_numbers = #tpu.dot_dimension_numbers<[1], [0], [0], [1], [0, 0, 1, 1], [], []>} : vector<6x128xbf16>, vector<128x128xbf16>, vector<6x128xf32> -> vector<6x128xf32>
    %82 = arith.addf %76, %81 : vector<6x128xf32>
    %c0_81 = arith.constant 0 : index
    %c5_82 = arith.constant 5 : index
    %c0_83 = arith.constant 0 : index
    %83 = vector.load %arg5[%c0_81, %c5_82, %c0_83] : memref<4x16x128xbf16, #tpu.memory_space<vmem>>, vector<1x6x128xbf16>
    %84 = vector.shape_cast %83 : vector<1x6x128xbf16> to vector<6x128xbf16>
    %c12 = arith.constant 12 : index
    %c0_84 = arith.constant 0 : index
    %c0_85 = arith.constant 0 : index
    %85 = vector.load %arg2[%c12, %c0_84, %c0_85] : memref<25x128x128xbf16, #tpu.memory_space<vmem>>, vector<1x128x128xbf16>
    %86 = vector.shape_cast %85 : vector<1x128x128xbf16> to vector<128x128xbf16>
    %cst_86 = arith.constant dense<0.000000e+00> : vector<6x128xf32>
    %87 = tpu.matmul %84, %86, %cst_86 {dimension_numbers = #tpu.dot_dimension_numbers<[1], [0], [0], [1], [0, 0, 1, 1], [], []>} : vector<6x128xbf16>, vector<128x128xbf16>, vector<6x128xf32> -> vector<6x128xf32>
    %88 = arith.addf %82, %87 : vector<6x128xf32>
    %c1_87 = arith.constant 1 : index
    %c5_88 = arith.constant 5 : index
    %c0_89 = arith.constant 0 : index
    %89 = vector.load %arg5[%c1_87, %c5_88, %c0_89] : memref<4x16x128xbf16, #tpu.memory_space<vmem>>, vector<1x6x128xbf16>
    %90 = vector.shape_cast %89 : vector<1x6x128xbf16> to vector<6x128xbf16>
    %c13 = arith.constant 13 : index
    %c0_90 = arith.constant 0 : index
    %c0_91 = arith.constant 0 : index
    %91 = vector.load %arg2[%c13, %c0_90, %c0_91] : memref<25x128x128xbf16, #tpu.memory_space<vmem>>, vector<1x128x128xbf16>
    %92 = vector.shape_cast %91 : vector<1x128x128xbf16> to vector<128x128xbf16>
    %cst_92 = arith.constant dense<0.000000e+00> : vector<6x128xf32>
    %93 = tpu.matmul %90, %92, %cst_92 {dimension_numbers = #tpu.dot_dimension_numbers<[1], [0], [0], [1], [0, 0, 1, 1], [], []>} : vector<6x128xbf16>, vector<128x128xbf16>, vector<6x128xf32> -> vector<6x128xf32>
    %94 = arith.addf %88, %93 : vector<6x128xf32>
    %c0_93 = arith.constant 0 : index
    %c6_94 = arith.constant 6 : index
    %c0_95 = arith.constant 0 : index
    %95 = vector.load %arg5[%c0_93, %c6_94, %c0_95] : memref<4x16x128xbf16, #tpu.memory_space<vmem>>, vector<1x6x128xbf16>
    %96 = vector.shape_cast %95 : vector<1x6x128xbf16> to vector<6x128xbf16>
    %c14 = arith.constant 14 : index
    %c0_96 = arith.constant 0 : index
    %c0_97 = arith.constant 0 : index
    %97 = vector.load %arg2[%c14, %c0_96, %c0_97] : memref<25x128x128xbf16, #tpu.memory_space<vmem>>, vector<1x128x128xbf16>
    %98 = vector.shape_cast %97 : vector<1x128x128xbf16> to vector<128x128xbf16>
    %cst_98 = arith.constant dense<0.000000e+00> : vector<6x128xf32>
    %99 = tpu.matmul %96, %98, %cst_98 {dimension_numbers = #tpu.dot_dimension_numbers<[1], [0], [0], [1], [0, 0, 1, 1], [], []>} : vector<6x128xbf16>, vector<128x128xbf16>, vector<6x128xf32> -> vector<6x128xf32>
    %100 = arith.addf %94, %99 : vector<6x128xf32>
    %c2_99 = arith.constant 2 : index
    %c4_100 = arith.constant 4 : index
    %c0_101 = arith.constant 0 : index
    %101 = vector.load %arg5[%c2_99, %c4_100, %c0_101] : memref<4x16x128xbf16, #tpu.memory_space<vmem>>, vector<1x6x128xbf16>
    %102 = vector.shape_cast %101 : vector<1x6x128xbf16> to vector<6x128xbf16>
    %c15 = arith.constant 15 : index
    %c0_102 = arith.constant 0 : index
    %c0_103 = arith.constant 0 : index
    %103 = vector.load %arg2[%c15, %c0_102, %c0_103] : memref<25x128x128xbf16, #tpu.memory_space<vmem>>, vector<1x128x128xbf16>
    %104 = vector.shape_cast %103 : vector<1x128x128xbf16> to vector<128x128xbf16>
    %cst_104 = arith.constant dense<0.000000e+00> : vector<6x128xf32>
    %105 = tpu.matmul %102, %104, %cst_104 {dimension_numbers = #tpu.dot_dimension_numbers<[1], [0], [0], [1], [0, 0, 1, 1], [], []>} : vector<6x128xbf16>, vector<128x128xbf16>, vector<6x128xf32> -> vector<6x128xf32>
    %106 = arith.addf %100, %105 : vector<6x128xf32>
    %c3_105 = arith.constant 3 : index
    %c4_106 = arith.constant 4 : index
    %c0_107 = arith.constant 0 : index
    %107 = vector.load %arg5[%c3_105, %c4_106, %c0_107] : memref<4x16x128xbf16, #tpu.memory_space<vmem>>, vector<1x6x128xbf16>
    %108 = vector.shape_cast %107 : vector<1x6x128xbf16> to vector<6x128xbf16>
    %c16 = arith.constant 16 : index
    %c0_108 = arith.constant 0 : index
    %c0_109 = arith.constant 0 : index
    %109 = vector.load %arg2[%c16, %c0_108, %c0_109] : memref<25x128x128xbf16, #tpu.memory_space<vmem>>, vector<1x128x128xbf16>
    %110 = vector.shape_cast %109 : vector<1x128x128xbf16> to vector<128x128xbf16>
    %cst_110 = arith.constant dense<0.000000e+00> : vector<6x128xf32>
    %111 = tpu.matmul %108, %110, %cst_110 {dimension_numbers = #tpu.dot_dimension_numbers<[1], [0], [0], [1], [0, 0, 1, 1], [], []>} : vector<6x128xbf16>, vector<128x128xbf16>, vector<6x128xf32> -> vector<6x128xf32>
    %112 = arith.addf %106, %111 : vector<6x128xf32>
    %c2_111 = arith.constant 2 : index
    %c5_112 = arith.constant 5 : index
    %c0_113 = arith.constant 0 : index
    %113 = vector.load %arg5[%c2_111, %c5_112, %c0_113] : memref<4x16x128xbf16, #tpu.memory_space<vmem>>, vector<1x6x128xbf16>
    %114 = vector.shape_cast %113 : vector<1x6x128xbf16> to vector<6x128xbf16>
    %c17 = arith.constant 17 : index
    %c0_114 = arith.constant 0 : index
    %c0_115 = arith.constant 0 : index
    %115 = vector.load %arg2[%c17, %c0_114, %c0_115] : memref<25x128x128xbf16, #tpu.memory_space<vmem>>, vector<1x128x128xbf16>
    %116 = vector.shape_cast %115 : vector<1x128x128xbf16> to vector<128x128xbf16>
    %cst_116 = arith.constant dense<0.000000e+00> : vector<6x128xf32>
    %117 = tpu.matmul %114, %116, %cst_116 {dimension_numbers = #tpu.dot_dimension_numbers<[1], [0], [0], [1], [0, 0, 1, 1], [], []>} : vector<6x128xbf16>, vector<128x128xbf16>, vector<6x128xf32> -> vector<6x128xf32>
    %118 = arith.addf %112, %117 : vector<6x128xf32>
    %c3_117 = arith.constant 3 : index
    %c5_118 = arith.constant 5 : index
    %c0_119 = arith.constant 0 : index
    %119 = vector.load %arg5[%c3_117, %c5_118, %c0_119] : memref<4x16x128xbf16, #tpu.memory_space<vmem>>, vector<1x6x128xbf16>
    %120 = vector.shape_cast %119 : vector<1x6x128xbf16> to vector<6x128xbf16>
    %c18 = arith.constant 18 : index
    %c0_120 = arith.constant 0 : index
    %c0_121 = arith.constant 0 : index
    %121 = vector.load %arg2[%c18, %c0_120, %c0_121] : memref<25x128x128xbf16, #tpu.memory_space<vmem>>, vector<1x128x128xbf16>
    %122 = vector.shape_cast %121 : vector<1x128x128xbf16> to vector<128x128xbf16>
    %cst_122 = arith.constant dense<0.000000e+00> : vector<6x128xf32>
    %123 = tpu.matmul %120, %122, %cst_122 {dimension_numbers = #tpu.dot_dimension_numbers<[1], [0], [0], [1], [0, 0, 1, 1], [], []>} : vector<6x128xbf16>, vector<128x128xbf16>, vector<6x128xf32> -> vector<6x128xf32>
    %124 = arith.addf %118, %123 : vector<6x128xf32>
    %c2_123 = arith.constant 2 : index
    %c6_124 = arith.constant 6 : index
    %c0_125 = arith.constant 0 : index
    %125 = vector.load %arg5[%c2_123, %c6_124, %c0_125] : memref<4x16x128xbf16, #tpu.memory_space<vmem>>, vector<1x6x128xbf16>
    %126 = vector.shape_cast %125 : vector<1x6x128xbf16> to vector<6x128xbf16>
    %c19 = arith.constant 19 : index
    %c0_126 = arith.constant 0 : index
    %c0_127 = arith.constant 0 : index
    %127 = vector.load %arg2[%c19, %c0_126, %c0_127] : memref<25x128x128xbf16, #tpu.memory_space<vmem>>, vector<1x128x128xbf16>
    %128 = vector.shape_cast %127 : vector<1x128x128xbf16> to vector<128x128xbf16>
    %cst_128 = arith.constant dense<0.000000e+00> : vector<6x128xf32>
    %129 = tpu.matmul %126, %128, %cst_128 {dimension_numbers = #tpu.dot_dimension_numbers<[1], [0], [0], [1], [0, 0, 1, 1], [], []>} : vector<6x128xbf16>, vector<128x128xbf16>, vector<6x128xf32> -> vector<6x128xf32>
    %130 = arith.addf %124, %129 : vector<6x128xf32>
    %c0_129 = arith.constant 0 : index
    %c8_130 = arith.constant 8 : index
    %c0_131 = arith.constant 0 : index
    %131 = vector.load %arg5[%c0_129, %c8_130, %c0_131] : memref<4x16x128xbf16, #tpu.memory_space<vmem>>, vector<1x6x128xbf16>
    %132 = vector.shape_cast %131 : vector<1x6x128xbf16> to vector<6x128xbf16>
    %c20 = arith.constant 20 : index
    %c0_132 = arith.constant 0 : index
    %c0_133 = arith.constant 0 : index
    %133 = vector.load %arg2[%c20, %c0_132, %c0_133] : memref<25x128x128xbf16, #tpu.memory_space<vmem>>, vector<1x128x128xbf16>
    %134 = vector.shape_cast %133 : vector<1x128x128xbf16> to vector<128x128xbf16>
    %cst_134 = arith.constant dense<0.000000e+00> : vector<6x128xf32>
    %135 = tpu.matmul %132, %134, %cst_134 {dimension_numbers = #tpu.dot_dimension_numbers<[1], [0], [0], [1], [0, 0, 1, 1], [], []>} : vector<6x128xbf16>, vector<128x128xbf16>, vector<6x128xf32> -> vector<6x128xf32>
    %136 = arith.addf %130, %135 : vector<6x128xf32>
    %c1_135 = arith.constant 1 : index
    %c8_136 = arith.constant 8 : index
    %c0_137 = arith.constant 0 : index
    %137 = vector.load %arg5[%c1_135, %c8_136, %c0_137] : memref<4x16x128xbf16, #tpu.memory_space<vmem>>, vector<1x6x128xbf16>
    %138 = vector.shape_cast %137 : vector<1x6x128xbf16> to vector<6x128xbf16>
    %c21 = arith.constant 21 : index
    %c0_138 = arith.constant 0 : index
    %c0_139 = arith.constant 0 : index
    %139 = vector.load %arg2[%c21, %c0_138, %c0_139] : memref<25x128x128xbf16, #tpu.memory_space<vmem>>, vector<1x128x128xbf16>
    %140 = vector.shape_cast %139 : vector<1x128x128xbf16> to vector<128x128xbf16>
    %cst_140 = arith.constant dense<0.000000e+00> : vector<6x128xf32>
    %141 = tpu.matmul %138, %140, %cst_140 {dimension_numbers = #tpu.dot_dimension_numbers<[1], [0], [0], [1], [0, 0, 1, 1], [], []>} : vector<6x128xbf16>, vector<128x128xbf16>, vector<6x128xf32> -> vector<6x128xf32>
    %142 = arith.addf %136, %141 : vector<6x128xf32>
    %c0_141 = arith.constant 0 : index
    %c9_142 = arith.constant 9 : index
    %c0_143 = arith.constant 0 : index
    %143 = vector.load %arg5[%c0_141, %c9_142, %c0_143] : memref<4x16x128xbf16, #tpu.memory_space<vmem>>, vector<1x6x128xbf16>
    %144 = vector.shape_cast %143 : vector<1x6x128xbf16> to vector<6x128xbf16>
    %c22 = arith.constant 22 : index
    %c0_144 = arith.constant 0 : index
    %c0_145 = arith.constant 0 : index
    %145 = vector.load %arg2[%c22, %c0_144, %c0_145] : memref<25x128x128xbf16, #tpu.memory_space<vmem>>, vector<1x128x128xbf16>
    %146 = vector.shape_cast %145 : vector<1x128x128xbf16> to vector<128x128xbf16>
    %cst_146 = arith.constant dense<0.000000e+00> : vector<6x128xf32>
    %147 = tpu.matmul %144, %146, %cst_146 {dimension_numbers = #tpu.dot_dimension_numbers<[1], [0], [0], [1], [0, 0, 1, 1], [], []>} : vector<6x128xbf16>, vector<128x128xbf16>, vector<6x128xf32> -> vector<6x128xf32>
    %148 = arith.addf %142, %147 : vector<6x128xf32>
    %c1_147 = arith.constant 1 : index
    %c9_148 = arith.constant 9 : index
    %c0_149 = arith.constant 0 : index
    %149 = vector.load %arg5[%c1_147, %c9_148, %c0_149] : memref<4x16x128xbf16, #tpu.memory_space<vmem>>, vector<1x6x128xbf16>
    %150 = vector.shape_cast %149 : vector<1x6x128xbf16> to vector<6x128xbf16>
    %c23 = arith.constant 23 : index
    %c0_150 = arith.constant 0 : index
    %c0_151 = arith.constant 0 : index
    %151 = vector.load %arg2[%c23, %c0_150, %c0_151] : memref<25x128x128xbf16, #tpu.memory_space<vmem>>, vector<1x128x128xbf16>
    %152 = vector.shape_cast %151 : vector<1x128x128xbf16> to vector<128x128xbf16>
    %cst_152 = arith.constant dense<0.000000e+00> : vector<6x128xf32>
    %153 = tpu.matmul %150, %152, %cst_152 {dimension_numbers = #tpu.dot_dimension_numbers<[1], [0], [0], [1], [0, 0, 1, 1], [], []>} : vector<6x128xbf16>, vector<128x128xbf16>, vector<6x128xf32> -> vector<6x128xf32>
    %154 = arith.addf %148, %153 : vector<6x128xf32>
    %c0_153 = arith.constant 0 : index
    %c10_154 = arith.constant 10 : index
    %c0_155 = arith.constant 0 : index
    %155 = vector.load %arg5[%c0_153, %c10_154, %c0_155] : memref<4x16x128xbf16, #tpu.memory_space<vmem>>, vector<1x6x128xbf16>
    %156 = vector.shape_cast %155 : vector<1x6x128xbf16> to vector<6x128xbf16>
    %c24 = arith.constant 24 : index
    %c0_156 = arith.constant 0 : index
    %c0_157 = arith.constant 0 : index
    %157 = vector.load %arg2[%c24, %c0_156, %c0_157] : memref<25x128x128xbf16, #tpu.memory_space<vmem>>, vector<1x128x128xbf16>
    %158 = vector.shape_cast %157 : vector<1x128x128xbf16> to vector<128x128xbf16>
    %cst_158 = arith.constant dense<0.000000e+00> : vector<6x128xf32>
    %159 = tpu.matmul %156, %158, %cst_158 {dimension_numbers = #tpu.dot_dimension_numbers<[1], [0], [0], [1], [0, 0, 1, 1], [], []>} : vector<6x128xbf16>, vector<128x128xbf16>, vector<6x128xf32> -> vector<6x128xf32>
    %160 = arith.addf %154, %159 : vector<6x128xf32>
    %c0_159 = arith.constant 0 : index
    %c0_160 = arith.constant 0 : index
    %161 = vector.load %arg3[%c0_159, %c0_160] : memref<1x128xf32, #tpu.memory_space<vmem>>, vector<1x128xf32>
    %162 = vector.broadcast %161 : vector<1x128xf32> to vector<6x128xf32>
    %163 = arith.addf %160, %162 : vector<6x128xf32>
    %164 = arith.truncf %163 : vector<6x128xf32> to vector<6x128xbf16>
    %c0_161 = arith.constant 0 : index
    %c0_162 = arith.constant 0 : index
    %c0_163 = arith.constant 0 : index
    %165 = vector.load %arg4[%c0_161, %c0_162, %c0_163] : memref<1x6x128xbf16, #tpu.memory_space<vmem>>, vector<1x6x128xbf16>
    %166 = vector.shape_cast %165 : vector<1x6x128xbf16> to vector<6x128xbf16>
    %167 = vector.shape_cast %164 : vector<6x128xbf16> to vector<1x6x128xbf16>
    tpu.vector_store %arg4[%c0_161, %c0_162, %c0_163], %167 {strides = array<i32>} : memref<1x6x128xbf16, #tpu.memory_space<vmem>>, vector<1x6x128xbf16>,
    return
  }
  func.func @transform_0(%arg0: i32) -> (i32, i32, i32, i32) {
    %c0_i32 = arith.constant 0 : i32
    %c0_i32_0 = arith.constant 0 : i32
    %c0_i32_1 = arith.constant 0 : i32
    %c0_i32_2 = arith.constant 0 : i32
    return %arg0, %c0_i32, %c0_i32_0, %c0_i32_1 : i32, i32, i32, i32
  }
  func.func @transform_1(%arg0: i32) -> (i32, i32, i32) {
    %c0_i32 = arith.constant 0 : i32
    %c0_i32_0 = arith.constant 0 : i32
    %c0_i32_1 = arith.constant 0 : i32
    %c0_i32_2 = arith.constant 0 : i32
    return %c0_i32, %c0_i32_0, %c0_i32_1 : i32, i32, i32
  }
  func.func @transform_2(%arg0: i32) -> (i32, i32) {
    %c0_i32 = arith.constant 0 : i32
    %c0_i32_0 = arith.constant 0 : i32
    %c0_i32_1 = arith.constant 0 : i32
    return %c0_i32, %c0_i32_0 : i32, i32
  }
  func.func @transform_3(%arg0: i32) -> (i32, i32, i32) {
    %c0_i32 = arith.constant 0 : i32
    %c0_i32_0 = arith.constant 0 : i32
    %c0_i32_1 = arith.constant 0 : i32
    return %arg0, %c0_i32, %c0_i32_0 : i32, i32, i32
  }
}

module attributes {stable_mosaic.version = 11 : i64} {
  func.func @_conv_head_kernel(%arg0: i32, %arg1: memref<1x1x36x128xbf16, #tpu.memory_space<vmem>>, %arg2: memref<25x128x256xbf16, #tpu.memory_space<vmem>>, %arg3: memref<1x256xf32, #tpu.memory_space<vmem>>, %arg4: memref<1x256xf32, #tpu.memory_space<vmem>>, %arg5: memref<1x1xf32, #tpu.memory_space<vmem>>, %arg6: memref<1x1x1xf32, #tpu.memory_space<vmem>>, %arg7: memref<1x36x128xbf16, #tpu.memory_space<vmem>>) attributes {dimension_semantics = [#tpu.dimension_semantics<parallel>], iteration_bounds = array<i64: 2>, scalar_prefetch = 0 : i64, scratch_operands = 1 : i64, tpu.core_type = #tpu.core_type<tc>, window_params = [{transform_indices = @transform_0, window_bounds = array<i64: 1, 1, 36, 128>}, {pipeline_mode = #tpu.pipeline_mode<synchronous>, transform_indices = @transform_1, window_bounds = array<i64: 25, 128, 256>}, {pipeline_mode = #tpu.pipeline_mode<synchronous>, transform_indices = @transform_2, window_bounds = array<i64: 1, 256>}, {pipeline_mode = #tpu.pipeline_mode<synchronous>, transform_indices = @transform_3, window_bounds = array<i64: 1, 256>}, {pipeline_mode = #tpu.pipeline_mode<synchronous>, transform_indices = @transform_4, window_bounds = array<i64: 1, 1>}, {transform_indices = @transform_5, window_bounds = array<i64: 1, 1, 1>}]} {
    %c0 = arith.constant 0 : index
    %c0_0 = arith.constant 0 : index
    %c0_1 = arith.constant 0 : index
    %c0_2 = arith.constant 0 : index
    %0 = vector.load %arg1[%c0, %c0_0, %c0_1, %c0_2] : memref<1x1x36x128xbf16, #tpu.memory_space<vmem>>, vector<1x1x36x128xbf16>
    %1 = vector.shape_cast %0 : vector<1x1x36x128xbf16> to vector<1x36x128xbf16>
    %2 = arith.extf %1 : vector<1x36x128xbf16> to vector<1x36x128xf32>
    %cst = arith.constant 0.000000e+00 : f32
    %3 = vector.broadcast %cst : f32 to vector<1x36x128xf32>
    %4 = arith.cmpf ogt, %2, %3 : vector<1x36x128xf32>
    %cst_3 = arith.constant 2.000000e-01 : f32
    %5 = vector.broadcast %cst_3 : f32 to vector<1x36x128xf32>
    %6 = arith.mulf %5, %2 : vector<1x36x128xf32>
    %7 = arith.select %4, %2, %6 : vector<1x36x128xi1>, vector<1x36x128xf32>
    %8 = arith.truncf %7 : vector<1x36x128xf32> to vector<1x36x128xbf16>
    %c0_4 = arith.constant 0 : index
    %c0_5 = arith.constant 0 : index
    %c0_6 = arith.constant 0 : index
    %9 = vector.load %arg7[%c0_4, %c0_5, %c0_6] : memref<1x36x128xbf16, #tpu.memory_space<vmem>>, vector<1x36x128xbf16>
    tpu.vector_store %arg7[%c0_4, %c0_5, %c0_6], %8 {strides = array<i32>} : memref<1x36x128xbf16, #tpu.memory_space<vmem>>, vector<1x36x128xbf16>,
    %cst_7 = arith.constant 0.000000e+00 : f32
    %10 = vector.broadcast %cst_7 : f32 to vector<8x256xf32>
    %c0_8 = arith.constant 0 : index
    %c0_9 = arith.constant 0 : index
    %c0_10 = arith.constant 0 : index
    %11 = vector.load %arg7[%c0_8, %c0_9, %c0_10] : memref<1x36x128xbf16, #tpu.memory_space<vmem>>, vector<1x8x128xbf16>
    %12 = vector.shape_cast %11 : vector<1x8x128xbf16> to vector<8x128xbf16>
    %c0_11 = arith.constant 0 : index
    %c0_12 = arith.constant 0 : index
    %c0_13 = arith.constant 0 : index
    %13 = vector.load %arg2[%c0_11, %c0_12, %c0_13] : memref<25x128x256xbf16, #tpu.memory_space<vmem>>, vector<1x128x256xbf16>
    %14 = vector.shape_cast %13 : vector<1x128x256xbf16> to vector<128x256xbf16>
    %cst_14 = arith.constant dense<0.000000e+00> : vector<8x256xf32>
    %15 = tpu.matmul %12, %14, %cst_14 {dimension_numbers = #tpu.dot_dimension_numbers<[1], [0], [0], [1], [0, 0, 1, 1], [], []>} : vector<8x128xbf16>, vector<128x256xbf16>, vector<8x256xf32> -> vector<8x256xf32>
    %16 = arith.addf %10, %15 : vector<8x256xf32>
    %c0_15 = arith.constant 0 : index
    %c1 = arith.constant 1 : index
    %c0_16 = arith.constant 0 : index
    %17 = vector.load %arg7[%c0_15, %c1, %c0_16] : memref<1x36x128xbf16, #tpu.memory_space<vmem>>, vector<1x8x128xbf16>
    %18 = vector.shape_cast %17 : vector<1x8x128xbf16> to vector<8x128xbf16>
    %c1_17 = arith.constant 1 : index
    %c0_18 = arith.constant 0 : index
    %c0_19 = arith.constant 0 : index
    %19 = vector.load %arg2[%c1_17, %c0_18, %c0_19] : memref<25x128x256xbf16, #tpu.memory_space<vmem>>, vector<1x128x256xbf16>
    %20 = vector.shape_cast %19 : vector<1x128x256xbf16> to vector<128x256xbf16>
    %cst_20 = arith.constant dense<0.000000e+00> : vector<8x256xf32>
    %21 = tpu.matmul %18, %20, %cst_20 {dimension_numbers = #tpu.dot_dimension_numbers<[1], [0], [0], [1], [0, 0, 1, 1], [], []>} : vector<8x128xbf16>, vector<128x256xbf16>, vector<8x256xf32> -> vector<8x256xf32>
    %22 = arith.addf %16, %21 : vector<8x256xf32>
    %c0_21 = arith.constant 0 : index
    %c2 = arith.constant 2 : index
    %c0_22 = arith.constant 0 : index
    %23 = vector.load %arg7[%c0_21, %c2, %c0_22] : memref<1x36x128xbf16, #tpu.memory_space<vmem>>, vector<1x8x128xbf16>
    %24 = vector.shape_cast %23 : vector<1x8x128xbf16> to vector<8x128xbf16>
    %c2_23 = arith.constant 2 : index
    %c0_24 = arith.constant 0 : index
    %c0_25 = arith.constant 0 : index
    %25 = vector.load %arg2[%c2_23, %c0_24, %c0_25] : memref<25x128x256xbf16, #tpu.memory_space<vmem>>, vector<1x128x256xbf16>
    %26 = vector.shape_cast %25 : vector<1x128x256xbf16> to vector<128x256xbf16>
    %cst_26 = arith.constant dense<0.000000e+00> : vector<8x256xf32>
    %27 = tpu.matmul %24, %26, %cst_26 {dimension_numbers = #tpu.dot_dimension_numbers<[1], [0], [0], [1], [0, 0, 1, 1], [], []>} : vector<8x128xbf16>, vector<128x256xbf16>, vector<8x256xf32> -> vector<8x256xf32>
    %28 = arith.addf %22, %27 : vector<8x256xf32>
    %c0_27 = arith.constant 0 : index
    %c3 = arith.constant 3 : index
    %c0_28 = arith.constant 0 : index
    %29 = vector.load %arg7[%c0_27, %c3, %c0_28] : memref<1x36x128xbf16, #tpu.memory_space<vmem>>, vector<1x8x128xbf16>
    %30 = vector.shape_cast %29 : vector<1x8x128xbf16> to vector<8x128xbf16>
    %c3_29 = arith.constant 3 : index
    %c0_30 = arith.constant 0 : index
    %c0_31 = arith.constant 0 : index
    %31 = vector.load %arg2[%c3_29, %c0_30, %c0_31] : memref<25x128x256xbf16, #tpu.memory_space<vmem>>, vector<1x128x256xbf16>
    %32 = vector.shape_cast %31 : vector<1x128x256xbf16> to vector<128x256xbf16>
    %cst_32 = arith.constant dense<0.000000e+00> : vector<8x256xf32>
    %33 = tpu.matmul %30, %32, %cst_32 {dimension_numbers = #tpu.dot_dimension_numbers<[1], [0], [0], [1], [0, 0, 1, 1], [], []>} : vector<8x128xbf16>, vector<128x256xbf16>, vector<8x256xf32> -> vector<8x256xf32>
    %34 = arith.addf %28, %33 : vector<8x256xf32>
    %c0_33 = arith.constant 0 : index
    %c4 = arith.constant 4 : index
    %c0_34 = arith.constant 0 : index
    %35 = vector.load %arg7[%c0_33, %c4, %c0_34] : memref<1x36x128xbf16, #tpu.memory_space<vmem>>, vector<1x8x128xbf16>
    %36 = vector.shape_cast %35 : vector<1x8x128xbf16> to vector<8x128xbf16>
    %c4_35 = arith.constant 4 : index
    %c0_36 = arith.constant 0 : index
    %c0_37 = arith.constant 0 : index
    %37 = vector.load %arg2[%c4_35, %c0_36, %c0_37] : memref<25x128x256xbf16, #tpu.memory_space<vmem>>, vector<1x128x256xbf16>
    %38 = vector.shape_cast %37 : vector<1x128x256xbf16> to vector<128x256xbf16>
    %cst_38 = arith.constant dense<0.000000e+00> : vector<8x256xf32>
    %39 = tpu.matmul %36, %38, %cst_38 {dimension_numbers = #tpu.dot_dimension_numbers<[1], [0], [0], [1], [0, 0, 1, 1], [], []>} : vector<8x128xbf16>, vector<128x256xbf16>, vector<8x256xf32> -> vector<8x256xf32>
    %40 = arith.addf %34, %39 : vector<8x256xf32>
    %c0_39 = arith.constant 0 : index
    %c6 = arith.constant 6 : index
    %c0_40 = arith.constant 0 : index
    %41 = vector.load %arg7[%c0_39, %c6, %c0_40] : memref<1x36x128xbf16, #tpu.memory_space<vmem>>, vector<1x8x128xbf16>
    %42 = vector.shape_cast %41 : vector<1x8x128xbf16> to vector<8x128xbf16>
    %c5 = arith.constant 5 : index
    %c0_41 = arith.constant 0 : index
    %c0_42 = arith.constant 0 : index
    %43 = vector.load %arg2[%c5, %c0_41, %c0_42] : memref<25x128x256xbf16, #tpu.memory_space<vmem>>, vector<1x128x256xbf16>
    %44 = vector.shape_cast %43 : vector<1x128x256xbf16> to vector<128x256xbf16>
    %cst_43 = arith.constant dense<0.000000e+00> : vector<8x256xf32>
    %45 = tpu.matmul %42, %44, %cst_43 {dimension_numbers = #tpu.dot_dimension_numbers<[1], [0], [0], [1], [0, 0, 1, 1], [], []>} : vector<8x128xbf16>, vector<128x256xbf16>, vector<8x256xf32> -> vector<8x256xf32>
    %46 = arith.addf %40, %45 : vector<8x256xf32>
    %c0_44 = arith.constant 0 : index
    %c7 = arith.constant 7 : index
    %c0_45 = arith.constant 0 : index
    %47 = vector.load %arg7[%c0_44, %c7, %c0_45] : memref<1x36x128xbf16, #tpu.memory_space<vmem>>, vector<1x8x128xbf16>
    %48 = vector.shape_cast %47 : vector<1x8x128xbf16> to vector<8x128xbf16>
    %c6_46 = arith.constant 6 : index
    %c0_47 = arith.constant 0 : index
    %c0_48 = arith.constant 0 : index
    %49 = vector.load %arg2[%c6_46, %c0_47, %c0_48] : memref<25x128x256xbf16, #tpu.memory_space<vmem>>, vector<1x128x256xbf16>
    %50 = vector.shape_cast %49 : vector<1x128x256xbf16> to vector<128x256xbf16>
    %cst_49 = arith.constant dense<0.000000e+00> : vector<8x256xf32>
    %51 = tpu.matmul %48, %50, %cst_49 {dimension_numbers = #tpu.dot_dimension_numbers<[1], [0], [0], [1], [0, 0, 1, 1], [], []>} : vector<8x128xbf16>, vector<128x256xbf16>, vector<8x256xf32> -> vector<8x256xf32>
    %52 = arith.addf %46, %51 : vector<8x256xf32>
    %c0_50 = arith.constant 0 : index
    %c8 = arith.constant 8 : index
    %c0_51 = arith.constant 0 : index
    %53 = vector.load %arg7[%c0_50, %c8, %c0_51] : memref<1x36x128xbf16, #tpu.memory_space<vmem>>, vector<1x8x128xbf16>
    %54 = vector.shape_cast %53 : vector<1x8x128xbf16> to vector<8x128xbf16>
    %c7_52 = arith.constant 7 : index
    %c0_53 = arith.constant 0 : index
    %c0_54 = arith.constant 0 : index
    %55 = vector.load %arg2[%c7_52, %c0_53, %c0_54] : memref<25x128x256xbf16, #tpu.memory_space<vmem>>, vector<1x128x256xbf16>
    %56 = vector.shape_cast %55 : vector<1x128x256xbf16> to vector<128x256xbf16>
    %cst_55 = arith.constant dense<0.000000e+00> : vector<8x256xf32>
    %57 = tpu.matmul %54, %56, %cst_55 {dimension_numbers = #tpu.dot_dimension_numbers<[1], [0], [0], [1], [0, 0, 1, 1], [], []>} : vector<8x128xbf16>, vector<128x256xbf16>, vector<8x256xf32> -> vector<8x256xf32>
    %58 = arith.addf %52, %57 : vector<8x256xf32>
    %c0_56 = arith.constant 0 : index
    %c9 = arith.constant 9 : index
    %c0_57 = arith.constant 0 : index
    %59 = vector.load %arg7[%c0_56, %c9, %c0_57] : memref<1x36x128xbf16, #tpu.memory_space<vmem>>, vector<1x8x128xbf16>
    %60 = vector.shape_cast %59 : vector<1x8x128xbf16> to vector<8x128xbf16>
    %c8_58 = arith.constant 8 : index
    %c0_59 = arith.constant 0 : index
    %c0_60 = arith.constant 0 : index
    %61 = vector.load %arg2[%c8_58, %c0_59, %c0_60] : memref<25x128x256xbf16, #tpu.memory_space<vmem>>, vector<1x128x256xbf16>
    %62 = vector.shape_cast %61 : vector<1x128x256xbf16> to vector<128x256xbf16>
    %cst_61 = arith.constant dense<0.000000e+00> : vector<8x256xf32>
    %63 = tpu.matmul %60, %62, %cst_61 {dimension_numbers = #tpu.dot_dimension_numbers<[1], [0], [0], [1], [0, 0, 1, 1], [], []>} : vector<8x128xbf16>, vector<128x256xbf16>, vector<8x256xf32> -> vector<8x256xf32>
    %64 = arith.addf %58, %63 : vector<8x256xf32>
    %c0_62 = arith.constant 0 : index
    %c10 = arith.constant 10 : index
    %c0_63 = arith.constant 0 : index
    %65 = vector.load %arg7[%c0_62, %c10, %c0_63] : memref<1x36x128xbf16, #tpu.memory_space<vmem>>, vector<1x8x128xbf16>
    %66 = vector.shape_cast %65 : vector<1x8x128xbf16> to vector<8x128xbf16>
    %c9_64 = arith.constant 9 : index
    %c0_65 = arith.constant 0 : index
    %c0_66 = arith.constant 0 : index
    %67 = vector.load %arg2[%c9_64, %c0_65, %c0_66] : memref<25x128x256xbf16, #tpu.memory_space<vmem>>, vector<1x128x256xbf16>
    %68 = vector.shape_cast %67 : vector<1x128x256xbf16> to vector<128x256xbf16>
    %cst_67 = arith.constant dense<0.000000e+00> : vector<8x256xf32>
    %69 = tpu.matmul %66, %68, %cst_67 {dimension_numbers = #tpu.dot_dimension_numbers<[1], [0], [0], [1], [0, 0, 1, 1], [], []>} : vector<8x128xbf16>, vector<128x256xbf16>, vector<8x256xf32> -> vector<8x256xf32>
    %70 = arith.addf %64, %69 : vector<8x256xf32>
    %c0_68 = arith.constant 0 : index
    %c12 = arith.constant 12 : index
    %c0_69 = arith.constant 0 : index
    %71 = vector.load %arg7[%c0_68, %c12, %c0_69] : memref<1x36x128xbf16, #tpu.memory_space<vmem>>, vector<1x8x128xbf16>
    %72 = vector.shape_cast %71 : vector<1x8x128xbf16> to vector<8x128xbf16>
    %c10_70 = arith.constant 10 : index
    %c0_71 = arith.constant 0 : index
    %c0_72 = arith.constant 0 : index
    %73 = vector.load %arg2[%c10_70, %c0_71, %c0_72] : memref<25x128x256xbf16, #tpu.memory_space<vmem>>, vector<1x128x256xbf16>
    %74 = vector.shape_cast %73 : vector<1x128x256xbf16> to vector<128x256xbf16>
    %cst_73 = arith.constant dense<0.000000e+00> : vector<8x256xf32>
    %75 = tpu.matmul %72, %74, %cst_73 {dimension_numbers = #tpu.dot_dimension_numbers<[1], [0], [0], [1], [0, 0, 1, 1], [], []>} : vector<8x128xbf16>, vector<128x256xbf16>, vector<8x256xf32> -> vector<8x256xf32>
    %76 = arith.addf %70, %75 : vector<8x256xf32>
    %c0_74 = arith.constant 0 : index
    %c13 = arith.constant 13 : index
    %c0_75 = arith.constant 0 : index
    %77 = vector.load %arg7[%c0_74, %c13, %c0_75] : memref<1x36x128xbf16, #tpu.memory_space<vmem>>, vector<1x8x128xbf16>
    %78 = vector.shape_cast %77 : vector<1x8x128xbf16> to vector<8x128xbf16>
    %c11 = arith.constant 11 : index
    %c0_76 = arith.constant 0 : index
    %c0_77 = arith.constant 0 : index
    %79 = vector.load %arg2[%c11, %c0_76, %c0_77] : memref<25x128x256xbf16, #tpu.memory_space<vmem>>, vector<1x128x256xbf16>
    %80 = vector.shape_cast %79 : vector<1x128x256xbf16> to vector<128x256xbf16>
    %cst_78 = arith.constant dense<0.000000e+00> : vector<8x256xf32>
    %81 = tpu.matmul %78, %80, %cst_78 {dimension_numbers = #tpu.dot_dimension_numbers<[1], [0], [0], [1], [0, 0, 1, 1], [], []>} : vector<8x128xbf16>, vector<128x256xbf16>, vector<8x256xf32> -> vector<8x256xf32>
    %82 = arith.addf %76, %81 : vector<8x256xf32>
    %c0_79 = arith.constant 0 : index
    %c14 = arith.constant 14 : index
    %c0_80 = arith.constant 0 : index
    %83 = vector.load %arg7[%c0_79, %c14, %c0_80] : memref<1x36x128xbf16, #tpu.memory_space<vmem>>, vector<1x8x128xbf16>
    %84 = vector.shape_cast %83 : vector<1x8x128xbf16> to vector<8x128xbf16>
    %c12_81 = arith.constant 12 : index
    %c0_82 = arith.constant 0 : index
    %c0_83 = arith.constant 0 : index
    %85 = vector.load %arg2[%c12_81, %c0_82, %c0_83] : memref<25x128x256xbf16, #tpu.memory_space<vmem>>, vector<1x128x256xbf16>
    %86 = vector.shape_cast %85 : vector<1x128x256xbf16> to vector<128x256xbf16>
    %cst_84 = arith.constant dense<0.000000e+00> : vector<8x256xf32>
    %87 = tpu.matmul %84, %86, %cst_84 {dimension_numbers = #tpu.dot_dimension_numbers<[1], [0], [0], [1], [0, 0, 1, 1], [], []>} : vector<8x128xbf16>, vector<128x256xbf16>, vector<8x256xf32> -> vector<8x256xf32>
    %88 = arith.addf %82, %87 : vector<8x256xf32>
    %c0_85 = arith.constant 0 : index
    %c15 = arith.constant 15 : index
    %c0_86 = arith.constant 0 : index
    %89 = vector.load %arg7[%c0_85, %c15, %c0_86] : memref<1x36x128xbf16, #tpu.memory_space<vmem>>, vector<1x8x128xbf16>
    %90 = vector.shape_cast %89 : vector<1x8x128xbf16> to vector<8x128xbf16>
    %c13_87 = arith.constant 13 : index
    %c0_88 = arith.constant 0 : index
    %c0_89 = arith.constant 0 : index
    %91 = vector.load %arg2[%c13_87, %c0_88, %c0_89] : memref<25x128x256xbf16, #tpu.memory_space<vmem>>, vector<1x128x256xbf16>
    %92 = vector.shape_cast %91 : vector<1x128x256xbf16> to vector<128x256xbf16>
    %cst_90 = arith.constant dense<0.000000e+00> : vector<8x256xf32>
    %93 = tpu.matmul %90, %92, %cst_90 {dimension_numbers = #tpu.dot_dimension_numbers<[1], [0], [0], [1], [0, 0, 1, 1], [], []>} : vector<8x128xbf16>, vector<128x256xbf16>, vector<8x256xf32> -> vector<8x256xf32>
    %94 = arith.addf %88, %93 : vector<8x256xf32>
    %c0_91 = arith.constant 0 : index
    %c16 = arith.constant 16 : index
    %c0_92 = arith.constant 0 : index
    %95 = vector.load %arg7[%c0_91, %c16, %c0_92] : memref<1x36x128xbf16, #tpu.memory_space<vmem>>, vector<1x8x128xbf16>
    %96 = vector.shape_cast %95 : vector<1x8x128xbf16> to vector<8x128xbf16>
    %c14_93 = arith.constant 14 : index
    %c0_94 = arith.constant 0 : index
    %c0_95 = arith.constant 0 : index
    %97 = vector.load %arg2[%c14_93, %c0_94, %c0_95] : memref<25x128x256xbf16, #tpu.memory_space<vmem>>, vector<1x128x256xbf16>
    %98 = vector.shape_cast %97 : vector<1x128x256xbf16> to vector<128x256xbf16>
    %cst_96 = arith.constant dense<0.000000e+00> : vector<8x256xf32>
    %99 = tpu.matmul %96, %98, %cst_96 {dimension_numbers = #tpu.dot_dimension_numbers<[1], [0], [0], [1], [0, 0, 1, 1], [], []>} : vector<8x128xbf16>, vector<128x256xbf16>, vector<8x256xf32> -> vector<8x256xf32>
    %100 = arith.addf %94, %99 : vector<8x256xf32>
    %c0_97 = arith.constant 0 : index
    %c18 = arith.constant 18 : index
    %c0_98 = arith.constant 0 : index
    %101 = vector.load %arg7[%c0_97, %c18, %c0_98] : memref<1x36x128xbf16, #tpu.memory_space<vmem>>, vector<1x8x128xbf16>
    %102 = vector.shape_cast %101 : vector<1x8x128xbf16> to vector<8x128xbf16>
    %c15_99 = arith.constant 15 : index
    %c0_100 = arith.constant 0 : index
    %c0_101 = arith.constant 0 : index
    %103 = vector.load %arg2[%c15_99, %c0_100, %c0_101] : memref<25x128x256xbf16, #tpu.memory_space<vmem>>, vector<1x128x256xbf16>
    %104 = vector.shape_cast %103 : vector<1x128x256xbf16> to vector<128x256xbf16>
    %cst_102 = arith.constant dense<0.000000e+00> : vector<8x256xf32>
    %105 = tpu.matmul %102, %104, %cst_102 {dimension_numbers = #tpu.dot_dimension_numbers<[1], [0], [0], [1], [0, 0, 1, 1], [], []>} : vector<8x128xbf16>, vector<128x256xbf16>, vector<8x256xf32> -> vector<8x256xf32>
    %106 = arith.addf %100, %105 : vector<8x256xf32>
    %c0_103 = arith.constant 0 : index
    %c19 = arith.constant 19 : index
    %c0_104 = arith.constant 0 : index
    %107 = vector.load %arg7[%c0_103, %c19, %c0_104] : memref<1x36x128xbf16, #tpu.memory_space<vmem>>, vector<1x8x128xbf16>
    %108 = vector.shape_cast %107 : vector<1x8x128xbf16> to vector<8x128xbf16>
    %c16_105 = arith.constant 16 : index
    %c0_106 = arith.constant 0 : index
    %c0_107 = arith.constant 0 : index
    %109 = vector.load %arg2[%c16_105, %c0_106, %c0_107] : memref<25x128x256xbf16, #tpu.memory_space<vmem>>, vector<1x128x256xbf16>
    %110 = vector.shape_cast %109 : vector<1x128x256xbf16> to vector<128x256xbf16>
    %cst_108 = arith.constant dense<0.000000e+00> : vector<8x256xf32>
    %111 = tpu.matmul %108, %110, %cst_108 {dimension_numbers = #tpu.dot_dimension_numbers<[1], [0], [0], [1], [0, 0, 1, 1], [], []>} : vector<8x128xbf16>, vector<128x256xbf16>, vector<8x256xf32> -> vector<8x256xf32>
    %112 = arith.addf %106, %111 : vector<8x256xf32>
    %c0_109 = arith.constant 0 : index
    %c20 = arith.constant 20 : index
    %c0_110 = arith.constant 0 : index
    %113 = vector.load %arg7[%c0_109, %c20, %c0_110] : memref<1x36x128xbf16, #tpu.memory_space<vmem>>, vector<1x8x128xbf16>
    %114 = vector.shape_cast %113 : vector<1x8x128xbf16> to vector<8x128xbf16>
    %c17 = arith.constant 17 : index
    %c0_111 = arith.constant 0 : index
    %c0_112 = arith.constant 0 : index
    %115 = vector.load %arg2[%c17, %c0_111, %c0_112] : memref<25x128x256xbf16, #tpu.memory_space<vmem>>, vector<1x128x256xbf16>
    %116 = vector.shape_cast %115 : vector<1x128x256xbf16> to vector<128x256xbf16>
    %cst_113 = arith.constant dense<0.000000e+00> : vector<8x256xf32>
    %117 = tpu.matmul %114, %116, %cst_113 {dimension_numbers = #tpu.dot_dimension_numbers<[1], [0], [0], [1], [0, 0, 1, 1], [], []>} : vector<8x128xbf16>, vector<128x256xbf16>, vector<8x256xf32> -> vector<8x256xf32>
    %118 = arith.addf %112, %117 : vector<8x256xf32>
    %c0_114 = arith.constant 0 : index
    %c21 = arith.constant 21 : index
    %c0_115 = arith.constant 0 : index
    %119 = vector.load %arg7[%c0_114, %c21, %c0_115] : memref<1x36x128xbf16, #tpu.memory_space<vmem>>, vector<1x8x128xbf16>
    %120 = vector.shape_cast %119 : vector<1x8x128xbf16> to vector<8x128xbf16>
    %c18_116 = arith.constant 18 : index
    %c0_117 = arith.constant 0 : index
    %c0_118 = arith.constant 0 : index
    %121 = vector.load %arg2[%c18_116, %c0_117, %c0_118] : memref<25x128x256xbf16, #tpu.memory_space<vmem>>, vector<1x128x256xbf16>
    %122 = vector.shape_cast %121 : vector<1x128x256xbf16> to vector<128x256xbf16>
    %cst_119 = arith.constant dense<0.000000e+00> : vector<8x256xf32>
    %123 = tpu.matmul %120, %122, %cst_119 {dimension_numbers = #tpu.dot_dimension_numbers<[1], [0], [0], [1], [0, 0, 1, 1], [], []>} : vector<8x128xbf16>, vector<128x256xbf16>, vector<8x256xf32> -> vector<8x256xf32>
    %124 = arith.addf %118, %123 : vector<8x256xf32>
    %c0_120 = arith.constant 0 : index
    %c22 = arith.constant 22 : index
    %c0_121 = arith.constant 0 : index
    %125 = vector.load %arg7[%c0_120, %c22, %c0_121] : memref<1x36x128xbf16, #tpu.memory_space<vmem>>, vector<1x8x128xbf16>
    %126 = vector.shape_cast %125 : vector<1x8x128xbf16> to vector<8x128xbf16>
    %c19_122 = arith.constant 19 : index
    %c0_123 = arith.constant 0 : index
    %c0_124 = arith.constant 0 : index
    %127 = vector.load %arg2[%c19_122, %c0_123, %c0_124] : memref<25x128x256xbf16, #tpu.memory_space<vmem>>, vector<1x128x256xbf16>
    %128 = vector.shape_cast %127 : vector<1x128x256xbf16> to vector<128x256xbf16>
    %cst_125 = arith.constant dense<0.000000e+00> : vector<8x256xf32>
    %129 = tpu.matmul %126, %128, %cst_125 {dimension_numbers = #tpu.dot_dimension_numbers<[1], [0], [0], [1], [0, 0, 1, 1], [], []>} : vector<8x128xbf16>, vector<128x256xbf16>, vector<8x256xf32> -> vector<8x256xf32>
    %130 = arith.addf %124, %129 : vector<8x256xf32>
    %c0_126 = arith.constant 0 : index
    %c24 = arith.constant 24 : index
    %c0_127 = arith.constant 0 : index
    %131 = vector.load %arg7[%c0_126, %c24, %c0_127] : memref<1x36x128xbf16, #tpu.memory_space<vmem>>, vector<1x8x128xbf16>
    %132 = vector.shape_cast %131 : vector<1x8x128xbf16> to vector<8x128xbf16>
    %c20_128 = arith.constant 20 : index
    %c0_129 = arith.constant 0 : index
    %c0_130 = arith.constant 0 : index
    %133 = vector.load %arg2[%c20_128, %c0_129, %c0_130] : memref<25x128x256xbf16, #tpu.memory_space<vmem>>, vector<1x128x256xbf16>
    %134 = vector.shape_cast %133 : vector<1x128x256xbf16> to vector<128x256xbf16>
    %cst_131 = arith.constant dense<0.000000e+00> : vector<8x256xf32>
    %135 = tpu.matmul %132, %134, %cst_131 {dimension_numbers = #tpu.dot_dimension_numbers<[1], [0], [0], [1], [0, 0, 1, 1], [], []>} : vector<8x128xbf16>, vector<128x256xbf16>, vector<8x256xf32> -> vector<8x256xf32>
    %136 = arith.addf %130, %135 : vector<8x256xf32>
    %c0_132 = arith.constant 0 : index
    %c25 = arith.constant 25 : index
    %c0_133 = arith.constant 0 : index
    %137 = vector.load %arg7[%c0_132, %c25, %c0_133] : memref<1x36x128xbf16, #tpu.memory_space<vmem>>, vector<1x8x128xbf16>
    %138 = vector.shape_cast %137 : vector<1x8x128xbf16> to vector<8x128xbf16>
    %c21_134 = arith.constant 21 : index
    %c0_135 = arith.constant 0 : index
    %c0_136 = arith.constant 0 : index
    %139 = vector.load %arg2[%c21_134, %c0_135, %c0_136] : memref<25x128x256xbf16, #tpu.memory_space<vmem>>, vector<1x128x256xbf16>
    %140 = vector.shape_cast %139 : vector<1x128x256xbf16> to vector<128x256xbf16>
    %cst_137 = arith.constant dense<0.000000e+00> : vector<8x256xf32>
    %141 = tpu.matmul %138, %140, %cst_137 {dimension_numbers = #tpu.dot_dimension_numbers<[1], [0], [0], [1], [0, 0, 1, 1], [], []>} : vector<8x128xbf16>, vector<128x256xbf16>, vector<8x256xf32> -> vector<8x256xf32>
    %142 = arith.addf %136, %141 : vector<8x256xf32>
    %c0_138 = arith.constant 0 : index
    %c26 = arith.constant 26 : index
    %c0_139 = arith.constant 0 : index
    %143 = vector.load %arg7[%c0_138, %c26, %c0_139] : memref<1x36x128xbf16, #tpu.memory_space<vmem>>, vector<1x8x128xbf16>
    %144 = vector.shape_cast %143 : vector<1x8x128xbf16> to vector<8x128xbf16>
    %c22_140 = arith.constant 22 : index
    %c0_141 = arith.constant 0 : index
    %c0_142 = arith.constant 0 : index
    %145 = vector.load %arg2[%c22_140, %c0_141, %c0_142] : memref<25x128x256xbf16, #tpu.memory_space<vmem>>, vector<1x128x256xbf16>
    %146 = vector.shape_cast %145 : vector<1x128x256xbf16> to vector<128x256xbf16>
    %cst_143 = arith.constant dense<0.000000e+00> : vector<8x256xf32>
    %147 = tpu.matmul %144, %146, %cst_143 {dimension_numbers = #tpu.dot_dimension_numbers<[1], [0], [0], [1], [0, 0, 1, 1], [], []>} : vector<8x128xbf16>, vector<128x256xbf16>, vector<8x256xf32> -> vector<8x256xf32>
    %148 = arith.addf %142, %147 : vector<8x256xf32>
    %c0_144 = arith.constant 0 : index
    %c27 = arith.constant 27 : index
    %c0_145 = arith.constant 0 : index
    %149 = vector.load %arg7[%c0_144, %c27, %c0_145] : memref<1x36x128xbf16, #tpu.memory_space<vmem>>, vector<1x8x128xbf16>
    %150 = vector.shape_cast %149 : vector<1x8x128xbf16> to vector<8x128xbf16>
    %c23 = arith.constant 23 : index
    %c0_146 = arith.constant 0 : index
    %c0_147 = arith.constant 0 : index
    %151 = vector.load %arg2[%c23, %c0_146, %c0_147] : memref<25x128x256xbf16, #tpu.memory_space<vmem>>, vector<1x128x256xbf16>
    %152 = vector.shape_cast %151 : vector<1x128x256xbf16> to vector<128x256xbf16>
    %cst_148 = arith.constant dense<0.000000e+00> : vector<8x256xf32>
    %153 = tpu.matmul %150, %152, %cst_148 {dimension_numbers = #tpu.dot_dimension_numbers<[1], [0], [0], [1], [0, 0, 1, 1], [], []>} : vector<8x128xbf16>, vector<128x256xbf16>, vector<8x256xf32> -> vector<8x256xf32>
    %154 = arith.addf %148, %153 : vector<8x256xf32>
    %c0_149 = arith.constant 0 : index
    %c28 = arith.constant 28 : index
    %c0_150 = arith.constant 0 : index
    %155 = vector.load %arg7[%c0_149, %c28, %c0_150] : memref<1x36x128xbf16, #tpu.memory_space<vmem>>, vector<1x8x128xbf16>
    %156 = vector.shape_cast %155 : vector<1x8x128xbf16> to vector<8x128xbf16>
    %c24_151 = arith.constant 24 : index
    %c0_152 = arith.constant 0 : index
    %c0_153 = arith.constant 0 : index
    %157 = vector.load %arg2[%c24_151, %c0_152, %c0_153] : memref<25x128x256xbf16, #tpu.memory_space<vmem>>, vector<1x128x256xbf16>
    %158 = vector.shape_cast %157 : vector<1x128x256xbf16> to vector<128x256xbf16>
    %cst_154 = arith.constant dense<0.000000e+00> : vector<8x256xf32>
    %159 = tpu.matmul %156, %158, %cst_154 {dimension_numbers = #tpu.dot_dimension_numbers<[1], [0], [0], [1], [0, 0, 1, 1], [], []>} : vector<8x128xbf16>, vector<128x256xbf16>, vector<8x256xf32> -> vector<8x256xf32>
    %160 = arith.addf %154, %159 : vector<8x256xf32>
    %c0_155 = arith.constant 0 : index
    %c0_156 = arith.constant 0 : index
    %161 = vector.load %arg3[%c0_155, %c0_156] : memref<1x256xf32, #tpu.memory_space<vmem>>, vector<1x256xf32>
    %162 = vector.broadcast %161 : vector<1x256xf32> to vector<8x256xf32>
    %163 = arith.addf %160, %162 : vector<8x256xf32>
    %164 = tpu.iota {dimensions = array<i32: 0>} : vector<8x1xi32>
    %c6_i32 = arith.constant 6 : i32
    %c0_i32 = arith.constant 0 : i32
    %165 = arith.cmpi eq, %c6_i32, %c0_i32 : i32
    %c1_i32 = arith.constant 1 : i32
    %166 = arith.select %165, %c1_i32, %c6_i32 : i32
    %167 = vector.broadcast %166 : i32 to vector<8x1xi32>
    %168 = arith.remsi %164, %167 : vector<8x1xi32>
    %c0_i32_157 = arith.constant 0 : i32
    %169 = vector.broadcast %c0_i32_157 : i32 to vector<8x1xi32>
    %170 = arith.cmpi ne, %168, %169 : vector<8x1xi32>
    %c0_i32_158 = arith.constant 0 : i32
    %171 = vector.broadcast %c0_i32_158 : i32 to vector<8x1xi32>
    %172 = arith.cmpi slt, %168, %171 : vector<8x1xi32>
    %c0_i32_159 = arith.constant 0 : i32
    %173 = arith.cmpi slt, %166, %c0_i32_159 : i32
    %174 = vector.broadcast %173 : i1 to vector<8x1xi1>
    %175 = vector.broadcast %174 : vector<8x1xi1> to vector<8x1xi1>
    %176 = arith.xori %172, %175 : vector<8x1xi1>
    %177 = arith.andi %176, %170 : vector<8x1xi1>
    %178 = vector.broadcast %166 : i32 to vector<8x1xi32>
    %179 = arith.addi %168, %178 : vector<8x1xi32>
    %180 = arith.select %177, %179, %168 : vector<8x1xi1>, vector<8x1xi32>
    %c2_i32 = arith.constant 2 : i32
    %181 = vector.broadcast %c2_i32 : i32 to vector<8x1xi32>
    %182 = arith.cmpi slt, %180, %181 : vector<8x1xi32>
    %cst_160 = arith.constant 0.000000e+00 : f32
    %183 = vector.shape_cast %182 : vector<8x1xi1> to vector<8x1xi1>
    %184 = vector.broadcast %183 : vector<8x1xi1> to vector<8x256xi1>
    %185 = vector.broadcast %cst_160 : f32 to vector<8x256xf32>
    %186 = arith.select %184, %163, %185 : vector<8x256xi1>, vector<8x256xf32>
    %cst_161 = arith.constant dense<0.000000e+00> : vector<256xf32>
    %187 = vector.multi_reduction <add>, %186, %cst_161 [0] : vector<8x256xf32> to vector<256xf32>
    %188 = vector.shape_cast %187 : vector<256xf32> to vector<1x256xf32>
    %cst_162 = arith.constant 4.000000e+00 : f32
    %189 = vector.broadcast %cst_162 : f32 to vector<1x256xf32>
    %190 = arith.divf %188, %189 : vector<1x256xf32>
    %c0_163 = arith.constant 0 : index
    %c0_164 = arith.constant 0 : index
    %191 = vector.load %arg4[%c0_163, %c0_164] : memref<1x256xf32, #tpu.memory_space<vmem>>, vector<1x256xf32>
    %192 = arith.mulf %190, %191 : vector<1x256xf32>
    %cst_165 = arith.constant dense<0.000000e+00> : vector<1xf32>
    %193 = vector.multi_reduction <add>, %192, %cst_165 [1] : vector<1x256xf32> to vector<1xf32>
    %194 = vector.shape_cast %193 : vector<1xf32> to vector<1x1xf32>
    %c0_166 = arith.constant 0 : index
    %c0_167 = arith.constant 0 : index
    %195 = vector.load %arg5[%c0_166, %c0_167] : memref<1x1xf32, #tpu.memory_space<vmem>>, vector<1x1xf32>
    %196 = arith.addf %194, %195 : vector<1x1xf32>
    %cst_168 = arith.constant 0.000000e+00 : f32
    %197 = vector.broadcast %cst_168 : f32 to vector<1x1xf32>
    %198 = arith.subf %197, %196 : vector<1x1xf32>
    %199 = math.exp %198 : vector<1x1xf32>
    %cst_169 = arith.constant 1.000000e+00 : f32
    %200 = vector.broadcast %cst_169 : f32 to vector<1x1xf32>
    %201 = arith.addf %200, %199 : vector<1x1xf32>
    %cst_170 = arith.constant 1.000000e+00 : f32
    %202 = vector.broadcast %cst_170 : f32 to vector<1x1xf32>
    %203 = arith.divf %202, %201 : vector<1x1xf32>
    %c0_171 = arith.constant 0 : index
    %c0_172 = arith.constant 0 : index
    %c0_173 = arith.constant 0 : index
    %204 = vector.load %arg6[%c0_171, %c0_172, %c0_173] : memref<1x1x1xf32, #tpu.memory_space<vmem>>, vector<1x1x1xf32>
    %205 = vector.shape_cast %204 : vector<1x1x1xf32> to vector<1x1xf32>
    %206 = vector.shape_cast %203 : vector<1x1xf32> to vector<1x1x1xf32>
    tpu.vector_store %arg6[%c0_171, %c0_172, %c0_173], %206 {strides = array<i32>} : memref<1x1x1xf32, #tpu.memory_space<vmem>>, vector<1x1x1xf32>,
    return
  }
  func.func @transform_0(%arg0: i32) -> (i32, i32, i32, i32) {
    %c0_i32 = arith.constant 0 : i32
    %c0_i32_0 = arith.constant 0 : i32
    %c0_i32_1 = arith.constant 0 : i32
    %c0_i32_2 = arith.constant 0 : i32
    return %arg0, %c0_i32, %c0_i32_0, %c0_i32_1 : i32, i32, i32, i32
  }
  func.func @transform_1(%arg0: i32) -> (i32, i32, i32) {
    %c0_i32 = arith.constant 0 : i32
    %c0_i32_0 = arith.constant 0 : i32
    %c0_i32_1 = arith.constant 0 : i32
    %c0_i32_2 = arith.constant 0 : i32
    return %c0_i32, %c0_i32_0, %c0_i32_1 : i32, i32, i32
  }
  func.func @transform_2(%arg0: i32) -> (i32, i32) {
    %c0_i32 = arith.constant 0 : i32
    %c0_i32_0 = arith.constant 0 : i32
    %c0_i32_1 = arith.constant 0 : i32
    return %c0_i32, %c0_i32_0 : i32, i32
  }
  func.func @transform_3(%arg0: i32) -> (i32, i32) {
    %c0_i32 = arith.constant 0 : i32
    %c0_i32_0 = arith.constant 0 : i32
    %c0_i32_1 = arith.constant 0 : i32
    return %c0_i32, %c0_i32_0 : i32, i32
  }
  func.func @transform_4(%arg0: i32) -> (i32, i32) {
    %c0_i32 = arith.constant 0 : i32
    %c0_i32_0 = arith.constant 0 : i32
    %c0_i32_1 = arith.constant 0 : i32
    return %c0_i32, %c0_i32_0 : i32, i32
  }
  func.func @transform_5(%arg0: i32) -> (i32, i32, i32) {
    %c0_i32 = arith.constant 0 : i32
    %c0_i32_0 = arith.constant 0 : i32
    %c0_i32_1 = arith.constant 0 : i32
    return %arg0, %c0_i32, %c0_i32_0 : i32, i32, i32
  }
}

</mosaic_0001>

<bundles_post_ra>
// kernel: discriminator_forward.4
= control target key start
LH: loop header
LB: loop body
LE: loop exit
PB: predicated region body
PF: predicated region fallthrough
CT: control target
= control target key end

     0   :  { %8 = vsyncpa [#allocation4], 0  ;;  %s2920_s12 = smov 0   ;;  %s4081_s0 = inlined_call_operand.vmem [shape: f32[2,4,100,1], index: 0, kind: input, shape index: {}]   ;;  %s4082_s1 = inlined_call_operand.vmem [shape: bf16[25,1,128], index: 1, kind: input, shape index: {}]   ;;  %s4083_s2 = inlined_call_operand.hbm [shape: f32[1,128], index: 2, kind: input, shape index: {}]   ;;  %s4084_s3 = inlined_call_operand.vmem [shape: bf16[2,78,128], index: 3, kind: output, shape index: {}]  }
   0x1 LB: > { %s2757_s13 = sadd.s32 4294967295, %s2896_s12   ;;  %p2759_p0 = scmp.ge.s32.totalorder %s2896_s12, 1  ;;  %s2896_s12 = sphi %s2920_s12, %s14_s12  }
   0x2   : > { %p113_p1 = scmp.lt.s32.totalorder %s2896_s12, 3  ;;  %p2846_p3 = scmp.eq.s32.totalorder %s2757_s13, 0 }
   0x3   : > { %s2898_s15 = smov [#allocation3]  }
   0x4   : > { %p2928_p2 = pnand %p2759_p0, %p113_p1  ;;  %s129_s16 = sshll.u32 %s2898_s15, 4  ;;  %s130_s16 = int_to_ptr.vmem [resolvable:$true] %s129_s16 }
   0x5   : > { %s2871_s17 = scalar_lea.vmem %s130_s16, 16  ;;  %s2878_s18 = scalar_lea.vmem %s130_s16, 32 }
   0x6   : > { %p2842_p4 = pneg %p2928_p2  ;;  %p2872_p7 = scmp.ne.s32.totalorder %s130_s16, %s2871_s17 }
   0x7   : > { %p2879_p10 = scmp.lt.s32.totalorder %s130_s16, %s130_s16  ;;  %p2880_p11 = scmp.lt.s32.totalorder %s2878_s18, %s2871_s17 }
   0x8   : > { %p2843_p5 = pnand %p2846_p3, %p2842_p4 }
   0x9   : > { %p2881_p12 = por %p2880_p11, %p2879_p10 }
   0xa   : > { %p2862_p6 = pneg %p2843_p5 }
   0xc   : > { %p2874_p8 = pnand %p2872_p7, %p2862_p6 }
   0xe   : > { %p2875_p9 = pneg %p2874_p8 }
  0x10   : > { %p2882_p13 = pnand %p2881_p12, %p2875_p9 }
  0x12   : > { %2885 = shalt.err (!%p2882_p13)
}
  0x13   : > { %2845 = dma.hbm_to_vmem [thread:$0]  (!%p2843_p5), %s4083_s2, 16, %s130_s16, [#allocation4]  }
  0x14   : > { %150 = sbr.rel (%p2928_p2) target bundleno = 674 (0x2a2), region = 32 }
  0x19   : > { %2891 = dma.done.wait (%p2846_p3), [#allocation4], 16  }
  0x1a   : > { %2893 = vsyncadd (%p2846_p3), [#allocation4], 4294967280  ;;  %p174_p0 = scmp.lt.s32.totalorder %s2757_s13, 1  ;;  %v2899_v0 = vmov 0   ;;  %vm392_vm0 = vcmask 7168  }
  0x1b   : > { %2859 = vset.pattern.permute.xlu1 %v2899_v0  ;;  %2858 = vset.pattern.permute.xlu0 %v2899_v0 }
  0x1c   : > { %s4303_s13 = smov (!%p174_p0, %s2757_s13), 1 }
  0x1d   : > { %s2836_s21 = smul.u32 416, %s4303_s13 }
  0x1e   : > { %s2837_s25 = smul.u32 40, %s4303_s13 }
  0x1f   : > { %s2948_s24 = scalar_lea.vmem %s4081_s0, %s2836_s21 }
  0x20   : > { %v186_v1 = vld [vmem:[%s2948_s24 + $0x10] sm:$0xff]  ;;  %v184_v2 = vld [vmem:[%s2948_s24] sm:$0xff]  ;;  %v187_v3 = vld [vmem:[%s2948_s24 + $0x18] sm:$0xff]  ;;  %s4042_s27 = scalar_lea.vmem %s4084_s3, %s2837_s25 }
  0x21   : > { %vm238_vm1 = vcmp.gt.f32.partialorder %v186_v1, 0.0  ;;  %v290_v4 = vmul.f32 0.2, %v186_v1  ;;  %vm236_vm2 = vcmp.gt.f32.partialorder %v184_v2, 0.0  ;;  %v288_v5 = vmul.f32 0.2, %v184_v2 }
  0x22   : > { %vm239_vm3 = vcmp.gt.f32.partialorder %v187_v3, 0.0  ;;  %v291_v6 = vmul.f32 0.2, %v187_v3  ;;  %v185_v7 = vld [vmem:[%s2948_s24 + $0x8] sm:$0xff]  ;;  %v188_v9 = vld [vmem:[%s2948_s24 + $0x20] sm:$0xff]  ;;  %v191_v13 = vld [vmem:[%s2948_s24 + $0x38] sm:$0xff] }
  0x23   : > { %v189_v8 = vld [vmem:[%s2948_s24 + $0x28] sm:$0xff]  ;;  %v342_v10 = vsel %vm238_vm1, %v186_v1, %v290_v4  ;;  %v340_v11 = vsel %vm236_vm2, %v184_v2, %v288_v5  ;;  %vm237_vm4 = vcmp.gt.f32.partialorder %v185_v7, 0.0  ;;  %v289_v12 = vmul.f32 0.2, %v185_v7  ;;  %v190_v14 = vld [vmem:[%s2948_s24 + $0x30] sm:$0xff]  ;;  %v192_v18 = vld [vmem:[%s2948_s24 + $0x40] sm:$0xff] }
  0x24   : > { %v193_v15 = vld [vmem:[%s2948_s24 + $0x48] sm:$0xff]  ;;  %395 = vst.msk [vmem:[#allocation2 + $0x10] sm:$0xff] %vm392_vm0, %v342_v10  ;;  %393 = vst.msk [vmem:[#allocation2] sm:$0xff] %vm392_vm0, %v340_v11  ;;  %v343_v16 = vsel %vm239_vm3, %v187_v3, %v291_v6  ;;  %vm241_vm5 = vcmp.gt.f32.partialorder %v189_v8, 0.0  ;;  %v293_v17 = vmul.f32 0.2, %v189_v8 }
  0x25   : > { %vm240_vm6 = vcmp.gt.f32.partialorder %v188_v9, 0.0  ;;  %396 = vst.msk [vmem:[#allocation2 + $0x18] sm:$0xff] %vm392_vm0, %v343_v16  ;;  %v341_v19 = vsel %vm237_vm4, %v185_v7, %v289_v12  ;;  %v292_v20 = vmul.f32 0.2, %v188_v9  ;;  %vm243_vm7 = vcmp.gt.f32.partialorder %v191_v13, 0.0  ;;  %v198_v22 = vld [vmem:[%s2948_s24 + $0x70] sm:$0xff] }
  0x26   : > { %v295_v21 = vmul.f32 0.2, %v191_v13  ;;  %394 = vst.msk [vmem:[#allocation2 + $0x8] sm:$0xff] %vm392_vm0, %v341_v19  ;;  %v345_v23 = vsel %vm241_vm5, %v189_v8, %v293_v17  ;;  %vm242_vm8 = vcmp.gt.f32.partialorder %v190_v14, 0.0  ;;  %v294_v24 = vmul.f32 0.2, %v190_v14 }
  0x27   : > { %vm245_vm9 = vcmp.gt.f32.partialorder %v193_v15, 0.0  ;;  %v197_v25 = vld [vmem:[%s2948_s24 + $0x68] sm:$0xff]  ;;  %v200_v26 = vld [vmem:[%s2948_s24 + $0x80] sm:$0xff]  ;;  %398 = vst.msk [vmem:[#allocation2 + $0x28] sm:$0xff] %vm392_vm0, %v345_v23  ;;  %v344_v27 = vsel %vm240_vm6, %v188_v9, %v292_v20  ;;  %v297_v29 = vmul.f32 0.2, %v193_v15 }
  0x28   : > { %v347_v28 = vsel %vm243_vm7, %v191_v13, %v295_v21  ;;  %vm244_vm10 = vcmp.gt.f32.partialorder %v192_v18, 0.0  ;;  %v199_v30 = vld [vmem:[%s2948_s24 + $0x78] sm:$0xff]  ;;  %v202_v31 = vld [vmem:[%s2948_s24 + $0x90] sm:$0xff]  ;;  %397 = vst.msk [vmem:[#allocation2 + $0x20] sm:$0xff] %vm392_vm0, %v344_v27  ;;  %v346_v32 = vsel %vm242_vm8, %v190_v14, %v294_v24  ;;  %v296_v33 = vmul.f32 0.2, %v192_v18 }
  0x29   : > { %400 = vst.msk [vmem:[#allocation2 + $0x38] sm:$0xff] %vm392_vm0, %v347_v28  ;;  %vm250_vm11 = vcmp.gt.f32.partialorder %v198_v22, 0.0  ;;  %v302_v34 = vmul.f32 0.2, %v198_v22  ;;  %v201_v35 = vld [vmem:[%s2948_s24 + $0x88] sm:$0xff]  ;;  %399 = vst.msk [vmem:[#allocation2 + $0x30] sm:$0xff] %vm392_vm0, %v346_v32  ;;  %v349_v36 = vsel %vm245_vm9, %v193_v15, %v297_v29 }
  0x2a   : > { %vm249_vm12 = vcmp.gt.f32.partialorder %v197_v25, 0.0  ;;  %v301_v37 = vmul.f32 0.2, %v197_v25  ;;  %vm252_vm13 = vcmp.gt.f32.partialorder %v200_v26, 0.0  ;;  %v204_v38 = vld [vmem:[%s2948_s24 + $0xa0] sm:$0xff]  ;;  %402 = vst.msk [vmem:[#allocation2 + $0x48] sm:$0xff] %vm392_vm0, %v349_v36  ;;  %v348_v39 = vsel %vm244_vm10, %v192_v18, %v296_v33 }
  0x2b   : > { %v354_v40 = vsel %vm250_vm11, %v198_v22, %v302_v34  ;;  %v304_v41 = vmul.f32 0.2, %v200_v26  ;;  %vm251_vm14 = vcmp.gt.f32.partialorder %v199_v30, 0.0  ;;  %v203_v42 = vld [vmem:[%s2948_s24 + $0x98] sm:$0xff]  ;;  %v206_v43 = vld [vmem:[%s2948_s24 + $0xb0] sm:$0xff]  ;;  %v205_v44 = vld [vmem:[%s2948_s24 + $0xa8] sm:$0xff] }
  0x2c   : > { %v448_v45 = vld [vmem:[#allocation2 + $0x10] sm:$0xff]  ;;  %v446_v46 = vld [vmem:[#allocation2] sm:$0xff]  ;;  %401 = vst.msk [vmem:[#allocation2 + $0x40] sm:$0xff] %vm392_vm0, %v348_v39  ;;  %408 = vst.msk [vmem:[#allocation2 + $0x70] sm:$0xff] %vm392_vm0, %v354_v40  ;;  %v353_v47 = vsel %vm249_vm12, %v197_v25, %v301_v37  ;;  %v303_v48 = vmul.f32 0.2, %v199_v30 }
  0x2d   : > { %vm254_vm15 = vcmp.gt.f32.partialorder %v202_v31, 0.0  ;;  %vm253_vm1 = vcmp.gt.f32.partialorder %v201_v35, 0.0  ;;  %v211_v49 = vld [vmem:[%s2948_s24 + $0xd8] sm:$0xff]  ;;  %470 = vperm.xlu1 %2859, %v448_v45   ;;  %460 = vperm.xlu0 %2858, %v446_v46   ;;  %407 = vst.msk [vmem:[#allocation2 + $0x68] sm:$0xff] %vm392_vm0, %v353_v47  ;;  %v356_v51 = vsel %vm252_vm13, %v200_v26, %v304_v41  ;;  %v306_v52 = vmul.f32 0.2, %v202_v31 }
  0x2e   : > { %v449_v50 = vld [vmem:[#allocation2 + $0x18] sm:$0xff]  ;;  %v305_v53 = vmul.f32 0.2, %v201_v35  ;;  %vm256_vm2 = vcmp.gt.f32.partialorder %v204_v38, 0.0  ;;  %v447_v54 = vld [vmem:[#allocation2 + $0x8] sm:$0xff]  ;;  %410 = vst.msk [vmem:[#allocation2 + $0x80] sm:$0xff] %vm392_vm0, %v356_v51  ;;  %v355_v55 = vsel %vm251_vm14, %v199_v30, %v303_v48 }
  0x2f   : > { %v308_v56 = vmul.f32 0.2, %v204_v38  ;;  %vm255_vm3 = vcmp.gt.f32.partialorder %v203_v42, 0.0  ;;  %v307_v57 = vmul.f32 0.2, %v203_v42  ;;  %409 = vst.msk [vmem:[#allocation2 + $0x78] sm:$0xff] %vm392_vm0, %v355_v55  ;;  %v358_v58 = vsel %vm254_vm15, %v202_v31, %v306_v52 }
  0x30   : > { %v357_v59 = vsel %vm253_vm1, %v201_v35, %v305_v53  ;;  %vm258_vm4 = vcmp.gt.f32.partialorder %v206_v43, 0.0  ;;  %v310_v60 = vmul.f32 0.2, %v206_v43  ;;  %v210_v61 = vld [vmem:[%s2948_s24 + $0xd0] sm:$0xff]  ;;  %412 = vst.msk [vmem:[#allocation2 + $0x90] sm:$0xff] %vm392_vm0, %v358_v58  ;;  %vm257_vm5 = vcmp.gt.f32.partialorder %v205_v44, 0.0 }
  0x31   : > { %411 = vst.msk [vmem:[#allocation2 + $0x88] sm:$0xff] %vm392_vm0, %v357_v59  ;;  %v360_v62 = vsel %vm256_vm2, %v204_v38, %v308_v56  ;;  %v359_v63 = vsel %vm255_vm3, %v203_v42, %v307_v57  ;;  %v309_v0 = vmul.f32 0.2, %v205_v44  ;;  %v213_v1 = vld [vmem:[%s2948_s24 + $0xe8] sm:$0xff]  ;;  %475 = vperm.xlu1 %2859, %v449_v50   ;;  %465 = vperm.xlu0 %2858, %v447_v54   ;;  %vm263_vm6 = vcmp.gt.f32.partialorder %v211_v49, 0.0  ;;  %v450_v5 = vld [vmem:[#allocation2 + $0x20] sm:$0xff] }
  0x32   : > { %414 = vst.msk [vmem:[#allocation2 + $0xa0] sm:$0xff] %vm392_vm0, %v360_v62  ;;  %413 = vst.msk [vmem:[#allocation2 + $0x98] sm:$0xff] %vm392_vm0, %v359_v63  ;;  %v362_v2 = vsel %vm258_vm4, %v206_v43, %v310_v60  ;;  %v315_v3 = vmul.f32 0.2, %v211_v49  ;;  %v451_v4 = vld [vmem:[#allocation2 + $0x28] sm:$0xff]  ;;  %vm262_vm7 = vcmp.gt.f32.partialorder %v210_v61, 0.0 }
  0x33   : > { %416 = vst.msk [vmem:[#allocation2 + $0xb0] sm:$0xff] %vm392_vm0, %v362_v2  ;;  %v361_v6 = vsel %vm257_vm5, %v205_v44, %v309_v0  ;;  %v314_v8 = vmul.f32 0.2, %v210_v61  ;;  %vm265_vm8 = vcmp.gt.f32.partialorder %v213_v1, 0.0  ;;  %v317_v9 = vmul.f32 0.2, %v213_v1 }
  0x34   : > { %415 = vst.msk [vmem:[#allocation2 + $0xa8] sm:$0xff] %vm392_vm0, %v361_v6  ;;  %v367_v7 = vsel %vm263_vm6, %v211_v49, %v315_v3  ;;  %v453_v11 = vld [vmem:[#allocation2 + $0x38] sm:$0xff]  ;;  %v452_v12 = vld [vmem:[#allocation2 + $0x30] sm:$0xff]  ;;  %v455_v14 = vld [vmem:[#allocation2 + $0x48] sm:$0x3f] }
  0x35   : > { %421 = vst.msk [vmem:[#allocation2 + $0xd8] sm:$0xff] %vm392_vm0, %v367_v7  ;;  %485 = vperm.xlu1 %2859, %v451_v4   ;;  %480 = vperm.xlu0 %2858, %v450_v5   ;;  %v366_v10 = vsel %vm262_vm7, %v210_v61, %v314_v8  ;;  %v369_v13 = vsel %vm265_vm8, %v213_v1, %v317_v9  ;;  %v454_v15 = vld [vmem:[#allocation2 + $0x40] sm:$0xff]  ;;  %v534_v16 = vld [vmem:[#allocation2 + $0x70] sm:$0xff]  ;;  %v533_v17 = vld [vmem:[#allocation2 + $0x68] sm:$0xff] }
  0x36   : > { %420 = vst.msk [vmem:[#allocation2 + $0xd0] sm:$0xff] %vm392_vm0, %v366_v10  ;;  %423 = vst.msk [vmem:[#allocation2 + $0xe8] sm:$0xff] %vm392_vm0, %v369_v13  ;;  %v212_v18 = vld [vmem:[%s2948_s24 + $0xe0] sm:$0xff]  ;;  %v215_v19 = vld [vmem:[%s2948_s24 + $0xf8] sm:$0xff] }
  0x37   : > { %v536_v20 = vld [vmem:[#allocation2 + $0x80] sm:$0xff]  ;;  %v535_v21 = vld [vmem:[#allocation2 + $0x78] sm:$0xff]  ;;  %vm264_vm9 = vcmp.gt.f32.partialorder %v212_v18, 0.0  ;;  %v316_v22 = vmul.f32 0.2, %v212_v18  ;;  %vm267_vm10 = vcmp.gt.f32.partialorder %v215_v19, 0.0 }
  0x38   : > { %v319_v23 = vmul.f32 0.2, %v215_v19  ;;  %v214_v24 = vld [vmem:[%s2948_s24 + $0xf0] sm:$0xff]  ;;  %v217_v25 = vld [vmem:[%s2948_s24 + $0x108] sm:$0xff]  ;;  %v216_v26 = vld [vmem:[%s2948_s24 + $0x100] sm:$0xff] }
  0x39   : > { %495 = vperm.xlu1 %2859, %v453_v11   ;;  %490 = vperm.xlu0 %2858, %v452_v12   ;;  %v368_v27 = vsel %vm264_vm9, %v212_v18, %v316_v22  ;;  %vm266_vm11 = vcmp.gt.f32.partialorder %v214_v24, 0.0  ;;  %v318_v29 = vmul.f32 0.2, %v214_v24  ;;  %v219_v30 = vld [vmem:[%s2948_s24 + $0x118] sm:$0xff]  ;;  %v218_v31 = vld [vmem:[%s2948_s24 + $0x110] sm:$0xff]  ;;  %v224_v32 = vld [vmem:[%s2948_s24 + $0x140] sm:$0xff] }
  0x3a   : > { %v371_v28 = vsel %vm267_vm10, %v215_v19, %v319_v23  ;;  %422 = vst.msk [vmem:[#allocation2 + $0xe0] sm:$0xff] %vm392_vm0, %v368_v27  ;;  %vm269_vm12 = vcmp.gt.f32.partialorder %v217_v25, 0.0  ;;  %v321_v33 = vmul.f32 0.2, %v217_v25  ;;  %vm268_vm13 = vcmp.gt.f32.partialorder %v216_v26, 0.0  ;;  %v223_v37 = vld [vmem:[%s2948_s24 + $0x138] sm:$0xff] }
  0x3b   : > { %425 = vst.msk [vmem:[#allocation2 + $0xf8] sm:$0xff] %vm392_vm0, %v371_v28  ;;  %v320_v34 = vmul.f32 0.2, %v216_v26  ;;  %v370_v35 = vsel %vm266_vm11, %v214_v24, %v318_v29  ;;  %vm271_vm14 = vcmp.gt.f32.partialorder %v219_v30, 0.0  ;;  %v323_v36 = vmul.f32 0.2, %v219_v30 }
  0x3c   : > { %vm270_vm15 = vcmp.gt.f32.partialorder %v218_v31, 0.0  ;;  %v226_v38 = vld [vmem:[%s2948_s24 + $0x150] sm:$0xff]  ;;  %v537_v40 = vld [vmem:[#allocation2 + $0x88] sm:$0xff]  ;;  %424 = vst.msk [vmem:[#allocation2 + $0xf0] sm:$0xff] %vm392_vm0, %v370_v35  ;;  %v373_v41 = vsel %vm269_vm12, %v217_v25, %v321_v33  ;;  %v322_v43 = vmul.f32 0.2, %v218_v31 }
  0x3d   : > { %505 = vperm.xlu1 %2859, %v455_v14   ;;  %500 = vperm.xlu0 %2858, %v454_v15   ;;  %v538_v39 = vld [vmem:[#allocation2 + $0x90] sm:$0xff]  ;;  %v372_v42 = vsel %vm268_vm13, %v216_v26, %v320_v34  ;;  %vm276_vm1 = vcmp.gt.f32.partialorder %v224_v32, 0.0  ;;  %v225_v44 = vld [vmem:[%s2948_s24 + $0x148] sm:$0xff]  ;;  %427 = vst.msk [vmem:[#allocation2 + $0x108] sm:$0xff] %vm392_vm0, %v373_v41  ;;  %v375_v45 = vsel %vm271_vm14, %v219_v30, %v323_v36  ;;  %v328_v46 = vmul.f32 0.2, %v224_v32 }
  0x3e   : > { %426 = vst.msk [vmem:[#allocation2 + $0x100] sm:$0xff] %vm392_vm0, %v372_v42  ;;  %vm275_vm2 = vcmp.gt.f32.partialorder %v223_v37, 0.0  ;;  %v327_v47 = vmul.f32 0.2, %v223_v37  ;;  %v228_v48 = vld [vmem:[%s2948_s24 + $0x160] sm:$0xff]  ;;  %429 = vst.msk [vmem:[#allocation2 + $0x118] sm:$0xff] %vm392_vm0, %v375_v45  ;;  %v374_v49 = vsel %vm270_vm15, %v218_v31, %v322_v43 }
  0x3f   : > { %vm278_vm3 = vcmp.gt.f32.partialorder %v226_v38, 0.0  ;;  %v330_v50 = vmul.f32 0.2, %v226_v38  ;;  %v227_v51 = vld [vmem:[%s2948_s24 + $0x158] sm:$0xff]  ;;  %v230_v52 = vld [vmem:[%s2948_s24 + $0x170] sm:$0xff]  ;;  %428 = vst.msk [vmem:[#allocation2 + $0x110] sm:$0xff] %vm392_vm0, %v374_v49  ;;  %v380_v53 = vsel %vm276_vm1, %v224_v32, %v328_v46 }
  0x40   : > { %v379_v54 = vsel %vm275_vm2, %v223_v37, %v327_v47  ;;  %vm277_vm4 = vcmp.gt.f32.partialorder %v225_v44, 0.0  ;;  %v329_v55 = vmul.f32 0.2, %v225_v44  ;;  %v229_v56 = vld [vmem:[%s2948_s24 + $0x168] sm:$0xff]  ;;  %434 = vst.msk [vmem:[#allocation2 + $0x140] sm:$0xff] %vm392_vm0, %v380_v53  ;;  %vm280_vm5 = vcmp.gt.f32.partialorder %v228_v48, 0.0 }
  0x41   : > { %553 = vperm.xlu1 %2859, %v534_v16   ;;  %548 = vperm.xlu0 %2858, %v533_v17   ;;  %433 = vst.msk [vmem:[#allocation2 + $0x138] sm:$0xff] %vm392_vm0, %v379_v54  ;;  %v382_v57 = vsel %vm278_vm3, %v226_v38, %v330_v50  ;;  %v332_v58 = vmul.f32 0.2, %v228_v48  ;;  %v232_v59 = vld [vmem:[%s2948_s24 + $0x180] sm:$0xff]  ;;  %v231_v60 = vld [vmem:[%s2948_s24 + $0x178] sm:$0xff]  ;;  %vm279_vm6 = vcmp.gt.f32.partialorder %v227_v51, 0.0 }
  0x42   : > { %v540_v61 = vld [vmem:[#allocation2 + $0xa0] sm:$0xff]  ;;  %v539_v62 = vld [vmem:[#allocation2 + $0x98] sm:$0xff]  ;;  %436 = vst.msk [vmem:[#allocation2 + $0x150] sm:$0xff] %vm392_vm0, %v382_v57  ;;  %v381_v63 = vsel %vm277_vm4, %v225_v44, %v329_v55  ;;  %v331_v0 = vmul.f32 0.2, %v227_v51  ;;  %vm282_vm7 = vcmp.gt.f32.partialorder %v230_v52, 0.0 }
  0x43   : > { %435 = vst.msk [vmem:[#allocation2 + $0x148] sm:$0xff] %vm392_vm0, %v381_v63  ;;  %v384_v1 = vsel %vm280_vm5, %v228_v48, %v332_v58  ;;  %v334_v2 = vmul.f32 0.2, %v230_v52  ;;  %vm281_vm8 = vcmp.gt.f32.partialorder %v229_v56, 0.0  ;;  %v333_v3 = vmul.f32 0.2, %v229_v56 }
  0x44   : > { %438 = vst.msk [vmem:[#allocation2 + $0x160] sm:$0xff] %vm392_vm0, %v384_v1  ;;  %v383_v4 = vsel %vm279_vm6, %v227_v51, %v331_v0  ;;  %vm284_vm9 = vcmp.gt.f32.partialorder %v232_v59, 0.0  ;;  %v336_v5 = vmul.f32 0.2, %v232_v59  ;;  %vm283_vm10 = vcmp.gt.f32.partialorder %v231_v60, 0.0  ;;  %v541_v10 = vld [vmem:[#allocation2 + $0xa8] sm:$0xff] }
  0x45   : > { %563 = vperm.xlu1 %2859, %v536_v20   ;;  %558 = vperm.xlu0 %2858, %v535_v21   ;;  %437 = vst.msk [vmem:[#allocation2 + $0x158] sm:$0xff] %vm392_vm0, %v383_v4  ;;  %v386_v6 = vsel %vm282_vm7, %v230_v52, %v334_v2  ;;  %v385_v7 = vsel %vm281_vm8, %v229_v56, %v333_v3  ;;  %v335_v8 = vmul.f32 0.2, %v231_v60  ;;  %v542_v9 = vld [vmem:[#allocation2 + $0xb0] sm:$0x3f]  ;;  %v620_v14 = vld [vmem:[#allocation2 + $0x1] sm:$0xff] }
  0x46   : > { %440 = vst.msk [vmem:[#allocation2 + $0x170] sm:$0xff] %vm392_vm0, %v386_v6  ;;  %439 = vst.msk [vmem:[#allocation2 + $0x168] sm:$0xff] %vm392_vm0, %v385_v7  ;;  %v388_v11 = vsel %vm284_vm9, %v232_v59, %v336_v5  ;;  %v621_v13 = vld [vmem:[#allocation2 + $0x9] sm:$0xff]  ;;  %v623_v15 = vld [vmem:[#allocation2 + $0x19] sm:$0xff]  ;;  %vm405_vm4 = vcmask 3072  }
  0x47   : > { %442 = vst.msk [vmem:[#allocation2 + $0x180] sm:$0xff] %vm392_vm0, %v388_v11  ;;  %v387_v12 = vsel %vm283_vm10, %v231_v60, %v335_v8  ;;  %v622_v16 = vld [vmem:[#allocation2 + $0x11] sm:$0xff]  ;;  %v625_v17 = vld [vmem:[#allocation2 + $0x29] sm:$0xff]  ;;  %v624_v18 = vld [vmem:[#allocation2 + $0x21] sm:$0xff] }
  0x48   : > { %441 = vst.msk [vmem:[#allocation2 + $0x178] sm:$0xff] %vm392_vm0, %v387_v12  ;;  %v627_v19 = vld [vmem:[#allocation2 + $0x39] sm:$0xff]  ;;  %v626_v20 = vld [vmem:[#allocation2 + $0x31] sm:$0xff]  ;;  %v629_v21 = vld [vmem:[#allocation2 + $0x49] sm:$0x3f] }
  0x49   : > { %573 = vperm.xlu1 %2859, %v538_v39   ;;  %568 = vperm.xlu0 %2858, %v537_v40   ;;  %v628_v22 = vld [vmem:[#allocation2 + $0x41] sm:$0xff]  ;;  %v708_v23 = vld [vmem:[#allocation2 + $0x71] sm:$0xff]  ;;  %v707_v24 = vld [vmem:[#allocation2 + $0x69] sm:$0xff] }
  0x4a   : > { %v710_v25 = vld [vmem:[#allocation2 + $0x81] sm:$0xff]  ;;  %v709_v26 = vld [vmem:[#allocation2 + $0x79] sm:$0xff]  ;;  %v712_v27 = vld [vmem:[#allocation2 + $0x91] sm:$0xff] }
  0x4b   : > { %v711_v28 = vld [vmem:[#allocation2 + $0x89] sm:$0xff]  ;;  %v714_v29 = vld [vmem:[#allocation2 + $0xa1] sm:$0xff]  ;;  %v713_v30 = vld [vmem:[#allocation2 + $0x99] sm:$0xff] }
  0x4c   : > { %v716_v31 = vld [vmem:[#allocation2 + $0xb1] sm:$0x3f]  ;;  %v715_v32 = vld [vmem:[#allocation2 + $0xa9] sm:$0xff]  ;;  %v3046_v38 = vld [vmem:[#allocation2 + $0x1a] sm:$0xff] }
  0x4d   : > { %583 = vperm.xlu1 %2859, %v540_v61   ;;  %578 = vperm.xlu0 %2858, %v539_v62   ;;  %v194_v33 = vld [vmem:[%s2948_s24 + $0x50] sm:$0xff]  ;;  %v794_v35 = vld [vmem:[#allocation2 + $0x2] sm:$0xff]  ;;  %v3058_v42 = vld [vmem:[#allocation2 + $0x3a] sm:$0xff] }
  0x4e   : > { %v3042_v34 = vld [vmem:[#allocation2 + $0xa] sm:$0xff]  ;;  %v298_v36 = vmul.f32 0.2, %v194_v33  ;;  %vm246_vm11 = vcmp.gt.f32.partialorder %v194_v33, 0.0  ;;  %v3048_v39 = vld [vmem:[#allocation2 + $0x12] sm:$0xff]  ;;  %v3054_v41 = vld [vmem:[#allocation2 + $0x22] sm:$0xff] }
  0x4f   : > { %v3052_v40 = vld [vmem:[#allocation2 + $0x2a] sm:$0xff]  ;;  %v3060_v43 = vld [vmem:[#allocation2 + $0x32] sm:$0xff]  ;;  %v3064_v45 = vld [vmem:[#allocation2 + $0x42] sm:$0xff] }
  0x50   : > { %v350_v37 = vsel %vm246_vm11, %v194_v33, %v298_v36  ;;  %v803_v44 = vld [vmem:[#allocation2 + $0x4a] sm:$0x3f]  ;;  %v207_v46 = vld [vmem:[%s2948_s24 + $0xb8] sm:$0xff]  ;;  %v882_v48 = vld [vmem:[#allocation2 + $0xd0] sm:$0xff] }
  0x51   : > { %593 = vperm.xlu1 %2859, %v542_v9   ;;  %588 = vperm.xlu0 %2858, %v541_v10   ;;  %403 = vst.msk [vmem:[#allocation2 + $0x50] sm:$0xff] %vm392_vm0, %v350_v37  ;;  %v883_v47 = vld [vmem:[#allocation2 + $0xd8] sm:$0xff]  ;;  %v311_v49 = vmul.f32 0.2, %v207_v46  ;;  %vm259_vm12 = vcmp.gt.f32.partialorder %v207_v46, 0.0  ;;  %v885_v51 = vld [vmem:[#allocation2 + $0xe8] sm:$0xff] }
  0x52   : > { %v884_v52 = vld [vmem:[#allocation2 + $0xe0] sm:$0xff]  ;;  %v887_v53 = vld [vmem:[#allocation2 + $0xf8] sm:$0xff]  ;;  %v886_v54 = vld [vmem:[#allocation2 + $0xf0] sm:$0xff] }
  0x53   : > { %v363_v50 = vsel %vm259_vm12, %v207_v46, %v311_v49  ;;  %v889_v55 = vld [vmem:[#allocation2 + $0x108] sm:$0xff]  ;;  %v888_v56 = vld [vmem:[#allocation2 + $0x100] sm:$0xff]  ;;  %v891_v57 = vld [vmem:[#allocation2 + $0x118] sm:$0x3f] }
  0x54   : > { %417 = vst.msk [vmem:[#allocation2 + $0xb8] sm:$0xff] %vm392_vm0, %v363_v50  ;;  %v890_v58 = vld [vmem:[#allocation2 + $0x110] sm:$0xff]  ;;  %v195_v59 = vld [vmem:[%s2948_s24 + $0x58] sm:$0xff]  ;;  %v971_v60 = vld [vmem:[#allocation2 + $0x140] sm:$0xff] }
  0x55   : > { %640 = vperm.xlu1 %2859, %v621_v13   ;;  %635 = vperm.xlu0 %2858, %v620_v14   ;;  %v970_v61 = vld [vmem:[#allocation2 + $0x138] sm:$0xff]  ;;  %v299_v62 = vmul.f32 0.2, %v195_v59  ;;  %vm247_vm13 = vcmp.gt.f32.partialorder %v195_v59, 0.0  ;;  %v973_v0 = vld [vmem:[#allocation2 + $0x150] sm:$0xff]  ;;  %v972_v1 = vld [vmem:[#allocation2 + $0x148] sm:$0xff] }
  0x56   : > { %v975_v4 = vld [vmem:[#allocation2 + $0x160] sm:$0xff]  ;;  %v974_v5 = vld [vmem:[#allocation2 + $0x158] sm:$0xff]  ;;  %v977_v8 = vld [vmem:[#allocation2 + $0x170] sm:$0xff] }
  0x57   : > { %v351_v63 = vsel %vm247_vm13, %v195_v59, %v299_v62  ;;  %v976_v9 = vld [vmem:[#allocation2 + $0x168] sm:$0xff]  ;;  %v979_v12 = vld [vmem:[#allocation2 + $0x180] sm:$0x3f]  ;;  %v978_v13 = vld [vmem:[#allocation2 + $0x178] sm:$0xff] }
  0x58   : > { %404 = vst.msk [vmem:[#allocation2 + $0x58] sm:$0xff] %vm392_vm0, %v351_v63  ;;  %v1066_v36 = vld [vmem:[#allocation2 + $0x119] sm:$0x3f]  ;;  %v1065_v37 = vld [vmem:[#allocation2 + $0x111] sm:$0xff]  ;;  %v1153_v63 = vld [vmem:[#allocation2 + $0x181] sm:$0x3f] }
  0x59   : > { %650 = vperm.xlu1 %2859, %v623_v15   ;;  %645 = vperm.xlu0 %2858, %v622_v16   ;;  %v208_v16 = vld [vmem:[%s2948_s24 + $0xc0] sm:$0xff]  ;;  %v1151_v59 = vld [vmem:[#allocation2 + $0x171] sm:$0xff] }
  0x5a   : > { %vm260_vm14 = vcmp.gt.f32.partialorder %v208_v16, 0.0 }
  0x5d   : > { %660 = vperm.xlu1 %2859, %v625_v17   ;;  %655 = vperm.xlu0 %2858, %v624_v18   ;;  %v1058_v17 = vld [vmem:[#allocation2 + $0xd9] sm:$0xff]  ;;  %v1057_v18 = vld [vmem:[#allocation2 + $0xd1] sm:$0xff] }
  0x61   : > { %670 = vperm.xlu1 %2859, %v627_v19   ;;  %665 = vperm.xlu0 %2858, %v626_v20   ;;  %v312_v19 = vmul.f32 0.2, %v208_v16 }
  0x65   : > { %680 = vperm.xlu1 %2859, %v629_v21   ;;  %675 = vperm.xlu0 %2858, %v628_v22   ;;  %v364_v22 = vsel %vm260_vm14, %v208_v16, %v312_v19  ;;  %v3140_v19 = vld [vmem:[#allocation2 + $0xe2] sm:$0xff] }
  0x66   : > { %418 = vst.msk [vmem:[#allocation2 + $0xc0] sm:$0xff] %vm392_vm0, %v364_v22 }
  0x69   : > { %727 = vperm.xlu1 %2859, %v708_v23   ;;  %722 = vperm.xlu0 %2858, %v707_v24   ;;  %v1060_v23 = vld [vmem:[#allocation2 + $0xe9] sm:$0xff]  ;;  %v1059_v24 = vld [vmem:[#allocation2 + $0xe1] sm:$0xff] }
  0x6d   : > { %737 = vperm.xlu1 %2859, %v710_v25   ;;  %732 = vperm.xlu0 %2858, %v709_v26  }
  0x71   : > { %747 = vperm.xlu1 %2859, %v712_v27   ;;  %742 = vperm.xlu0 %2858, %v711_v28   ;;  %v1062_v27 = vld [vmem:[#allocation2 + $0xf9] sm:$0xff]  ;;  %v1061_v28 = vld [vmem:[#allocation2 + $0xf1] sm:$0xff] }
  0x75   : > { %757 = vperm.xlu1 %2859, %v714_v29   ;;  %752 = vperm.xlu0 %2858, %v713_v30  }
  0x79   : > { %767 = vperm.xlu1 %2859, %v716_v31   ;;  %762 = vperm.xlu0 %2858, %v715_v32   ;;  %v1064_v31 = vld [vmem:[#allocation2 + $0x109] sm:$0xff]  ;;  %v1063_v32 = vld [vmem:[#allocation2 + $0x101] sm:$0xff] }
  0x7d   : > { %814 = vperm.xlu1 %2859, %v3042_v34   ;;  %809 = vperm.xlu0 %2858, %v794_v35  }
  0x81   : > { %824 = vperm.xlu1 %2859, %v3046_v38   ;;  %819 = vperm.xlu0 %2858, %v3048_v39  }
  0x85   : > { %834 = vperm.xlu1 %2859, %v3052_v40   ;;  %829 = vperm.xlu0 %2858, %v3054_v41  }
  0x89   : > { %844 = vperm.xlu1 %2859, %v3058_v42   ;;  %839 = vperm.xlu0 %2858, %v3060_v43  }
  0x8d   : > { %854 = vperm.xlu1 %2859, %v803_v44   ;;  %849 = vperm.xlu0 %2858, %v3064_v45  }
  0x91   : > { %902 = vperm.xlu1 %2859, %v883_v47   ;;  %897 = vperm.xlu0 %2858, %v882_v48   ;;  %v1145_v47 = vld [vmem:[#allocation2 + $0x141] sm:$0xff]  ;;  %v1144_v48 = vld [vmem:[#allocation2 + $0x139] sm:$0xff] }
  0x95   : > { %912 = vperm.xlu1 %2859, %v885_v51   ;;  %907 = vperm.xlu0 %2858, %v884_v52   ;;  %v1147_v51 = vld [vmem:[#allocation2 + $0x151] sm:$0xff]  ;;  %v1146_v52 = vld [vmem:[#allocation2 + $0x149] sm:$0xff] }
  0x99   : > { %922 = vperm.xlu1 %2859, %v887_v53   ;;  %917 = vperm.xlu0 %2858, %v886_v54  }
  0x9d   : > { %932 = vperm.xlu1 %2859, %v889_v55   ;;  %927 = vperm.xlu0 %2858, %v888_v56   ;;  %v1149_v55 = vld [vmem:[#allocation2 + $0x161] sm:$0xff]  ;;  %v1148_v56 = vld [vmem:[#allocation2 + $0x159] sm:$0xff] }
  0xa1   : > { %942 = vperm.xlu1 %2859, %v891_v57   ;;  %937 = vperm.xlu0 %2858, %v890_v58  }
  0xa5   : > { %990 = vperm.xlu1 %2859, %v971_v60   ;;  %985 = vperm.xlu0 %2858, %v970_v61   ;;  %v1150_v60 = vld [vmem:[#allocation2 + $0x169] sm:$0xff] }
  0xa8   : > { %v3071_v2 = vpop.permute.xlu1 %470  ;;  %v3073_v3 = vpop.permute.xlu0 %460 }
  0xa9   : > { %1000 = vperm.xlu1 %2859, %v973_v0   ;;  %995 = vperm.xlu0 %2858, %v972_v1   ;;  %v1152_v0 = vld [vmem:[#allocation2 + $0x179] sm:$0xff] }
  0xac   : > { %v3075_v6 = vpop.permute.xlu1 %475  ;;  %v3077_v7 = vpop.permute.xlu0 %465 }
  0xad   : > { %1010 = vperm.xlu1 %2859, %v975_v4   ;;  %1005 = vperm.xlu0 %2858, %v974_v5   ;;  %v220_v5 = vld [vmem:[%s2948_s24 + $0x120] sm:$0xff] }
  0xae   : > { %vm272_vm15 = vcmp.gt.f32.partialorder %v220_v5, 0.0 }
  0xb0   : > { %v3079_v10 = vpop.permute.xlu1 %485  ;;  %v3081_v11 = vpop.permute.xlu0 %480 }
  0xb1   : > { %1020 = vperm.xlu1 %2859, %v977_v8   ;;  %1015 = vperm.xlu0 %2858, %v976_v9   ;;  %v3130_v8 = vld [vmem:[#allocation2 + $0xda] sm:$0xff]  ;;  %v1231_v9 = vld [vmem:[#allocation2 + $0xd2] sm:$0xff] }
  0xb4   : > { %v3083_v14 = vpop.permute.xlu1 %495  ;;  %v3085_v15 = vpop.permute.xlu0 %490 }
  0xb5   : > { %1030 = vperm.xlu1 %2859, %v979_v12   ;;  %1025 = vperm.xlu0 %2858, %v978_v13   ;;  %v324_v12 = vmul.f32 0.2, %v220_v5 }
  0xb8   : > { %v3088_v20 = vpop.permute.xlu1 %505  ;;  %v3090_v21 = vpop.permute.xlu0 %500 }
  0xb9   : > { %1077 = vperm.xlu1 %2859, %v1058_v17   ;;  %1072 = vperm.xlu0 %2858, %v1057_v18   ;;  %v376_v17 = vsel %vm272_vm15, %v220_v5, %v324_v12  ;;  %v3138_v18 = vld [vmem:[#allocation2 + $0xea] sm:$0xff] }
  0xba   : > { %430 = vst.msk [vmem:[#allocation2 + $0x120] sm:$0xff] %vm392_vm0, %v376_v17 }
  0xbc   : > { %v3093_v25 = vpop.permute.xlu1 %553  ;;  %v3095_v26 = vpop.permute.xlu0 %548 }
  0xbd   : > { %1087 = vperm.xlu1 %2859, %v1060_v23   ;;  %1082 = vperm.xlu0 %2858, %v1059_v24   ;;  %v3148_v24 = vld [vmem:[#allocation2 + $0xfa] sm:$0xff] }
  0xc0   : > { %v3097_v29 = vpop.permute.xlu1 %563  ;;  %v3099_v30 = vpop.permute.xlu0 %558 }
  0xc1   : > { %1097 = vperm.xlu1 %2859, %v1062_v27   ;;  %1092 = vperm.xlu0 %2858, %v1061_v28   ;;  %v3150_v27 = vld [vmem:[#allocation2 + $0xf2] sm:$0xff] }
  0xc4   : > { %v3101_v33 = vpop.permute.xlu1 %573  ;;  %v3103_v35 = vpop.permute.xlu0 %568 }
  0xc5   : > { %1107 = vperm.xlu1 %2859, %v1064_v31   ;;  %1102 = vperm.xlu0 %2858, %v1063_v32   ;;  %v3158_v32 = vld [vmem:[#allocation2 + $0x10a] sm:$0xff] }
  0xc8   : > { %v3105_v44 = vpop.permute.xlu1 %583  ;;  %v3107_v46 = vpop.permute.xlu0 %578 }
  0xc9   : > { %1117 = vperm.xlu1 %2859, %v1066_v36   ;;  %1112 = vperm.xlu0 %2858, %v1065_v37   ;;  %v3160_v36 = vld [vmem:[#allocation2 + $0x102] sm:$0xff] }
  0xcc   : > { %v3109_v49 = vpop.permute.xlu1 %593  ;;  %v3111_v50 = vpop.permute.xlu0 %588 }
  0xcd   : > { %1164 = vperm.xlu1 %2859, %v1145_v47   ;;  %1159 = vperm.xlu0 %2858, %v1144_v48   ;;  %v1240_v48 = vld [vmem:[#allocation2 + $0x11a] sm:$0x3f] }
  0xd0   : > { %v3113_v53 = vpop.permute.xlu1 %640  ;;  %v3115_v54 = vpop.permute.xlu0 %635 }
  0xd1   : > { %1174 = vperm.xlu1 %2859, %v1147_v51   ;;  %1169 = vperm.xlu0 %2858, %v1146_v52   ;;  %v3168_v51 = vld [vmem:[#allocation2 + $0x112] sm:$0xff] }
  0xd4   : > { %v3117_v57 = vpop.permute.xlu1 %650  ;;  %v3119_v58 = vpop.permute.xlu0 %645 }
  0xd5   : > { %1184 = vperm.xlu1 %2859, %v1149_v55   ;;  %1179 = vperm.xlu0 %2858, %v1148_v56   ;;  %v233_v56 = vld [vmem:[%s2948_s24 + $0x188] sm:$0xff] }
  0xd6   : > { %vm285_vm1 = vcmp.gt.f32.partialorder %v233_v56, 0.0 }
  0xd8   : > { %v3121_v61 = vpop.permute.xlu1 %660  ;;  %v3123_v62 = vpop.permute.xlu0 %655 }
  0xd9   : > { %1194 = vperm.xlu1 %2859, %v1151_v59   ;;  %1189 = vperm.xlu0 %2858, %v1150_v60   ;;  %v337_v59 = vmul.f32 0.2, %v233_v56 }
  0xdc   : > { %v3125_v1 = vpop.permute.xlu1 %670  ;;  %v3127_v4 = vpop.permute.xlu0 %665 }
  0xdd   : > { %1204 = vperm.xlu1 %2859, %v1153_v63   ;;  %1199 = vperm.xlu0 %2858, %v1152_v0   ;;  %v389_v0 = vsel %vm285_vm1, %v233_v56, %v337_v59  ;;  %v221_v59 = vld [vmem:[%s2948_s24 + $0x128] sm:$0xff] }
  0xde   : > { %443 = vst.msk [vmem:[#allocation2 + $0x188] sm:$0xff] %vm392_vm0, %v389_v0  ;;  %v1405_v0 = vld [vmem:[#allocation2 + $0x72] sm:$0xff]  ;;  %vm273_vm2 = vcmp.gt.f32.partialorder %v221_v59, 0.0 }
  0xe0   : > { %v3132_v13 = vpop.permute.xlu1 %680  ;;  %v3134_v16 = vpop.permute.xlu0 %675 }
  0xe1   : > { %1251 = vperm.xlu1 %2859, %v3130_v8   ;;  %1246 = vperm.xlu0 %2858, %v1231_v9  }
  0xe4   : > { %v3142_v22 = vpop.permute.xlu1 %727  ;;  %v3144_v23 = vpop.permute.xlu0 %722 }
  0xe5   : > { %1261 = vperm.xlu1 %2859, %v3138_v18   ;;  %1256 = vperm.xlu0 %2858, %v3140_v19  }
  0xe8   : > { %v3152_v28 = vpop.permute.xlu1 %737  ;;  %v3154_v31 = vpop.permute.xlu0 %732 }
  0xe9   : > { %1271 = vperm.xlu1 %2859, %v3148_v24   ;;  %1266 = vperm.xlu0 %2858, %v3150_v27  }
  0xec   : > { %v3162_v37 = vpop.permute.xlu1 %747  ;;  %v3164_v47 = vpop.permute.xlu0 %742 }
  0xed   : > { %1281 = vperm.xlu1 %2859, %v3158_v32   ;;  %1276 = vperm.xlu0 %2858, %v3160_v36  }
  0xf0   : > { %v3170_v52 = vpop.permute.xlu1 %757  ;;  %v3172_v55 = vpop.permute.xlu0 %752 }
  0xf1   : > { %1291 = vperm.xlu1 %2859, %v1240_v48   ;;  %1286 = vperm.xlu0 %2858, %v3168_v51   ;;  %v1326_v48 = vld [vmem:[#allocation2 + $0x4a] sm:$0xff] }
  0xf4   : > { %v3176_v60 = vpop.permute.xlu1 %767  ;;  %v3178_v63 = vpop.permute.xlu0 %762 }
  0xf5   : > { %1338 = vperm.xlu1 %2859, %v3048_v39   ;;  %1333 = vperm.xlu0 %2858, %v3042_v34  }
  0xf8   : > { %v3183_v5 = vpop.permute.xlu1 %814  ;;  %v3185_v9 = vpop.permute.xlu0 %809 }
  0xf9   : > { %1348 = vperm.xlu1 %2859, %v3054_v41   ;;  %1343 = vperm.xlu0 %2858, %v3046_v38   ;;  %v1327_v41 = vld [vmem:[#allocation2 + $0x52] sm:$0x3f] }
  0xfc   : > { %v3189_v12 = vpop.permute.xlu1 %824  ;;  %v3191_v17 = vpop.permute.xlu0 %819 }
  0xfd   : > { %4098 = vst [vmem:[#allocation6_spill] sm:$0xff] %v3189_v12  ;;  %4099 = vst [vmem:[#allocation7_spill] sm:$0xff] %v3191_v17  ;;  %1358 = vperm.xlu1 %2859, %v3060_v43   ;;  %1353 = vperm.xlu0 %2858, %v3052_v40   ;;  %v1406_v43 = vld [vmem:[#allocation2 + $0x7a] sm:$0xff]  ;;  %v325_v40 = vmul.f32 0.2, %v221_v59 }
 0x100   : > { %v3195_v34 = vpop.permute.xlu1 %834  ;;  %v3197_v39 = vpop.permute.xlu0 %829 }
 0x101   : > { %4100 = vst [vmem:[#allocation8_spill] sm:$0xff] %v3195_v34  ;;  %4101 = vst [vmem:[#allocation9_spill] sm:$0xff] %v3197_v39  ;;  %1368 = vperm.xlu1 %2859, %v3064_v45   ;;  %1363 = vperm.xlu0 %2858, %v3058_v42   ;;  %v377_v45 = vsel %vm273_vm2, %v221_v59, %v325_v40  ;;  %v1408_v42 = vld [vmem:[#allocation2 + $0x8a] sm:$0xff] }
 0x102   : > { %431 = vst.msk [vmem:[#allocation2 + $0x128] sm:$0xff] %vm392_vm0, %v377_v45  ;;  %v1412_v59 = vld [vmem:[#allocation2 + $0xaa] sm:$0xff]  ;;  %v1414_v45 = vld [vmem:[#allocation2 + $0xba] sm:$0x3f] }
 0x104   : > { %v3201_v56 = vpop.permute.xlu1 %844  ;;  %v3203_v38 = vpop.permute.xlu0 %839 }
 0x105   : > { %4102 = vst [vmem:[#allocation10_spill] sm:$0xff] %v3201_v56  ;;  %4103 = vst [vmem:[#allocation11_spill] sm:$0xff] %v3203_v38  ;;  %1378 = vperm.xlu1 %2859, %v1327_v41   ;;  %1373 = vperm.xlu0 %2858, %v1326_v48   ;;  %v1407_v56 = vld [vmem:[#allocation2 + $0x82] sm:$0xff]  ;;  %v1410_v48 = vld [vmem:[#allocation2 + $0x9a] sm:$0xff] }
 0x106   : > { %v1409_v38 = vld [vmem:[#allocation2 + $0x92] sm:$0xff] }
 0x108   : > { %v3206_v34 = vpop.permute.xlu1 %854  ;;  %v3208_v39 = vpop.permute.xlu0 %849 }
 0x109   : > { %4104 = vst [vmem:[#allocation12_spill] sm:$0xff] %v3206_v34  ;;  %4105 = vst [vmem:[#allocation13_spill] sm:$0xff] %v3208_v39  ;;  %1425 = vperm.xlu1 %2859, %v1406_v43   ;;  %1420 = vperm.xlu0 %2858, %v1405_v0   ;;  %v1411_v43 = vld [vmem:[#allocation2 + $0xa2] sm:$0xff] }
 0x10c   : > { %v3211_v17 = vpop.permute.xlu1 %902  ;;  %v3213_v41 = vpop.permute.xlu0 %897 }
 0x10d   : > { %4106 = vst [vmem:[#allocation14_spill] sm:$0xff] %v3211_v17  ;;  %4107 = vst [vmem:[#allocation15_spill] sm:$0xff] %v3213_v41  ;;  %1435 = vperm.xlu1 %2859, %v1408_v42   ;;  %1430 = vperm.xlu0 %2858, %v1407_v56   ;;  %v1413_v42 = vld [vmem:[#allocation2 + $0xb2] sm:$0xff] }
 0x110   : > { %v3215_v12 = vpop.permute.xlu1 %912  ;;  %v3217_v34 = vpop.permute.xlu0 %907 }
 0x111   : > { %4108 = vst [vmem:[#allocation16_spill] sm:$0xff] %v3215_v12  ;;  %4109 = vst [vmem:[#allocation17_spill] sm:$0xff] %v3217_v34  ;;  %1445 = vperm.xlu1 %2859, %v1410_v48   ;;  %1440 = vperm.xlu0 %2858, %v1409_v38   ;;  %v234_v12 = vld [vmem:[%s2948_s24 + $0x190] sm:$0xff] }
 0x112   : > { %v1493_v34 = vld [vmem:[#allocation2 + $0x13] sm:$0xff]  ;;  %v1492_v48 = vld [vmem:[#allocation2 + $0xb] sm:$0xff]  ;;  %v338_v38 = vmul.f32 0.2, %v234_v12  ;;  %vm286_vm3 = vcmp.gt.f32.partialorder %v234_v12, 0.0 }
 0x114   : > { %v3219_v0 = vpop.permute.xlu1 %922  ;;  %v3221_v40 = vpop.permute.xlu0 %917 }
 0x115   : > { %4110 = vst [vmem:[#allocation18_spill] sm:$0xff] %v3219_v0  ;;  %4111 = vst [vmem:[#allocation19_spill] sm:$0xff] %v3221_v40  ;;  %1455 = vperm.xlu1 %2859, %v1412_v59   ;;  %1450 = vperm.xlu0 %2858, %v1411_v43   ;;  %v390_v40 = vsel %vm286_vm3, %v234_v12, %v338_v38  ;;  %v1495_v59 = vld [vmem:[#allocation2 + $0x23] sm:$0xff]  ;;  %v1494_v43 = vld [vmem:[#allocation2 + $0x1b] sm:$0xff] }
 0x116   : > { %444 = vst.msk [vmem:[#allocation2 + $0x190] sm:$0xff] %vm392_vm0, %v390_v40  ;;  %v1499_v12 = vld [vmem:[#allocation2 + $0x43] sm:$0xff]  ;;  %v1501_v38 = vld [vmem:[#allocation2 + $0x53] sm:$0x3f] }
 0x118   : > { %v3223_v56 = vpop.permute.xlu1 %932  ;;  %v3225_v41 = vpop.permute.xlu0 %927 }
 0x119   : > { %4112 = vst [vmem:[#allocation20_spill] sm:$0xff] %v3223_v56  ;;  %4113 = vst [vmem:[#allocation21_spill] sm:$0xff] %v3225_v41  ;;  %1465 = vperm.xlu1 %2859, %v1414_v45   ;;  %1460 = vperm.xlu0 %2858, %v1413_v42   ;;  %v1497_v42 = vld [vmem:[#allocation2 + $0x33] sm:$0xff]  ;;  %v1496_v41 = vld [vmem:[#allocation2 + $0x2b] sm:$0xff] }
 0x11c   : > { %v3228_v17 = vpop.permute.xlu1 %942  ;;  %v3230_v0 = vpop.permute.xlu0 %937 }
 0x11d   : > { %4114 = vst [vmem:[#allocation22_spill] sm:$0xff] %v3228_v17  ;;  %4115 = vst [vmem:[#allocation23_spill] sm:$0xff] %v3230_v0  ;;  %1512 = vperm.xlu1 %2859, %v1493_v34   ;;  %1507 = vperm.xlu0 %2858, %v1492_v48   ;;  %v1498_v34 = vld [vmem:[#allocation2 + $0x3b] sm:$0xff] }
 0x120   : > { %v3233_v56 = vpop.permute.xlu1 %990  ;;  %v3235_v45 = vpop.permute.xlu0 %985 }
 0x121   : > { %4116 = vst [vmem:[#allocation24_spill] sm:$0xff] %v3233_v56  ;;  %4117 = vst [vmem:[#allocation25_spill] sm:$0xff] %v3235_v45  ;;  %1522 = vperm.xlu1 %2859, %v1495_v59   ;;  %1517 = vperm.xlu0 %2858, %v1494_v43   ;;  %v1500_v45 = vld [vmem:[#allocation2 + $0x4b] sm:$0xff] }
 0x124   : > { %v3237_v39 = vpop.permute.xlu1 %1000  ;;  %v3239_v17 = vpop.permute.xlu0 %995 }
 0x125   : > { %4118 = vst [vmem:[#allocation26_spill] sm:$0xff] %v3237_v39  ;;  %4119 = vst [vmem:[#allocation27_spill] sm:$0xff] %v3239_v17  ;;  %1532 = vperm.xlu1 %2859, %v1497_v42   ;;  %1527 = vperm.xlu0 %2858, %v1496_v41   ;;  %v1580_v39 = vld [vmem:[#allocation2 + $0x7b] sm:$0xff]  ;;  %v1579_v17 = vld [vmem:[#allocation2 + $0x73] sm:$0xff] }
 0x128   : > { %v3241_v48 = vpop.permute.xlu1 %1010  ;;  %v3243_v40 = vpop.permute.xlu0 %1005 }
 0x129   : > { %4120 = vst [vmem:[#allocation28_spill] sm:$0xff] %v3241_v48  ;;  %4121 = vst [vmem:[#allocation29_spill] sm:$0xff] %v3243_v40  ;;  %1542 = vperm.xlu1 %2859, %v1499_v12   ;;  %1537 = vperm.xlu0 %2858, %v1498_v34   ;;  %v1582_v48 = vld [vmem:[#allocation2 + $0x8b] sm:$0xff]  ;;  %v1581_v40 = vld [vmem:[#allocation2 + $0x83] sm:$0xff] }
 0x12c   : > { %v3245_v59 = vpop.permute.xlu1 %1020  ;;  %v3247_v43 = vpop.permute.xlu0 %1015 }
 0x12d   : > { %4122 = vst [vmem:[#allocation30_spill] sm:$0xff] %v3245_v59  ;;  %4123 = vst [vmem:[#allocation31_spill] sm:$0xff] %v3247_v43  ;;  %1552 = vperm.xlu1 %2859, %v1501_v38   ;;  %1547 = vperm.xlu0 %2858, %v1500_v45   ;;  %v1584_v59 = vld [vmem:[#allocation2 + $0x9b] sm:$0xff]  ;;  %v1583_v43 = vld [vmem:[#allocation2 + $0x93] sm:$0xff] }
 0x130   : > { %v3249_v42 = vpop.permute.xlu1 %1030  ;;  %v3251_v41 = vpop.permute.xlu0 %1025 }
 0x131   : > { %4124 = vst [vmem:[#allocation32_spill] sm:$0xff] %v3249_v42  ;;  %4125 = vst [vmem:[#allocation33_spill] sm:$0xff] %v3251_v41  ;;  %1599 = vperm.xlu1 %2859, %v1580_v39   ;;  %1594 = vperm.xlu0 %2858, %v1579_v17   ;;  %v1586_v41 = vld [vmem:[#allocation2 + $0xab] sm:$0xff]  ;;  %v1585_v39 = vld [vmem:[#allocation2 + $0xa3] sm:$0xff] }
 0x134   : > { %v3253_v12 = vpop.permute.xlu1 %1077  ;;  %v3255_v34 = vpop.permute.xlu0 %1072 }
 0x135   : > { %4126 = vst [vmem:[#allocation34_spill] sm:$0xff] %v3253_v12  ;;  %4127 = vst [vmem:[#allocation35_spill] sm:$0xff] %v3255_v34  ;;  %1609 = vperm.xlu1 %2859, %v1582_v48   ;;  %1604 = vperm.xlu0 %2858, %v1581_v40   ;;  %v1588_v34 = vld [vmem:[#allocation2 + $0xbb] sm:$0x3f]  ;;  %v1587_v48 = vld [vmem:[#allocation2 + $0xb3] sm:$0xff] }
 0x138   : > { %v3257_v38 = vpop.permute.xlu1 %1087  ;;  %v3259_v45 = vpop.permute.xlu0 %1082 }
 0x139   : > { %4128 = vst [vmem:[#allocation36_spill] sm:$0xff] %v3257_v38  ;;  %4129 = vst [vmem:[#allocation37_spill] sm:$0xff] %v3259_v45  ;;  %1619 = vperm.xlu1 %2859, %v1584_v59   ;;  %1614 = vperm.xlu0 %2858, %v1583_v43   ;;  %v196_v38 = vld [vmem:[%s2948_s24 + $0x60] sm:$0xf]  ;;  %v3270_v45 = vld [vmem:[#allocation2 + $0x14] sm:$0xff] }
 0x13a   : > { %4134 = vst [vmem:[#allocation42_spill] sm:$0xff] %v3270_v45  ;;  %v1666_v59 = vld [vmem:[#allocation2 + $0xc] sm:$0xff]  ;;  %v300_v43 = vmul.f32 0.2, %v196_v38  ;;  %vm248_vm0 = vcmp.gt.f32.partialorder %v196_v38, 0.0 }
 0x13c   : > { %v3261_v17 = vpop.permute.xlu1 %1097  ;;  %v3263_v42 = vpop.permute.xlu0 %1092 }
 0x13d   : > { %4130 = vst [vmem:[#allocation38_spill] sm:$0xff] %v3261_v17  ;;  %4131 = vst [vmem:[#allocation39_spill] sm:$0xff] %v3263_v42  ;;  %1629 = vperm.xlu1 %2859, %v1586_v41   ;;  %1624 = vperm.xlu0 %2858, %v1585_v39   ;;  %v352_v41 = vsel %vm248_vm0, %v196_v38, %v300_v43  ;;  %v3278_v39 = vld [vmem:[#allocation2 + $0x24] sm:$0xff]  ;;  %v3290_v38 = vld [vmem:[#allocation2 + $0x2c] sm:$0xff] }
 0x13e   : > { %406 = vst.msk [vmem:[#allocation2 + $0x60] sm:$0xf] %vm405_vm4, %v352_v41  ;;  %4137 = vst [vmem:[#allocation45_spill] sm:$0xff] %v3278_v39  ;;  %v3298_v41 = vld [vmem:[#allocation2 + $0x44] sm:$0xff] }
 0x13f   : > { %4142 = vst [vmem:[#allocation50_spill] sm:$0xff] %v3290_v38  ;;  %4145 = vst [vmem:[#allocation53_spill] sm:$0xff] %v3298_v41  ;;  %v209_v42 = vld [vmem:[%s2948_s24 + $0xc8] sm:$0xf] }
 0x140   : > { %v3265_v40 = vpop.permute.xlu1 %1107  ;;  %v3267_v12 = vpop.permute.xlu0 %1102  ;;  %vm261_vm5 = vcmp.gt.f32.partialorder %v209_v42, 0.0 }
 0x141   : > { %4132 = vst [vmem:[#allocation40_spill] sm:$0xff] %v3265_v40  ;;  %4133 = vst [vmem:[#allocation41_spill] sm:$0xff] %v3267_v12  ;;  %1639 = vperm.xlu1 %2859, %v1588_v34   ;;  %1634 = vperm.xlu0 %2858, %v1587_v48   ;;  %v3280_v34 = vld [vmem:[#allocation2 + $0x1c] sm:$0xff]  ;;  %v3308_v40 = vld [vmem:[#allocation2 + $0x4c] sm:$0xff] }
 0x142   : > { %4138 = vst [vmem:[#allocation46_spill] sm:$0xff] %v3280_v34  ;;  %4149 = vst [vmem:[#allocation57_spill] sm:$0xff] %v3308_v40 }
 0x144   : > { %v3272_v56 = vpop.permute.xlu1 %1117  ;;  %v3274_v17 = vpop.permute.xlu0 %1112 }
 0x145   : > { %4135 = vst [vmem:[#allocation43_spill] sm:$0xff] %v3272_v56  ;;  %4136 = vst [vmem:[#allocation44_spill] sm:$0xff] %v3274_v17  ;;  %1686 = vperm.xlu1 %2859, %v3270_v45   ;;  %1681 = vperm.xlu0 %2858, %v1666_v59   ;;  %v3288_v17 = vld [vmem:[#allocation2 + $0x34] sm:$0xff]  ;;  %v2019_v45 = vld [vmem:[#allocation2 + $0x16b] sm:$0xff] }
 0x146   : > { %4141 = vst [vmem:[#allocation49_spill] sm:$0xff] %v3288_v17 }
 0x148   : > { %v3282_v48 = vpop.permute.xlu1 %1164  ;;  %v3284_v12 = vpop.permute.xlu0 %1159 }
 0x149   : > { %4139 = vst [vmem:[#allocation47_spill] sm:$0xff] %v3282_v48  ;;  %4140 = vst [vmem:[#allocation48_spill] sm:$0xff] %v3284_v12  ;;  %1696 = vperm.xlu1 %2859, %v3278_v39   ;;  %1691 = vperm.xlu0 %2858, %v3280_v34   ;;  %v3300_v12 = vld [vmem:[#allocation2 + $0x3c] sm:$0xff]  ;;  %v313_v39 = vmul.f32 0.2, %v209_v42 }
 0x14a   : > { %4146 = vst [vmem:[#allocation54_spill] sm:$0xff] %v3300_v12  ;;  %v2018_v34 = vld [vmem:[#allocation2 + $0x163] sm:$0xff] }
 0x14c   : > { %v3292_v43 = vpop.permute.xlu1 %1174  ;;  %v3294_v59 = vpop.permute.xlu0 %1169 }
 0x14d   : > { %4143 = vst [vmem:[#allocation51_spill] sm:$0xff] %v3292_v43  ;;  %4144 = vst [vmem:[#allocation52_spill] sm:$0xff] %v3294_v59  ;;  %1706 = vperm.xlu1 %2859, %v3288_v17   ;;  %1701 = vperm.xlu0 %2858, %v3290_v38   ;;  %v1675_v43 = vld [vmem:[#allocation2 + $0x54] sm:$0x3f]  ;;  %v2772_v38 = vld [vmem:[%s4082_s1 + $0x7] sm:$0x1] }
 0x150   : > { %v3302_v48 = vpop.permute.xlu1 %1184  ;;  %v3304_v56 = vpop.permute.xlu0 %1179 }
 0x151   : > { %4147 = vst [vmem:[#allocation55_spill] sm:$0xff] %v3302_v48  ;;  %4148 = vst [vmem:[#allocation56_spill] sm:$0xff] %v3304_v56  ;;  %1716 = vperm.xlu1 %2859, %v3298_v41   ;;  %1711 = vperm.xlu0 %2858, %v3300_v12   ;;  %v365_v41 = vsel %vm261_vm5, %v209_v42, %v313_v39  ;;  %v1762_v42 = vld [vmem:[#allocation2 + $0x122] sm:$0x3f] }
 0x152   : > { %419 = vst.msk [vmem:[#allocation2 + $0xc8] sm:$0xf] %vm405_vm4, %v365_v41  ;;  %v1841_v41 = vld [vmem:[#allocation2 + $0x14a] sm:$0xff] }
 0x154   : > { %v3310_v59 = vpop.permute.xlu1 %1194  ;;  %v3312_v17 = vpop.permute.xlu0 %1189 }
 0x155   : > { %4150 = vst [vmem:[#allocation58_spill] sm:$0xff] %v3310_v59  ;;  %4151 = vst [vmem:[#allocation59_spill] sm:$0xff] %v3312_v17  ;;  %1726 = vperm.xlu1 %2859, %v1675_v43   ;;  %1721 = vperm.xlu0 %2858, %v3308_v40  }
 0x158   : > { %v3316_v48 = vpop.permute.xlu1 %1204  ;;  %v3318_v56 = vpop.permute.xlu0 %1199 }
 0x159   : > { %4152 = vst [vmem:[#allocation60_spill] sm:$0xff] %v3316_v48  ;;  %4153 = vst [vmem:[#allocation61_spill] sm:$0xff] %v3318_v56  ;;  %1773 = vperm.xlu1 %2859, %v3140_v19   ;;  %1768 = vperm.xlu0 %2858, %v3130_v8  }
 0x15c   : > { %v3323_v59 = vpop.permute.xlu1 %1251  ;;  %v3325_v17 = vpop.permute.xlu0 %1246 }
 0x15d   : > { %4154 = vst [vmem:[#allocation62_spill] sm:$0xff] %v3323_v59  ;;  %4155 = vst [vmem:[#allocation63_spill] sm:$0xff] %v3325_v17  ;;  %1783 = vperm.xlu1 %2859, %v3150_v27   ;;  %1778 = vperm.xlu0 %2858, %v3138_v18   ;;  %v1761_v27 = vld [vmem:[#allocation2 + $0x11a] sm:$0xff]  ;;  %v2770_v17 = vld [vmem:[%s4082_s1 + $0x5] sm:$0x1] }
 0x15e   : > { %v2771_v59 = vld [vmem:[%s4082_s1 + $0x6] sm:$0x1] }
 0x15f   : > { %v982_v12 = vunpack.c.l.bf16 %v2771_v59  ;;  %v1069_v59 = vunpack.c.l.bf16 %v2772_v38 }
 0x160   : > { %v3329_v43 = vpop.permute.xlu1 %1261  ;;  %v3331_v48 = vpop.permute.xlu0 %1256 }
 0x161   : > { %4156 = vst [vmem:[#allocation64_spill] sm:$0xff] %v3329_v43  ;;  %4157 = vst [vmem:[#allocation65_spill] sm:$0xff] %v3331_v48  ;;  %1793 = vperm.xlu1 %2859, %v3160_v36   ;;  %1788 = vperm.xlu0 %2858, %v3148_v24   ;;  %v1840_v36 = vld [vmem:[#allocation2 + $0x142] sm:$0xff] }
 0x164   : > { %v3335_v19 = vpop.permute.xlu1 %1271  ;;  %v3337_v8 = vpop.permute.xlu0 %1266 }
 0x165   : > { %4158 = vst [vmem:[#allocation66_spill] sm:$0xff] %v3335_v19  ;;  %4159 = vst [vmem:[#allocation67_spill] sm:$0xff] %v3337_v8  ;;  %1803 = vperm.xlu1 %2859, %v3168_v51   ;;  %1798 = vperm.xlu0 %2858, %v3158_v32   ;;  %v1843_v8 = vld [vmem:[#allocation2 + $0x15a] sm:$0xff]  ;;  %v1842_v51 = vld [vmem:[#allocation2 + $0x152] sm:$0xff] }
 0x168   : > { %v3341_v39 = vpop.permute.xlu1 %1281  ;;  %v3343_v18 = vpop.permute.xlu0 %1276 }
 0x169   : > { %4160 = vst [vmem:[#allocation68_spill] sm:$0xff] %v3341_v39  ;;  %4161 = vst [vmem:[#allocation69_spill] sm:$0xff] %v3343_v18  ;;  %1813 = vperm.xlu1 %2859, %v1762_v42   ;;  %1808 = vperm.xlu0 %2858, %v1761_v27   ;;  %v1845_v39 = vld [vmem:[#allocation2 + $0x16a] sm:$0xff]  ;;  %v1844_v18 = vld [vmem:[#allocation2 + $0x162] sm:$0xff] }
 0x16c   : > { %v3345_v48 = vpop.permute.xlu1 %1291  ;;  %v3347_v24 = vpop.permute.xlu0 %1286 }
 0x16d   : > { %4162 = vst [vmem:[#allocation70_spill] sm:$0xff] %v3345_v48  ;;  %4163 = vst [vmem:[#allocation71_spill] sm:$0xff] %v3347_v24  ;;  %1860 = vperm.xlu1 %2859, %v1841_v41   ;;  %1855 = vperm.xlu0 %2858, %v1840_v36   ;;  %v1847_v48 = vld [vmem:[#allocation2 + $0x17a] sm:$0xff]  ;;  %v1846_v24 = vld [vmem:[#allocation2 + $0x172] sm:$0xff] }
 0x170   : > { %v3349_v19 = vpop.permute.xlu1 %1338  ;;  %v3351_v32 = vpop.permute.xlu0 %1333 }
 0x171   : > { %4164 = vst [vmem:[#allocation72_spill] sm:$0xff] %v3349_v19  ;;  %4165 = vst [vmem:[#allocation73_spill] sm:$0xff] %v3351_v32  ;;  %1870 = vperm.xlu1 %2859, %v1843_v8   ;;  %1865 = vperm.xlu0 %2858, %v1842_v51   ;;  %v1849_v19 = vld [vmem:[#allocation2 + $0x18a] sm:$0x3f]  ;;  %v1848_v32 = vld [vmem:[#allocation2 + $0x182] sm:$0xff] }
 0x174   : > { %v3353_v42 = vpop.permute.xlu1 %1348  ;;  %v3355_v27 = vpop.permute.xlu0 %1343 }
 0x175   : > { %4166 = vst [vmem:[#allocation74_spill] sm:$0xff] %v3353_v42  ;;  %4167 = vst [vmem:[#allocation75_spill] sm:$0xff] %v3355_v27  ;;  %1880 = vperm.xlu1 %2859, %v1845_v39   ;;  %1875 = vperm.xlu0 %2858, %v1844_v18   ;;  %v1928_v42 = vld [vmem:[#allocation2 + $0xe3] sm:$0xff]  ;;  %v1927_v27 = vld [vmem:[#allocation2 + $0xdb] sm:$0xff] }
 0x178   : > { %v3357_v41 = vpop.permute.xlu1 %1358  ;;  %v3359_v36 = vpop.permute.xlu0 %1353 }
 0x179   : > { %4168 = vst [vmem:[#allocation76_spill] sm:$0xff] %v3357_v41  ;;  %4169 = vst [vmem:[#allocation77_spill] sm:$0xff] %v3359_v36  ;;  %1890 = vperm.xlu1 %2859, %v1847_v48   ;;  %1885 = vperm.xlu0 %2858, %v1846_v24   ;;  %v1930_v41 = vld [vmem:[#allocation2 + $0xf3] sm:$0xff]  ;;  %v1929_v36 = vld [vmem:[#allocation2 + $0xeb] sm:$0xff] }
 0x17c   : > { %v3361_v8 = vpop.permute.xlu1 %1368  ;;  %v3363_v51 = vpop.permute.xlu0 %1363 }
 0x17d   : > { %4170 = vst [vmem:[#allocation78_spill] sm:$0xff] %v3361_v8  ;;  %4171 = vst [vmem:[#allocation79_spill] sm:$0xff] %v3363_v51  ;;  %1900 = vperm.xlu1 %2859, %v1849_v19   ;;  %1895 = vperm.xlu0 %2858, %v1848_v32   ;;  %v1932_v8 = vld [vmem:[#allocation2 + $0x103] sm:$0xff]  ;;  %v1931_v51 = vld [vmem:[#allocation2 + $0xfb] sm:$0xff] }
 0x180   : > { %v3365_v39 = vpop.permute.xlu1 %1378  ;;  %v3367_v18 = vpop.permute.xlu0 %1373 }
 0x181   : > { %4172 = vst [vmem:[#allocation80_spill] sm:$0xff] %v3365_v39  ;;  %4173 = vst [vmem:[#allocation81_spill] sm:$0xff] %v3367_v18  ;;  %1947 = vperm.xlu1 %2859, %v1928_v42   ;;  %1942 = vperm.xlu0 %2858, %v1927_v27   ;;  %v1934_v39 = vld [vmem:[#allocation2 + $0x113] sm:$0xff]  ;;  %v1933_v18 = vld [vmem:[#allocation2 + $0x10b] sm:$0xff] }
 0x184   : > { %v3369_v48 = vpop.permute.xlu1 %1425  ;;  %v3371_v24 = vpop.permute.xlu0 %1420 }
 0x185   : > { %4174 = vst [vmem:[#allocation82_spill] sm:$0xff] %v3369_v48  ;;  %4175 = vst [vmem:[#allocation83_spill] sm:$0xff] %v3371_v24  ;;  %1957 = vperm.xlu1 %2859, %v1930_v41   ;;  %1952 = vperm.xlu0 %2858, %v1929_v36   ;;  %v508_v48 = vlaneseq  ;;  %v1936_v24 = vld [vmem:[#allocation2 + $0x123] sm:$0x3f]  ;;  %v1935_v41 = vld [vmem:[#allocation2 + $0x11b] sm:$0xff] }
 0x188   : > { %v3373_v19 = vpop.permute.xlu1 %1435  ;;  %v3375_v32 = vpop.permute.xlu0 %1430 }
 0x189   : > { %4176 = vst [vmem:[#allocation84_spill] sm:$0xff] %v3373_v19  ;;  %4177 = vst [vmem:[#allocation85_spill] sm:$0xff] %v3375_v32  ;;  %1967 = vperm.xlu1 %2859, %v1932_v8   ;;  %1962 = vperm.xlu0 %2858, %v1931_v51   ;;  %v509_v32 = vshrl.u32 %v508_v48, 7  ;;  %v2015_v8 = vld [vmem:[#allocation2 + $0x14b] sm:$0xff]  ;;  %v2014_v51 = vld [vmem:[#allocation2 + $0x143] sm:$0xff] }
 0x18a   : > { %v2768_v48 = vld [vmem:[%s4082_s1 + $0x3] sm:$0x1]  ;;  %v2016_v19 = vld [vmem:[#allocation2 + $0x153] sm:$0xff] }
 0x18c   : > { %v3377_v42 = vpop.permute.xlu1 %1445  ;;  %v3379_v27 = vpop.permute.xlu0 %1440 }
 0x18d   : > { %4178 = vst [vmem:[#allocation86_spill] sm:$0xff] %v3377_v42  ;;  %4179 = vst [vmem:[#allocation87_spill] sm:$0xff] %v3379_v27  ;;  %1977 = vperm.xlu1 %2859, %v1934_v39   ;;  %1972 = vperm.xlu0 %2858, %v1933_v18   ;;  %v456_v42 = vld [vmem:[%s4082_s1] sm:$0x1]  ;;  %v2766_v39 = vld [vmem:[%s4082_s1 + $0x1] sm:$0x1] }
 0x190   : > { %v3381_v36 = vpop.permute.xlu1 %1455  ;;  %v3383_v43 = vpop.permute.xlu0 %1450 }
 0x191   : > { %4180 = vst [vmem:[#allocation88_spill] sm:$0xff] %v3381_v36  ;;  %4181 = vst [vmem:[#allocation89_spill] sm:$0xff] %v3383_v43  ;;  %1987 = vperm.xlu1 %2859, %v1936_v24   ;;  %1982 = vperm.xlu0 %2858, %v1935_v41   ;;  %v2767_v24 = vld [vmem:[%s4082_s1 + $0x2] sm:$0x1]  ;;  %v457_v41 = vunpack.c.l.bf16 %v456_v42  ;;  %v3401_v43 = vsub.s32 0, %v509_v32 }
 0x192   : > { %v2769_v36 = vld [vmem:[%s4082_s1 + $0x4] sm:$0x1]  ;;  %v632_v32 = vunpack.c.l.bf16 %v2767_v24 }
 0x193   : > { %4184 = vst [vmem:[#allocation92_spill] sm:$0xff] %v3401_v43  ;;  %v806_v56 = vunpack.c.l.bf16 %v2769_v36  ;;  %v511_v40 = vrot.slane %v457_v41, %v3401_v43  ;;  %v2021_v41 = vld [vmem:[#allocation2 + $0x17b] sm:$0xff] }
 0x194   : > { %v3391_v18 = vpop.permute.xlu1 %1465  ;;  %v3393_v27 = vpop.permute.xlu0 %1460  ;;  %v3426_v36 = vrot.slane %v632_v32, %v3401_v43  ;;  %v2020_v32 = vld [vmem:[#allocation2 + $0x173] sm:$0xff] }
 0x195   : > { %4182 = vst [vmem:[#allocation90_spill] sm:$0xff] %v3391_v18  ;;  %4183 = vst [vmem:[#allocation91_spill] sm:$0xff] %v3393_v27  ;;  %2034 = vperm.xlu1 %2859, %v2015_v8   ;;  %2029 = vperm.xlu0 %2858, %v2014_v51   ;;  %v2017_v18 = vld [vmem:[#allocation2 + $0x15b] sm:$0xff]  ;;  %v545_v27 = vunpack.c.l.bf16 %v2766_v39  ;;  %v719_v51 = vunpack.c.l.bf16 %v2768_v48  ;;  %v894_v39 = vunpack.c.l.bf16 %v2770_v17  ;;  %v3432_v17 = vrot.slane %v806_v56, %v3401_v43 }
 0x196   : > { %v3440_v48 = vrot.slane %v982_v12, %v3401_v43  ;;  %v513_v56 = vmul.f32 %v511_v40, %v3077_v7  ;;  %v519_v7 = vmul.f32 %v511_v40, %v3083_v14 }
 0x197   : > { %v599_v0 = vrot.slane %v545_v27, %v3401_v43  ;;  %v512_v27 = vmul.f32 %v511_v40, %v3073_v3  ;;  %v3437_v24 = vrot.slane %v894_v39, %v3401_v43  ;;  %v517_v3 = vmul.f32 %v511_v40, %v3079_v10 }
 0x198   : > { %v3412_v8 = vpop.permute.xlu1 %1512  ;;  %v3414_v42 = vpop.permute.xlu0 %1507  ;;  %4190 = vst [vmem:[#allocation98_spill] sm:$0xff] %v3440_v48  ;;  %v518_v10 = vmul.f32 %v511_v40, %v3085_v15 }
 0x199   : > { %4185 = vst [vmem:[#allocation93_spill] sm:$0xff] %v3412_v8  ;;  %4186 = vst [vmem:[#allocation94_spill] sm:$0xff] %v3414_v42  ;;  %2044 = vperm.xlu1 %2859, %v2017_v18   ;;  %2039 = vperm.xlu0 %2858, %v2016_v19   ;;  %v3429_v19 = vrot.slane %v719_v51, %v3401_v43  ;;  %v514_v18 = vmul.f32 %v511_v40, %v3071_v2  ;;  %v2773_v2 = vld [vmem:[%s4082_s1 + $0x8] sm:$0x1] }
 0x19a   : > { %4189 = vst [vmem:[#allocation97_spill] sm:$0xff] %v3437_v24  ;;  %v515_v51 = vmul.f32 %v511_v40, %v3075_v6  ;;  %v601_v38 = vmul.f32 %v599_v0, %v3093_v25  ;;  %v603_v12 = vmul.f32 %v599_v0, %v3097_v29  ;;  %v602_v39 = vmul.f32 %v599_v0, %v3099_v30 }
 0x19b   : > { %v605_v25 = vmul.f32 %v599_v0, %v3101_v33  ;;  %v604_v29 = vmul.f32 %v599_v0, %v3103_v35  ;;  %v1156_v30 = vunpack.c.l.bf16 %v2773_v2  ;;  %v607_v33 = vmul.f32 %v599_v0, %v3105_v44  ;;  %v2774_v44 = vld [vmem:[%s4082_s1 + $0x9] sm:$0x1] }
 0x19c   : > { %v3421_v8 = vpop.permute.xlu1 %1522  ;;  %v3423_v42 = vpop.permute.xlu0 %1517  ;;  %v611_v48 = vadd.f32 %v601_v38, %v513_v56  ;;  %v613_v24 = vadd.f32 %v603_v12, %v515_v51  ;;  %v608_v2 = vmul.f32 %v599_v0, %v3111_v50  ;;  %v2102_v50 = vld [vmem:[#allocation2 + $0xe4] sm:$0xff]  ;;  %v1243_v56 = vunpack.c.l.bf16 %v2774_v44 }
 0x19d   : > { %4187 = vst [vmem:[#allocation95_spill] sm:$0xff] %v3421_v8  ;;  %4188 = vst [vmem:[#allocation96_spill] sm:$0xff] %v3423_v42  ;;  %2054 = vperm.xlu1 %2859, %v2019_v45   ;;  %2049 = vperm.xlu0 %2858, %v2018_v34   ;;  %v600_v45 = vmul.f32 %v599_v0, %v3095_v26  ;;  %v516_v34 = vmul.f32 %v511_v40, %v3081_v11  ;;  %v2023_v8 = vld [vmem:[#allocation2 + $0x18b] sm:$0x3f] }
 0x19e   : > { %v3460_v26 = vrot.slane %v1069_v59, %v3401_v43  ;;  %v521_v11 = vmul.f32 %v511_v40, %v3088_v20  ;;  %v612_v59 = vadd.f32 %v602_v39, %v514_v18  ;;  %v615_v35 = vadd.f32 %v605_v25, %v517_v3  ;;  %v2104_v39 = vld [vmem:[#allocation2 + $0xf4] sm:$0xff] }
 0x19f   : > { %v610_v14 = vadd.f32 %v600_v45, %v512_v27  ;;  %v3484_v18 = vrot.slane %v1156_v30, %v3401_v43  ;;  %v617_v27 = vadd.f32 %v607_v33, %v519_v7  ;;  %v2103_v7 = vld [vmem:[#allocation2 + $0xec] sm:$0xff] }
 0x1a0   : > { %v3453_v42 = vpop.permute.xlu1 %1532  ;;  %v3455_v6 = vpop.permute.xlu0 %1527 }
 0x1a1   : > { %4191 = vst [vmem:[#allocation99_spill] sm:$0xff] %v3453_v42  ;;  %4192 = vst [vmem:[#allocation100_spill] sm:$0xff] %v3455_v6  ;;  %2064 = vperm.xlu1 %2859, %v2021_v41   ;;  %2059 = vperm.xlu0 %2858, %v2020_v32   ;;  %v2022_v42 = vld [vmem:[#allocation2 + $0x183] sm:$0xff]  ;;  %v520_v6 = vmul.f32 %v511_v40, %v3090_v21  ;;  %v606_v41 = vmul.f32 %v599_v0, %v3107_v46 }
 0x1a2   : > { %v609_v32 = vmul.f32 %v599_v0, %v3109_v49  ;;  %v688_v21 = vmul.f32 %v3426_v36, %v3113_v53  ;;  %v614_v40 = vadd.f32 %v604_v29, %v516_v34  ;;  %v687_v46 = vmul.f32 %v3426_v36, %v3115_v54  ;;  %v2101_v0 = vld [vmem:[#allocation2 + $0xdc] sm:$0xff] }
 0x1a3   : > { %v690_v49 = vmul.f32 %v3426_v36, %v3117_v57  ;;  %v689_v53 = vmul.f32 %v3426_v36, %v3119_v58  ;;  %v616_v51 = vadd.f32 %v606_v41, %v518_v10  ;;  %v694_v57 = vmul.f32 %v3426_v36, %v3125_v1  ;;  %v2106_v41 = vld [vmem:[#allocation2 + $0x104] sm:$0xff] }
 0x1a4   : > { %v3469_v15 = vpop.permute.xlu1 %1542  ;;  %v3471_v20 = vpop.permute.xlu0 %1537  ;;  %v619_v54 = vadd.f32 %v609_v32, %v521_v11  ;;  %v618_v3 = vadd.f32 %v608_v2, %v520_v6  ;;  %v698_v34 = vadd.f32 %v688_v21, %v611_v48  ;;  %v693_v58 = vmul.f32 %v3426_v36, %v3127_v4  ;;  %v2775_v4 = vld [vmem:[%s4082_s1 + $0xa] sm:$0x1]  ;;  %v2105_v32 = vld [vmem:[#allocation2 + $0xfc] sm:$0xff] }
 0x1a5   : > { %2074 = vperm.xlu1 %2859, %v2023_v8   ;;  %2069 = vperm.xlu0 %2858, %v2022_v42   ;;  %v692_v8 = vmul.f32 %v3426_v36, %v3121_v61  ;;  %v691_v42 = vmul.f32 %v3426_v36, %v3123_v62  ;;  %v697_v61 = vadd.f32 %v687_v46, %v610_v14 }
 0x1a6   : > { %v700_v12 = vadd.f32 %v690_v49, %v613_v24  ;;  %v696_v62 = vmul.f32 %v3426_v36, %v3132_v13  ;;  %v695_v1 = vmul.f32 %v3426_v36, %v3134_v16  ;;  %v699_v25 = vadd.f32 %v689_v53, %v612_v59 }
 0x1a7   : > { %v702_v10 = vadd.f32 %v692_v8, %v615_v35  ;;  %v701_v11 = vadd.f32 %v691_v42, %v614_v40  ;;  %v775_v48 = vmul.f32 %v3429_v19, %v3142_v22  ;;  %v704_v6 = vadd.f32 %v694_v57, %v617_v27  ;;  %v2108_v8 = vld [vmem:[#allocation2 + $0x114] sm:$0xff]  ;;  %v2107_v42 = vld [vmem:[#allocation2 + $0x10c] sm:$0xff] }
 0x1a8   : > { %v3494_v38 = vpop.permute.xlu1 %1552  ;;  %v3496_v45 = vpop.permute.xlu0 %1547  ;;  %v774_v24 = vmul.f32 %v3429_v19, %v3144_v23  ;;  %v777_v13 = vmul.f32 %v3429_v19, %v3152_v28  ;;  %v3514_v16 = vrot.slane %v1243_v56, %v3401_v43  ;;  %v703_v30 = vadd.f32 %v693_v58, %v616_v51  ;;  %v4195_v57 = vld [vmem:[#allocation8_spill] sm:$0xff]  ;;  %v4196_v58 = vld [vmem:[#allocation9_spill] sm:$0xff] }
 0x1a9   : > { %2121 = vperm.xlu1 %2859, %v2102_v50   ;;  %2116 = vperm.xlu0 %2858, %v2101_v0   ;;  %v776_v22 = vmul.f32 %v3429_v19, %v3154_v31  ;;  %v779_v14 = vmul.f32 %v3429_v19, %v3162_v37  ;;  %v706_v23 = vadd.f32 %v696_v62, %v619_v54  ;;  %v1330_v59 = vunpack.c.l.bf16 %v2775_v4 }
 0x1aa   : > { %v705_v33 = vadd.f32 %v695_v1, %v618_v3  ;;  %v778_v28 = vmul.f32 %v3429_v19, %v3164_v47  ;;  %v785_v35 = vadd.f32 %v775_v48, %v698_v34  ;;  %v781_v2 = vmul.f32 %v3429_v19, %v3170_v52 }
 0x1ab   : > { %v780_v31 = vmul.f32 %v3429_v19, %v3172_v55  ;;  %v783_v37 = vmul.f32 %v3429_v19, %v3176_v60  ;;  %v784_v21 = vadd.f32 %v774_v24, %v697_v61  ;;  %v787_v44 = vadd.f32 %v777_v13, %v700_v12  ;;  %v2776_v60 = vld [vmem:[%s4082_s1 + $0xb] sm:$0x1]  ;;  %v4200_v13 = vld [vmem:[#allocation13_spill] sm:$0xff] }
 0x1ac   : > { %v3516_v36 = vpop.permute.xlu1 %1599  ;;  %v3518_v29 = vpop.permute.xlu0 %1594  ;;  %v782_v40 = vmul.f32 %v3429_v19, %v3178_v63  ;;  %v862_v47 = vmul.f32 %v3432_v17, %v3183_v5  ;;  %v786_v50 = vadd.f32 %v776_v22, %v699_v25  ;;  %v789_v52 = vadd.f32 %v779_v14, %v702_v10  ;;  %v4193_v63 = vld [vmem:[#allocation6_spill] sm:$0xff]  ;;  %v4194_v5 = vld [vmem:[#allocation7_spill] sm:$0xff] }
 0x1ad   : > { %2131 = vperm.xlu1 %2859, %v2104_v39   ;;  %2126 = vperm.xlu0 %2858, %v2103_v7   ;;  %v861_v55 = vmul.f32 %v3432_v17, %v3185_v9  ;;  %v788_v0 = vadd.f32 %v778_v28, %v701_v11  ;;  %v864_v19 = vmul.f32 %v3432_v17, %v4193_v63  ;;  %v1417_v12 = vunpack.c.l.bf16 %v2776_v60  ;;  %v4197_v7 = vld [vmem:[#allocation10_spill] sm:$0xff]  ;;  %v4198_v10 = vld [vmem:[#allocation11_spill] sm:$0xff] }
 0x1ae   : > { %v863_v27 = vmul.f32 %v3432_v17, %v4194_v5  ;;  %v3550_v53 = vrot.slane %v1330_v59, %v3401_v43  ;;  %v791_v51 = vadd.f32 %v781_v2, %v704_v6  ;;  %v790_v9 = vadd.f32 %v780_v31, %v703_v30  ;;  %v4199_v6 = vld [vmem:[#allocation12_spill] sm:$0xff]  ;;  %v2777_v22 = vld [vmem:[%s4082_s1 + $0xc] sm:$0x1]  ;;  %v2110_v14 = vld [vmem:[#allocation2 + $0x124] sm:$0x3f] }
 0x1af   : > { %v793_v54 = vadd.f32 %v783_v37, %v706_v23  ;;  %v866_v56 = vmul.f32 %v3432_v17, %v4195_v57  ;;  %v792_v3 = vadd.f32 %v782_v40, %v705_v33  ;;  %v872_v34 = vadd.f32 %v862_v47, %v785_v35  ;;  %v2109_v23 = vld [vmem:[#allocation2 + $0x11c] sm:$0xff]  ;;  %v4204_v2 = vld [vmem:[#allocation16_spill] sm:$0xff]  ;;  %v4207_v63 = vld [vmem:[#allocation19_spill] sm:$0xff] }
 0x1b0   : > { %v3536_v46 = vpop.permute.xlu1 %1609  ;;  %v3538_v49 = vpop.permute.xlu0 %1604  ;;  %v865_v61 = vmul.f32 %v3432_v17, %v4196_v58  ;;  %v871_v39 = vadd.f32 %v861_v55, %v784_v21  ;;  %v868_v25 = vmul.f32 %v3432_v17, %v4197_v7  ;;  %v867_v11 = vmul.f32 %v3432_v17, %v4198_v10  ;;  %v4201_v28 = vld [vmem:[#allocation14_spill] sm:$0xff]  ;;  %v4202_v59 = vld [vmem:[#allocation97_spill] sm:$0xff]  ;;  %v4211_v10 = vld [vmem:[#allocation23_spill] sm:$0xff] }
 0x1b1   : > { %2141 = vperm.xlu1 %2859, %v2106_v41   ;;  %2136 = vperm.xlu0 %2858, %v2105_v32   ;;  %v874_v48 = vadd.f32 %v864_v19, %v787_v44  ;;  %v873_v4 = vadd.f32 %v863_v27, %v786_v50  ;;  %v870_v24 = vmul.f32 %v3432_v17, %v4199_v6  ;;  %v4203_v32 = vld [vmem:[#allocation15_spill] sm:$0xff]  ;;  %v4205_v21 = vld [vmem:[#allocation17_spill] sm:$0xff]  ;;  %v4206_v44 = vld [vmem:[#allocation18_spill] sm:$0xff]  ;;  %v1504_v5 = vunpack.c.l.bf16 %v2777_v22 }
 0x1b2   : > { %v869_v30 = vmul.f32 %v3432_v17, %v4200_v13  ;;  %v876_v33 = vadd.f32 %v866_v56, %v789_v52  ;;  %v950_v41 = vmul.f32 %v4202_v59, %v4201_v28  ;;  %v949_v35 = vmul.f32 %v4202_v59, %v4203_v32  ;;  %v4209_v57 = vld [vmem:[#allocation21_spill] sm:$0xff]  ;;  %v4210_v7 = vld [vmem:[#allocation22_spill] sm:$0xff]  ;;  %v4212_v6 = vld [vmem:[#allocation24_spill] sm:$0xff] }
 0x1b3   : > { %v952_v31 = vmul.f32 %v4202_v59, %v4204_v2  ;;  %v875_v37 = vadd.f32 %v865_v61, %v788_v0  ;;  %v951_v17 = vmul.f32 %v4202_v59, %v4205_v21  ;;  %v954_v40 = vmul.f32 %v4202_v59, %v4206_v44  ;;  %v4215_v22 = vld [vmem:[#allocation46_spill] sm:$0xff]  ;;  %v4219_v2 = vld [vmem:[#allocation28_spill] sm:$0xff] }
 0x1b4   : > { %v3556_v62 = vpop.permute.xlu1 %1619  ;;  %v3558_v1 = vpop.permute.xlu0 %1614  ;;  %v3582_v47 = vrot.slane %v1417_v12, %v3401_v43  ;;  %v878_v55 = vadd.f32 %v868_v25, %v791_v51  ;;  %v877_v60 = vadd.f32 %v867_v11, %v790_v9  ;;  %v953_v19 = vmul.f32 %v4202_v59, %v4207_v63  ;;  %v4217_v28 = vld [vmem:[#allocation26_spill] sm:$0xff] }
 0x1b5   : > { %2151 = vperm.xlu1 %2859, %v2108_v8   ;;  %2146 = vperm.xlu0 %2858, %v2107_v42   ;;  %v880_v0 = vadd.f32 %v870_v24, %v793_v54  ;;  %v879_v27 = vadd.f32 %v869_v30, %v792_v3  ;;  %v4208_v8 = vld [vmem:[#allocation20_spill] sm:$0xff]  ;;  %v955_v56 = vmul.f32 %v4202_v59, %v4209_v57  ;;  %v4213_v54 = vld [vmem:[#allocation98_spill] sm:$0xff]  ;;  %v2778_v24 = vld [vmem:[%s4082_s1 + $0xd] sm:$0x1] }
 0x1b6   : > { %v956_v42 = vmul.f32 %v4202_v59, %v4208_v8  ;;  %v960_v58 = vadd.f32 %v950_v41, %v872_v34  ;;  %v959_v61 = vadd.f32 %v949_v35, %v871_v39  ;;  %v962_v12 = vadd.f32 %v952_v31, %v874_v48  ;;  %v4214_v48 = vld [vmem:[#allocation25_spill] sm:$0xff]  ;;  %v4218_v41 = vld [vmem:[#allocation27_spill] sm:$0xff]  ;;  %v4221_v63 = vld [vmem:[#allocation30_spill] sm:$0xff] }
 0x1b7   : > { %v958_v51 = vmul.f32 %v4202_v59, %v4210_v7  ;;  %v961_v9 = vadd.f32 %v951_v17, %v873_v4  ;;  %v964_v25 = vadd.f32 %v954_v40, %v876_v33  ;;  %v957_v11 = vmul.f32 %v4202_v59, %v4211_v10 }
 0x1b8   : > { %v3584_v50 = vpop.permute.xlu1 %1629  ;;  %v3586_v52 = vpop.permute.xlu0 %1624  ;;  %v1038_v3 = vmul.f32 %v4213_v54, %v4212_v6  ;;  %v963_v39 = vadd.f32 %v953_v19, %v875_v37  ;;  %v1037_v30 = vmul.f32 %v4213_v54, %v4214_v48  ;;  %v3610_v4 = vrot.slane %v1504_v5, %v3401_v43  ;;  %v4220_v37 = vld [vmem:[#allocation29_spill] sm:$0xff] }
 0x1b9   : > { %2161 = vperm.xlu1 %2859, %v2110_v14   ;;  %2156 = vperm.xlu0 %2858, %v2109_v23   ;;  %v4216_v14 = vld [vmem:[#allocation42_spill] sm:$0xff]  ;;  %v966_v23 = vadd.f32 %v956_v42, %v878_v55  ;;  %v965_v33 = vadd.f32 %v955_v56, %v877_v60  ;;  %v1040_v59 = vmul.f32 %v4213_v54, %v4217_v28  ;;  %v1591_v17 = vunpack.c.l.bf16 %v2778_v24  ;;  %v4222_v60 = vld [vmem:[#allocation31_spill] sm:$0xff]  ;;  %v4225_v42 = vld [vmem:[#allocation32_spill] sm:$0xff] }
 0x1ba   : > { %v1039_v32 = vmul.f32 %v4213_v54, %v4218_v41  ;;  %v968_v35 = vadd.f32 %v958_v51, %v880_v0  ;;  %v1042_v31 = vmul.f32 %v4213_v54, %v4219_v2  ;;  %v1041_v21 = vmul.f32 %v4213_v54, %v4220_v37  ;;  %v4226_v56 = vld [vmem:[#allocation33_spill] sm:$0xff]  ;;  %v4227_v51 = vld [vmem:[#allocation50_spill] sm:$0xff] }
 0x1bb   : > { %v967_v44 = vadd.f32 %v957_v11, %v879_v27  ;;  %v1048_v40 = vadd.f32 %v1038_v3, %v960_v58  ;;  %v1044_v55 = vmul.f32 %v4213_v54, %v4221_v63  ;;  %v1043_v19 = vmul.f32 %v4213_v54, %v4222_v60  ;;  %v4228_v27 = vld [vmem:[#allocation45_spill] sm:$0xff]  ;;  %v4229_v11 = vld [vmem:[#allocation34_spill] sm:$0xff]  ;;  %v4230_v3 = vld [vmem:[#allocation35_spill] sm:$0xff] }
 0x1bc   : > { %v3603_v13 = vpop.permute.xlu1 %1639  ;;  %v3605_v34 = vpop.permute.xlu0 %1634  ;;  %v1047_v0 = vadd.f32 %v1037_v30, %v959_v61  ;;  %v1046_v57 = vmul.f32 %v4213_v54, %v4225_v42  ;;  %v1045_v7 = vmul.f32 %v4213_v54, %v4226_v56  ;;  %v1050_v58 = vadd.f32 %v1040_v59, %v962_v12  ;;  %v2779_v61 = vld [vmem:[%s4082_s1 + $0xe] sm:$0x1]  ;;  %v4232_v28 = vld [vmem:[#allocation37_spill] sm:$0xff]  ;;  %v4233_v41 = vld [vmem:[#allocation38_spill] sm:$0xff] }
 0x1bd   : > { %2208 = vperm.xlu1 %2859, %v4215_v22   ;;  %2203 = vperm.xlu0 %2858, %v4216_v14   ;;  %v1049_v10 = vadd.f32 %v1039_v32, %v961_v9  ;;  %v1125_v6 = vmul.f32 %v3460_v26, %v4229_v11  ;;  %v1124_v24 = vmul.f32 %v3460_v26, %v4230_v3  ;;  %v4231_v22 = vld [vmem:[#allocation36_spill] sm:$0xff]  ;;  %v1678_v63 = vunpack.c.l.bf16 %v2779_v61  ;;  %v4238_v42 = vld [vmem:[#allocation41_spill] sm:$0xff] }
 0x1be   : > { %v1052_v48 = vadd.f32 %v1042_v31, %v964_v25  ;;  %v1051_v30 = vadd.f32 %v1041_v21, %v963_v39  ;;  %v1127_v54 = vmul.f32 %v3460_v26, %v4231_v22  ;;  %v3646_v14 = vrot.slane %v1591_v17, %v3401_v43  ;;  %v4234_v31 = vld [vmem:[#allocation39_spill] sm:$0xff]  ;;  %v4235_v17 = vld [vmem:[#allocation54_spill] sm:$0xff]  ;;  %v4237_v60 = vld [vmem:[#allocation40_spill] sm:$0xff] }
 0x1bf   : > { %v1054_v12 = vadd.f32 %v1044_v55, %v966_v23  ;;  %v1053_v9 = vadd.f32 %v1043_v19, %v965_v33  ;;  %v1126_v59 = vmul.f32 %v3460_v26, %v4232_v28  ;;  %v1129_v32 = vmul.f32 %v3460_v26, %v4233_v41  ;;  %v4236_v23 = vld [vmem:[#allocation49_spill] sm:$0xff]  ;;  %v4244_v28 = vld [vmem:[#allocation52_spill] sm:$0xff] }
 0x1c0   : > { %v3626_v5 = vpop.permute.xlu1 %1686  ;;  %v3628_v8 = vpop.permute.xlu0 %1681  ;;  %v1056_v25 = vadd.f32 %v1046_v57, %v968_v35  ;;  %v1055_v39 = vadd.f32 %v1045_v7, %v967_v44  ;;  %v1128_v21 = vmul.f32 %v3460_v26, %v4234_v31  ;;  %v1135_v33 = vadd.f32 %v1125_v6, %v1048_v40  ;;  %v4240_v44 = vld [vmem:[#allocation44_spill] sm:$0xff]  ;;  %v4241_v7 = vld [vmem:[#allocation47_spill] sm:$0xff] }
 0x1c1   : > { %4223 = vst [vmem:[#allocation6_spill] sm:$0xff] %v3626_v5  ;;  %4224 = vst [vmem:[#allocation7_spill] sm:$0xff] %v3628_v8  ;;  %2218 = vperm.xlu1 %2859, %v4227_v51   ;;  %2213 = vperm.xlu0 %2858, %v4228_v27   ;;  %v1134_v55 = vadd.f32 %v1124_v24, %v1047_v0  ;;  %v1131_v19 = vmul.f32 %v3460_v26, %v4237_v60  ;;  %v4239_v27 = vld [vmem:[#allocation43_spill] sm:$0xff]  ;;  %v4242_v40 = vld [vmem:[#allocation48_spill] sm:$0xff] }
 0x1c2   : > { %v1130_v56 = vmul.f32 %v3460_v26, %v4238_v42  ;;  %v1137_v51 = vadd.f32 %v1127_v54, %v1050_v58  ;;  %v1133_v35 = vmul.f32 %v3460_v26, %v4239_v27  ;;  %v1132_v57 = vmul.f32 %v3460_v26, %v4240_v44  ;;  %v4243_v6 = vld [vmem:[#allocation51_spill] sm:$0xff]  ;;  %v4248_v60 = vld [vmem:[#allocation56_spill] sm:$0xff]  ;;  %v2197_v27 = vld [vmem:[#allocation2 + $0x5c] sm:$0x3f] }
 0x1c3   : > { %v1212_v11 = vmul.f32 %v3484_v18, %v4241_v7  ;;  %v1136_v3 = vadd.f32 %v1126_v59, %v1049_v10  ;;  %v1139_v61 = vadd.f32 %v1129_v32, %v1052_v48  ;;  %v1211_v0 = vmul.f32 %v3484_v18, %v4242_v40  ;;  %v2780_v54 = vld [vmem:[%s4082_s1 + $0xf] sm:$0x1]  ;;  %v4245_v48 = vld [vmem:[#allocation57_spill] sm:$0xff]  ;;  %v4262_v8 = vld [vmem:[#allocation68_spill] sm:$0xff] }
 0x1c4   : > { %v3652_v2 = vpop.permute.xlu1 %1696  ;;  %v3654_v37 = vpop.permute.xlu0 %1691  ;;  %v1214_v24 = vmul.f32 %v3484_v18, %v4243_v6  ;;  %v1138_v26 = vadd.f32 %v1128_v21, %v1051_v30  ;;  %v1213_v41 = vmul.f32 %v3484_v18, %v4244_v28  ;;  %v3684_v10 = vrot.slane %v1678_v63, %v3401_v43  ;;  %v4246_v59 = vld [vmem:[#allocation53_spill] sm:$0xff]  ;;  %v4249_v28 = vld [vmem:[#allocation58_spill] sm:$0xff] }
 0x1c5   : > { %2228 = vperm.xlu1 %2859, %v4235_v17   ;;  %2223 = vperm.xlu0 %2858, %v4236_v23   ;;  %v1141_v32 = vadd.f32 %v1131_v19, %v1054_v12  ;;  %v1140_v31 = vadd.f32 %v1130_v56, %v1053_v9  ;;  %v4247_v17 = vld [vmem:[#allocation55_spill] sm:$0xff]  ;;  %v1215_v42 = vmul.f32 %v3484_v18, %v4248_v60  ;;  %v2196_v30 = vld [vmem:[#allocation2 + $0x54] sm:$0xff]  ;;  %v1765_v40 = vunpack.c.l.bf16 %v2780_v54 }
 0x1c6   : > { %v1216_v23 = vmul.f32 %v3484_v18, %v4247_v17  ;;  %v1143_v21 = vadd.f32 %v1133_v35, %v1056_v25  ;;  %v1142_v44 = vadd.f32 %v1132_v57, %v1055_v39  ;;  %v1222_v7 = vadd.f32 %v1212_v11, %v1135_v33  ;;  %v4252_v17 = vld [vmem:[#allocation60_spill] sm:$0xff]  ;;  %v4253_v25 = vld [vmem:[#allocation61_spill] sm:$0xff]  ;;  %v2781_v33 = vld [vmem:[%s4082_s1 + $0x10] sm:$0x1] }
 0x1c7   : > { %v1221_v63 = vadd.f32 %v1211_v0, %v1134_v55  ;;  %v1224_v6 = vadd.f32 %v1214_v24, %v1137_v51  ;;  %v1223_v56 = vadd.f32 %v1213_v41, %v1136_v3  ;;  %v1220_v60 = vmul.f32 %v3484_v18, %v4252_v17  ;;  %v4254_v35 = vld [vmem:[#allocation62_spill] sm:$0xff]  ;;  %v4255_v11 = vld [vmem:[#allocation63_spill] sm:$0xff]  ;;  %v4256_v54 = vld [vmem:[#allocation64_spill] sm:$0xff] }
 0x1c8   : > { %v3674_v22 = vpop.permute.xlu1 %1706  ;;  %v3676_v58 = vpop.permute.xlu0 %1701  ;;  %v1219_v39 = vmul.f32 %v3484_v18, %v4253_v25  ;;  %v1226_v55 = vadd.f32 %v1216_v23, %v1139_v61  ;;  %v1225_v51 = vadd.f32 %v1215_v42, %v1138_v26  ;;  %v1299_v57 = vmul.f32 %v3514_v16, %v4254_v35  ;;  %v2276_v0 = vld [vmem:[#allocation2 + $0x84] sm:$0xff]  ;;  %v2275_v24 = vld [vmem:[#allocation2 + $0x7c] sm:$0xff] }
 0x1c9   : > { %2238 = vperm.xlu1 %2859, %v4245_v48   ;;  %2233 = vperm.xlu0 %2858, %v4246_v59   ;;  %v1218_v48 = vmul.f32 %v3484_v18, %v4249_v28  ;;  %v4250_v59 = vld [vmem:[#allocation59_spill] sm:$0xff]  ;;  %v1298_v3 = vmul.f32 %v3514_v16, %v4255_v11  ;;  %v1301_v41 = vmul.f32 %v3514_v16, %v4256_v54  ;;  %v1852_v35 = vunpack.c.l.bf16 %v2781_v33  ;;  %v4263_v5 = vld [vmem:[#allocation69_spill] sm:$0xff] }
 0x1ca   : > { %v1217_v12 = vmul.f32 %v3484_v18, %v4250_v59  ;;  %v4257_v18 = vld [vmem:[#allocation65_spill] sm:$0xff]  ;;  %v3718_v61 = vrot.slane %v1765_v40, %v3401_v43  ;;  %v4259_v42 = vld [vmem:[#allocation67_spill] sm:$0xff]  ;;  %v1230_v11 = vadd.f32 %v1220_v60, %v1143_v21  ;;  %v1229_v54 = vadd.f32 %v1219_v39, %v1142_v44 }
 0x1cb   : > { %v1228_v26 = vadd.f32 %v1218_v48, %v1141_v32  ;;  %v1302_v59 = vmul.f32 %v3514_v16, %v4259_v42  ;;  %v1308_v40 = vadd.f32 %v1298_v3, %v1221_v63  ;;  %v1304_v32 = vmul.f32 %v3514_v16, %v4263_v5  ;;  %v2277_v42 = vld [vmem:[#allocation2 + $0x8c] sm:$0xff] }
 0x1cc   : > { %v3696_v9 = vpop.permute.xlu1 %1716  ;;  %v3698_v19 = vpop.permute.xlu0 %1711  ;;  %v1227_v23 = vadd.f32 %v1217_v12, %v1140_v31  ;;  %v4264_v31 = vld [vmem:[#allocation70_spill] sm:$0xff]  ;;  %v2278_v12 = vld [vmem:[#allocation2 + $0x94] sm:$0xff]  ;;  %v4265_v21 = vld [vmem:[#allocation71_spill] sm:$0xff]  ;;  %v3743_v3 = vrot.slane %v1852_v35, %v3401_v43 }
 0x1cd   : > { %4251 = vst [vmem:[#allocation8_spill] sm:$0xff] %v3698_v19  ;;  %2248 = vperm.xlu1 %2859, %v2197_v27   ;;  %2243 = vperm.xlu0 %2858, %v2196_v30   ;;  %v1300_v27 = vmul.f32 %v3514_v16, %v4257_v18  ;;  %v4258_v30 = vld [vmem:[#allocation66_spill] sm:$0xff]  ;;  %v1305_v18 = vmul.f32 %v3514_v16, %v4262_v8  ;;  %v4266_v8 = vld [vmem:[#allocation72_spill] sm:$0xff]  ;;  %v4281_v19 = vld [vmem:[#allocation85_spill] sm:$0xff] }
 0x1ce   : > { %v1303_v28 = vmul.f32 %v3514_v16, %v4258_v30  ;;  %v1309_v30 = vadd.f32 %v1299_v57, %v1222_v7  ;;  %v1307_v48 = vmul.f32 %v3514_v16, %v4264_v31  ;;  %v1306_v44 = vmul.f32 %v3514_v16, %v4265_v21  ;;  %v4267_v7 = vld [vmem:[#allocation73_spill] sm:$0xff]  ;;  %v4270_v16 = vld [vmem:[#allocation74_spill] sm:$0xff] }
 0x1cf   : > { %v1312_v60 = vadd.f32 %v1302_v59, %v1225_v51  ;;  %v1386_v39 = vmul.f32 %v3550_v53, %v4266_v8  ;;  %v1385_v63 = vmul.f32 %v3550_v53, %v4267_v7  ;;  %v4271_v51 = vld [vmem:[#allocation75_spill] sm:$0xff]  ;;  %v4273_v59 = vld [vmem:[#allocation77_spill] sm:$0xff] }
 0x1d0   : > { %v3722_v17 = vpop.permute.xlu1 %1726  ;;  %v3724_v25 = vpop.permute.xlu0 %1721  ;;  %v1313_v33 = vadd.f32 %v1303_v28, %v1226_v55  ;;  %v1388_v55 = vmul.f32 %v3550_v53, %v4270_v16  ;;  %v1389_v35 = vmul.f32 %v3550_v53, %v4273_v59  ;;  %v2280_v31 = vld [vmem:[#allocation2 + $0xa4] sm:$0xff]  ;;  %v2279_v21 = vld [vmem:[#allocation2 + $0x9c] sm:$0xff]  ;;  %v1316_v8 = vadd.f32 %v1306_v44, %v1229_v54 }
 0x1d1   : > { %4260 = vst [vmem:[#allocation9_spill] sm:$0xff] %v3722_v17  ;;  %4261 = vst [vmem:[#allocation10_spill] sm:$0xff] %v3724_v25  ;;  %2295 = vperm.xlu1 %2859, %v2276_v0   ;;  %2290 = vperm.xlu0 %2858, %v2275_v24   ;;  %v1311_v17 = vadd.f32 %v1301_v41, %v1224_v6  ;;  %v1310_v25 = vadd.f32 %v1300_v27, %v1223_v56  ;;  %v2782_v6 = vld [vmem:[%s4082_s1 + $0x11] sm:$0x1]  ;;  %v4272_v27 = vld [vmem:[#allocation76_spill] sm:$0xff] }
 0x1d2   : > { %v1315_v56 = vadd.f32 %v1305_v18, %v1228_v26  ;;  %v1387_v0 = vmul.f32 %v3550_v53, %v4271_v51  ;;  %v1314_v24 = vadd.f32 %v1304_v32, %v1227_v23  ;;  %v1317_v41 = vadd.f32 %v1307_v48, %v1230_v11  ;;  %v4274_v26 = vld [vmem:[#allocation78_spill] sm:$0xff]  ;;  %v4275_v7 = vld [vmem:[#allocation79_spill] sm:$0xff]  ;;  %v4276_v23 = vld [vmem:[#allocation80_spill] sm:$0xff] }
 0x1d3   : > { %v1390_v28 = vmul.f32 %v3550_v53, %v4272_v27  ;;  %v1392_v18 = vmul.f32 %v3550_v53, %v4274_v26  ;;  %v1391_v16 = vmul.f32 %v3550_v53, %v4275_v7  ;;  %v1939_v51 = vunpack.c.l.bf16 %v2782_v6  ;;  %v4277_v32 = vld [vmem:[#allocation81_spill] sm:$0xff] }
 0x1d4   : > { %v3738_v57 = vpop.permute.xlu1 %1773  ;;  %v3740_v5 = vpop.permute.xlu0 %1768  ;;  %v1394_v11 = vmul.f32 %v3550_v53, %v4276_v23  ;;  %v1393_v48 = vmul.f32 %v3550_v53, %v4277_v32  ;;  %v1398_v54 = vadd.f32 %v1388_v55, %v1311_v17  ;;  %v1397_v44 = vadd.f32 %v1387_v0, %v1310_v25  ;;  %v2282_v53 = vld [vmem:[#allocation2 + $0xb4] sm:$0xff]  ;;  %v2281_v23 = vld [vmem:[#allocation2 + $0xac] sm:$0xff] }
 0x1d5   : > { %4268 = vst [vmem:[#allocation11_spill] sm:$0xff] %v3738_v57  ;;  %4269 = vst [vmem:[#allocation12_spill] sm:$0xff] %v3740_v5  ;;  %2305 = vperm.xlu1 %2859, %v2278_v12   ;;  %2300 = vperm.xlu0 %2858, %v2277_v42   ;;  %v1396_v12 = vadd.f32 %v1386_v39, %v1309_v30  ;;  %v1395_v42 = vadd.f32 %v1385_v63, %v1308_v40  ;;  %v4278_v5 = vld [vmem:[#allocation82_spill] sm:$0xff]  ;;  %v4279_v40 = vld [vmem:[#allocation83_spill] sm:$0xff] }
 0x1d6   : > { %v1473_v26 = vmul.f32 %v3582_v47, %v4278_v5  ;;  %v1400_v6 = vadd.f32 %v1390_v28, %v1313_v33  ;;  %v1399_v30 = vadd.f32 %v1389_v35, %v1312_v60  ;;  %v1472_v39 = vmul.f32 %v3582_v47, %v4279_v40  ;;  %v4280_v63 = vld [vmem:[#allocation84_spill] sm:$0xff]  ;;  %v4282_v33 = vld [vmem:[#allocation86_spill] sm:$0xff]  ;;  %v4283_v0 = vld [vmem:[#allocation87_spill] sm:$0xff] }
 0x1d7   : > { %v1475_v7 = vmul.f32 %v3582_v47, %v4280_v63  ;;  %v1402_v32 = vadd.f32 %v1392_v18, %v1315_v56  ;;  %v1401_v57 = vadd.f32 %v1391_v16, %v1314_v24  ;;  %v1474_v17 = vmul.f32 %v3582_v47, %v4281_v19  ;;  %v4284_v24 = vld [vmem:[#allocation88_spill] sm:$0xff]  ;;  %v4285_v19 = vld [vmem:[#allocation89_spill] sm:$0xff]  ;;  %v4286_v16 = vld [vmem:[#allocation90_spill] sm:$0xff] }
 0x1d8   : > { %v3764_v27 = vpop.permute.xlu1 %1783  ;;  %v3766_v59 = vpop.permute.xlu0 %1778  ;;  %v3777_v25 = vrot.slane %v1939_v51, %v3401_v43  ;;  %v1404_v5 = vadd.f32 %v1394_v11, %v1317_v41  ;;  %v1403_v55 = vadd.f32 %v1393_v48, %v1316_v8  ;;  %v1477_v60 = vmul.f32 %v3582_v47, %v4282_v33  ;;  %v4287_v11 = vld [vmem:[#allocation91_spill] sm:$0xff]  ;;  %v2284_v40 = vld [vmem:[#allocation2 + $0xc4] sm:$0x3f]  ;;  %v2283_v63 = vld [vmem:[#allocation2 + $0xbc] sm:$0xff] }
 0x1d9   : > { %2315 = vperm.xlu1 %2859, %v2280_v31   ;;  %2310 = vperm.xlu0 %2858, %v2279_v21   ;;  %v1476_v28 = vmul.f32 %v3582_v47, %v4283_v0  ;;  %v1483_v56 = vadd.f32 %v1473_v26, %v1396_v12  ;;  %v1479_v21 = vmul.f32 %v3582_v47, %v4284_v24  ;;  %v4288_v12 = vld [vmem:[#allocation93_spill] sm:$0xff]  ;;  %v4289_v0 = vld [vmem:[#allocation94_spill] sm:$0xff] }
 0x1da   : > { %v1478_v18 = vmul.f32 %v3582_v47, %v4285_v19  ;;  %v1482_v41 = vadd.f32 %v1472_v39, %v1395_v42  ;;  %v1485_v8 = vadd.f32 %v1475_v7, %v1398_v54  ;;  %v1481_v51 = vmul.f32 %v3582_v47, %v4286_v16  ;;  %v4290_v19 = vld [vmem:[#allocation95_spill] sm:$0xff]  ;;  %v4291_v39 = vld [vmem:[#allocation96_spill] sm:$0xff] }
 0x1db   : > { %v1480_v48 = vmul.f32 %v3582_v47, %v4287_v11  ;;  %v1484_v33 = vadd.f32 %v1474_v17, %v1397_v44  ;;  %v1560_v26 = vmul.f32 %v3610_v4, %v4288_v12  ;;  %v1559_v24 = vmul.f32 %v3610_v4, %v4289_v0  ;;  %v4293_v12 = vld [vmem:[#allocation100_spill] sm:$0xff] }
 0x1dc   : > { %v3783_v35 = vpop.permute.xlu1 %1793  ;;  %v3785_v31 = vpop.permute.xlu0 %1788  ;;  %v1487_v42 = vadd.f32 %v1477_v60, %v1400_v6  ;;  %v1486_v54 = vadd.f32 %v1476_v28, %v1399_v30  ;;  %v1561_v7 = vmul.f32 %v3610_v4, %v4291_v39  ;;  %v1489_v17 = vadd.f32 %v1479_v21, %v1402_v32  ;;  %v2363_v28 = vld [vmem:[#allocation2 + $0x1d] sm:$0xff]  ;;  %v2362_v39 = vld [vmem:[#allocation2 + $0x15] sm:$0xff] }
 0x1dd   : > { %2325 = vperm.xlu1 %2859, %v2282_v53   ;;  %2320 = vperm.xlu0 %2858, %v2281_v23   ;;  %v1562_v53 = vmul.f32 %v3610_v4, %v4290_v19  ;;  %v4292_v23 = vld [vmem:[#allocation99_spill] sm:$0xff]  ;;  %v1488_v11 = vadd.f32 %v1478_v18, %v1401_v57  ;;  %v1563_v0 = vmul.f32 %v3610_v4, %v4293_v12 }
 0x1de   : > { %v1564_v47 = vmul.f32 %v3610_v4, %v4292_v23  ;;  %v1491_v19 = vadd.f32 %v1481_v51, %v1404_v5  ;;  %v1490_v6 = vadd.f32 %v1480_v48, %v1403_v55  ;;  %v1566_v30 = vmul.f32 %v3610_v4, %v3469_v15  ;;  %v2364_v48 = vld [vmem:[#allocation2 + $0x25] sm:$0xff] }
 0x1df   : > { %v1565_v60 = vmul.f32 %v3610_v4, %v3471_v20  ;;  %v1570_v23 = vadd.f32 %v1560_v26, %v1483_v56  ;;  %v3815_v43 = vadd.f32 %v1559_v24, %v1482_v41  ;;  %v1572_v32 = vadd.f32 %v1562_v53, %v1485_v8 }
 0x1e0   : > { %v3805_v16 = vpop.permute.xlu1 %1803  ;;  %v3807_v44 = vpop.permute.xlu0 %1798  ;;  %v1568_v57 = vmul.f32 %v3610_v4, %v3494_v38  ;;  %v1571_v21 = vadd.f32 %v1561_v7, %v1484_v33  ;;  %v1574_v18 = vadd.f32 %v1564_v47, %v1487_v42  ;;  %v1567_v5 = vmul.f32 %v3610_v4, %v3496_v45  ;;  %v2365_v4 = vld [vmem:[#allocation2 + $0x2d] sm:$0xff]  ;;  %v2367_v7 = vld [vmem:[#allocation2 + $0x3d] sm:$0xff]  ;;  %v2366_v47 = vld [vmem:[#allocation2 + $0x35] sm:$0xff] }
 0x1e1   : > { %2335 = vperm.xlu1 %2859, %v2284_v40   ;;  %2330 = vperm.xlu0 %2858, %v2283_v63   ;;  %v1649_v15 = vmul.f32 %v3646_v14, %v3536_v46  ;;  %v1573_v51 = vadd.f32 %v1563_v0, %v1486_v54  ;;  %v1647_v56 = vmul.f32 %v3646_v14, %v3516_v36 }
 0x1e2   : > { %v1648_v41 = vmul.f32 %v3646_v14, %v3538_v49  ;;  %v1576_v38 = vadd.f32 %v1566_v30, %v1489_v17  ;;  %v1575_v8 = vadd.f32 %v1565_v60, %v1488_v11  ;;  %v1651_v45 = vmul.f32 %v3646_v14, %v3556_v62 }
 0x1e3   : > { %v1736_v46 = vmul.f32 %v3684_v10, %v3652_v2  ;;  %v1578_v40 = vadd.f32 %v1568_v57, %v1491_v19  ;;  %v1650_v63 = vmul.f32 %v3646_v14, %v3558_v1  ;;  %v1653_v36 = vmul.f32 %v3646_v14, %v3584_v50  ;;  %v2368_v57 = vld [vmem:[#allocation2 + $0x45] sm:$0xff] }
 0x1e4   : > { %v3823_v55 = vpop.permute.xlu1 %1813  ;;  %v3825_v20 = vpop.permute.xlu0 %1808  ;;  %v1735_v49 = vmul.f32 %v3684_v10, %v3654_v37  ;;  %v1577_v33 = vadd.f32 %v1567_v5, %v1490_v6  ;;  %v3843_v26 = vmul.f32 %v3646_v14, %v3518_v29  ;;  %v1659_v62 = vadd.f32 %v1649_v15, %v1572_v32  ;;  %v2369_v32 = vld [vmem:[#allocation2 + $0x4d] sm:$0xff] }
 0x1e5   : > { %2382 = vperm.xlu1 %2859, %v2363_v28   ;;  %2377 = vperm.xlu0 %2858, %v2362_v39   ;;  %v1823_v2 = vmul.f32 %v3718_v61, %v3764_v27  ;;  %v3851_v1 = vadd.f32 %v1647_v56, %v1570_v23  ;;  %v1658_v42 = vadd.f32 %v1648_v41, %v1571_v21  ;;  %v4294_v21 = vld [vmem:[#allocation8_spill] sm:$0xff] }
 0x1e6   : > { %v1822_v50 = vmul.f32 %v3718_v61, %v3766_v59  ;;  %v1661_v37 = vadd.f32 %v1651_v45, %v1574_v18  ;;  %v1746_v54 = vadd.f32 %v1736_v46, %v1659_v62  ;;  %v1738_v29 = vmul.f32 %v3684_v10, %v3674_v22  ;;  %v4297_v62 = vld [vmem:[#allocation6_spill] sm:$0xff] }
 0x1e7   : > { %v1737_v27 = vmul.f32 %v3684_v10, %v3676_v58  ;;  %v1660_v17 = vadd.f32 %v1650_v63, %v1573_v51  ;;  %v1663_v11 = vadd.f32 %v1653_v36, %v1576_v38  ;;  %v1652_v12 = vmul.f32 %v3646_v14, %v3586_v52  ;;  %v4296_v63 = vld [vmem:[#allocation10_spill] sm:$0xff] }
 0x1e8   : > { %v3847_v24 = vpop.permute.xlu1 %1860  ;;  %v3849_v53 = vpop.permute.xlu0 %1855  ;;  %v1745_v0 = vadd.f32 %v1735_v49, %v1658_v42  ;;  %v1655_v59 = vmul.f32 %v3646_v14, %v3603_v13  ;;  %v1833_v19 = vadd.f32 %v1823_v2, %v1746_v54  ;;  %v1825_v6 = vmul.f32 %v3718_v61, %v3783_v35  ;;  %v2370_v49 = vld [vmem:[#allocation2 + $0x55] sm:$0xff] }
 0x1e9   : > { %2392 = vperm.xlu1 %2859, %v2365_v4   ;;  %2387 = vperm.xlu0 %2858, %v2364_v48   ;;  %v1824_v22 = vmul.f32 %v3718_v61, %v3785_v31  ;;  %v1654_v52 = vmul.f32 %v3646_v14, %v3605_v34  ;;  %v1748_v13 = vadd.f32 %v1738_v29, %v1661_v37  ;;  %v4295_v48 = vld [vmem:[#allocation9_spill] sm:$0xff]  ;;  %v4298_v37 = vld [vmem:[#allocation7_spill] sm:$0xff] }
 0x1ea   : > { %v1832_v60 = vadd.f32 %v1822_v50, %v1745_v0  ;;  %v1747_v23 = vadd.f32 %v1737_v27, %v1660_v17  ;;  %v1740_v35 = vmul.f32 %v3684_v10, %v3696_v9  ;;  %v1662_v31 = vadd.f32 %v1652_v12, %v1575_v8 }
 0x1eb   : > { %v1739_v18 = vmul.f32 %v3684_v10, %v4294_v21  ;;  %v1665_v51 = vadd.f32 %v1655_v59, %v1578_v40  ;;  %v1835_v56 = vadd.f32 %v1825_v6, %v1748_v13  ;;  %v1827_v34 = vmul.f32 %v3718_v61, %v3805_v16  ;;  %v2371_v16 = vld [vmem:[#allocation2 + $0x5d] sm:$0x3f]  ;;  %v2450_v6 = vld [vmem:[#allocation2 + $0x85] sm:$0xff] }
 0x1ec   : > { %v1871_v30 = vpop.permute.xlu1 %1870  ;;  %v1866_v58 = vpop.permute.xlu0 %1865  ;;  %v1834_v41 = vadd.f32 %v1824_v22, %v1747_v23  ;;  %v1826_v9 = vmul.f32 %v3718_v61, %v3807_v44  ;;  %v1664_v46 = vadd.f32 %v1654_v52, %v1577_v33  ;;  %v1750_v4 = vadd.f32 %v1740_v35, %v1663_v11  ;;  %v2449_v22 = vld [vmem:[#allocation2 + $0x7d] sm:$0xff] }
 0x1ed   : > { %v1910_v28 = vmul.f32 %v3743_v3, %v1871_v30  ;;  %v1909_v39 = vmul.f32 %v3743_v3, %v1866_v58  ;;  %2402 = vperm.xlu1 %2859, %v2367_v7   ;;  %2397 = vperm.xlu0 %2858, %v2366_v47   ;;  %v1742_v40 = vmul.f32 %v3684_v10, %v4295_v48  ;;  %v4300_v30 = vld [vmem:[#allocation12_spill] sm:$0xff] }
 0x1ee   : > { %v1741_v36 = vmul.f32 %v3684_v10, %v4296_v63  ;;  %v1734_v2 = vmul.f32 %v3684_v10, %v4297_v62  ;;  %v1749_v44 = vadd.f32 %v1739_v18, %v1662_v31  ;;  %v1733_v33 = vmul.f32 %v3684_v10, %v4298_v37  ;;  %v2451_v31 = vld [vmem:[#allocation2 + $0x8d] sm:$0xff]  ;;  %v2458_v37 = vld [vmem:[#allocation2 + $0xc5] sm:$0x3f] }
 0x1ef   : > { %v3875_v5 = vadd.f32 %v1910_v28, %v1833_v19  ;;  %v3877_v15 = vadd.f32 %v1909_v39, %v1832_v60  ;;  %v1837_v54 = vadd.f32 %v1827_v34, %v1750_v4  ;;  %v1829_v29 = vmul.f32 %v3718_v61, %v3823_v55  ;;  %v4299_v19 = vld [vmem:[#allocation11_spill] sm:$0xff] }
 0x1f0   : > { %v1881_v14 = vpop.permute.xlu1 %1880  ;;  %v1876_v38 = vpop.permute.xlu0 %1875  ;;  %v1828_v27 = vmul.f32 %v3718_v61, %v3825_v20  ;;  %v1836_v17 = vadd.f32 %v1826_v9, %v1749_v44  ;;  %v1656_v0 = vadd.f32 %v3843_v26, %v3815_v43  ;;  %v1752_v10 = vadd.f32 %v1742_v40, %v1665_v51  ;;  %v2456_v40 = vld [vmem:[#allocation2 + $0xb5] sm:$0xff]  ;;  %v2455_v63 = vld [vmem:[#allocation2 + $0xad] sm:$0xff] }
 0x1f1   : > { %v1912_v8 = vmul.f32 %v3743_v3, %v1881_v14  ;;  %v1911_v45 = vmul.f32 %v3743_v3, %v1876_v38  ;;  %2412 = vperm.xlu1 %2859, %v2369_v32   ;;  %2407 = vperm.xlu0 %2858, %v2368_v57   ;;  %v1751_v59 = vadd.f32 %v1741_v36, %v1664_v46  ;;  %v2452_v57 = vld [vmem:[#allocation2 + $0x95] sm:$0xff]  ;;  %v2454_v38 = vld [vmem:[#allocation2 + $0xa5] sm:$0xff] }
 0x1f2   : > { %v1821_v55 = vmul.f32 %v3718_v61, %v4299_v19  ;;  %v1744_v20 = vadd.f32 %v1734_v2, %v3851_v1  ;;  %v1820_v58 = vmul.f32 %v3718_v61, %v4300_v30  ;;  %v1743_v39 = vadd.f32 %v1733_v33, %v1656_v0  ;;  %v2457_v33 = vld [vmem:[#allocation2 + $0xbd] sm:$0xff] }
 0x1f3   : > { %v3891_v42 = vadd.f32 %v1912_v8, %v1835_v56  ;;  %v3893_v50 = vadd.f32 %v1911_v45, %v1834_v41  ;;  %v1839_v52 = vadd.f32 %v1829_v29, %v1752_v10  ;;  %v1838_v13 = vadd.f32 %v1828_v27, %v1751_v59 }
 0x1f4   : > { %v1891_v7 = vpop.permute.xlu1 %1890  ;;  %v1886_v47 = vpop.permute.xlu0 %1885  ;;  %v1908_v43 = vmul.f32 %v3743_v3, %v3847_v24  ;;  %v1907_v35 = vmul.f32 %v3743_v3, %v3849_v53  ;;  %v1831_v61 = vadd.f32 %v1821_v55, %v1744_v20  ;;  %v1830_v21 = vadd.f32 %v1820_v58, %v1743_v39  ;;  %v2538_v20 = vld [vmem:[#allocation2 + $0x26] sm:$0xff] }
 0x1f5   : > { %v1914_v11 = vmul.f32 %v3743_v3, %v1891_v7  ;;  %v1913_v12 = vmul.f32 %v3743_v3, %v1886_v47  ;;  %2422 = vperm.xlu1 %2859, %v2371_v16   ;;  %2417 = vperm.xlu0 %2858, %v2370_v49  }
 0x1f6   : > { %v1918_v56 = vadd.f32 %v1908_v43, %v1831_v61  ;;  %v1917_v34 = vadd.f32 %v1907_v35, %v1830_v21  ;;  %v2543_v61 = vld [vmem:[#allocation2 + $0x4e] sm:$0xff] }
 0x1f7   : > { %v1924_v60 = vadd.f32 %v1914_v11, %v1837_v54  ;;  %v1923_v28 = vadd.f32 %v1913_v12, %v1836_v17  ;;  %v2783_v54 = vld [vmem:[%s4082_s1 + $0x12] sm:$0x1]  ;;  %v2537_v11 = vld [vmem:[#allocation2 + $0x1e] sm:$0xff]  ;;  %v2536_v12 = vld [vmem:[#allocation2 + $0x16] sm:$0xff] }
 0x1f8   : > { %v1901_v26 = vpop.permute.xlu1 %1900  ;;  %v1896_v23 = vpop.permute.xlu0 %1895  ;;  %v2026_v17 = vunpack.c.l.bf16 %v2783_v54 }
 0x1f9   : > { %v1916_v32 = vmul.f32 %v3743_v3, %v1901_v26  ;;  %v1915_v1 = vmul.f32 %v3743_v3, %v1896_v23  ;;  %2469 = vperm.xlu1 %2859, %v2450_v6   ;;  %2464 = vperm.xlu0 %2858, %v2449_v22   ;;  %v2453_v3 = vld [vmem:[#allocation2 + $0x9d] sm:$0xff]  ;;  %v2539_v22 = vld [vmem:[#allocation2 + $0x2e] sm:$0xff] }
 0x1fb   : > { %v1926_v18 = vadd.f32 %v1916_v32, %v1839_v52  ;;  %v1925_v51 = vadd.f32 %v1915_v1, %v1838_v13 }
 0x1fc   : > { %v1948_v41 = vpop.permute.xlu1 %1947  ;;  %v1943_v24 = vpop.permute.xlu0 %1942 }
 0x1fd   : > { %v1995_v14 = vmul.f32 %v3777_v25, %v1948_v41  ;;  %v1994_v53 = vmul.f32 %v3777_v25, %v1943_v24  ;;  %2479 = vperm.xlu1 %2859, %v2452_v57   ;;  %2474 = vperm.xlu0 %2858, %v2451_v31   ;;  %v2542_v57 = vld [vmem:[#allocation2 + $0x46] sm:$0xff]  ;;  %v2545_v24 = vld [vmem:[#allocation2 + $0x5e] sm:$0x3f] }
 0x1ff   : > { %v2005_v9 = vadd.f32 %v1995_v14, %v1918_v56  ;;  %v2004_v8 = vadd.f32 %v1994_v53, %v1917_v34  ;;  %v2544_v34 = vld [vmem:[#allocation2 + $0x56] sm:$0xff]  ;;  %v2784_v14 = vld [vmem:[%s4082_s1 + $0x13] sm:$0x1] }
 0x200   : > { %v1958_v45 = vpop.permute.xlu1 %1957  ;;  %v1953_v46 = vpop.permute.xlu0 %1952 }
 0x201   : > { %v1997_v4 = vmul.f32 %v3777_v25, %v1958_v45  ;;  %v1996_v48 = vmul.f32 %v3777_v25, %v1953_v46  ;;  %2489 = vperm.xlu1 %2859, %v2454_v38   ;;  %2484 = vperm.xlu0 %2858, %v2453_v3   ;;  %v2113_v46 = vunpack.c.l.bf16 %v2784_v14 }
 0x203   : > { %v2007_v36 = vadd.f32 %v1997_v4, %v3875_v5  ;;  %v2006_v16 = vadd.f32 %v1996_v48, %v3877_v15 }
 0x204   : > { %v1968_v49 = vpop.permute.xlu1 %1967  ;;  %v1963_v62 = vpop.permute.xlu0 %1962 }
 0x205   : > { %v1999_v2 = vmul.f32 %v3777_v25, %v1968_v49  ;;  %v1998_v44 = vmul.f32 %v3777_v25, %v1963_v62  ;;  %2499 = vperm.xlu1 %2859, %v2456_v40   ;;  %2494 = vperm.xlu0 %2858, %v2455_v63  }
 0x207   : > { %v2009_v29 = vadd.f32 %v1999_v2, %v3891_v42  ;;  %v2008_v5 = vadd.f32 %v1998_v44, %v3893_v50  ;;  %v4301_v50 = vld [vmem:[#allocation92_spill] sm:$0xff] }
 0x208   : > { %v1978_v27 = vpop.permute.xlu1 %1977  ;;  %v1973_v15 = vpop.permute.xlu0 %1972  ;;  %v2080_v6 = vrot.slane %v2026_v17, %v4301_v50  ;;  %v2167_v49 = vrot.slane %v2113_v46, %v4301_v50 }
 0x209   : > { %v2001_v7 = vmul.f32 %v3777_v25, %v1978_v27  ;;  %v2000_v47 = vmul.f32 %v3777_v25, %v1973_v15  ;;  %2509 = vperm.xlu1 %2859, %v2458_v37   ;;  %2504 = vperm.xlu0 %2858, %v2457_v33  }
 0x20b   : > { %v2011_v0 = vadd.f32 %v2001_v7, %v1924_v60  ;;  %v2010_v10 = vadd.f32 %v2000_v47, %v1923_v28  ;;  %v2541_v60 = vld [vmem:[#allocation2 + $0x3e] sm:$0xff]  ;;  %v2540_v28 = vld [vmem:[#allocation2 + $0x36] sm:$0xff] }
 0x20c   : > { %v1988_v59 = vpop.permute.xlu1 %1987  ;;  %v1983_v19 = vpop.permute.xlu0 %1982 }
 0x20d   : > { %v2003_v55 = vmul.f32 %v3777_v25, %v1988_v59  ;;  %v2002_v42 = vmul.f32 %v3777_v25, %v1983_v19  ;;  %2556 = vperm.xlu1 %2859, %v2537_v11   ;;  %2551 = vperm.xlu0 %2858, %v2536_v12   ;;  %v2785_v19 = vld [vmem:[%s4082_s1 + $0x14] sm:$0x1] }
 0x20f   : > { %v2013_v30 = vadd.f32 %v2003_v55, %v1926_v18  ;;  %v2012_v58 = vadd.f32 %v2002_v42, %v1925_v51 }
 0x210   : > { %v2035_v39 = vpop.permute.xlu1 %2034  ;;  %v2030_v52 = vpop.permute.xlu0 %2029 }
 0x211   : > { %v2082_v13 = vmul.f32 %v2080_v6, %v2035_v39  ;;  %v2081_v43 = vmul.f32 %v2080_v6, %v2030_v52  ;;  %2566 = vperm.xlu1 %2859, %v2539_v22   ;;  %2561 = vperm.xlu0 %2858, %v2538_v20  }
 0x213   : > { %v2092_v26 = vadd.f32 %v2082_v13, %v2005_v9  ;;  %v2091_v23 = vadd.f32 %v2081_v43, %v2004_v8 }
 0x214   : > { %v2045_v35 = vpop.permute.xlu1 %2044  ;;  %v2040_v25 = vpop.permute.xlu0 %2039 }
 0x215   : > { %v2084_v32 = vmul.f32 %v2080_v6, %v2045_v35  ;;  %v2083_v1 = vmul.f32 %v2080_v6, %v2040_v25  ;;  %2576 = vperm.xlu1 %2859, %v2541_v60   ;;  %2571 = vperm.xlu0 %2858, %v2540_v28  }
 0x217   : > { %v2094_v31 = vadd.f32 %v2084_v32, %v2007_v36  ;;  %v2093_v21 = vadd.f32 %v2083_v1, %v2006_v16 }
 0x218   : > { %v2055_v18 = vpop.permute.xlu1 %2054  ;;  %v2050_v51 = vpop.permute.xlu0 %2049 }
 0x219   : > { %v2086_v56 = vmul.f32 %v2080_v6, %v2055_v18  ;;  %v2085_v41 = vmul.f32 %v2080_v6, %v2050_v51  ;;  %2586 = vperm.xlu1 %2859, %v2543_v61   ;;  %2581 = vperm.xlu0 %2858, %v2542_v57  }
 0x21b   : > { %v2096_v53 = vadd.f32 %v2086_v56, %v2009_v29  ;;  %v2095_v38 = vadd.f32 %v2085_v41, %v2008_v5 }
 0x21c   : > { %v2065_v3 = vpop.permute.xlu1 %2064  ;;  %v2060_v9 = vpop.permute.xlu0 %2059 }
 0x21d   : > { %v2088_v8 = vmul.f32 %v2080_v6, %v2065_v3  ;;  %v2087_v45 = vmul.f32 %v2080_v6, %v2060_v9  ;;  %2596 = vperm.xlu1 %2859, %v2545_v24   ;;  %2591 = vperm.xlu0 %2858, %v2544_v34  }
 0x21f   : > { %v2098_v4 = vadd.f32 %v2088_v8, %v2011_v0  ;;  %v2097_v48 = vadd.f32 %v2087_v45, %v2010_v10 }
 0x220   : > { %v2075_v40 = vpop.permute.xlu1 %2074  ;;  %v2070_v63 = vpop.permute.xlu0 %2069 }
 0x221   : > { %v2090_v36 = vmul.f32 %v2080_v6, %v2075_v40  ;;  %v2089_v16 = vmul.f32 %v2080_v6, %v2070_v63 }
 0x223   : > { %v2100_v62 = vadd.f32 %v2090_v36, %v2013_v30  ;;  %v2099_v2 = vadd.f32 %v2089_v16, %v2012_v58  ;;  %v2200_v58 = vunpack.c.l.bf16 %v2785_v19 }
 0x224   : > { %v2122_v44 = vpop.permute.xlu1 %2121  ;;  %v2117_v37 = vpop.permute.xlu0 %2116 }
 0x225   : > { %v2169_v33 = vmul.f32 %v2167_v49, %v2122_v44  ;;  %v2168_v54 = vmul.f32 %v2167_v49, %v2117_v37 }
 0x227   : > { %v2179_v29 = vadd.f32 %v2169_v33, %v2092_v26  ;;  %v2178_v5 = vadd.f32 %v2168_v54, %v2091_v23  ;;  %v2254_v26 = vrot.slane %v2200_v58, %v4301_v50  ;;  %v2787_v58 = vld [vmem:[%s4082_s1 + $0x16] sm:$0x1] }
 0x228   : > { %v2132_v27 = vpop.permute.xlu1 %2131  ;;  %v2127_v15 = vpop.permute.xlu0 %2126 }
 0x229   : > { %v2171_v7 = vmul.f32 %v2167_v49, %v2132_v27  ;;  %v2170_v47 = vmul.f32 %v2167_v49, %v2127_v15 }
 0x22b   : > { %v2181_v17 = vadd.f32 %v2171_v7, %v2094_v31  ;;  %v2180_v11 = vadd.f32 %v2170_v47, %v2093_v21 }
 0x22c   : > { %v2142_v12 = vpop.permute.xlu1 %2141  ;;  %v2137_v0 = vpop.permute.xlu0 %2136 }
 0x22d   : > { %v2173_v10 = vmul.f32 %v2167_v49, %v2142_v12  ;;  %v2172_v59 = vmul.f32 %v2167_v49, %v2137_v0 }
 0x22f   : > { %v2183_v55 = vadd.f32 %v2173_v10, %v2096_v53  ;;  %v2182_v42 = vadd.f32 %v2172_v59, %v2095_v38 }
 0x230   : > { %v2152_v6 = vpop.permute.xlu1 %2151  ;;  %v2147_v22 = vpop.permute.xlu0 %2146 }
 0x231   : > { %v2175_v20 = vmul.f32 %v2167_v49, %v2152_v6  ;;  %v2174_v30 = vmul.f32 %v2167_v49, %v2147_v22 }
 0x233   : > { %v2185_v39 = vadd.f32 %v2175_v20, %v2098_v4  ;;  %v2184_v52 = vadd.f32 %v2174_v30, %v2097_v48  ;;  %v2786_v30 = vld [vmem:[%s4082_s1 + $0x15] sm:$0x1] }
 0x234   : > { %v2162_v13 = vpop.permute.xlu1 %2161  ;;  %v2157_v43 = vpop.permute.xlu0 %2156 }
 0x235   : > { %v2177_v60 = vmul.f32 %v2167_v49, %v2162_v13  ;;  %v2176_v28 = vmul.f32 %v2167_v49, %v2157_v43  ;;  %v2287_v13 = vunpack.c.l.bf16 %v2786_v30  ;;  %v2788_v43 = vld [vmem:[%s4082_s1 + $0x17] sm:$0x1] }
 0x237   : > { %v2187_v23 = vadd.f32 %v2177_v60, %v2100_v62  ;;  %v2186_v35 = vadd.f32 %v2176_v28, %v2099_v2  ;;  %v2374_v60 = vunpack.c.l.bf16 %v2787_v58 }
 0x238   : > { %v2209_v25 = vpop.permute.xlu1 %2208  ;;  %v2204_v32 = vpop.permute.xlu0 %2203 }
 0x239   : > { %v2256_v1 = vmul.f32 %v2254_v26, %v2209_v25  ;;  %v2255_v61 = vmul.f32 %v2254_v26, %v2204_v32  ;;  %v2789_v25 = vld [vmem:[%s4082_s1 + $0x18] sm:$0x1]  ;;  %v3988_v32 = vrot.slane %v2374_v60, %v4301_v50 }
 0x23b   : > { %v3942_v57 = vadd.f32 %v2256_v1, %v2179_v29  ;;  %v3944_v31 = vadd.f32 %v2255_v61, %v2178_v5 }
 0x23c   : > { %v2219_v21 = vpop.permute.xlu1 %2218  ;;  %v2214_v18 = vpop.permute.xlu0 %2213 }
 0x23d   : > { %v2258_v51 = vmul.f32 %v2254_v26, %v2219_v21  ;;  %v2257_v56 = vmul.f32 %v2254_v26, %v2214_v18  ;;  %v2548_v21 = vunpack.c.l.bf16 %v2789_v25 }
 0x23f   : > { %v3946_v41 = vadd.f32 %v2258_v51, %v2181_v17  ;;  %v3948_v24 = vadd.f32 %v2257_v56, %v2180_v11 }
 0x240   : > { %v2229_v34 = vpop.permute.xlu1 %2228  ;;  %v2224_v14 = vpop.permute.xlu0 %2223 }
 0x241   : > { %v2260_v53 = vmul.f32 %v2254_v26, %v2229_v34  ;;  %v2259_v38 = vmul.f32 %v2254_v26, %v2224_v14 }
 0x243   : > { %v3950_v3 = vadd.f32 %v2260_v53, %v2183_v55  ;;  %v3952_v9 = vadd.f32 %v2259_v38, %v2182_v42 }
 0x244   : > { %v2239_v8 = vpop.permute.xlu1 %2238  ;;  %v2234_v45 = vpop.permute.xlu0 %2233 }
 0x245   : > { %v2262_v46 = vmul.f32 %v2254_v26, %v2239_v8  ;;  %v2261_v4 = vmul.f32 %v2254_v26, %v2234_v45 }
 0x247   : > { %v3954_v48 = vadd.f32 %v2262_v46, %v2185_v39  ;;  %v3956_v40 = vadd.f32 %v2261_v4, %v2184_v52 }
 0x248   : > { %v2249_v63 = vpop.permute.xlu1 %2248  ;;  %v2244_v36 = vpop.permute.xlu0 %2243 }
 0x249   : > { %v2264_v16 = vmul.f32 %v2254_v26, %v2249_v63  ;;  %v2263_v49 = vmul.f32 %v2254_v26, %v2244_v36 }
 0x24b   : > { %v3958_v62 = vadd.f32 %v2264_v16, %v2187_v23  ;;  %v3960_v2 = vadd.f32 %v2263_v49, %v2186_v35  ;;  %v2341_v23 = vrot.slane %v2287_v13, %v4301_v50  ;;  %v2461_v35 = vunpack.c.l.bf16 %v2788_v43  ;;  %v4024_v43 = vld [vmem:[#allocation3] ss:$0 sm:$0xff] }
 0x24c   : > { %v2296_v44 = vpop.permute.xlu1 %2295  ;;  %v2291_v37 = vpop.permute.xlu0 %2290  ;;  %v4004_v16 = vrot.slane %v2548_v21, %v4301_v50 }
 0x24d   : > { %v2343_v18 = vmul.f32 %v2341_v23, %v2296_v44  ;;  %v2342_v51 = vmul.f32 %v2341_v23, %v2291_v37  ;;  %v3995_v56 = vrot.slane %v2461_v35, %v4301_v50 }
 0x24f   : > { %v2353_v49 = vadd.f32 %v2343_v18, %v3942_v57  ;;  %v2352_v44 = vadd.f32 %v2342_v51, %v3944_v31 }
 0x250   : > { %v2306_v33 = vpop.permute.xlu1 %2305  ;;  %v2301_v54 = vpop.permute.xlu0 %2300 }
 0x251   : > { %v2345_v34 = vmul.f32 %v2341_v23, %v2306_v33  ;;  %v2344_v14 = vmul.f32 %v2341_v23, %v2301_v54 }
 0x253   : > { %v2355_v54 = vadd.f32 %v2345_v34, %v3946_v41 }
 0x254   : > { %v2316_v29 = vpop.permute.xlu1 %2315  ;;  %v2311_v5 = vpop.permute.xlu0 %2310 }
 0x255   : > { %v2347_v53 = vmul.f32 %v2341_v23, %v2316_v29  ;;  %v2346_v38 = vmul.f32 %v2341_v23, %v2311_v5  ;;  %v2354_v29 = vadd.f32 %v2344_v14, %v3948_v24 }
 0x257   : > { %v2356_v50 = vadd.f32 %v2346_v38, %v3952_v9 }
 0x258   : > { %v2326_v27 = vpop.permute.xlu1 %2325  ;;  %v2321_v15 = vpop.permute.xlu0 %2320 }
 0x259   : > { %v2349_v46 = vmul.f32 %v2341_v23, %v2326_v27  ;;  %v2348_v4 = vmul.f32 %v2341_v23, %v2321_v15  ;;  %v2357_v15 = vadd.f32 %v2347_v53, %v3950_v3 }
 0x25b   : > { %v2359_v31 = vadd.f32 %v2349_v46, %v3954_v48 }
 0x25c   : > { %v3962_v7 = vpop.permute.xlu1 %2335  ;;  %v3964_v47 = vpop.permute.xlu0 %2330 }
 0x260   : > { %v2383_v17 = vpop.permute.xlu1 %2382  ;;  %v2378_v11 = vpop.permute.xlu0 %2377 }
 0x261   : > { %v2430_v8 = vmul.f32 %v3988_v32, %v2383_v17  ;;  %v2429_v45 = vmul.f32 %v3988_v32, %v2378_v11  ;;  %v2358_v11 = vadd.f32 %v2348_v4, %v3956_v40  ;;  %v2351_v40 = vmul.f32 %v2341_v23, %v3962_v7 }
 0x263   : > { %v2440_v17 = vadd.f32 %v2430_v8, %v2353_v49  ;;  %v2439_v57 = vadd.f32 %v2429_v45, %v2352_v44 }
 0x264   : > { %v2393_v12 = vpop.permute.xlu1 %2392  ;;  %v2388_v0 = vpop.permute.xlu0 %2387 }
 0x265   : > { %v2432_v5 = vmul.f32 %v3988_v32, %v2393_v12  ;;  %v2431_v27 = vmul.f32 %v3988_v32, %v2388_v0 }
 0x267   : > { %v2442_v9 = vadd.f32 %v2432_v5, %v2355_v54  ;;  %v2441_v58 = vadd.f32 %v2431_v27, %v2354_v29 }
 0x268   : > { %v2403_v10 = vpop.permute.xlu1 %2402  ;;  %v2398_v59 = vpop.permute.xlu0 %2397 }
 0x269   : > { %v2434_v13 = vmul.f32 %v3988_v32, %v2403_v10  ;;  %v2433_v48 = vmul.f32 %v3988_v32, %v2398_v59 }
 0x26b   : > { %v2444_v53 = vadd.f32 %v2434_v13, %v2357_v15 }
 0x26c   : > { %v3966_v19 = vpop.permute.xlu1 %2412  ;;  %v3968_v55 = vpop.permute.xlu0 %2407 }
 0x270   : > { %v3970_v42 = vpop.permute.xlu1 %2422  ;;  %v3972_v6 = vpop.permute.xlu0 %2417 }
 0x274   : > { %v2470_v22 = vpop.permute.xlu1 %2469  ;;  %v2465_v20 = vpop.permute.xlu0 %2464 }
 0x275   : > { %v2517_v37 = vmul.f32 %v3995_v56, %v2470_v22  ;;  %v2516_v33 = vmul.f32 %v3995_v56, %v2465_v20 }
 0x277   : > { %v2527_v12 = vadd.f32 %v2517_v37, %v2440_v17  ;;  %v2526_v30 = vadd.f32 %v2516_v33, %v2439_v57 }
 0x278   : > { %v2480_v39 = vpop.permute.xlu1 %2479  ;;  %v2475_v52 = vpop.permute.xlu0 %2474 }
 0x279   : > { %v2519_v22 = vmul.f32 %v3995_v56, %v2480_v39  ;;  %v2518_v41 = vmul.f32 %v3995_v56, %v2475_v52  ;;  %v2350_v39 = vmul.f32 %v2341_v23, %v3964_v47  ;;  %v2443_v47 = vadd.f32 %v2433_v48, %v2356_v50 }
 0x27a   : > { %v2436_v23 = vmul.f32 %v3988_v32, %v3966_v19 }
 0x27b   : > { %v2529_v35 = vadd.f32 %v2519_v22, %v2442_v9  ;;  %v2528_v25 = vadd.f32 %v2518_v41, %v2441_v58  ;;  %v2360_v27 = vadd.f32 %v2350_v39, %v3960_v2 }
 0x27c   : > { %v2490_v28 = vpop.permute.xlu1 %2489  ;;  %v2485_v26 = vpop.permute.xlu0 %2484  ;;  %v2446_v29 = vadd.f32 %v2436_v23, %v2359_v31 }
 0x27d   : > { %v2521_v21 = vmul.f32 %v3995_v56, %v2490_v28  ;;  %v2520_v18 = vmul.f32 %v3995_v56, %v2485_v26  ;;  %v2435_v28 = vmul.f32 %v3988_v32, %v3968_v55  ;;  %v2361_v26 = vadd.f32 %v2351_v40, %v3958_v62 }
 0x27f   : > { %v2531_v46 = vadd.f32 %v2521_v21, %v2444_v53  ;;  %v2530_v4 = vadd.f32 %v2520_v18, %v2443_v47  ;;  %v2445_v5 = vadd.f32 %v2435_v28, %v2358_v11 }
 0x280   : > { %v3990_v1 = vpop.permute.xlu1 %2499  ;;  %v3992_v61 = vpop.permute.xlu0 %2494 }
 0x281   : > { %v2523_v49 = vmul.f32 %v3995_v56, %v3990_v1  ;;  %v2522_v19 = vmul.f32 %v3995_v56, %v3992_v61  ;;  %v2438_v1 = vmul.f32 %v3988_v32, %v3970_v42  ;;  %v2437_v61 = vmul.f32 %v3988_v32, %v3972_v6 }
 0x283   : > { %v2533_v57 = vadd.f32 %v2523_v49, %v2446_v29  ;;  %v2532_v22 = vadd.f32 %v2522_v19, %v2445_v5 }
 0x284   : > { %v3999_v63 = vpop.permute.xlu1 %2509  ;;  %v4001_v36 = vpop.permute.xlu0 %2504 }
 0x285   : > { %v2525_v41 = vmul.f32 %v3995_v56, %v3999_v63  ;;  %v2524_v31 = vmul.f32 %v3995_v56, %v4001_v36 }
 0x288   : > { %v2557_v24 = vpop.permute.xlu1 %2556  ;;  %v2552_v20 = vpop.permute.xlu0 %2551 }
 0x289   : > { %v2604_v0 = vmul.f32 %v4004_v16, %v2557_v24  ;;  %v2603_v3 = vmul.f32 %v4004_v16, %v2552_v20  ;;  %v2448_v20 = vadd.f32 %v2438_v1, %v2361_v26 }
 0x28b   : > { %v2614_v52 = vadd.f32 %v2604_v0, %v2527_v12  ;;  %v2613_v60 = vadd.f32 %v2603_v3, %v2526_v30  ;;  %v2447_v12 = vadd.f32 %v2437_v61, %v2360_v27  ;;  %v2535_v3 = vadd.f32 %v2525_v41, %v2448_v20 }
 0x28c   : > { %v2567_v51 = vpop.permute.xlu1 %2566  ;;  %v2562_v34 = vpop.permute.xlu0 %2561 }
 0x28d   : > { %v2631_v10 = vadd.f32 %v4024_v43, %v2614_v52  ;;  %v2630_v59 = vadd.f32 %v4024_v43, %v2613_v60  ;;  %v2606_v14 = vmul.f32 %v4004_v16, %v2567_v51  ;;  %v2605_v7 = vmul.f32 %v4004_v16, %v2562_v34 }
 0x28e   : > { %v2534_v56 = vadd.f32 %v2524_v31, %v2447_v12 }
 0x28f   : > { %v2816_v38 = vpack.c.bf16 %v2631_v10, %v2630_v59  ;;  %v2616_v8 = vadd.f32 %v2606_v14, %v2529_v35  ;;  %v2615_v45 = vadd.f32 %v2605_v7, %v2528_v25 }
 0x290   : > { %v2577_v55 = vpop.permute.xlu1 %2576  ;;  %v2572_v44 = vpop.permute.xlu0 %2571 }
 0x291   : > { %2817 = vst [vmem:[%s4042_s27] sm:$0xff] %v2816_v38   ;;  %v2633_v37 = vadd.f32 %v4024_v43, %v2616_v8  ;;  %v2632_v33 = vadd.f32 %v4024_v43, %v2615_v45  ;;  %v2608_v62 = vmul.f32 %v4004_v16, %v2577_v55  ;;  %v2607_v54 = vmul.f32 %v4004_v16, %v2572_v44 }
 0x293   : > { %v2821_v15 = vpack.c.bf16 %v2633_v37, %v2632_v33  ;;  %v2618_v50 = vadd.f32 %v2608_v62, %v2531_v46  ;;  %v2617_v17 = vadd.f32 %v2607_v54, %v2530_v4 }
 0x294   : > { %v2587_v11 = vpop.permute.xlu1 %2586  ;;  %v2582_v24 = vpop.permute.xlu0 %2581 }
 0x295   : > { %2833 = vst [vmem:[%s4042_s27 + $0x8] sm:$0xff] %v2821_v15   ;;  %v2635_v42 = vadd.f32 %v4024_v43, %v2618_v50  ;;  %v2634_v6 = vadd.f32 %v4024_v43, %v2617_v17  ;;  %v2610_v2 = vmul.f32 %v4004_v16, %v2587_v11  ;;  %v2609_v32 = vmul.f32 %v4004_v16, %v2582_v24 }
 0x297   : > { %v2826_v30 = vpack.c.bf16 %v2635_v42, %v2634_v6  ;;  %v2620_v63 = vadd.f32 %v2610_v2, %v2533_v57  ;;  %v2619_v0 = vadd.f32 %v2609_v32, %v2532_v22 }
 0x298   : > { %v2597_v36 = vpop.permute.xlu1 %2596  ;;  %v2592_v9 = vpop.permute.xlu0 %2591 }
 0x299   : > { %2834 = vst [vmem:[%s4042_s27 + $0x10] sm:$0xff] %v2826_v30   ;;  %v2637_v58 = vadd.f32 %v4024_v43, %v2620_v63  ;;  %v2636_v13 = vadd.f32 %v4024_v43, %v2619_v0  ;;  %v2612_v48 = vmul.f32 %v4004_v16, %v2597_v36  ;;  %v2611_v40 = vmul.f32 %v4004_v16, %v2592_v9 }
 0x29b   : > { %v2831_v39 = vpack.c.bf16 %v2637_v58, %v2636_v13  ;;  %v2622_v52 = vadd.f32 %v2612_v48, %v2535_v3  ;;  %v2621_v60 = vadd.f32 %v2611_v40, %v2534_v56 }
 0x29d   : > { %2835 = vst [vmem:[%s4042_s27 + $0x18] sm:$0xff] %v2831_v39   ;;  %v2639_v35 = vadd.f32 %v4024_v43, %v2622_v52  ;;  %v2638_v25 = vadd.f32 %v4024_v43, %v2621_v60 }
 0x29f   : > { %v2812_v21 = vpack.c.bf16 %v2639_v35, %v2639_v35  ;;  %v2811_v18 = vpack.c.bf16 %v2638_v25, %v2638_v25 }
 0x2a1   : > { %2689 = vst [vmem:[%s4042_s27 + $0x24] sm:$0x7] %v2812_v21  ;;  %2688 = vst [vmem:[%s4042_s27 + $0x20] sm:$0xf] %v2811_v18 }
 0x2a2 PF: > { %s14_s12 = sadd.s32 1, %s2896_s12  }
 0x2a3   : > { %p11_p1 = scmp.ge.s32.totalorder %s14_s12, 4  }
 0x2a5   :  { %13 = sbr.rel (!%p11_p1) target bundleno = 1 (0x1), region = 94 }
 0x2aa   :  { %2711 = vsyncpa [#allocation4], 1 }
 0x2ab   :  { %2713 = vsyncpa [#allocation4 + $0x1], 1 }

// kernel: discriminator_forward.6
= control target key start
LH: loop header
LB: loop body
LE: loop exit
PB: predicated region body
PF: predicated region fallthrough
CT: control target
= control target key end

     0   :  { %s4816_s12 = smov 0   ;;  %s5717_s0 = inlined_call_operand.vmem [shape: bf16[2,4,16,128], index: 0, kind: input, shape index: {}]   ;;  %s5718_s1 = inlined_call_operand.vmem [shape: bf16[25,128,128], index: 1, kind: input, shape index: {}]   ;;  %s5719_s2 = inlined_call_operand.vmem [shape: f32[1,128], index: 2, kind: input, shape index: {}]   ;;  %s5720_s3 = inlined_call_operand.vmem [shape: bf16[2,6,128], index: 3, kind: output, shape index: {}]  }
   0x1 LB: > { %s3159_s13 = sadd.s32 4294967295, %s4792_s12   ;;  %p3163_p0 = scmp.ge.s32.totalorder %s4792_s12, 1  ;;  %s4792_s12 = sphi %s4816_s12, %s13_s12  }
   0x2   : > { %p137_p1 = scmp.lt.s32.totalorder %s4792_s12, 3 }
   0x4   : > { %p138_p2 = pnand %p3163_p0, %p137_p1 }
   0x5   : > { %p160_p3 = scmp.lt.s32.totalorder (!%p138_p2), %s3159_s13, 1 }
   0x6   : > { %141 = sbr.rel (%p138_p2) target bundleno = 628 (0x274), region = 32 }
   0xb   : > { %v4567_v0 = vld [vmem:[%s5718_s1 + $0x78] sm:$0xff]   ;;  %v4794_v1 = vmov 0.0   ;;  %v4569_v3 = vld [vmem:[%s5718_s1 + $0x70] sm:$0xff]   ;;  %vm4795_vm0 = vmmov 0   ;;  %v4571_v5 = vld [vmem:[%s5718_s1 + $0x68] sm:$0xff]   ;;  %s5722_s13 = smov (!%p160_p3, %s3159_s13), 1 }
   0xc   : > { %4057 = vmatprep.subr.bf16.mxu0 %v4794_v1  ;;  %4077 = vmatprep.subr.bf16.mxu1 %v4794_v1  ;;  %v4568_v2 = vld [vmem:[%s5718_s1 + $0x38] sm:$0xff]   ;;  %v4570_v4 = vld [vmem:[%s5718_s1 + $0x30] sm:$0xff]   ;;  %v4572_v6 = vld [vmem:[%s5718_s1 + $0x28] sm:$0xff]   ;;  %s3781_s28 = sshll.u32 %s5722_s13, 5  ;;  %s3166_s22 = sshll.u32 %s5722_s13, 2 }
   0xd   : > { %4058 = vmatpush3.bf16.msra.mxu0 %v4567_v0  ;;  %4073 = vmatprep.mubr.msk.bf16.mxu0 %vm4795_vm0, %v4794_v1  ;;  %v4573_v7 = vld [vmem:[%s5718_s1 + $0x60] sm:$0xff]   ;;  %s4866_s6 = scalar_lea.vmem %s5717_s0, %s3781_s28  ;;  %v4575_v9 = vld [vmem:[%s5718_s1 + $0x58] sm:$0xff]   ;;  %v4577_v13 = vld [vmem:[%s5718_s1 + $0x50] sm:$0xff]  }
   0xe   : > { %4078 = vmatpush3.bf16.msra.mxu1 %v4568_v2  ;;  %4059 = vmatprep.subr.bf16.mxu0 %v4794_v1  ;;  %v4574_v8 = vld [vmem:[%s5718_s1 + $0x20] sm:$0xff]   ;;  %v4576_v10 = vld [vmem:[%s5718_s1 + $0x18] sm:$0xff]   ;;  %v3826_v11 = vld [vmem:[%s4866_s6 + $0x8] sm:$0xff]  }
   0xf   : > { %4079 = vmatprep.subr.bf16.mxu1 %v4794_v1  ;;  %4093 = vmatprep.mubr.msk.bf16.mxu1 %vm4795_vm0, %v4794_v1  ;;  %v3791_v12 = vld [vmem:[%s4866_s6] sm:$0xff]   ;;  %v3796_v14 = vunpack.c.l.bf16 %v3826_v11  ;;  %v3797_v15 = vunpack.c.h.bf16 %v3826_v11  ;;  %v4578_v18 = vld [vmem:[%s5718_s1 + $0x10] sm:$0xff]   ;;  %v4579_v25 = vld [vmem:[%s5718_s1 + $0x48] sm:$0xff]  }
  0x10   : > { %v3792_v16 = vunpack.c.l.bf16 %v3791_v12  ;;  %v3793_v17 = vunpack.c.h.bf16 %v3791_v12  ;;  %v4580_v29 = vld [vmem:[%s5718_s1 + $0x8] sm:$0xff]   ;;  %v4581_v31 = vld [vmem:[%s5718_s1 + $0x40] sm:$0xff]   ;;  %v4583_v33 = vld [vmem:[%s5718_s1 + $0xb8] sm:$0xff]  }
  0x11   : > { %4060 = vmatpush3.bf16.msra.mxu0 %v4569_v3  ;;  %vm188_vm1 = vcmp.gt.f32.partialorder %v3796_v14, 0.0  ;;  %vm189_vm2 = vcmp.gt.f32.partialorder %v3797_v15, 0.0  ;;  %v196_v19 = vmul.f32 0.2, %v3796_v14  ;;  %v197_v20 = vmul.f32 0.2, %v3797_v15 }
  0x12   : > { %4080 = vmatpush3.bf16.msra.mxu1 %v4570_v4  ;;  %4061 = vmatprep.subr.bf16.mxu0 %v4794_v1  ;;  %vm186_vm3 = vcmp.gt.f32.partialorder %v3792_v16, 0.0  ;;  %vm187_vm4 = vcmp.gt.f32.partialorder %v3793_v17, 0.0  ;;  %v194_v21 = vmul.f32 0.2, %v3792_v16  ;;  %v195_v22 = vmul.f32 0.2, %v3793_v17 }
  0x13   : > { %4081 = vmatprep.subr.bf16.mxu1 %v4794_v1  ;;  %v204_v23 = vsel %vm188_vm1, %v3796_v14, %v196_v19  ;;  %v205_v24 = vsel %vm189_vm2, %v3797_v15, %v197_v20  ;;  %v4582_v32 = vld [vmem:[%s5718_s1] sm:$0xff]   ;;  %v4584_v35 = vld [vmem:[%s5718_s1 + $0xf8] sm:$0xff]   ;;  %v4585_v37 = vld [vmem:[%s5718_s1 + $0xb0] sm:$0xff]  }
  0x14   : > { %v3814_v26 = vpack.c.bf16 %v205_v24, %v204_v23  ;;  %v202_v27 = vsel %vm186_vm3, %v3792_v16, %v194_v21  ;;  %v203_v28 = vsel %vm187_vm4, %v3793_v17, %v195_v22  ;;  %v4586_v38 = vld [vmem:[%s5718_s1 + $0xf0] sm:$0xff]   ;;  %v4587_v39 = vld [vmem:[%s5718_s1 + $0xa8] sm:$0xff]   ;;  %v4589_v41 = vld [vmem:[%s5718_s1 + $0xa0] sm:$0xff]  }
  0x15   : > { %4062 = vmatpush3.bf16.msra.mxu0 %v4571_v5  ;;  %v3809_v30 = vpack.c.bf16 %v203_v28, %v202_v27  ;;  %v4588_v40 = vld [vmem:[%s5718_s1 + $0xe8] sm:$0xff]   ;;  %v4590_v42 = vld [vmem:[%s5718_s1 + $0xe0] sm:$0xff]   ;;  %v4591_v43 = vld [vmem:[%s5718_s1 + $0x98] sm:$0xff]  }
  0x16   : > { %4082 = vmatpush3.bf16.msra.mxu1 %v4572_v6  ;;  %4063 = vmatprep.subr.bf16.mxu0 %v4794_v1  ;;  %3829 = vst [vmem:[#allocation2 + $0x8] sm:$0xff] %v3814_v26   ;;  %v4592_v44 = vld [vmem:[%s5718_s1 + $0xd8] sm:$0xff]   ;;  %v4593_v47 = vld [vmem:[%s5718_s1 + $0x90] sm:$0xff]   ;;  %v4595_v50 = vld [vmem:[%s5718_s1 + $0x88] sm:$0xff]  }
  0x17   : > { %4083 = vmatprep.subr.bf16.mxu1 %v4794_v1  ;;  %3810 = vst [vmem:[#allocation2] sm:$0xff] %v3809_v30   ;;  %v4594_v48 = vld [vmem:[%s5718_s1 + $0xd0] sm:$0xff]   ;;  %v4596_v52 = vld [vmem:[%s5718_s1 + $0xc8] sm:$0xff]   ;;  %v4597_v54 = vld [vmem:[%s5718_s1 + $0x80] sm:$0xff]  }
  0x18   : > { %v3827_v53 = vld [vmem:[%s4866_s6 + $0x10] sm:$0xff]   ;;  %v4598_v63 = vld [vmem:[%s5718_s1 + $0xc0] sm:$0xff]   ;;  %v4600_v5 = vld [vmem:[%s5718_s1 + $0x138] sm:$0xff]  }
  0x19   : > { %4064 = vmatpush3.bf16.msra.mxu0 %v4573_v7  ;;  %v3800_v57 = vunpack.c.l.bf16 %v3827_v53  ;;  %v3801_v58 = vunpack.c.h.bf16 %v3827_v53  ;;  %v4602_v7 = vld [vmem:[%s5718_s1 + $0x178] sm:$0xff]   ;;  %v4606_v11 = vld [vmem:[%s5718_s1 + $0x168] sm:$0xff]   ;;  %v4607_v15 = vld [vmem:[%s5718_s1 + $0x120] sm:$0xff]  }
  0x1a   : > { %4084 = vmatpush3.bf16.msra.mxu1 %v4574_v8  ;;  %4065 = vmatprep.subr.bf16.mxu0 %v4794_v1  ;;  %v4603_v8 = vld [vmem:[%s5718_s1 + $0x130] sm:$0xff]   ;;  %v3828_v12 = vld [vmem:[%s4866_s6 + $0x18] sm:$0xff]   ;;  %v4613_v26 = vld [vmem:[%s5718_s1 + $0x108] sm:$0xff]   ;;  %s168_s6 = scalar_lea.vmem %s5720_s3, %s3166_s22 }
  0x1b   : > { %4085 = vmatprep.subr.bf16.mxu1 %v4794_v1  ;;  %vm190_vm5 = vcmp.gt.f32.partialorder %v3800_v57, 0.0  ;;  %vm191_vm6 = vcmp.gt.f32.partialorder %v3801_v58, 0.0  ;;  %v198_v61 = vmul.f32 0.2, %v3800_v57  ;;  %v199_v62 = vmul.f32 0.2, %v3801_v58 }
  0x1c   : > { %v3805_v14 = vunpack.c.h.bf16 %v3828_v12  ;;  %v4609_v22 = vld [vmem:[%s5718_s1 + $0x118] sm:$0xff]   ;;  %v4611_v24 = vld [vmem:[%s5718_s1 + $0x110] sm:$0xff]   ;;  %v4614_v28 = vld [vmem:[%s5718_s1 + $0x148] sm:$0xff]  }
  0x1d   : > { %4066 = vmatpush3.bf16.msra.mxu0 %v4575_v9  ;;  %v268_v34 = vld [vmem:[#allocation2 + $0x8] sm:$0x7]  ;;  %v206_v0 = vsel %vm190_vm5, %v3800_v57, %v198_v61  ;;  %v207_v2 = vsel %vm191_vm6, %v3801_v58, %v199_v62  ;;  %v4604_v9 = vld [vmem:[%s5718_s1 + $0x170] sm:$0xff]   ;;  %v4610_v23 = vld [vmem:[%s5718_s1 + $0x158] sm:$0xff]  }
  0x1e   : > { %4086 = vmatpush3.bf16.msra.mxu1 %v4576_v10  ;;  %4067 = vmatprep.subr.bf16.mxu0 %v4794_v1  ;;  %v250_v36 = vld [vmem:[#allocation2] sm:$0x7]  ;;  %v4601_v46 = vld [vmem:[#allocation2 + $0x8] ss:$0 sps:$4 sm:$0xff]   ;;  %v3819_v4 = vpack.c.bf16 %v207_v2, %v206_v0  ;;  %vm193_vm8 = vcmp.gt.f32.partialorder %v3805_v14, 0.0  ;;  %v4634_v53 = vld [vmem:[%s5718_s1 + $0x238] sm:$0xff]  }
  0x1f   : > { %4087 = vmatprep.subr.bf16.mxu1 %v4794_v1  ;;  %v4599_v45 = vld [vmem:[#allocation2] ss:$0 sps:$4 sm:$0xff]   ;;  %v604_v51 = vshll.u32 %v4601_v46, 16  ;;  %v602_v59 = vshrl.u32 %v4601_v46, 16  ;;  %v4605_v10 = vld [vmem:[%s5718_s1 + $0x128] sm:$0xff]   ;;  %v4637_v57 = vld [vmem:[%s5718_s1 + $0x230] sm:$0xff]  }
  0x20   : > { %v486_v49 = vshll.u32 %v4599_v45, 16  ;;  %v484_v55 = vshrl.u32 %v4599_v45, 16  ;;  %3830 = vst [vmem:[#allocation2 + $0x10] sm:$0xff] %v3819_v4   ;;  %v201_v17 = vmul.f32 0.2, %v3805_v14  ;;  %v4616_v30 = vld [vmem:[%s5718_s1 + $0x140] sm:$0xff]  }
  0x21   : > { %4068 = vmatpush3.bf16.msra.mxu0 %v4577_v13  ;;  %v606_v60 = vrot.slane %v604_v51, 1  ;;  %v3804_v13 = vunpack.c.l.bf16 %v3828_v12  ;;  %v4617_v27 = vld [vmem:[#allocation2] ss:$0 sps:$4 sm:$0xee]   ;;  %v4629_v45 = vld [vmem:[%s5718_s1 + $0x1d0] sm:$0xff]   ;;  %v4630_v46 = vld [vmem:[%s5718_s1 + $0x188] sm:$0xff]  }
  0x22   : > { %4088 = vmatpush3.bf16.msra.mxu1 %v4578_v18  ;;  %4069 = vmatprep.subr.bf16.mxu0 %v4794_v1  ;;  %v488_v56 = vrot.slane %v486_v49, 1  ;;  %v4608_v18 = vld [vmem:[%s5718_s1 + $0x160] sm:$0xff]   ;;  %v209_v20 = vsel %vm193_vm8, %v3805_v14, %v201_v17  ;;  %v4638_v58 = vld [vmem:[%s5718_s1 + $0x270] sm:$0xff]   ;;  %v4644_v0 = vld [vmem:[%s5718_s1 + $0x258] sm:$0xff]  }
  0x23   : > { %4089 = vmatprep.subr.bf16.mxu1 %v4794_v1  ;;  %v607_v6 = vor.u32 %v606_v60, %v602_v59  ;;  %vm192_vm7 = vcmp.gt.f32.partialorder %v3804_v13, 0.0  ;;  %v200_v16 = vmul.f32 0.2, %v3804_v13  ;;  %v4632_v49 = vld [vmem:[%s5718_s1 + $0x180] sm:$0xff]   ;;  %v4639_v59 = vld [vmem:[%s5718_s1 + $0x228] sm:$0xff]   ;;  %v4646_v4 = vld [vmem:[%s5718_s1 + $0x250] sm:$0xff]  }
  0x24   : > { %v489_v3 = vor.u32 %v488_v56, %v484_v55  ;;  %v4636_v56 = vld [vmem:[%s5718_s1 + $0x278] sm:$0xff]   ;;  %v4640_v60 = vld [vmem:[%s5718_s1 + $0x268] sm:$0xff]   ;;  %v4641_v61 = vld [vmem:[%s5718_s1 + $0x220] sm:$0xff]  }
  0x25   : > { %4070 = vmatpush3.bf16.msra.mxu0 %v4579_v25  ;;  %v208_v19 = vsel %vm192_vm7, %v3804_v13, %v200_v16  ;;  %v4612_v25 = vld [vmem:[%s5718_s1 + $0x150] sm:$0xff]   ;;  %v4642_v62 = vld [vmem:[%s5718_s1 + $0x260] sm:$0xff]   ;;  %v4652_v14 = vld [vmem:[%s5718_s1 + $0x2b8] sm:$0xff]  }
  0x26   : > { %4090 = vmatpush3.bf16.msra.mxu1 %v4580_v29  ;;  %4071 = vmatprep.subr.bf16.mxu0 %v4794_v1  ;;  %v3824_v21 = vpack.c.bf16 %v209_v20, %v208_v19  ;;  %v4615_v29 = vld [vmem:[%s5718_s1 + $0x100] sm:$0xff]   ;;  %v4654_v16 = vld [vmem:[%s5718_s1 + $0x2f8] sm:$0xff]   ;;  %v4655_v17 = vld [vmem:[%s5718_s1 + $0x2b0] sm:$0xff]  }
  0x27   : > { %4091 = vmatprep.subr.bf16.mxu1 %v4794_v1  ;;  %v4650_v12 = vld [vmem:[%s5718_s1 + $0x240] sm:$0xff]   ;;  %v4657_v19 = vld [vmem:[%s5718_s1 + $0x2a8] sm:$0xff]  }
  0x28   : > { %3831 = vst [vmem:[#allocation2 + $0x18] sm:$0xff] %v3824_v21   ;;  %v4658_v20 = vld [vmem:[%s5718_s1 + $0x2e8] sm:$0xff]   ;;  %v4659_v21 = vld [vmem:[%s5718_s1 + $0x2a0] sm:$0xff]  }
  0x29   : > { %4072 = vmatpush3.bf16.msra.mxu0 %v4581_v31  ;;  %v719_v31 = vrot.slane %v4617_v27, 1  ;;  %v4665_v27 = vld [vmem:[%s5718_s1 + $0x288] sm:$0xff]  }
  0x2a   : > { %4092 = vmatpush3.bf16.msra.mxu1 %v4582_v32  ;;  %4097 = vmatprep.subr.bf16.mxu0 %v4794_v1  ;;  %v4618_v32 = vld [vmem:[%s5718_s1 + $0x1b8] sm:$0xff]  }
  0x2b   : > { %4117 = vmatprep.subr.bf16.mxu1 %v4794_v1 }
  0x2c   : > { %4074 = vmatmul.mubr.bf16.vlgmr.msra.gmra.mxu0 %v268_v34  ;;  %v4619_v34 = vld [vmem:[%s5718_s1 + $0x1f8] sm:$0xff]  }
  0x2d   : > { %4094 = vmatmul.mubr.bf16.vlgmr.msra.gmra.mxu1 %v250_v36  ;;  %4098 = vmatpush3.bf16.msra.mxu0 %v4583_v33  ;;  %v811_v33 = vld [vmem:[#allocation2 + $0x10] sm:$0x7] }
  0x2e   : > { %4118 = vmatpush3.bf16.msra.mxu1 %v4584_v35  ;;  %4099 = vmatprep.subr.bf16.mxu0 %v4794_v1  ;;  %v4620_v35 = vld [vmem:[%s5718_s1 + $0x1b0] sm:$0xff]  }
  0x2f   : > { %4119 = vmatprep.subr.bf16.mxu1 %v4794_v1  ;;  %4113 = vmatprep.mubr.msk.bf16.mxu0 %vm4795_vm0, %v4794_v1  ;;  %v4621_v36 = vld [vmem:[%s5718_s1 + $0x1f0] sm:$0xff]   ;;  %v4651_v2 = vld [vmem:[#allocation2 + $0x18] ss:$0 sps:$4 sm:$0xff]  }
  0x30   : > { %4133 = vmatprep.mubr.msk.bf16.mxu1 %vm4795_vm0, %v4794_v1 }
  0x31   : > { %4100 = vmatpush3.bf16.msra.mxu0 %v4585_v37  ;;  %v4622_v37 = vld [vmem:[%s5718_s1 + $0x1a8] sm:$0xff]  }
  0x32   : > { %4120 = vmatpush3.bf16.msra.mxu1 %v4586_v38  ;;  %4101 = vmatprep.subr.bf16.mxu0 %v4794_v1  ;;  %v4623_v38 = vld [vmem:[%s5718_s1 + $0x1e8] sm:$0xff]  }
  0x33   : > { %4121 = vmatprep.subr.bf16.mxu1 %v4794_v1 }
  0x35   : > { %4102 = vmatpush3.bf16.msra.mxu0 %v4587_v39  ;;  %v4624_v39 = vld [vmem:[%s5718_s1 + $0x1a0] sm:$0xff]  }
  0x36   : > { %4122 = vmatpush3.bf16.msra.mxu1 %v4588_v40  ;;  %4103 = vmatprep.subr.bf16.mxu0 %v4794_v1  ;;  %v4625_v40 = vld [vmem:[%s5718_s1 + $0x1e0] sm:$0xff]  }
  0x37   : > { %4123 = vmatprep.subr.bf16.mxu1 %v4794_v1 }
  0x39   : > { %4104 = vmatpush3.bf16.msra.mxu0 %v4589_v41  ;;  %v4626_v41 = vld [vmem:[%s5718_s1 + $0x198] sm:$0xff]  }
  0x3a   : > { %4124 = vmatpush3.bf16.msra.mxu1 %v4590_v42  ;;  %4105 = vmatprep.subr.bf16.mxu0 %v4794_v1  ;;  %v4627_v42 = vld [vmem:[%s5718_s1 + $0x1d8] sm:$0xff]  }
  0x3b   : > { %4125 = vmatprep.subr.bf16.mxu1 %v4794_v1 }
  0x3d   : > { %4106 = vmatpush3.bf16.msra.mxu0 %v4591_v43  ;;  %v4628_v43 = vld [vmem:[%s5718_s1 + $0x190] sm:$0xff]  }
  0x3e   : > { %4126 = vmatpush3.bf16.msra.mxu1 %v4592_v44  ;;  %4107 = vmatprep.subr.bf16.mxu0 %v4794_v1  ;;  %v4635_v44 = vld [vmem:[#allocation2 + $0x10] ss:$0 sps:$4 sm:$0xff]  }
  0x3f   : > { %4127 = vmatprep.subr.bf16.mxu1 %v4794_v1 }
  0x41   : > { %4108 = vmatpush3.bf16.msra.mxu0 %v4593_v47  ;;  %v1050_v47 = vshll.u32 %v4635_v44, 16 }
  0x42   : > { %4128 = vmatpush3.bf16.msra.mxu1 %v4594_v48  ;;  %4109 = vmatprep.subr.bf16.mxu0 %v4794_v1  ;;  %v4631_v48 = vld [vmem:[%s5718_s1 + $0x1c8] sm:$0xff]  }
  0x43   : > { %4129 = vmatprep.subr.bf16.mxu1 %v4794_v1  ;;  %v1052_v51 = vrot.slane %v1050_v47, 1  ;;  %v5279_v47 = vld [vmem:[#allocation2 + $0x4] sm:$0x3] }
  0x45   : > { %4110 = vmatpush3.bf16.msra.mxu0 %v4595_v50  ;;  %v1048_v50 = vshrl.u32 %v4635_v44, 16  ;;  %v4678_v44 = vld [vmem:[%s5718_s1 + $0x368] sm:$0xff]  }
  0x46   : > { %4130 = vmatpush3.bf16.msra.mxu1 %v4596_v52  ;;  %4111 = vmatprep.subr.bf16.mxu0 %v4794_v1  ;;  %v4633_v52 = vld [vmem:[%s5718_s1 + $0x1c0] sm:$0xff]  }
  0x47   : > { %4131 = vmatprep.subr.bf16.mxu1 %v4794_v1  ;;  %v1053_v55 = vor.u32 %v1052_v51, %v1048_v50  ;;  %v4682_v50 = vld [vmem:[%s5718_s1 + $0x358] sm:$0xff]  }
  0x49   : > { %4112 = vmatpush3.bf16.msra.mxu0 %v4597_v54  ;;  %v919_v54 = vld [vmem:[#allocation2 + $0x18] sm:$0x7] }
  0x4a   : > { %4132 = vmatpush3.bf16.msra.mxu1 %v4598_v63  ;;  %4137 = vmatprep.subr.bf16.mxu0 %v4794_v1  ;;  %v4643_v63 = vld [vmem:[%s5718_s1 + $0x218] sm:$0xff]  }
  0x4b   : > { %4157 = vmatprep.subr.bf16.mxu1 %v4794_v1 }
  0x4c   : > { %4114 = vmatmul.mubr.bf16.vlgmr.msra.gmra.mxu0 %v489_v3  ;;  %v4645_v3 = vld [vmem:[%s5718_s1 + $0x210] sm:$0xff]  }
  0x4d   : > { %4138 = vmatpush3.bf16.msra.mxu0 %v4600_v5  ;;  %4134 = vmatmul.mubr.bf16.vlgmr.msra.gmra.mxu1 %v607_v6  ;;  %v1168_v5 = vshll.u32 %v4651_v2, 16  ;;  %v4647_v6 = vld [vmem:[%s5718_s1 + $0x208] sm:$0xff]  }
  0x4e   : > { %4158 = vmatpush3.bf16.msra.mxu1 %v4602_v7  ;;  %4139 = vmatprep.subr.bf16.mxu0 %v4794_v1  ;;  %v4648_v7 = vld [vmem:[%s5718_s1 + $0x248] sm:$0xff]  }
  0x4f   : > { %4159 = vmatprep.subr.bf16.mxu1 %v4794_v1  ;;  %4153 = vmatprep.mubr.msk.bf16.mxu0 %vm4795_vm0, %v4794_v1 }
  0x50   : > { %4173 = vmatprep.mubr.msk.bf16.mxu1 %vm4795_vm0, %v4794_v1 }
  0x51   : > { %4140 = vmatpush3.bf16.msra.mxu0 %v4603_v8  ;;  %v4653_v8 = vld [vmem:[#allocation2 + $0x10] ss:$0 sps:$4 sm:$0xee]  }
  0x52   : > { %4160 = vmatpush3.bf16.msra.mxu1 %v4604_v9  ;;  %4141 = vmatprep.subr.bf16.mxu0 %v4794_v1  ;;  %v1166_v9 = vshrl.u32 %v4651_v2, 16 }
  0x53   : > { %4161 = vmatprep.subr.bf16.mxu1 %v4794_v1 }
  0x55   : > { %4142 = vmatpush3.bf16.msra.mxu0 %v4605_v10  ;;  %v1170_v10 = vrot.slane %v1168_v5, 1  ;;  %v4689_v5 = vld [vmem:[%s5718_s1 + $0x3b8] sm:$0xff]  }
  0x56   : > { %4162 = vmatpush3.bf16.msra.mxu1 %v4606_v11  ;;  %4143 = vmatprep.subr.bf16.mxu0 %v4794_v1  ;;  %v4649_v11 = vld [vmem:[%s5718_s1 + $0x200] sm:$0xff]  }
  0x57   : > { %4163 = vmatprep.subr.bf16.mxu1 %v4794_v1  ;;  %v1171_v13 = vor.u32 %v1170_v10, %v1166_v9  ;;  %v4691_v10 = vld [vmem:[%s5718_s1 + $0x3b0] sm:$0xff]  }
  0x59   : > { %4144 = vmatpush3.bf16.msra.mxu0 %v4607_v15  ;;  %v1283_v15 = vrot.slane %v4653_v8, 1 }
  0x5a   : > { %4164 = vmatpush3.bf16.msra.mxu1 %v4608_v18  ;;  %4145 = vmatprep.subr.bf16.mxu0 %v4794_v1  ;;  %v4656_v18 = vld [vmem:[%s5718_s1 + $0x2f0] sm:$0xff]  }
  0x5b   : > { %4165 = vmatprep.subr.bf16.mxu1 %v4794_v1 }
  0x5d   : > { %4146 = vmatpush3.bf16.msra.mxu0 %v4609_v22  ;;  %v4660_v22 = vld [vmem:[%s5718_s1 + $0x2e0] sm:$0xff]  }
  0x5e   : > { %4166 = vmatpush3.bf16.msra.mxu1 %v4610_v23  ;;  %4147 = vmatprep.subr.bf16.mxu0 %v4794_v1  ;;  %v4661_v23 = vld [vmem:[%s5718_s1 + $0x298] sm:$0xff]  }
  0x5f   : > { %4167 = vmatprep.subr.bf16.mxu1 %v4794_v1 }
  0x61   : > { %4148 = vmatpush3.bf16.msra.mxu0 %v4611_v24  ;;  %v4662_v24 = vld [vmem:[%s5718_s1 + $0x2d8] sm:$0xff]  }
  0x62   : > { %4168 = vmatpush3.bf16.msra.mxu1 %v4612_v25  ;;  %4149 = vmatprep.subr.bf16.mxu0 %v4794_v1  ;;  %v4663_v25 = vld [vmem:[%s5718_s1 + $0x290] sm:$0xff]  }
  0x63   : > { %4169 = vmatprep.subr.bf16.mxu1 %v4794_v1 }
  0x65   : > { %4150 = vmatpush3.bf16.msra.mxu0 %v4613_v26  ;;  %v4664_v26 = vld [vmem:[%s5718_s1 + $0x2d0] sm:$0xff]  }
  0x66   : > { %4170 = vmatpush3.bf16.msra.mxu1 %v4614_v28  ;;  %4151 = vmatprep.subr.bf16.mxu0 %v4794_v1  ;;  %v1374_v28 = vld [vmem:[#allocation2] sm:$0xc] }
  0x67   : > { %4171 = vmatprep.subr.bf16.mxu1 %v4794_v1  ;;  %v3471_v51 = vcombine.low %v1374_v28, %v5279_v47 }
  0x69   : > { %4152 = vmatpush3.bf16.msra.mxu0 %v4615_v29  ;;  %v1375_v29 = vld [vmem:[#allocation2 + $0x4] sm:$0x1] }
  0x6a   : > { %4172 = vmatpush3.bf16.msra.mxu1 %v4616_v30  ;;  %4177 = vmatprep.subr.bf16.mxu0 %v4794_v1  ;;  %v4666_v30 = vld [vmem:[%s5718_s1 + $0x2c8] sm:$0xff]  }
  0x6b   : > { %4197 = vmatprep.subr.bf16.mxu1 %v4794_v1 }
  0x6c   : > { %4154 = vmatmul.mubr.bf16.vlgmr.msra.gmra.mxu0 %v719_v31  ;;  %v1489_v31 = vld [vmem:[#allocation2 + $0x8] sm:$0xc] }
  0x6d   : > { %4178 = vmatpush3.bf16.msra.mxu0 %v4618_v32  ;;  %4174 = vmatmul.mubr.bf16.vlgmr.msra.gmra.mxu1 %v811_v33  ;;  %v1490_v32 = vld [vmem:[#allocation2 + $0xc] sm:$0x1]  ;;  %v3421_v33 = vcombine.low %v1374_v28, %v1375_v29  ;;  %v1842_v28 = vld [vmem:[#allocation2] sm:$0x8] }
  0x6e   : > { %4198 = vmatpush3.bf16.msra.mxu1 %v4619_v34  ;;  %4179 = vmatprep.subr.bf16.mxu0 %v4794_v1  ;;  %v4667_v34 = vld [vmem:[%s5718_s1 + $0x280] sm:$0xff]   ;;  %v4702_v29 = vld [vmem:[%s5718_s1 + $0x3c8] sm:$0xff]  }
  0x6f   : > { %4199 = vmatprep.subr.bf16.mxu1 %v4794_v1  ;;  %4193 = vmatprep.mubr.msk.bf16.mxu0 %vm4795_vm0, %v4794_v1 }
  0x70   : > { %4213 = vmatprep.mubr.msk.bf16.mxu1 %vm4795_vm0, %v4794_v1 }
  0x71   : > { %4180 = vmatpush3.bf16.msra.mxu0 %v4620_v35  ;;  %v3446_v35 = vcombine.low %v1489_v31, %v1490_v32  ;;  %v3521_v32 = vcombine.low %v1842_v28, %v5279_v47  ;;  %v4732_v28 = vld [vmem:[%s5718_s1 + $0x4a0] sm:$0xff]  }
  0x72   : > { %4200 = vmatpush3.bf16.msra.mxu1 %v4621_v36  ;;  %4181 = vmatprep.subr.bf16.mxu0 %v4794_v1  ;;  %v4668_v36 = vld [vmem:[%s5718_s1 + $0x2c0] sm:$0xff]  }
  0x73   : > { %4201 = vmatprep.subr.bf16.mxu1 %v4794_v1 }
  0x75   : > { %4182 = vmatpush3.bf16.msra.mxu0 %v4622_v37  ;;  %v1398_v37 = vrot.slane %v3421_v33, 2  ;;  %v4703_v33 = vld [vmem:[%s5718_s1 + $0x380] sm:$0xff]  }
  0x76   : > { %4202 = vmatpush3.bf16.msra.mxu1 %v4623_v38  ;;  %4183 = vmatprep.subr.bf16.mxu0 %v4794_v1  ;;  %v4671_v38 = vld [vmem:[%s5718_s1 + $0x338] sm:$0xff]  }
  0x77   : > { %4203 = vmatprep.subr.bf16.mxu1 %v4794_v1 }
  0x79   : > { %4184 = vmatpush3.bf16.msra.mxu0 %v4624_v39  ;;  %v1513_v39 = vrot.slane %v3446_v35, 2  ;;  %v4704_v35 = vld [vmem:[%s5718_s1 + $0x3c0] sm:$0xff]  }
  0x7a   : > { %4204 = vmatpush3.bf16.msra.mxu1 %v4625_v40  ;;  %4185 = vmatprep.subr.bf16.mxu0 %v4794_v1  ;;  %v4674_v40 = vld [vmem:[%s5718_s1 + $0x378] sm:$0xff]  }
  0x7b   : > { %4205 = vmatprep.subr.bf16.mxu1 %v4794_v1 }
  0x7d   : > { %4186 = vmatpush3.bf16.msra.mxu0 %v4626_v41  ;;  %v4675_v41 = vld [vmem:[%s5718_s1 + $0x330] sm:$0xff]  }
  0x7e   : > { %4206 = vmatpush3.bf16.msra.mxu1 %v4627_v42  ;;  %4187 = vmatprep.subr.bf16.mxu0 %v4794_v1  ;;  %v4676_v42 = vld [vmem:[%s5718_s1 + $0x370] sm:$0xff]  }
  0x7f   : > { %4207 = vmatprep.subr.bf16.mxu1 %v4794_v1 }
  0x81   : > { %4188 = vmatpush3.bf16.msra.mxu0 %v4628_v43  ;;  %v4677_v43 = vld [vmem:[%s5718_s1 + $0x328] sm:$0xff]  }
  0x82   : > { %4208 = vmatpush3.bf16.msra.mxu1 %v4629_v45  ;;  %4189 = vmatprep.subr.bf16.mxu0 %v4794_v1  ;;  %v4679_v45 = vld [vmem:[%s5718_s1 + $0x320] sm:$0xff]  }
  0x83   : > { %4209 = vmatprep.subr.bf16.mxu1 %v4794_v1 }
  0x85   : > { %4190 = vmatpush3.bf16.msra.mxu0 %v4630_v46  ;;  %v4680_v46 = vld [vmem:[%s5718_s1 + $0x360] sm:$0xff]  }
  0x86   : > { %4210 = vmatpush3.bf16.msra.mxu1 %v4631_v48  ;;  %4191 = vmatprep.subr.bf16.mxu0 %v4794_v1  ;;  %v1723_v48 = vld [vmem:[#allocation2 + $0xc] sm:$0x3] }
  0x87   : > { %4211 = vmatprep.subr.bf16.mxu1 %v4794_v1 }
  0x89   : > { %4192 = vmatpush3.bf16.msra.mxu0 %v4632_v49  ;;  %v4681_v49 = vld [vmem:[%s5718_s1 + $0x318] sm:$0xff]  }
  0x8a   : > { %4212 = vmatpush3.bf16.msra.mxu1 %v4633_v52  ;;  %4217 = vmatprep.subr.bf16.mxu0 %v4794_v1  ;;  %v3496_v52 = vcombine.low %v1489_v31, %v1723_v48  ;;  %v1955_v31 = vld [vmem:[#allocation2 + $0x14] sm:$0x1] }
  0x8b   : > { %4237 = vmatprep.subr.bf16.mxu1 %v4794_v1 }
  0x8c   : > { %4194 = vmatmul.mubr.bf16.vlgmr.msra.gmra.mxu0 %v919_v54  ;;  %v4684_v54 = vld [vmem:[%s5718_s1 + $0x350] sm:$0xff]  }
  0x8d   : > { %4218 = vmatpush3.bf16.msra.mxu0 %v4634_v53  ;;  %4214 = vmatmul.mubr.bf16.vlgmr.msra.gmra.mxu1 %v1053_v55  ;;  %v4683_v53 = vld [vmem:[%s5718_s1 + $0x310] sm:$0xff]   ;;  %v1626_v55 = vshrl.u32 %v3471_v51, 16 }
  0x8e   : > { %4238 = vmatpush3.bf16.msra.mxu1 %v4636_v56  ;;  %4219 = vmatprep.subr.bf16.mxu0 %v4794_v1  ;;  %v1629_v56 = vshll.u32 %v3471_v51, 16 }
  0x8f   : > { %4239 = vmatprep.subr.bf16.mxu1 %v4794_v1  ;;  %4233 = vmatprep.mubr.msk.bf16.mxu0 %vm4795_vm0, %v4794_v1 }
  0x90   : > { %4253 = vmatprep.mubr.msk.bf16.mxu1 %vm4795_vm0, %v4794_v1 }
  0x91   : > { %4220 = vmatpush3.bf16.msra.mxu0 %v4637_v57  ;;  %v4685_v57 = vld [vmem:[%s5718_s1 + $0x308] sm:$0xff]  }
  0x92   : > { %4240 = vmatpush3.bf16.msra.mxu1 %v4638_v58  ;;  %4221 = vmatprep.subr.bf16.mxu0 %v4794_v1  ;;  %v1745_v58 = vshrl.u32 %v3496_v52, 16 }
  0x93   : > { %4241 = vmatprep.subr.bf16.mxu1 %v4794_v1 }
  0x95   : > { %4222 = vmatpush3.bf16.msra.mxu0 %v4639_v59  ;;  %v1748_v59 = vshll.u32 %v3496_v52, 16  ;;  %v4713_v52 = vld [vmem:[%s5718_s1 + $0x468] sm:$0xff]  }
  0x96   : > { %4242 = vmatpush3.bf16.msra.mxu1 %v4640_v60  ;;  %4223 = vmatprep.subr.bf16.mxu0 %v4794_v1  ;;  %v4686_v60 = vld [vmem:[%s5718_s1 + $0x348] sm:$0xff]  }
  0x97   : > { %4243 = vmatprep.subr.bf16.mxu1 %v4794_v1  ;;  %v1750_v2 = vrot.slane %v1748_v59, 3 }
  0x99   : > { %4224 = vmatpush3.bf16.msra.mxu0 %v4641_v61  ;;  %v1628_v61 = vrot.slane %v1626_v55, 2  ;;  %v4715_v55 = vld [vmem:[%s5718_s1 + $0x460] sm:$0xff]  }
  0x9a   : > { %4244 = vmatpush3.bf16.msra.mxu1 %v4642_v62  ;;  %4225 = vmatprep.subr.bf16.mxu0 %v4794_v1  ;;  %v1631_v62 = vrot.slane %v1629_v56, 3  ;;  %v4716_v56 = vld [vmem:[%s5718_s1 + $0x418] sm:$0xff]  }
  0x9b   : > { %4245 = vmatprep.subr.bf16.mxu1 %v4794_v1 }
  0x9d   : > { %4226 = vmatpush3.bf16.msra.mxu0 %v4643_v63  ;;  %v4687_v63 = vld [vmem:[%s5718_s1 + $0x300] sm:$0xff]  }
  0x9e   : > { %4246 = vmatpush3.bf16.msra.mxu1 %v4644_v0  ;;  %4227 = vmatprep.subr.bf16.mxu0 %v4794_v1  ;;  %v1747_v0 = vrot.slane %v1745_v58, 2  ;;  %v4717_v58 = vld [vmem:[%s5718_s1 + $0x458] sm:$0xff]  }
  0x9f   : > { %4247 = vmatprep.subr.bf16.mxu1 %v4794_v1 }
  0xa1   : > { %4228 = vmatpush3.bf16.msra.mxu0 %v4645_v3  ;;  %v4688_v3 = vld [vmem:[%s5718_s1 + $0x340] sm:$0xff]  }
  0xa2   : > { %4248 = vmatpush3.bf16.msra.mxu1 %v4646_v4  ;;  %4229 = vmatprep.subr.bf16.mxu0 %v4794_v1  ;;  %v1632_v4 = vor.u32 %v1631_v62, %v1628_v61  ;;  %v4719_v61 = vld [vmem:[%s5718_s1 + $0x450] sm:$0xff]   ;;  %v4720_v62 = vld [vmem:[%s5718_s1 + $0x408] sm:$0xff]  }
  0xa3   : > { %4249 = vmatprep.subr.bf16.mxu1 %v4794_v1 }
  0xa5   : > { %4230 = vmatpush3.bf16.msra.mxu0 %v4647_v6  ;;  %v1751_v6 = vor.u32 %v1750_v2, %v1747_v0  ;;  %v2070_v0 = vld [vmem:[#allocation2 + $0x1c] sm:$0x1] }
  0xa6   : > { %4250 = vmatpush3.bf16.msra.mxu1 %v4648_v7  ;;  %4231 = vmatprep.subr.bf16.mxu0 %v4794_v1  ;;  %v4690_v7 = vld [vmem:[%s5718_s1 + $0x3f8] sm:$0xff]  }
  0xa7   : > { %4251 = vmatprep.subr.bf16.mxu1 %v4794_v1 }
  0xa9   : > { %4232 = vmatpush3.bf16.msra.mxu0 %v4649_v11 }
  0xaa   : > { %4252 = vmatpush3.bf16.msra.mxu1 %v4650_v12  ;;  %4257 = vmatprep.subr.bf16.mxu0 %v4794_v1 }
  0xab   : > { %4277 = vmatprep.subr.bf16.mxu1 %v4794_v1 }
  0xac   : > { %4234 = vmatmul.mubr.bf16.vlgmr.msra.gmra.mxu0 %v1171_v13  ;;  %v4692_v13 = vld [vmem:[%s5718_s1 + $0x3f0] sm:$0xff]  }
  0xad   : > { %4258 = vmatpush3.bf16.msra.mxu0 %v4652_v14  ;;  %4254 = vmatmul.mubr.bf16.vlgmr.msra.gmra.mxu1 %v1283_v15 }
  0xae   : > { %4278 = vmatpush3.bf16.msra.mxu1 %v4654_v16  ;;  %4259 = vmatprep.subr.bf16.mxu0 %v4794_v1  ;;  %v4693_v16 = vld [vmem:[%s5718_s1 + $0x3a8] sm:$0xff]  }
  0xaf   : > { %4279 = vmatprep.subr.bf16.mxu1 %v4794_v1  ;;  %4273 = vmatprep.mubr.msk.bf16.mxu0 %vm4795_vm0, %v4794_v1 }
  0xb0   : > { %4293 = vmatprep.mubr.msk.bf16.mxu1 %vm4795_vm0, %v4794_v1 }
  0xb1   : > { %4260 = vmatpush3.bf16.msra.mxu0 %v4655_v17 }
  0xb2   : > { %4280 = vmatpush3.bf16.msra.mxu1 %v4656_v18  ;;  %4261 = vmatprep.subr.bf16.mxu0 %v4794_v1 }
  0xb3   : > { %4281 = vmatprep.subr.bf16.mxu1 %v4794_v1 }
  0xb5   : > { %4262 = vmatpush3.bf16.msra.mxu0 %v4657_v19  ;;  %v4694_v19 = vld [vmem:[%s5718_s1 + $0x3e8] sm:$0xff]  }
  0xb6   : > { %4282 = vmatpush3.bf16.msra.mxu1 %v4658_v20  ;;  %4263 = vmatprep.subr.bf16.mxu0 %v4794_v1 }
  0xb7   : > { %4283 = vmatprep.subr.bf16.mxu1 %v4794_v1 }
  0xb9   : > { %4264 = vmatpush3.bf16.msra.mxu0 %v4659_v21  ;;  %v4695_v21 = vld [vmem:[%s5718_s1 + $0x3a0] sm:$0xff]  }
  0xba   : > { %4284 = vmatpush3.bf16.msra.mxu1 %v4660_v22  ;;  %4265 = vmatprep.subr.bf16.mxu0 %v4794_v1  ;;  %v4696_v22 = vld [vmem:[%s5718_s1 + $0x3e0] sm:$0xff]  }
  0xbb   : > { %4285 = vmatprep.subr.bf16.mxu1 %v4794_v1 }
  0xbd   : > { %4266 = vmatpush3.bf16.msra.mxu0 %v4661_v23  ;;  %v4697_v23 = vld [vmem:[%s5718_s1 + $0x398] sm:$0xff]  }
  0xbe   : > { %4286 = vmatpush3.bf16.msra.mxu1 %v4662_v24  ;;  %4267 = vmatprep.subr.bf16.mxu0 %v4794_v1  ;;  %v4698_v24 = vld [vmem:[%s5718_s1 + $0x3d8] sm:$0xff]  }
  0xbf   : > { %4287 = vmatprep.subr.bf16.mxu1 %v4794_v1 }
  0xc1   : > { %4268 = vmatpush3.bf16.msra.mxu0 %v4663_v25  ;;  %v4699_v25 = vld [vmem:[%s5718_s1 + $0x390] sm:$0xff]  }
  0xc2   : > { %4288 = vmatpush3.bf16.msra.mxu1 %v4664_v26  ;;  %4269 = vmatprep.subr.bf16.mxu0 %v4794_v1  ;;  %v4700_v26 = vld [vmem:[%s5718_s1 + $0x3d0] sm:$0xff]  }
  0xc3   : > { %4289 = vmatprep.subr.bf16.mxu1 %v4794_v1 }
  0xc5   : > { %4270 = vmatpush3.bf16.msra.mxu0 %v4665_v27  ;;  %v4701_v27 = vld [vmem:[%s5718_s1 + $0x388] sm:$0xff]  }
  0xc6   : > { %4290 = vmatpush3.bf16.msra.mxu1 %v4666_v30  ;;  %4271 = vmatprep.subr.bf16.mxu0 %v4794_v1  ;;  %v1954_v30 = vld [vmem:[#allocation2 + $0x10] sm:$0xc] }
  0xc7   : > { %4291 = vmatprep.subr.bf16.mxu1 %v4794_v1 }
  0xc9   : > { %4272 = vmatpush3.bf16.msra.mxu0 %v4667_v34  ;;  %v3546_v34 = vcombine.low %v1954_v30, %v1955_v31  ;;  %v4734_v31 = vld [vmem:[%s5718_s1 + $0x498] sm:$0xff]  }
  0xca   : > { %4292 = vmatpush3.bf16.msra.mxu1 %v4668_v36  ;;  %4297 = vmatprep.subr.bf16.mxu0 %v4794_v1  ;;  %v1863_v36 = vrot.slane %v3521_v32, 3  ;;  %v4735_v32 = vld [vmem:[%s5718_s1 + $0x4d8] sm:$0xff]  }
  0xcb   : > { %4317 = vmatprep.subr.bf16.mxu1 %v4794_v1 }
  0xcc   : > { %4274 = vmatmul.mubr.bf16.vlgmr.msra.gmra.mxu0 %v1398_v37  ;;  %v4706_v37 = vld [vmem:[%s5718_s1 + $0x438] sm:$0xff]  }
  0xcd   : > { %4298 = vmatpush3.bf16.msra.mxu0 %v4671_v38  ;;  %4294 = vmatmul.mubr.bf16.vlgmr.msra.gmra.mxu1 %v1513_v39  ;;  %v1978_v38 = vrot.slane %v3546_v34, 2  ;;  %v4709_v39 = vld [vmem:[%s5718_s1 + $0x478] sm:$0xff]   ;;  %v4736_v34 = vld [vmem:[%s5718_s1 + $0x490] sm:$0xff]  }
  0xce   : > { %4318 = vmatpush3.bf16.msra.mxu1 %v4674_v40  ;;  %4299 = vmatprep.subr.bf16.mxu0 %v4794_v1 }
  0xcf   : > { %4319 = vmatprep.subr.bf16.mxu1 %v4794_v1  ;;  %4313 = vmatprep.mubr.msk.bf16.mxu0 %vm4795_vm0, %v4794_v1 }
  0xd0   : > { %4333 = vmatprep.mubr.msk.bf16.mxu1 %vm4795_vm0, %v4794_v1 }
  0xd1   : > { %4300 = vmatpush3.bf16.msra.mxu0 %v4675_v41 }
  0xd2   : > { %4320 = vmatpush3.bf16.msra.mxu1 %v4676_v42  ;;  %4301 = vmatprep.subr.bf16.mxu0 %v4794_v1 }
  0xd3   : > { %4321 = vmatprep.subr.bf16.mxu1 %v4794_v1 }
  0xd5   : > { %4302 = vmatpush3.bf16.msra.mxu0 %v4677_v43  ;;  %v4710_v43 = vld [vmem:[%s5718_s1 + $0x430] sm:$0xff]  }
  0xd6   : > { %4322 = vmatpush3.bf16.msra.mxu1 %v4678_v44  ;;  %4303 = vmatprep.subr.bf16.mxu0 %v4794_v1 }
  0xd7   : > { %4323 = vmatprep.subr.bf16.mxu1 %v4794_v1 }
  0xd9   : > { %4304 = vmatpush3.bf16.msra.mxu0 %v4679_v45  ;;  %v4711_v45 = vld [vmem:[%s5718_s1 + $0x470] sm:$0xff]  }
  0xda   : > { %4324 = vmatpush3.bf16.msra.mxu1 %v4680_v46  ;;  %4305 = vmatprep.subr.bf16.mxu0 %v4794_v1 }
  0xdb   : > { %4325 = vmatprep.subr.bf16.mxu1 %v4794_v1 }
  0xdd   : > { %4306 = vmatpush3.bf16.msra.mxu0 %v4681_v49  ;;  %v4712_v49 = vld [vmem:[%s5718_s1 + $0x428] sm:$0xff]  }
  0xde   : > { %4326 = vmatpush3.bf16.msra.mxu1 %v4682_v50  ;;  %4307 = vmatprep.subr.bf16.mxu0 %v4794_v1 }
  0xdf   : > { %4327 = vmatprep.subr.bf16.mxu1 %v4794_v1 }
  0xe1   : > { %4308 = vmatpush3.bf16.msra.mxu0 %v4683_v53 }
  0xe2   : > { %4328 = vmatpush3.bf16.msra.mxu1 %v4684_v54  ;;  %4309 = vmatprep.subr.bf16.mxu0 %v4794_v1  ;;  %v4714_v54 = vld [vmem:[%s5718_s1 + $0x420] sm:$0xff]  }
  0xe3   : > { %4329 = vmatprep.subr.bf16.mxu1 %v4794_v1 }
  0xe5   : > { %4310 = vmatpush3.bf16.msra.mxu0 %v4685_v57  ;;  %v5428_v57 = vld [vmem:[#allocation2 + $0x14] sm:$0x3] }
  0xe6   : > { %4330 = vmatpush3.bf16.msra.mxu1 %v4686_v60  ;;  %4311 = vmatprep.subr.bf16.mxu0 %v4794_v1  ;;  %v3596_v59 = vcombine.low %v1954_v30, %v5428_v57  ;;  %v4718_v60 = vld [vmem:[%s5718_s1 + $0x410] sm:$0xff]   ;;  %v2303_v30 = vld [vmem:[#allocation2 + $0x1c] sm:$0x3] }
  0xe7   : > { %4331 = vmatprep.subr.bf16.mxu1 %v4794_v1 }
  0xe8   : > { %v2206_v2 = vshrl.u32 %v3596_v59, 16 }
  0xe9   : > { %4312 = vmatpush3.bf16.msra.mxu0 %v4687_v63  ;;  %v5447_v63 = vld [vmem:[#allocation2 + $0x18] sm:$0xc] }
  0xea   : > { %4332 = vmatpush3.bf16.msra.mxu1 %v4688_v3  ;;  %4337 = vmatprep.subr.bf16.mxu0 %v4794_v1  ;;  %v2209_v3 = vshll.u32 %v3596_v59, 16  ;;  %v4747_v59 = vld [vmem:[%s5718_s1 + $0x528] sm:$0xff]  }
  0xeb   : > { %4357 = vmatprep.subr.bf16.mxu1 %v4794_v1 }
  0xec   : > { %v368_v8 = vpop.f32.mrf.mxu0  ;;  %4314 = vmatmul.mubr.bf16.vlgmr.msra.gmra.mxu0 %v1632_v4  ;;  %v4721_v4 = vld [vmem:[%s5718_s1 + $0x448] sm:$0xff]  }
  0xed   : > { %v456_v9 = vpop.f32.mrf.mxu1  ;;  %4338 = vmatpush3.bf16.msra.mxu0 %v4689_v5  ;;  %4334 = vmatmul.mubr.bf16.vlgmr.msra.gmra.mxu1 %v1751_v6  ;;  %v3571_v5 = vcombine.low %v5447_v63, %v2070_v0  ;;  %v4722_v6 = vld [vmem:[%s5718_s1 + $0x400] sm:$0xff]  }
  0xee   : > { %v5326_v11 = vadd.f32 %v456_v9, %v368_v8  ;;  %v4075_v12 = vpop.f32.mrf.mxu0  ;;  %4358 = vmatpush3.bf16.msra.mxu1 %v4690_v7  ;;  %4339 = vmatprep.subr.bf16.mxu0 %v4794_v1  ;;  %v2208_v7 = vrot.slane %v2206_v2, 2  ;;  %v2211_v8 = vrot.slane %v2209_v3, 3  ;;  %v4723_v9 = vld [vmem:[%s5718_s1 + $0x440] sm:$0xff]   ;;  %v4751_v3 = vld [vmem:[%s5718_s1 + $0x518] sm:$0xff]  }
  0xef   : > { %4359 = vmatprep.subr.bf16.mxu1 %v4794_v1  ;;  %v4095_v14 = vpop.f32.mrf.mxu1  ;;  %4353 = vmatprep.mubr.msk.bf16.mxu0 %vm4795_vm0, %v4794_v1  ;;  %v4749_v0 = vld [vmem:[%s5718_s1 + $0x520] sm:$0xff]  }
  0xf0   : > { %v371_v15 = vpop.f32.mrf.mxu0  ;;  %4373 = vmatprep.mubr.msk.bf16.mxu1 %vm4795_vm0, %v4794_v1  ;;  %v2212_v12 = vor.u32 %v2211_v8, %v2208_v7  ;;  %v4750_v2 = vld [vmem:[%s5718_s1 + $0x560] sm:$0xff]   ;;  %v4755_v7 = vld [vmem:[%s5718_s1 + $0x508] sm:$0xff]  }
  0xf1   : > { %4340 = vmatpush3.bf16.msra.mxu0 %v4691_v10  ;;  %v459_v17 = vpop.f32.mrf.mxu1  ;;  %v2093_v10 = vrot.slane %v3571_v5, 2  ;;  %v4753_v5 = vld [vmem:[%s5718_s1 + $0x510] sm:$0xff]   ;;  %v4756_v8 = vld [vmem:[%s5718_s1 + $0x548] sm:$0xff]  }
  0xf2   : > { %v4076_v18 = vpop.f32.mrf.mxu0  ;;  %4360 = vmatpush3.bf16.msra.mxu1 %v4692_v13  ;;  %4341 = vmatprep.subr.bf16.mxu0 %v4794_v1  ;;  %v4727_v13 = vld [vmem:[%s5718_s1 + $0x4f8] sm:$0xff]   ;;  %v4728_v17 = vld [vmem:[%s5718_s1 + $0x4b0] sm:$0xff]  }
  0xf3   : > { %4361 = vmatprep.subr.bf16.mxu1 %v4794_v1  ;;  %v4096_v20 = vpop.f32.mrf.mxu1 }
  0xf5   : > { %4342 = vmatpush3.bf16.msra.mxu0 %v4693_v16 }
  0xf6   : > { %4362 = vmatpush3.bf16.msra.mxu1 %v4694_v19  ;;  %4343 = vmatprep.subr.bf16.mxu0 %v4794_v1  ;;  %v4729_v19 = vld [vmem:[%s5718_s1 + $0x4f0] sm:$0xff]  }
  0xf7   : > { %4363 = vmatprep.subr.bf16.mxu1 %v4794_v1 }
  0xf9   : > { %4344 = vmatpush3.bf16.msra.mxu0 %v4695_v21 }
  0xfa   : > { %4364 = vmatpush3.bf16.msra.mxu1 %v4696_v22  ;;  %4345 = vmatprep.subr.bf16.mxu0 %v4794_v1 }
  0xfb   : > { %4365 = vmatprep.subr.bf16.mxu1 %v4794_v1 }
  0xfd   : > { %4346 = vmatpush3.bf16.msra.mxu0 %v4697_v23  ;;  %v4730_v23 = vld [vmem:[%s5718_s1 + $0x4a8] sm:$0xff]  }
  0xfe   : > { %4366 = vmatpush3.bf16.msra.mxu1 %v4698_v24  ;;  %4347 = vmatprep.subr.bf16.mxu0 %v4794_v1 }
  0xff   : > { %4367 = vmatprep.subr.bf16.mxu1 %v4794_v1 }
 0x101   : > { %4348 = vmatpush3.bf16.msra.mxu0 %v4699_v25 }
 0x102   : > { %4368 = vmatpush3.bf16.msra.mxu1 %v4700_v26  ;;  %4349 = vmatprep.subr.bf16.mxu0 %v4794_v1  ;;  %v4731_v26 = vld [vmem:[%s5718_s1 + $0x4e8] sm:$0xff]  }
 0x103   : > { %4369 = vmatprep.subr.bf16.mxu1 %v4794_v1 }
 0x105   : > { %4350 = vmatpush3.bf16.msra.mxu0 %v4701_v27 }
 0x106   : > { %4370 = vmatpush3.bf16.msra.mxu1 %v4702_v29  ;;  %4351 = vmatprep.subr.bf16.mxu0 %v4794_v1  ;;  %v4733_v29 = vld [vmem:[%s5718_s1 + $0x4e0] sm:$0xff]  }
 0x107   : > { %4371 = vmatprep.subr.bf16.mxu1 %v4794_v1 }
 0x109   : > { %4352 = vmatpush3.bf16.msra.mxu0 %v4703_v33  ;;  %v3621_v33 = vcombine.low %v5447_v63, %v2303_v30  ;;  %v4766_v30 = vld [vmem:[%s5718_s1 + $0x5e0] sm:$0xff]  }
 0x10a   : > { %4372 = vmatpush3.bf16.msra.mxu1 %v4704_v35  ;;  %4377 = vmatprep.subr.bf16.mxu0 %v4794_v1  ;;  %v4737_v35 = vld [vmem:[%s5718_s1 + $0x4d0] sm:$0xff]  }
 0x10b   : > { %4397 = vmatprep.subr.bf16.mxu1 %v4794_v1 }
 0x10c   : > { %v573_v40 = vpop.f32.mrf.mxu0  ;;  %4354 = vmatmul.mubr.bf16.vlgmr.msra.gmra.mxu0 %v1863_v36  ;;  %v2325_v36 = vshrl.u32 %v3621_v33, 16 }
 0x10d   : > { %v579_v41 = vadd.f32 %v573_v40, %v5326_v11  ;;  %4378 = vmatpush3.bf16.msra.mxu0 %v4706_v37  ;;  %v691_v42 = vpop.f32.mrf.mxu1  ;;  %4374 = vmatmul.mubr.bf16.vlgmr.msra.gmra.mxu1 %v1978_v38  ;;  %v4726_v11 = vld [vmem:[%s5718_s1 + $0x4b8] sm:$0xff]   ;;  %v2328_v37 = vshll.u32 %v3621_v33, 16  ;;  %v4738_v38 = vld [vmem:[%s5718_s1 + $0x488] sm:$0xff]   ;;  %v2422_v40 = vld [vmem:[#allocation2 + $0x10] sm:$0x8] }
 0x10e   : > { %v4115_v44 = vpop.f32.mrf.mxu0  ;;  %4398 = vmatpush3.bf16.msra.mxu1 %v4709_v39  ;;  %4379 = vmatprep.subr.bf16.mxu0 %v4794_v1  ;;  %v4739_v39 = vld [vmem:[%s5718_s1 + $0x4c8] sm:$0xff]   ;;  %v4775_v33 = vld [vmem:[#allocation2 + $0x4] ss:$0 sps:$4 sm:$0xff]  }
 0x10f   : > { %v5402_v46 = vadd.f32 %v691_v42, %v579_v41  ;;  %4399 = vmatprep.subr.bf16.mxu1 %v4794_v1  ;;  %v4135_v47 = vpop.f32.mrf.mxu1  ;;  %4393 = vmatprep.mubr.msk.bf16.mxu0 %vm4795_vm0, %v4794_v1  ;;  %v2327_v41 = vrot.slane %v2325_v36, 2  ;;  %v2330_v42 = vrot.slane %v2328_v37, 3  ;;  %v3646_v44 = vcombine.low %v2422_v40, %v5428_v57  ;;  %v4770_v36 = vld [vmem:[%s5718_s1 + $0x5d0] sm:$0xff]   ;;  %v4772_v40 = vld [vmem:[%s5718_s1 + $0x5c8] sm:$0xff]  }
 0x110   : > { %v576_v48 = vpop.f32.mrf.mxu0  ;;  %4413 = vmatprep.mubr.msk.bf16.mxu1 %vm4795_vm0, %v4794_v1  ;;  %v4742_v47 = vld [vmem:[%s5718_s1 + $0x538] sm:$0xff]   ;;  %v2772_v37 = vshll.u32 %v4775_v33, 16 }
 0x111   : > { %4380 = vmatpush3.bf16.msra.mxu0 %v4710_v43  ;;  %v694_v50 = vpop.f32.mrf.mxu1  ;;  %v4740_v43 = vld [vmem:[%s5718_s1 + $0x480] sm:$0xff]   ;;  %v2443_v48 = vrot.slane %v3646_v44, 3 }
 0x112   : > { %v4116_v51 = vpop.f32.mrf.mxu0  ;;  %4400 = vmatpush3.bf16.msra.mxu1 %v4711_v45  ;;  %4381 = vmatprep.subr.bf16.mxu0 %v4794_v1  ;;  %v4741_v45 = vld [vmem:[%s5718_s1 + $0x4c0] sm:$0xff]  }
 0x113   : > { %4401 = vmatprep.subr.bf16.mxu1 %v4794_v1  ;;  %v4136_v53 = vpop.f32.mrf.mxu1 }
 0x114   : > { %v4745_v53 = vld [vmem:[%s5718_s1 + $0x530] sm:$0xff]  }
 0x115   : > { %4382 = vmatpush3.bf16.msra.mxu0 %v4712_v49  ;;  %v4744_v49 = vld [vmem:[%s5718_s1 + $0x578] sm:$0xff]  }
 0x116   : > { %4402 = vmatpush3.bf16.msra.mxu1 %v4713_v52  ;;  %4383 = vmatprep.subr.bf16.mxu0 %v4794_v1 }
 0x117   : > { %4403 = vmatprep.subr.bf16.mxu1 %v4794_v1 }
 0x119   : > { %4384 = vmatpush3.bf16.msra.mxu0 %v4714_v54 }
 0x11a   : > { %4404 = vmatpush3.bf16.msra.mxu1 %v4715_v55  ;;  %4385 = vmatprep.subr.bf16.mxu0 %v4794_v1  ;;  %v4746_v55 = vld [vmem:[%s5718_s1 + $0x570] sm:$0xff]  }
 0x11b   : > { %4405 = vmatprep.subr.bf16.mxu1 %v4794_v1 }
 0x11d   : > { %4386 = vmatpush3.bf16.msra.mxu0 %v4716_v56 }
 0x11e   : > { %4406 = vmatpush3.bf16.msra.mxu1 %v4717_v58  ;;  %4387 = vmatprep.subr.bf16.mxu0 %v4794_v1 }
 0x11f   : > { %4407 = vmatprep.subr.bf16.mxu1 %v4794_v1 }
 0x121   : > { %4388 = vmatpush3.bf16.msra.mxu0 %v4718_v60 }
 0x122   : > { %4408 = vmatpush3.bf16.msra.mxu1 %v4719_v61  ;;  %4389 = vmatprep.subr.bf16.mxu0 %v4794_v1 }
 0x123   : > { %4409 = vmatprep.subr.bf16.mxu1 %v4794_v1 }
 0x125   : > { %4390 = vmatpush3.bf16.msra.mxu0 %v4720_v62  ;;  %v4748_v62 = vld [vmem:[%s5718_s1 + $0x568] sm:$0xff]  }
 0x126   : > { %4410 = vmatpush3.bf16.msra.mxu1 %v4721_v4  ;;  %4391 = vmatprep.subr.bf16.mxu0 %v4794_v1  ;;  %v4752_v4 = vld [vmem:[%s5718_s1 + $0x558] sm:$0xff]  }
 0x127   : > { %4411 = vmatprep.subr.bf16.mxu1 %v4794_v1 }
 0x129   : > { %4392 = vmatpush3.bf16.msra.mxu0 %v4722_v6  ;;  %v4754_v6 = vld [vmem:[%s5718_s1 + $0x550] sm:$0xff]  }
 0x12a   : > { %4412 = vmatpush3.bf16.msra.mxu1 %v4723_v9  ;;  %4417 = vmatprep.subr.bf16.mxu0 %v4794_v1  ;;  %v4757_v9 = vld [vmem:[%s5718_s1 + $0x500] sm:$0xff]  }
 0x12b   : > { %4437 = vmatprep.subr.bf16.mxu1 %v4794_v1 }
 0x12c   : > { %v803_v14 = vpop.f32.mrf.mxu0  ;;  %4394 = vmatmul.mubr.bf16.vlgmr.msra.gmra.mxu0 %v2093_v10  ;;  %v4758_v10 = vld [vmem:[%s5718_s1 + $0x540] sm:$0xff]  }
 0x12d   : > { %v809_v15 = vadd.f32 %v803_v14, %v5402_v46  ;;  %4418 = vmatpush3.bf16.msra.mxu0 %v4726_v11  ;;  %v911_v16 = vpop.f32.mrf.mxu1  ;;  %4414 = vmatmul.mubr.bf16.vlgmr.msra.gmra.mxu1 %v2212_v12  ;;  %v2331_v46 = vor.u32 %v2330_v42, %v2327_v41  ;;  %v2534_v11 = vld [vmem:[#allocation2 + $0x4] sm:$0x7]  ;;  %v4759_v12 = vld [vmem:[%s5718_s1 + $0x5b8] sm:$0xff]   ;;  %v2770_v41 = vshrl.u32 %v4775_v33, 16  ;;  %v2774_v42 = vrot.slane %v2772_v37, 1 }
 0x12e   : > { %v4155_v18 = vpop.f32.mrf.mxu0  ;;  %4438 = vmatpush3.bf16.msra.mxu1 %v4727_v13  ;;  %4419 = vmatprep.subr.bf16.mxu0 %v4794_v1  ;;  %v2641_v13 = vld [vmem:[#allocation2 + $0xc] sm:$0x7]  ;;  %v4760_v14 = vld [vmem:[%s5718_s1 + $0x5f8] sm:$0xff]  }
 0x12f   : > { %v5479_v20 = vadd.f32 %v911_v16, %v809_v15  ;;  %4439 = vmatprep.subr.bf16.mxu1 %v4794_v1  ;;  %v4175_v21 = vpop.f32.mrf.mxu1  ;;  %4433 = vmatprep.mubr.msk.bf16.mxu0 %vm4795_vm0, %v4794_v1  ;;  %v4761_v18 = vld [vmem:[%s5718_s1 + $0x5b0] sm:$0xff]  }
 0x130   : > { %v806_v22 = vpop.f32.mrf.mxu0  ;;  %4453 = vmatprep.mubr.msk.bf16.mxu1 %vm4795_vm0, %v4794_v1 }
 0x131   : > { %4420 = vmatpush3.bf16.msra.mxu0 %v4728_v17  ;;  %v914_v24 = vpop.f32.mrf.mxu1 }
 0x132   : > { %v4156_v25 = vpop.f32.mrf.mxu0  ;;  %4440 = vmatpush3.bf16.msra.mxu1 %v4729_v19  ;;  %4421 = vmatprep.subr.bf16.mxu0 %v4794_v1  ;;  %v4763_v24 = vld [vmem:[%s5718_s1 + $0x5a8] sm:$0xff]  }
 0x133   : > { %4441 = vmatprep.subr.bf16.mxu1 %v4794_v1  ;;  %v4176_v27 = vpop.f32.mrf.mxu1 }
 0x134   : > { %v4764_v27 = vld [vmem:[%s5718_s1 + $0x5e8] sm:$0xff]  }
 0x135   : > { %4422 = vmatpush3.bf16.msra.mxu0 %v4730_v23 }
 0x136   : > { %4442 = vmatpush3.bf16.msra.mxu1 %v4731_v26  ;;  %4423 = vmatprep.subr.bf16.mxu0 %v4794_v1 }
 0x137   : > { %4443 = vmatprep.subr.bf16.mxu1 %v4794_v1 }
 0x139   : > { %4424 = vmatpush3.bf16.msra.mxu0 %v4732_v28 }
 0x13a   : > { %4444 = vmatpush3.bf16.msra.mxu1 %v4733_v29  ;;  %4425 = vmatprep.subr.bf16.mxu0 %v4794_v1  ;;  %v4765_v29 = vld [vmem:[%s5718_s1 + $0x5a0] sm:$0xff]  }
 0x13b   : > { %4445 = vmatprep.subr.bf16.mxu1 %v4794_v1 }
 0x13d   : > { %4426 = vmatpush3.bf16.msra.mxu0 %v4734_v31  ;;  %v4767_v31 = vld [vmem:[%s5718_s1 + $0x598] sm:$0xff]  }
 0x13e   : > { %4446 = vmatpush3.bf16.msra.mxu1 %v4735_v32  ;;  %4427 = vmatprep.subr.bf16.mxu0 %v4794_v1  ;;  %v4768_v32 = vld [vmem:[%s5718_s1 + $0x5d8] sm:$0xff]  }
 0x13f   : > { %4447 = vmatprep.subr.bf16.mxu1 %v4794_v1 }
 0x141   : > { %4428 = vmatpush3.bf16.msra.mxu0 %v4736_v34  ;;  %v4769_v34 = vld [vmem:[%s5718_s1 + $0x590] sm:$0xff]  }
 0x142   : > { %4448 = vmatpush3.bf16.msra.mxu1 %v4737_v35  ;;  %4429 = vmatprep.subr.bf16.mxu0 %v4794_v1  ;;  %v4777_v35 = vld [vmem:[#allocation2 + $0xc] ss:$0 sps:$4 sm:$0xff]  }
 0x143   : > { %4449 = vmatprep.subr.bf16.mxu1 %v4794_v1  ;;  %v2888_v44 = vshrl.u32 %v4777_v35, 16 }
 0x145   : > { %4430 = vmatpush3.bf16.msra.mxu0 %v4738_v38  ;;  %v4771_v38 = vld [vmem:[%s5718_s1 + $0x588] sm:$0xff]  }
 0x146   : > { %4450 = vmatpush3.bf16.msra.mxu1 %v4739_v39  ;;  %4431 = vmatprep.subr.bf16.mxu0 %v4794_v1  ;;  %v2890_v39 = vshll.u32 %v4777_v35, 16 }
 0x147   : > { %4451 = vmatprep.subr.bf16.mxu1 %v4794_v1 }
 0x149   : > { %4432 = vmatpush3.bf16.msra.mxu0 %v4740_v43  ;;  %v4773_v43 = vld [vmem:[%s5718_s1 + $0x580] sm:$0xff]  }
 0x14a   : > { %4452 = vmatpush3.bf16.msra.mxu1 %v4741_v45  ;;  %4457 = vmatprep.subr.bf16.mxu0 %v4794_v1  ;;  %v2892_v45 = vrot.slane %v2890_v39, 1 }
 0x14b   : > { %4477 = vmatprep.subr.bf16.mxu1 %v4794_v1 }
 0x14c   : > { %v1019_v50 = vpop.f32.mrf.mxu0  ;;  %4434 = vmatmul.mubr.bf16.vlgmr.msra.gmra.mxu0 %v2331_v46  ;;  %v4774_v46 = vld [vmem:[%s5718_s1 + $0x5c0] sm:$0xff]  }
 0x14d   : > { %v1025_v51 = vadd.f32 %v1019_v50, %v5479_v20  ;;  %4458 = vmatpush3.bf16.msra.mxu0 %v4742_v47  ;;  %v1137_v52 = vpop.f32.mrf.mxu1  ;;  %4454 = vmatmul.mubr.bf16.vlgmr.msra.gmra.mxu1 %v2443_v48  ;;  %v4762_v20 = vld [vmem:[%s5718_s1 + $0x5f0] sm:$0xff]   ;;  %v2775_v47 = vor.u32 %v2774_v42, %v2770_v41  ;;  %v4776_v48 = vld [vmem:[%s5718_s1 + $0x638] sm:$0xff]  }
 0x14e   : > { %v4195_v54 = vpop.f32.mrf.mxu0  ;;  %4478 = vmatpush3.bf16.msra.mxu1 %v4744_v49  ;;  %4459 = vmatprep.subr.bf16.mxu0 %v4794_v1  ;;  %v2893_v49 = vor.u32 %v2892_v45, %v2888_v44 }
 0x14f   : > { %v1143_v56 = vadd.f32 %v1137_v52, %v1025_v51  ;;  %4479 = vmatprep.subr.bf16.mxu1 %v4794_v1  ;;  %v4215_v57 = vpop.f32.mrf.mxu1  ;;  %4473 = vmatprep.mubr.msk.bf16.mxu0 %vm4795_vm0, %v4794_v1 }
 0x150   : > { %v1022_v58 = vpop.f32.mrf.mxu0  ;;  %4493 = vmatprep.mubr.msk.bf16.mxu1 %vm4795_vm0, %v4794_v1 }
 0x151   : > { %4460 = vmatpush3.bf16.msra.mxu0 %v4745_v53  ;;  %v1140_v60 = vpop.f32.mrf.mxu1  ;;  %v4778_v53 = vld [vmem:[%s5718_s1 + $0x630] sm:$0xff]   ;;  %v4779_v58 = vld [vmem:[%s5718_s1 + $0x628] sm:$0xff]  }
 0x152   : > { %v4196_v61 = vpop.f32.mrf.mxu0  ;;  %4480 = vmatpush3.bf16.msra.mxu1 %v4746_v55  ;;  %4461 = vmatprep.subr.bf16.mxu0 %v4794_v1 }
 0x153   : > { %4481 = vmatprep.subr.bf16.mxu1 %v4794_v1  ;;  %v4216_v63 = vpop.f32.mrf.mxu1 }
 0x154   : > { %v4781_v63 = vld [vmem:[%s5718_s1 + $0x618] sm:$0xff]  }
 0x155   : > { %4462 = vmatpush3.bf16.msra.mxu0 %v4747_v59 }
 0x156   : > { %4482 = vmatpush3.bf16.msra.mxu1 %v4748_v62  ;;  %4463 = vmatprep.subr.bf16.mxu0 %v4794_v1  ;;  %v4780_v62 = vld [vmem:[%s5718_s1 + $0x620] sm:$0xff]  }
 0x157   : > { %4483 = vmatprep.subr.bf16.mxu1 %v4794_v1 }
 0x159   : > { %4464 = vmatpush3.bf16.msra.mxu0 %v4749_v0  ;;  %v4782_v0 = vld [vmem:[%s5718_s1 + $0x610] sm:$0xff]  }
 0x15a   : > { %4484 = vmatpush3.bf16.msra.mxu1 %v4750_v2  ;;  %4465 = vmatprep.subr.bf16.mxu0 %v4794_v1  ;;  %v4783_v2 = vld [vmem:[%s5718_s1 + $0x608] sm:$0xff]  }
 0x15b   : > { %4485 = vmatprep.subr.bf16.mxu1 %v4794_v1 }
 0x15d   : > { %4466 = vmatpush3.bf16.msra.mxu0 %v4751_v3  ;;  %v4785_v3 = vld [vmem:[#allocation2 + $0x4] ss:$0 sps:$4 sm:$0xee]  }
 0x15e   : > { %4486 = vmatpush3.bf16.msra.mxu1 %v4752_v4  ;;  %4467 = vmatprep.subr.bf16.mxu0 %v4794_v1  ;;  %v4784_v4 = vld [vmem:[%s5718_s1 + $0x600] sm:$0xff]  }
 0x15f   : > { %4487 = vmatprep.subr.bf16.mxu1 %v4794_v1 }
 0x161   : > { %4468 = vmatpush3.bf16.msra.mxu0 %v4753_v5  ;;  %v3005_v5 = vrot.slane %v4785_v3, 1  ;;  %v3778_v3 = vld [vmem:[%s5719_s2] ss:$0 sm:$0xff] }
 0x162   : > { %4488 = vmatpush3.bf16.msra.mxu1 %v4754_v6  ;;  %4469 = vmatprep.subr.bf16.mxu0 %v4794_v1 }
 0x163   : > { %4489 = vmatprep.subr.bf16.mxu1 %v4794_v1 }
 0x165   : > { %4470 = vmatpush3.bf16.msra.mxu0 %v4755_v7 }
 0x166   : > { %4490 = vmatpush3.bf16.msra.mxu1 %v4756_v8  ;;  %4471 = vmatprep.subr.bf16.mxu0 %v4794_v1 }
 0x167   : > { %4491 = vmatprep.subr.bf16.mxu1 %v4794_v1 }
 0x169   : > { %4472 = vmatpush3.bf16.msra.mxu0 %v4757_v9 }
 0x16a   : > { %4492 = vmatpush3.bf16.msra.mxu1 %v4758_v10  ;;  %4497 = vmatprep.subr.bf16.mxu0 %v4794_v1 }
 0x16b   : > { %4517 = vmatprep.subr.bf16.mxu1 %v4794_v1 }
 0x16c   : > { %v1255_v15 = vpop.f32.mrf.mxu0  ;;  %4474 = vmatmul.mubr.bf16.vlgmr.msra.gmra.mxu0 %v2534_v11 }
 0x16d   : > { %v1261_v16 = vadd.f32 %v1255_v15, %v1143_v56  ;;  %4498 = vmatpush3.bf16.msra.mxu0 %v4759_v12  ;;  %v1367_v17 = vpop.f32.mrf.mxu1  ;;  %4494 = vmatmul.mubr.bf16.vlgmr.msra.gmra.mxu1 %v2641_v13 }
 0x16e   : > { %v4235_v19 = vpop.f32.mrf.mxu0  ;;  %4518 = vmatpush3.bf16.msra.mxu1 %v4760_v14  ;;  %4499 = vmatprep.subr.bf16.mxu0 %v4794_v1 }
 0x16f   : > { %v1373_v21 = vadd.f32 %v1367_v17, %v1261_v16  ;;  %4519 = vmatprep.subr.bf16.mxu1 %v4794_v1  ;;  %v4255_v22 = vpop.f32.mrf.mxu1  ;;  %4513 = vmatprep.mubr.msk.bf16.mxu0 %vm4795_vm0, %v4794_v1 }
 0x170   : > { %v1258_v23 = vpop.f32.mrf.mxu0  ;;  %4533 = vmatprep.mubr.msk.bf16.mxu1 %vm4795_vm0, %v4794_v1 }
 0x171   : > { %4500 = vmatpush3.bf16.msra.mxu0 %v4761_v18  ;;  %v1370_v25 = vpop.f32.mrf.mxu1 }
 0x172   : > { %v4236_v26 = vpop.f32.mrf.mxu0  ;;  %4520 = vmatpush3.bf16.msra.mxu1 %v4762_v20  ;;  %4501 = vmatprep.subr.bf16.mxu0 %v4794_v1 }
 0x173   : > { %4521 = vmatprep.subr.bf16.mxu1 %v4794_v1  ;;  %v4256_v28 = vpop.f32.mrf.mxu1 }
 0x175   : > { %4502 = vmatpush3.bf16.msra.mxu0 %v4763_v24 }
 0x176   : > { %4522 = vmatpush3.bf16.msra.mxu1 %v4764_v27  ;;  %4503 = vmatprep.subr.bf16.mxu0 %v4794_v1 }
 0x177   : > { %4523 = vmatprep.subr.bf16.mxu1 %v4794_v1 }
 0x179   : > { %4504 = vmatpush3.bf16.msra.mxu0 %v4765_v29 }
 0x17a   : > { %4524 = vmatpush3.bf16.msra.mxu1 %v4766_v30  ;;  %4505 = vmatprep.subr.bf16.mxu0 %v4794_v1 }
 0x17b   : > { %4525 = vmatprep.subr.bf16.mxu1 %v4794_v1 }
 0x17d   : > { %4506 = vmatpush3.bf16.msra.mxu0 %v4767_v31 }
 0x17e   : > { %4526 = vmatpush3.bf16.msra.mxu1 %v4768_v32  ;;  %4507 = vmatprep.subr.bf16.mxu0 %v4794_v1 }
 0x17f   : > { %4527 = vmatprep.subr.bf16.mxu1 %v4794_v1 }
 0x181   : > { %4508 = vmatpush3.bf16.msra.mxu0 %v4769_v34 }
 0x182   : > { %4528 = vmatpush3.bf16.msra.mxu1 %v4770_v36  ;;  %4509 = vmatprep.subr.bf16.mxu0 %v4794_v1 }
 0x183   : > { %4529 = vmatprep.subr.bf16.mxu1 %v4794_v1 }
 0x185   : > { %4510 = vmatpush3.bf16.msra.mxu0 %v4771_v38 }
 0x186   : > { %4530 = vmatpush3.bf16.msra.mxu1 %v4772_v40  ;;  %4511 = vmatprep.subr.bf16.mxu0 %v4794_v1 }
 0x187   : > { %4531 = vmatprep.subr.bf16.mxu1 %v4794_v1 }
 0x189   : > { %4512 = vmatpush3.bf16.msra.mxu0 %v4773_v43 }
 0x18a   : > { %4532 = vmatpush3.bf16.msra.mxu1 %v4774_v46  ;;  %4537 = vmatprep.subr.bf16.mxu0 %v4794_v1 }
 0x18c   : > { %v1482_v50 = vpop.f32.mrf.mxu0  ;;  %4514 = vmatmul.mubr.bf16.vlgmr.msra.gmra.mxu0 %v2775_v47 }
 0x18d   : > { %v1488_v51 = vadd.f32 %v1482_v50, %v1373_v21  ;;  %4538 = vmatpush3.bf16.msra.mxu0 %v4776_v48  ;;  %v1597_v52 = vpop.f32.mrf.mxu1  ;;  %4534 = vmatmul.mubr.bf16.vlgmr.msra.gmra.mxu1 %v2893_v49 }
 0x18e   : > { %v4275_v54 = vpop.f32.mrf.mxu0  ;;  %4539 = vmatprep.subr.bf16.mxu0 %v4794_v1  ;;  %4553 = vmatprep.mubr.msk.bf16.mxu0 %vm4795_vm0, %v4794_v1 }
 0x18f   : > { %v1603_v55 = vadd.f32 %v1597_v52, %v1488_v51  ;;  %v4295_v56 = vpop.f32.mrf.mxu1 }
 0x190   : > { %v1485_v57 = vpop.f32.mrf.mxu0 }
 0x191   : > { %4540 = vmatpush3.bf16.msra.mxu0 %v4778_v53  ;;  %v1600_v59 = vpop.f32.mrf.mxu1 }
 0x192   : > { %v4276_v60 = vpop.f32.mrf.mxu0  ;;  %4541 = vmatprep.subr.bf16.mxu0 %v4794_v1 }
 0x193   : > { %v4296_v61 = vpop.f32.mrf.mxu1 }
 0x195   : > { %4542 = vmatpush3.bf16.msra.mxu0 %v4779_v58 }
 0x196   : > { %4543 = vmatprep.subr.bf16.mxu0 %v4794_v1 }
 0x199   : > { %4544 = vmatpush3.bf16.msra.mxu0 %v4780_v62 }
 0x19a   : > { %4545 = vmatprep.subr.bf16.mxu0 %v4794_v1 }
 0x19d   : > { %4546 = vmatpush3.bf16.msra.mxu0 %v4781_v63 }
 0x19e   : > { %4547 = vmatprep.subr.bf16.mxu0 %v4794_v1 }
 0x1a1   : > { %4548 = vmatpush3.bf16.msra.mxu0 %v4782_v0 }
 0x1a2   : > { %4549 = vmatprep.subr.bf16.mxu0 %v4794_v1 }
 0x1a5   : > { %4550 = vmatpush3.bf16.msra.mxu0 %v4783_v2 }
 0x1a6   : > { %4551 = vmatprep.subr.bf16.mxu0 %v4794_v1 }
 0x1a9   : > { %4552 = vmatpush3.bf16.msra.mxu0 %v4784_v4 }
 0x1ac   : > { %v1716_v6 = vpop.f32.mrf.mxu0  ;;  %4554 = vmatmul.mubr.bf16.vlgmr.msra.gmra.mxu0 %v3005_v5 }
 0x1ad   : > { %v1722_v7 = vadd.f32 %v1716_v6, %v1603_v55  ;;  %v1835_v8 = vpop.f32.mrf.mxu1 }
 0x1ae   : > { %v4315_v9 = vpop.f32.mrf.mxu0 }
 0x1af   : > { %v1841_v10 = vadd.f32 %v1835_v8, %v1722_v7  ;;  %v4335_v11 = vpop.f32.mrf.mxu1 }
 0x1b0   : > { %v1719_v12 = vpop.f32.mrf.mxu0 }
 0x1b1   : > { %v1838_v13 = vpop.f32.mrf.mxu1 }
 0x1b2   : > { %v4316_v14 = vpop.f32.mrf.mxu0 }
 0x1b3   : > { %v4336_v15 = vpop.f32.mrf.mxu1 }
 0x1cc   : > { %v1947_v16 = vpop.f32.mrf.mxu0 }
 0x1cd   : > { %v1953_v17 = vadd.f32 %v1947_v16, %v1841_v10  ;;  %v2062_v18 = vpop.f32.mrf.mxu1 }
 0x1ce   : > { %v4355_v19 = vpop.f32.mrf.mxu0 }
 0x1cf   : > { %v2068_v20 = vadd.f32 %v2062_v18, %v1953_v17  ;;  %v4375_v21 = vpop.f32.mrf.mxu1 }
 0x1d0   : > { %v1950_v1 = vpop.f32.mrf.mxu0 }
 0x1d1   : > { %v2065_v22 = vpop.f32.mrf.mxu1 }
 0x1d2   : > { %v4356_v23 = vpop.f32.mrf.mxu0 }
 0x1d3   : > { %v4376_v24 = vpop.f32.mrf.mxu1 }
 0x1ec   : > { %v2177_v25 = vpop.f32.mrf.mxu0 }
 0x1ed   : > { %v2183_v26 = vadd.f32 %v2177_v25, %v2068_v20  ;;  %v2296_v27 = vpop.f32.mrf.mxu1 }
 0x1ee   : > { %v4395_v28 = vpop.f32.mrf.mxu0 }
 0x1ef   : > { %v2302_v29 = vadd.f32 %v2296_v27, %v2183_v26  ;;  %v4415_v30 = vpop.f32.mrf.mxu1 }
 0x1f0   : > { %v2180_v31 = vpop.f32.mrf.mxu0 }
 0x1f1   : > { %v2299_v32 = vpop.f32.mrf.mxu1 }
 0x1f2   : > { %v4396_v33 = vpop.f32.mrf.mxu0 }
 0x1f3   : > { %v4416_v34 = vpop.f32.mrf.mxu1 }
 0x20c   : > { %v2415_v35 = vpop.f32.mrf.mxu0 }
 0x20d   : > { %v2421_v36 = vadd.f32 %v2415_v35, %v2302_v29  ;;  %v2527_v37 = vpop.f32.mrf.mxu1 }
 0x20e   : > { %v4435_v38 = vpop.f32.mrf.mxu0 }
 0x20f   : > { %v2533_v39 = vadd.f32 %v2527_v37, %v2421_v36  ;;  %v4455_v40 = vpop.f32.mrf.mxu1 }
 0x210   : > { %v2418_v41 = vpop.f32.mrf.mxu0 }
 0x211   : > { %v2530_v42 = vpop.f32.mrf.mxu1 }
 0x212   : > { %v4436_v43 = vpop.f32.mrf.mxu0 }
 0x213   : > { %v4456_v44 = vpop.f32.mrf.mxu1 }
 0x22c   : > { %v2634_v45 = vpop.f32.mrf.mxu0 }
 0x22d   : > { %v2741_v46 = vpop.f32.mrf.mxu1  ;;  %v2640_v61 = vadd.f32 %v2634_v45, %v2533_v39 }
 0x22e   : > { %v4475_v47 = vpop.f32.mrf.mxu0 }
 0x22f   : > { %v4495_v48 = vpop.f32.mrf.mxu1  ;;  %v2747_v62 = vadd.f32 %v2741_v46, %v2640_v61 }
 0x230   : > { %v2637_v49 = vpop.f32.mrf.mxu0 }
 0x231   : > { %v2744_v50 = vpop.f32.mrf.mxu1 }
 0x232   : > { %v4476_v51 = vpop.f32.mrf.mxu0 }
 0x233   : > { %v4496_v52 = vpop.f32.mrf.mxu1 }
 0x24c   : > { %v2859_v53 = vpop.f32.mrf.mxu0 }
 0x24d   : > { %v2977_v54 = vpop.f32.mrf.mxu1  ;;  %v2865_v63 = vadd.f32 %v2859_v53, %v2747_v62 }
 0x24e   : > { %v4515_v55 = vpop.f32.mrf.mxu0 }
 0x24f   : > { %v4535_v56 = vpop.f32.mrf.mxu1  ;;  %v2983_v0 = vadd.f32 %v2977_v54, %v2865_v63 }
 0x250   : > { %v2862_v57 = vpop.f32.mrf.mxu0 }
 0x251   : > { %v2980_v58 = vpop.f32.mrf.mxu1 }
 0x252   : > { %v4516_v59 = vpop.f32.mrf.mxu0 }
 0x253   : > { %v4536_v60 = vpop.f32.mrf.mxu1 }
 0x26c   : > { %v3089_v2 = vpop.f32.mrf.mxu0 }
 0x26d   : > { %v3095_v4 = vadd.f32 %v3089_v2, %v2983_v0 }
 0x26e   : > { %v4555_v5 = vpop.f32.mrf.mxu0 }
 0x26f   : > { %v3103_v6 = vadd.f32 %v3778_v3, %v3095_v4 }
 0x270   : > { %v3092_v7 = vpop.f32.mrf.mxu0 }
 0x271   : > { %v3104_v8 = vpack.c.bf16 %v3103_v6, %v3103_v6 }
 0x272   : > { %v4556_v9 = vpop.f32.mrf.mxu0 }
 0x273   : > { %3105 = vst [vmem:[%s168_s6] sm:$0x7] %v3104_v8 }
 0x274 PF: > { %s13_s12 = sadd.s32 1, %s4792_s12  }
 0x275   : > { %p10_p4 = scmp.ge.s32.totalorder %s13_s12, 4  }
 0x277   :  { %12 = sbr.rel (!%p10_p4) target bundleno = 1 (0x1), region = 89 }

// kernel: discriminator_forward.5
= control target key start
LH: loop header
LB: loop body
LE: loop exit
PB: predicated region body
PF: predicated region fallthrough
CT: control target
= control target key end

     0   :  { %s5553_s12 = smov 0   ;;  %s6440_s0 = inlined_call_operand.vmem [shape: bf16[2,4,36,128], index: 0, kind: input, shape index: {}]   ;;  %s6441_s1 = inlined_call_operand.vmem [shape: bf16[25,128,128], index: 1, kind: input, shape index: {}]   ;;  %s6442_s2 = inlined_call_operand.vmem [shape: f32[1,128], index: 2, kind: input, shape index: {}]   ;;  %s6443_s3 = inlined_call_operand.vmem [shape: bf16[2,22,128], index: 3, kind: output, shape index: {}]  }
   0x1 LB: > { %s3782_s13 = sadd.s32 4294967295, %s5531_s12   ;;  %p3786_p0 = scmp.ge.s32.totalorder %s5531_s12, 1  ;;  %s5531_s12 = sphi %s5553_s12, %s13_s12  }
   0x2   : > { %p137_p1 = scmp.lt.s32.totalorder %s5531_s12, 3 }
   0x4   : > { %p138_p2 = pnand %p3786_p0, %p137_p1 }
   0x5   : > { %p161_p3 = scmp.lt.s32.totalorder (!%p138_p2), %s3782_s13, 1 }
   0x6   : > { %141 = sbr.rel (%p138_p2) target bundleno = 634 (0x27a), region = 32 }
   0xb   : > { %v5288_v0 = vld [vmem:[%s6441_s1 + $0x78] sm:$0xff]   ;;  %v5290_v2 = vld [vmem:[%s6441_s1 + $0x70] sm:$0xff]   ;;  %v5292_v4 = vld [vmem:[%s6441_s1 + $0x68] sm:$0xff]   ;;  %s6445_s13 = smov (!%p161_p3, %s3782_s13), 1  ;;  %vm649_vm7 = vsmask.f32 7424 }
   0xc   : > { %v5289_v1 = vld [vmem:[%s6441_s1 + $0x38] sm:$0xff]   ;;  %4778 = vmatprep.subr.bf16.mxu0 %v5288_v0  ;;  %v5291_v3 = vld [vmem:[%s6441_s1 + $0x30] sm:$0xff]   ;;  %v5293_v5 = vld [vmem:[%s6441_s1 + $0x28] sm:$0xff]   ;;  %s5278_s30 = smul.u32 80, %s6445_s13  ;;  %vm924_vm12 = vcmask 1046528  }
   0xd   : > { %4798 = vmatprep.subr.bf16.mxu1 %v5289_v1  ;;  %4779 = vmatpush3.bf16.msra.mxu0 %v5288_v0  ;;  %v5294_v6 = vld [vmem:[%s6441_s1 + $0x60] sm:$0xff]   ;;  %v5296_v8 = vld [vmem:[%s6441_s1 + $0x58] sm:$0xff]   ;;  %v5298_v10 = vld [vmem:[%s6441_s1 + $0x50] sm:$0xff]   ;;  %s5279_s25 = smul.u32 12, %s6445_s13 }
   0xe   : > { %4799 = vmatpush3.bf16.msra.mxu1 %v5289_v1  ;;  %4780 = vmatprep.subr.bf16.mxu0 %v5290_v2  ;;  %v5295_v7 = vld [vmem:[%s6441_s1 + $0x20] sm:$0xff]   ;;  %v5297_v9 = vld [vmem:[%s6441_s1 + $0x18] sm:$0xff]   ;;  %s5597_s10 = scalar_lea.vmem %s6440_s0, %s5278_s30  ;;  %v5299_v11 = vld [vmem:[%s6441_s1 + $0x10] sm:$0xff]  }
   0xf   : > { %4800 = vmatprep.subr.bf16.mxu1 %v5291_v3  ;;  %v177_v12 = vld [vmem:[%s5597_s10 + $0x14] sm:$0xf]  ;;  %v4519_v13 = vld [vmem:[%s5597_s10 + $0x18] sm:$0xff]   ;;  %v4460_v17 = vld [vmem:[%s5597_s10] sm:$0xff]   ;;  %s170_s30 = scalar_lea.vmem %s6443_s3, %s5279_s25 }
  0x10   : > { %v4469_v14 = vunpack.c.l.bf16 %v4519_v13  ;;  %v4470_v15 = vunpack.c.h.bf16 %v4519_v13  ;;  %v197_v16 = vunpack.c.l.bf16 %v177_v12  ;;  %v4518_v18 = vld [vmem:[%s5597_s10 + $0x8] sm:$0xff]   ;;  %v4461_v20 = vunpack.c.l.bf16 %v4460_v17  ;;  %v5302_v31 = vld [vmem:[%s6441_s1 + $0x40] sm:$0xff]   ;;  %v5309_v44 = vld [vmem:[%s6441_s1 + $0xb8] sm:$0xff]  }
  0x11   : > { %4781 = vmatpush3.bf16.msra.mxu0 %v5290_v2  ;;  %v5300_v19 = vld [vmem:[%s6441_s1 + $0x48] sm:$0xff]   ;;  %v4462_v21 = vunpack.c.h.bf16 %v4460_v17  ;;  %v4465_v22 = vunpack.c.l.bf16 %v4518_v18  ;;  %v4466_v27 = vunpack.c.h.bf16 %v4518_v18  ;;  %v5303_v36 = vld [vmem:[%s6441_s1] sm:$0xff]   ;;  %v5310_v46 = vld [vmem:[%s6441_s1 + $0xf8] sm:$0xff]  }
  0x12   : > { %4801 = vmatpush3.bf16.msra.mxu1 %v5291_v3  ;;  %4782 = vmatprep.subr.bf16.mxu0 %v5292_v4  ;;  %v5301_v23 = vld [vmem:[%s6441_s1 + $0x8] sm:$0xff]   ;;  %vm217_vm0 = vcmp.gt.f32.partialorder %v197_v16, 0.0  ;;  %vm218_vm1 = vcmp.gt.f32.partialorder %v4469_v14, 0.0  ;;  %vm219_vm2 = vcmp.gt.f32.partialorder %v4470_v15, 0.0  ;;  %v237_v24 = vmul.f32 0.2, %v197_v16 }
  0x13   : > { %4802 = vmatprep.subr.bf16.mxu1 %v5293_v5  ;;  %v238_v25 = vmul.f32 0.2, %v4469_v14  ;;  %vm212_vm3 = vcmp.gt.f32.partialorder %v4461_v20, 0.0  ;;  %v239_v26 = vmul.f32 0.2, %v4470_v15  ;;  %vm213_vm4 = vcmp.gt.f32.partialorder %v4462_v21, 0.0 }
  0x14   : > { %v257_v28 = vsel %vm217_vm0, %v197_v16, %v237_v24  ;;  %v232_v30 = vmul.f32 0.2, %v4461_v20  ;;  %v233_v35 = vmul.f32 0.2, %v4462_v21  ;;  %vm214_vm5 = vcmp.gt.f32.partialorder %v4465_v22, 0.0  ;;  %v5311_v49 = vld [vmem:[%s6441_s1 + $0xb0] sm:$0xff]  }
  0x15   : > { %4783 = vmatpush3.bf16.msra.mxu0 %v5292_v4  ;;  %v258_v29 = vsel %vm218_vm1, %v4469_v14, %v238_v25  ;;  %v259_v32 = vsel %vm219_vm2, %v4470_v15, %v239_v26  ;;  %v4441_v33 = vpack.c.bf16 %v257_v28, %v257_v28  ;;  %vm215_vm6 = vcmp.gt.f32.partialorder %v4466_v27, 0.0  ;;  %v5312_v53 = vld [vmem:[%s6441_s1 + $0xf0] sm:$0xff]   ;;  %v5313_v55 = vld [vmem:[%s6441_s1 + $0xa8] sm:$0xff]   ;;  %v5315_v59 = vld [vmem:[%s6441_s1 + $0xa0] sm:$0xff]  }
  0x16   : > { %4803 = vmatpush3.bf16.msra.mxu1 %v5293_v5  ;;  %4784 = vmatprep.subr.bf16.mxu0 %v5294_v6  ;;  %v4496_v34 = vpack.c.bf16 %v259_v32, %v258_v29  ;;  %v252_v37 = vsel %vm212_vm3, %v4461_v20, %v232_v30  ;;  %v234_v38 = vmul.f32 0.2, %v4465_v22  ;;  %v253_v39 = vsel %vm213_vm4, %v4462_v21, %v233_v35  ;;  %v5314_v58 = vld [vmem:[%s6441_s1 + $0xe8] sm:$0xff]   ;;  %v5316_v4 = vld [vmem:[%s6441_s1 + $0xe0] sm:$0xff]   ;;  %v5319_v12 = vld [vmem:[%s6441_s1 + $0x90] sm:$0xff]  }
  0x17   : > { %4804 = vmatprep.subr.bf16.mxu1 %v5295_v7  ;;  %361 = vst [vmem:[#allocation2 + $0x14] sm:$0xf] %v4441_v33  ;;  %v235_v40 = vmul.f32 0.2, %v4466_v27  ;;  %v4486_v41 = vpack.c.bf16 %v253_v39, %v252_v37  ;;  %v5320_v14 = vld [vmem:[%s6441_s1 + $0xd0] sm:$0xff]   ;;  %v5321_v15 = vld [vmem:[%s6441_s1 + $0x88] sm:$0xff]  }
  0x18   : > { %4524 = vst [vmem:[#allocation2 + $0x18] sm:$0xff] %v4496_v34   ;;  %v254_v42 = vsel %vm214_vm5, %v4465_v22, %v234_v38  ;;  %v5322_v17 = vld [vmem:[%s6441_s1 + $0xc8] sm:$0xff]   ;;  %v5323_v20 = vld [vmem:[%s6441_s1 + $0x80] sm:$0xff]   ;;  %v5326_v22 = vld [vmem:[%s6441_s1 + $0x138] sm:$0xff]   ;;  %vm1719_vm1 = vcmask 1044480  }
  0x19   : > { %4785 = vmatpush3.bf16.msra.mxu0 %v5294_v6  ;;  %v255_v43 = vsel %vm215_vm6, %v4466_v27, %v235_v40  ;;  %4487 = vst [vmem:[#allocation2] sm:$0xff] %v4486_v41   ;;  %v5317_v6 = vld [vmem:[%s6441_s1 + $0x98] sm:$0xff]   ;;  %v5324_v21 = vld [vmem:[%s6441_s1 + $0xc0] sm:$0xff]   ;;  %v4521_v28 = vld [vmem:[%s5597_s10 + $0x30] sm:$0xff]   ;;  %vm1980_vm3 = vsmask.f32 4352 }
  0x1a   : > { %4805 = vmatpush3.bf16.msra.mxu1 %v5295_v7  ;;  %4786 = vmatprep.subr.bf16.mxu0 %v5296_v8  ;;  %v4491_v45 = vpack.c.bf16 %v255_v43, %v254_v42  ;;  %v4478_v32 = vunpack.c.h.bf16 %v4521_v28  ;;  %v5328_v37 = vld [vmem:[%s6441_s1 + $0x178] sm:$0xff]   ;;  %v5329_v40 = vld [vmem:[%s6441_s1 + $0x130] sm:$0xff]   ;;  %vm3057_vm6 = vcmask 1045504  }
  0x1b   : > { %4806 = vmatprep.subr.bf16.mxu1 %v5297_v9 }
  0x1c   : > { %4523 = vst [vmem:[#allocation2 + $0x8] sm:$0xff] %v4491_v45   ;;  %vm225_vm11 = vcmp.gt.f32.partialorder %v4478_v32, 0.0 }
  0x1d   : > { %4787 = vmatpush3.bf16.msra.mxu0 %v5296_v8 }
  0x1e   : > { %4807 = vmatpush3.bf16.msra.mxu1 %v5297_v9  ;;  %4788 = vmatprep.subr.bf16.mxu0 %v5298_v10 }
  0x1f   : > { %4808 = vmatprep.subr.bf16.mxu1 %v5299_v11  ;;  %v5304_v47 = vld [vmem:[#allocation2 + $0x14] sm:$0xff]   ;;  %v5307_v48 = vld [vmem:[#allocation2 + $0x1c] ss:$0 sps:$4 sm:$0x77]  }
  0x20   : > { %4794 = vmatprep.mubr.bf16.mxu0 %v5304_v47  ;;  %v376_v50 = vld [vmem:[#allocation2] sm:$0xf]  ;;  %v5632_v51 = vld [vmem:[#allocation2 + $0x4] sm:$0xf]  ;;  %v790_v56 = vshll.u32 %v5304_v47, 16  ;;  %v788_v63 = vshrl.u32 %v5304_v47, 16 }
  0x21   : > { %4789 = vmatpush3.bf16.msra.mxu0 %v5298_v10  ;;  %v3835_v52 = vcombine.low %v376_v50, %v5632_v51  ;;  %v5650_v2 = vld [vmem:[#allocation2 + $0x1c] ss:$0 sps:$4 sm:$0xff]   ;;  %v903_v16 = vld [vmem:[#allocation2] sm:$0xe]  ;;  %v5330_v47 = vld [vmem:[%s6441_s1 + $0x170] sm:$0xff]  }
  0x22   : > { %4809 = vmatpush3.bf16.msra.mxu1 %v5299_v11  ;;  %4790 = vmatprep.subr.bf16.mxu0 %v5300_v19  ;;  %v792_v3 = vrot.slane %v790_v56, 1  ;;  %v795_v8 = vshll.u32 %v5650_v2, 16  ;;  %v5318_v11 = vld [vmem:[%s6441_s1 + $0xd8] sm:$0xff]   ;;  %v799_v25 = vshrl.u32 %v5650_v2, 16  ;;  %v5333_v50 = vld [vmem:[%s6441_s1 + $0x120] sm:$0xff]  }
  0x23   : > { %4810 = vmatprep.subr.bf16.mxu1 %v5301_v23  ;;  %v5308_v54 = vld [vmem:[#allocation2 + $0x8] ss:$0 sps:$4 sm:$0x77]   ;;  %4814 = vmatprep.mubr.bf16.mxu1 %v3835_v52  ;;  %v653_v57 = vshll.u32 %v3835_v52, 16  ;;  %v651_v61 = vshrl.u32 %v3835_v52, 16 }
  0x24   : > { %v5647_v60 = vld [vmem:[#allocation2 + $0x8] ss:$0 sps:$4 sm:$0xff]   ;;  %v793_v7 = vor.u32 %v792_v3, %v788_v63  ;;  %v797_v10 = vrot.slane %v795_v8, 1  ;;  %v5725_v56 = vld [vmem:[%s5597_s10 + $0x20] ss:$28 sps:$4 sm:$0xff]   ;;  %v5337_v63 = vld [vmem:[%s6441_s1 + $0x110] sm:$0xff]  }
  0x25   : > { %4791 = vmatpush3.bf16.msra.mxu0 %v5300_v19  ;;  %v655_v62 = vrot.slane %v653_v57, 1  ;;  %v658_v0 = vshll.u32 %v5647_v60, 16  ;;  %v662_v18 = vshrl.u32 %v5647_v60, 16  ;;  %v3911_v19 = vcombine.low %v903_v16, %v5632_v51  ;;  %v4522_v57 = vld [vmem:[%s5597_s10 + $0x40] sm:$0xff]   ;;  %v5338_v3 = vld [vmem:[%s6441_s1 + $0x150] sm:$0xff]  }
  0x26   : > { %4811 = vmatpush3.bf16.msra.mxu1 %v5301_v23  ;;  %4792 = vmatprep.subr.bf16.mxu0 %v5302_v31  ;;  %v798_v13 = vsel %vm649_vm7, %v793_v7, %v797_v10  ;;  %v4520_v23 = vld [vmem:[%s5597_s10 + $0x28] sm:$0xff]   ;;  %v926_v30 = vrot.slane %v5647_v60, 1  ;;  %v801_v45 = vor.u32 %v799_v25, %v797_v10  ;;  %v5349_v25 = vld [vmem:[%s6441_s1 + $0x1f0] sm:$0xff]  }
  0x27   : > { %4812 = vmatprep.subr.bf16.mxu1 %v5303_v36  ;;  %v656_v1 = vor.u32 %v655_v62, %v651_v61  ;;  %v660_v5 = vrot.slane %v658_v0, 1  ;;  %v4473_v26 = vunpack.c.l.bf16 %v4520_v23  ;;  %v4474_v27 = vunpack.c.h.bf16 %v4520_v23  ;;  %v5340_v10 = vld [vmem:[%s6441_s1 + $0x148] sm:$0xff]  }
  0x28   : > { %v925_v29 = vrot.slane %v3911_v19, 1  ;;  %v4482_v61 = vunpack.c.h.bf16 %v4522_v57  ;;  %v207_v62 = vunpack.c.h.bf16 %v5725_v56  ;;  %v5347_v19 = vld [vmem:[%s6441_s1 + $0x1f8] sm:$0xff]  }
  0x29   : > { %4793 = vmatpush3.bf16.msra.mxu0 %v5302_v31  ;;  %v661_v9 = vsel %vm649_vm7, %v656_v1, %v660_v5  ;;  %v664_v24 = vor.u32 %v662_v18, %v660_v5  ;;  %v4477_v31 = vunpack.c.l.bf16 %v4521_v28  ;;  %vm222_vm8 = vcmp.gt.f32.partialorder %v4473_v26, 0.0  ;;  %v5339_v5 = vld [vmem:[%s6441_s1 + $0x108] sm:$0xff]   ;;  %v5352_v28 = vld [vmem:[%s6441_s1 + $0x1a0] sm:$0xff]  }
  0x2a   : > { %4813 = vmatpush3.bf16.msra.mxu1 %v5303_v36  ;;  %4818 = vmatprep.subr.bf16.mxu0 %v5309_v44  ;;  %vm223_vm9 = vcmp.gt.f32.partialorder %v4474_v27, 0.0  ;;  %v242_v33 = vmul.f32 0.2, %v4473_v26  ;;  %v243_v34 = vmul.f32 0.2, %v4474_v27  ;;  %vm227_vm13 = vcmp.gt.f32.partialorder %v207_v62, 0.0 }
  0x2b   : > { %4838 = vmatprep.subr.bf16.mxu1 %v5310_v46  ;;  %vm224_vm10 = vcmp.gt.f32.partialorder %v4477_v31, 0.0  ;;  %v244_v35 = vmul.f32 0.2, %v4477_v31  ;;  %v245_v36 = vmul.f32 0.2, %v4478_v32  ;;  %vm229_vm15 = vcmp.gt.f32.partialorder %v4482_v61, 0.0 }
  0x2c   : > { %4795 = vmatmul.mubr.bf16.vlgmr.msra.gmra.mxu0 %v5307_v48  ;;  %v262_v38 = vsel %vm222_vm8, %v4473_v26, %v242_v33  ;;  %v263_v39 = vsel %vm223_vm9, %v4474_v27, %v243_v34  ;;  %v5331_v48 = vld [vmem:[%s6441_s1 + $0x128] sm:$0xff]   ;;  %v247_v0 = vmul.f32 0.2, %v207_v62  ;;  %v249_v2 = vmul.f32 0.2, %v4482_v61  ;;  %v5357_v34 = vld [vmem:[%s6441_s1 + $0x1d0] sm:$0xff]  }
  0x2d   : > { %4819 = vmatpush3.bf16.msra.mxu0 %v5309_v44  ;;  %4815 = vmatmul.mubr.bf16.vlgmr.msra.gmra.mxu1 %v5308_v54  ;;  %v4501_v41 = vpack.c.bf16 %v263_v39, %v262_v38  ;;  %v264_v42 = vsel %vm224_vm10, %v4477_v31, %v244_v35  ;;  %v265_v43 = vsel %vm225_vm11, %v4478_v32, %v245_v36  ;;  %v5334_v54 = vld [vmem:[%s6441_s1 + $0x160] sm:$0xff]   ;;  %v5350_v26 = vld [vmem:[%s6441_s1 + $0x1a8] sm:$0xff]   ;;  %v5355_v31 = vld [vmem:[%s6441_s1 + $0x1d8] sm:$0xff]   ;;  %v200_v33 = vunpack.c.l.bf16 %v5725_v56 }
  0x2e   : > { %4820 = vmatprep.subr.bf16.mxu0 %v5311_v49  ;;  %4839 = vmatpush3.bf16.msra.mxu1 %v5310_v46  ;;  %v4506_v44 = vpack.c.bf16 %v265_v43, %v264_v42  ;;  %v927_v46 = vsel %vm924_vm12, %v925_v29, %v926_v30  ;;  %v269_v7 = vsel %vm229_vm15, %v4482_v61, %v249_v2  ;;  %v5351_v27 = vld [vmem:[%s6441_s1 + $0x1e8] sm:$0xff]   ;;  %v5353_v29 = vld [vmem:[%s6441_s1 + $0x1e0] sm:$0xff]   ;;  %v5356_v32 = vld [vmem:[%s6441_s1 + $0x190] sm:$0xff]  }
  0x2f   : > { %4840 = vmatprep.subr.bf16.mxu1 %v5312_v53  ;;  %4834 = vmatprep.mubr.bf16.mxu0 %v661_v9  ;;  %4525 = vst [vmem:[#allocation2 + $0x28] sm:$0xff] %v4501_v41   ;;  %v5358_v35 = vld [vmem:[%s6441_s1 + $0x188] sm:$0xff]   ;;  %vm220_vm0 = vcmp.gt.f32.partialorder %v200_v33, 0.0  ;;  %v240_v38 = vmul.f32 0.2, %v200_v33 }
  0x30   : > { %4854 = vmatprep.mubr.bf16.mxu1 %v798_v13  ;;  %4526 = vst [vmem:[#allocation2 + $0x30] sm:$0xff] %v4506_v44   ;;  %v5359_v39 = vld [vmem:[%s6441_s1 + $0x1c8] sm:$0xff]   ;;  %v5828_v56 = vld [vmem:[#allocation2 + $0x4] sm:$0xf] }
  0x31   : > { %4821 = vmatpush3.bf16.msra.mxu0 %v5311_v49  ;;  %v5332_v49 = vld [vmem:[%s6441_s1 + $0x168] sm:$0xff]   ;;  %v260_v42 = vsel %vm220_vm0, %v200_v33, %v240_v38 }
  0x32   : > { %4822 = vmatprep.subr.bf16.mxu0 %v5313_v55  ;;  %4841 = vmatpush3.bf16.msra.mxu1 %v5312_v53  ;;  %v4444_v43 = vpack.c.bf16 %v260_v42, %v260_v42  ;;  %v5386_v33 = vld [vmem:[%s6441_s1 + $0x2a8] sm:$0xff]  }
  0x33   : > { %4842 = vmatprep.subr.bf16.mxu1 %v5314_v58 }
  0x34   : > { %364 = vst [vmem:[#allocation2 + $0x20] sm:$0xf] %v4444_v43  ;;  %v5391_v43 = vld [vmem:[%s6441_s1 + $0x2d8] sm:$0xff]  }
  0x35   : > { %4823 = vmatpush3.bf16.msra.mxu0 %v5313_v55  ;;  %v5335_v55 = vld [vmem:[%s6441_s1 + $0x118] sm:$0xff]  }
  0x36   : > { %4824 = vmatprep.subr.bf16.mxu0 %v5315_v59  ;;  %4843 = vmatpush3.bf16.msra.mxu1 %v5314_v58  ;;  %v1030_v51 = vld [vmem:[#allocation2 + $0x28] sm:$0xf]  ;;  %v5712_v52 = vld [vmem:[#allocation2 + $0x2c] sm:$0xf]  ;;  %v5336_v58 = vld [vmem:[%s6441_s1 + $0x158] sm:$0xff]  }
  0x37   : > { %4844 = vmatprep.subr.bf16.mxu1 %v5316_v4  ;;  %v5715_v53 = vcombine.low %v1030_v51, %v5712_v52  ;;  %v5748_v13 = vld [vmem:[#allocation2 + $0x30] ss:$0 sps:$4 sm:$0xff]   ;;  %v1563_v44 = vld [vmem:[#allocation2 + $0x28] sm:$0xe] }
  0x38   : > { %v1318_v18 = vshll.u32 %v5748_v13, 16 }
  0x39   : > { %4825 = vmatpush3.bf16.msra.mxu0 %v5315_v59  ;;  %v4481_v59 = vunpack.c.l.bf16 %v4522_v57  ;;  %v1311_v16 = vshrl.u32 %v5715_v53, 16  ;;  %v5830_v57 = vld [vmem:[#allocation2 + $0x8] sm:$0xf] }
  0x3a   : > { %4826 = vmatprep.subr.bf16.mxu0 %v5317_v6  ;;  %4845 = vmatpush3.bf16.msra.mxu1 %v5316_v4  ;;  %v267_v4 = vsel %vm227_vm13, %v207_v62, %v247_v0  ;;  %v5368_v0 = vld [vmem:[%s6441_s1 + $0x270] sm:$0xff]  }
  0x3b   : > { %4846 = vmatprep.subr.bf16.mxu1 %v5318_v11  ;;  %vm228_vm14 = vcmp.gt.f32.partialorder %v4481_v59, 0.0  ;;  %v248_v1 = vmul.f32 0.2, %v4481_v59  ;;  %v4451_v8 = vpack.c.bf16 %v267_v4, %v267_v4  ;;  %v5371_v4 = vld [vmem:[%s6441_s1 + $0x220] sm:$0xff]  }
  0x3d   : > { %4827 = vmatpush3.bf16.msra.mxu0 %v5317_v6  ;;  %v268_v6 = vsel %vm228_vm14, %v4481_v59, %v248_v1  ;;  %371 = vst [vmem:[#allocation2 + $0x3c] sm:$0xf] %v4451_v8  ;;  %v5369_v1 = vld [vmem:[%s6441_s1 + $0x228] sm:$0xff]   ;;  %v5375_v8 = vld [vmem:[%s6441_s1 + $0x210] sm:$0xff]  }
  0x3e   : > { %4828 = vmatprep.subr.bf16.mxu0 %v5319_v12  ;;  %4847 = vmatpush3.bf16.msra.mxu1 %v5318_v11  ;;  %v4511_v9 = vpack.c.bf16 %v269_v7, %v268_v6  ;;  %v5341_v11 = vld [vmem:[%s6441_s1 + $0x100] sm:$0xff]   ;;  %v5373_v6 = vld [vmem:[%s6441_s1 + $0x218] sm:$0xff]  }
  0x3f   : > { %4848 = vmatprep.subr.bf16.mxu1 %v5320_v14  ;;  %v5374_v7 = vld [vmem:[%s6441_s1 + $0x258] sm:$0xff]  }
  0x40   : > { %4527 = vst [vmem:[#allocation2 + $0x40] sm:$0xff] %v4511_v9   ;;  %v5376_v9 = vld [vmem:[%s6441_s1 + $0x250] sm:$0xff]  }
  0x41   : > { %4829 = vmatpush3.bf16.msra.mxu0 %v5319_v12  ;;  %v1313_v12 = vshll.u32 %v5715_v53, 16 }
  0x42   : > { %4830 = vmatprep.subr.bf16.mxu0 %v5321_v15  ;;  %4849 = vmatpush3.bf16.msra.mxu1 %v5320_v14  ;;  %v5342_v14 = vld [vmem:[%s6441_s1 + $0x140] sm:$0xff]  }
  0x43   : > { %4850 = vmatprep.subr.bf16.mxu1 %v5322_v17 }
  0x45   : > { %4831 = vmatpush3.bf16.msra.mxu0 %v5321_v15  ;;  %v5343_v15 = vld [vmem:[%s6441_s1 + $0x1b8] sm:$0xff]  }
  0x46   : > { %4832 = vmatprep.subr.bf16.mxu0 %v5323_v20  ;;  %4851 = vmatpush3.bf16.msra.mxu1 %v5322_v17  ;;  %v1315_v17 = vrot.slane %v1313_v12, 1  ;;  %v1691_v12 = vld [vmem:[#allocation2 + $0xc] sm:$0x3] }
  0x47   : > { %4852 = vmatprep.subr.bf16.mxu1 %v5324_v21 }
  0x48   : > { %v1316_v23 = vor.u32 %v1315_v17, %v1311_v16 }
  0x49   : > { %4833 = vmatpush3.bf16.msra.mxu0 %v5323_v20  ;;  %v5346_v20 = vld [vmem:[#allocation2 + $0x30] ss:$0 sps:$4 sm:$0x77]  }
  0x4a   : > { %4858 = vmatprep.subr.bf16.mxu0 %v5326_v22  ;;  %4853 = vmatpush3.bf16.msra.mxu1 %v5324_v21  ;;  %v5348_v21 = vld [vmem:[%s6441_s1 + $0x1b0] sm:$0xff]  }
  0x4b   : > { %4878 = vmatprep.subr.bf16.mxu1 %v5328_v37 }
  0x4c   : > { %4835 = vmatmul.mubr.bf16.vlgmr.msra.gmra.mxu0 %v664_v24  ;;  %v5768_v24 = vrot.slane %v1318_v18, 1  ;;  %v4064_v18 = vcombine.low %v5830_v57, %v1691_v12 }
  0x4d   : > { %4859 = vmatpush3.bf16.msra.mxu0 %v5326_v22  ;;  %4874 = vmatprep.mubr.bf16.mxu0 %v927_v46  ;;  %v5764_v22 = vld [vmem:[#allocation2 + $0x3c] sm:$0xff]  }
  0x4e   : > { %4860 = vmatprep.subr.bf16.mxu0 %v5329_v40  ;;  %4855 = vmatmul.mubr.bf16.vlgmr.msra.gmra.mxu1 %v801_v45  ;;  %v1321_v60 = vsel %vm649_vm7, %v1316_v23, %v5768_v24  ;;  %v1450_v36 = vshll.u32 %v5764_v22, 16  ;;  %v1448_v41 = vshrl.u32 %v5764_v22, 16 }
  0x4f   : > { %4879 = vmatpush3.bf16.msra.mxu1 %v5328_v37  ;;  %4894 = vmatprep.mubr.bf16.mxu1 %v5715_v53  ;;  %v5805_v37 = vld [vmem:[#allocation2 + $0x44] ss:$0 sps:$4 sm:$0xff]   ;;  %v4038_v53 = vcombine.low %v1563_v44, %v5712_v52  ;;  %v4165_v52 = vcombine.low %v5828_v56, %v5830_v57 }
  0x50   : > { %4880 = vmatprep.subr.bf16.mxu1 %v5330_v47  ;;  %v1452_v45 = vrot.slane %v1450_v36, 1  ;;  %v1455_v46 = vshll.u32 %v5805_v37, 16  ;;  %v1459_v16 = vshrl.u32 %v5805_v37, 16  ;;  %v5388_v36 = vld [vmem:[%s6441_s1 + $0x2a0] sm:$0xff]   ;;  %v190_v37 = vld [vmem:[%s5597_s10 + $0x48] sm:$0xf] }
  0x51   : > { %4861 = vmatpush3.bf16.msra.mxu0 %v5329_v40  ;;  %v5360_v40 = vld [vmem:[%s6441_s1 + $0x180] sm:$0xff]   ;;  %v1584_v62 = vrot.slane %v4038_v53, 1  ;;  %v210_v38 = vunpack.c.l.bf16 %v190_v37 }
  0x52   : > { %4862 = vmatprep.subr.bf16.mxu0 %v5331_v48  ;;  %v5822_v51 = vrot.slane %v1455_v46, 1 }
  0x53   : > { %4881 = vmatpush3.bf16.msra.mxu1 %v5330_v47  ;;  %v5361_v47 = vld [vmem:[%s6441_s1 + $0x1c0] sm:$0xff]   ;;  %vm230_vm2 = vcmp.gt.f32.partialorder %v210_v38, 0.0 }
  0x54   : > { %4882 = vmatprep.subr.bf16.mxu1 %v5332_v49 }
  0x55   : > { %4863 = vmatpush3.bf16.msra.mxu0 %v5331_v48  ;;  %v5363_v48 = vld [vmem:[#allocation2 + $0x44] ss:$0 sps:$4 sm:$0x77]  }
  0x56   : > { %4864 = vmatprep.subr.bf16.mxu0 %v5333_v50 }
  0x57   : > { %4883 = vmatpush3.bf16.msra.mxu1 %v5332_v49  ;;  %v5364_v49 = vld [vmem:[%s6441_s1 + $0x238] sm:$0xff]  }
  0x58   : > { %4884 = vmatprep.subr.bf16.mxu1 %v5334_v54 }
  0x59   : > { %4865 = vmatpush3.bf16.msra.mxu0 %v5333_v50  ;;  %v1322_v50 = vshrl.u32 %v5748_v13, 16 }
  0x5a   : > { %4866 = vmatprep.subr.bf16.mxu0 %v5335_v55 }
  0x5b   : > { %4885 = vmatpush3.bf16.msra.mxu1 %v5334_v54  ;;  %v5366_v54 = vld [vmem:[%s6441_s1 + $0x278] sm:$0xff]   ;;  %v1324_v59 = vor.u32 %v1322_v50, %v5768_v24  ;;  %v5894_v24 = vrot.slane %v4064_v18, 3  ;;  %v5393_v50 = vld [vmem:[%s6441_s1 + $0x2d0] sm:$0xff]  }
  0x5c   : > { %4886 = vmatprep.subr.bf16.mxu1 %v5336_v58  ;;  %v5406_v18 = vld [vmem:[%s6441_s1 + $0x370] sm:$0xff]  }
  0x5d   : > { %4867 = vmatpush3.bf16.msra.mxu0 %v5335_v55  ;;  %v1453_v55 = vor.u32 %v1452_v45, %v1448_v41  ;;  %v5934_v41 = vld [vmem:[#allocation2 + $0xc] sm:$0x7]  ;;  %v5392_v45 = vld [vmem:[%s6441_s1 + $0x290] sm:$0xff]  }
  0x5e   : > { %4868 = vmatprep.subr.bf16.mxu0 %v5337_v63  ;;  %v4115_v46 = vcombine.low %v5830_v57, %v5934_v41 }
  0x5f   : > { %4887 = vmatpush3.bf16.msra.mxu1 %v5336_v58  ;;  %v5367_v58 = vld [vmem:[%s6441_s1 + $0x230] sm:$0xff]   ;;  %v1458_v61 = vsel %vm649_vm7, %v1453_v55, %v5822_v51  ;;  %vm3318_vm7 = vsmask.f32 5376 }
  0x60   : > { %4888 = vmatprep.subr.bf16.mxu1 %v5338_v3  ;;  %v1993_v55 = vshll.u32 %v4115_v46, 16 }
  0x61   : > { %4869 = vmatpush3.bf16.msra.mxu0 %v5337_v63  ;;  %v1585_v63 = vrot.slane %v5748_v13, 1  ;;  %v5389_v13 = vld [vmem:[%s6441_s1 + $0x2e0] sm:$0xff]  }
  0x62   : > { %4870 = vmatprep.subr.bf16.mxu0 %v5339_v5 }
  0x63   : > { %4889 = vmatpush3.bf16.msra.mxu1 %v5338_v3  ;;  %v1586_v2 = vsel %vm924_vm12, %v1584_v62, %v1585_v63  ;;  %v5370_v3 = vld [vmem:[%s6441_s1 + $0x268] sm:$0xff]  }
  0x64   : > { %4890 = vmatprep.subr.bf16.mxu1 %v5340_v10 }
  0x65   : > { %4871 = vmatpush3.bf16.msra.mxu0 %v5339_v5  ;;  %v5372_v5 = vld [vmem:[%s6441_s1 + $0x260] sm:$0xff]  }
  0x66   : > { %4872 = vmatprep.subr.bf16.mxu0 %v5341_v11 }
  0x67   : > { %4891 = vmatpush3.bf16.msra.mxu1 %v5340_v10  ;;  %v5377_v10 = vld [vmem:[%s6441_s1 + $0x208] sm:$0xff]  }
  0x68   : > { %4892 = vmatprep.subr.bf16.mxu1 %v5342_v14 }
  0x69   : > { %4873 = vmatpush3.bf16.msra.mxu0 %v5341_v11  ;;  %v1688_v11 = vld [vmem:[#allocation2] sm:$0x8] }
  0x6a   : > { %4898 = vmatprep.subr.bf16.mxu0 %v5343_v15  ;;  %v5882_v17 = vcombine.low %v1688_v11, %v5828_v56  ;;  %v5426_v56 = vld [vmem:[%s6441_s1 + $0x3a0] sm:$0xff]  }
  0x6b   : > { %4893 = vmatpush3.bf16.msra.mxu1 %v5342_v14  ;;  %v5378_v14 = vld [vmem:[%s6441_s1 + $0x248] sm:$0xff]  }
  0x6c   : > { %4875 = vmatmul.mubr.bf16.vlgmr.msra.gmra.mxu0 %v926_v30  ;;  %4918 = vmatprep.subr.bf16.mxu1 %v5347_v19  ;;  %v5354_v30 = vld [vmem:[%s6441_s1 + $0x198] sm:$0xff]   ;;  %v1720_v23 = vrot.slane %v5882_v17, 3 }
  0x6d   : > { %4899 = vmatpush3.bf16.msra.mxu0 %v5343_v15  ;;  %4914 = vmatprep.mubr.bf16.mxu0 %v5764_v22  ;;  %v5379_v15 = vld [vmem:[%s6441_s1 + $0x200] sm:$0xff]   ;;  %v5382_v22 = vld [vmem:[%s6441_s1 + $0x2b8] sm:$0xff]  }
  0x6e   : > { %4900 = vmatprep.subr.bf16.mxu0 %v5348_v21  ;;  %4895 = vmatmul.mubr.bf16.vlgmr.msra.gmra.mxu1 %v5346_v20  ;;  %v5888_v20 = vld [vmem:[#allocation2 + $0x1c] sm:$0xf] }
  0x6f   : > { %4919 = vmatpush3.bf16.msra.mxu1 %v5347_v19  ;;  %4934 = vmatprep.mubr.bf16.mxu1 %v1321_v60  ;;  %v5380_v19 = vld [vmem:[%s6441_s1 + $0x240] sm:$0xff]  }
  0x70   : > { %4920 = vmatprep.subr.bf16.mxu1 %v5349_v25 }
  0x71   : > { %4901 = vmatpush3.bf16.msra.mxu0 %v5348_v21  ;;  %v1827_v21 = vld [vmem:[#allocation2 + $0x20] sm:$0x3] }
  0x72   : > { %4902 = vmatprep.subr.bf16.mxu0 %v5350_v26  ;;  %v4090_v60 = vcombine.low %v5888_v20, %v1827_v21 }
  0x73   : > { %4921 = vmatpush3.bf16.msra.mxu1 %v5349_v25  ;;  %v1461_v25 = vor.u32 %v1459_v16, %v5822_v51  ;;  %v5394_v51 = vld [vmem:[%s6441_s1 + $0x288] sm:$0xff]  }
  0x74   : > { %4922 = vmatprep.subr.bf16.mxu1 %v5351_v27  ;;  %v5975_v16 = vld [vmem:[#allocation2 + $0x2c] sm:$0xf] }
  0x75   : > { %4903 = vmatpush3.bf16.msra.mxu0 %v5350_v26  ;;  %v5897_v26 = vld [vmem:[#allocation2 + $0x14] sm:$0xf8]  }
  0x76   : > { %4904 = vmatprep.subr.bf16.mxu0 %v5352_v28  ;;  %v2124_v62 = vshll.u32 %v5897_v26, 16 }
  0x77   : > { %4923 = vmatpush3.bf16.msra.mxu1 %v5351_v27  ;;  %v5383_v27 = vld [vmem:[%s6441_s1 + $0x2f8] sm:$0xff]  }
  0x78   : > { %4924 = vmatprep.subr.bf16.mxu1 %v5353_v29 }
  0x79   : > { %4905 = vmatpush3.bf16.msra.mxu0 %v5352_v28  ;;  %v5384_v28 = vld [vmem:[%s6441_s1 + $0x2b0] sm:$0xff]  }
  0x7a   : > { %4906 = vmatprep.subr.bf16.mxu0 %v5354_v30 }
  0x7b   : > { %4925 = vmatpush3.bf16.msra.mxu1 %v5353_v29  ;;  %v1722_v29 = vsel %vm1719_vm1, %v1720_v23, %v5894_v24 }
  0x7c   : > { %4926 = vmatprep.subr.bf16.mxu1 %v5355_v31 }
  0x7d   : > { %4907 = vmatpush3.bf16.msra.mxu0 %v5354_v30  ;;  %v1855_v30 = vrot.slane %v5897_v26, 3 }
  0x7e   : > { %4908 = vmatprep.subr.bf16.mxu0 %v5356_v32 }
  0x7f   : > { %4927 = vmatpush3.bf16.msra.mxu1 %v5355_v31  ;;  %v5909_v31 = vrot.slane %v4090_v60, 3  ;;  %v5410_v60 = vld [vmem:[%s6441_s1 + $0x360] sm:$0xff]  }
  0x80   : > { %4928 = vmatprep.subr.bf16.mxu1 %v5357_v34 }
  0x81   : > { %4909 = vmatpush3.bf16.msra.mxu0 %v5356_v32  ;;  %v5385_v32 = vld [vmem:[%s6441_s1 + $0x2f0] sm:$0xff]  }
  0x82   : > { %4910 = vmatprep.subr.bf16.mxu0 %v5358_v35 }
  0x83   : > { %4929 = vmatpush3.bf16.msra.mxu1 %v5357_v34  ;;  %v1857_v34 = vsel %vm1719_vm1, %v1855_v30, %v5909_v31  ;;  %v176_v30 = vld [vmem:[%s5597_s10 + $0x10] sm:$0x3] }
  0x84   : > { %4930 = vmatprep.subr.bf16.mxu1 %v5359_v39 }
  0x85   : > { %4911 = vmatpush3.bf16.msra.mxu0 %v5358_v35  ;;  %v5387_v35 = vld [vmem:[%s6441_s1 + $0x2e8] sm:$0xff]  }
  0x86   : > { %4912 = vmatprep.subr.bf16.mxu0 %v5360_v40 }
  0x87   : > { %4931 = vmatpush3.bf16.msra.mxu1 %v5359_v39  ;;  %v5390_v39 = vld [vmem:[%s6441_s1 + $0x298] sm:$0xff]  }
  0x88   : > { %4932 = vmatprep.subr.bf16.mxu1 %v5361_v47 }
  0x89   : > { %4913 = vmatpush3.bf16.msra.mxu0 %v5360_v40  ;;  %v250_v40 = vmul.f32 0.2, %v210_v38 }
  0x8a   : > { %4938 = vmatprep.subr.bf16.mxu0 %v5364_v49 }
  0x8b   : > { %4933 = vmatpush3.bf16.msra.mxu1 %v5361_v47  ;;  %v270_v42 = vsel %vm230_vm2, %v210_v38, %v250_v40  ;;  %v2099_v47 = vld [vmem:[#allocation2 + $0x20] sm:$0x7] }
  0x8c   : > { %4915 = vmatmul.mubr.bf16.vlgmr.msra.gmra.mxu0 %v5363_v48  ;;  %4958 = vmatprep.subr.bf16.mxu1 %v5366_v54  ;;  %v4454_v44 = vpack.c.bf16 %v270_v42, %v270_v42  ;;  %v1982_v48 = vshrl.u32 %v5882_v17, 16  ;;  %v4140_v53 = vcombine.low %v5888_v20, %v2099_v47  ;;  %v5417_v40 = vld [vmem:[%s6441_s1 + $0x300] sm:$0xff]   ;;  %v2361_v47 = vld [vmem:[#allocation2 + $0x34] sm:$0x3] }
  0x8d   : > { %4939 = vmatpush3.bf16.msra.mxu0 %v5364_v49  ;;  %4954 = vmatprep.mubr.bf16.mxu0 %v1458_v61  ;;  %v1985_v49 = vshll.u32 %v5882_v17, 16  ;;  %v2121_v61 = vshrl.u32 %v5897_v26, 16  ;;  %v5977_v17 = vld [vmem:[#allocation2 + $0x30] sm:$0xf]  ;;  %v5409_v26 = vld [vmem:[%s6441_s1 + $0x320] sm:$0xff]  }
  0x8e   : > { %4940 = vmatprep.subr.bf16.mxu0 %v5367_v58  ;;  %4935 = vmatmul.mubr.bf16.vlgmr.msra.gmra.mxu1 %v1324_v59  ;;  %374 = vst [vmem:[#allocation2 + $0x48] sm:$0xf] %v4454_v44  ;;  %v4293_v23 = vcombine.low %v5975_v16, %v5977_v17  ;;  %v5418_v44 = vld [vmem:[%s6441_s1 + $0x340] sm:$0xff]  }
  0x8f   : > { %4959 = vmatpush3.bf16.msra.mxu1 %v5366_v54  ;;  %4974 = vmatprep.mubr.bf16.mxu1 %v1586_v2  ;;  %v1990_v54 = vshrl.u32 %v4115_v46, 16  ;;  %v1987_v59 = vrot.slane %v1985_v49, 4  ;;  %v1995_v2 = vrot.slane %v1993_v55, 4  ;;  %v2358_v46 = vld [vmem:[#allocation2 + $0x28] sm:$0x8]  ;;  %v4192_v49 = vcombine.low %v5977_v17, %v2361_v47 }
  0x90   : > { %4960 = vmatprep.subr.bf16.mxu1 %v5368_v0 }
  0x91   : > { %4941 = vmatpush3.bf16.msra.mxu0 %v5367_v58  ;;  %v1984_v58 = vrot.slane %v1982_v48, 3  ;;  %v6034_v48 = vcombine.low %v2358_v46, %v5975_v16  ;;  %v6045_v55 = vrot.slane %v4192_v49, 3  ;;  %v5469_v16 = vld [vmem:[%s6441_s1 + $0x4d8] sm:$0xff]  }
  0x92   : > { %4942 = vmatprep.subr.bf16.mxu0 %v5369_v1 }
  0x93   : > { %4961 = vmatpush3.bf16.msra.mxu1 %v5368_v0  ;;  %v5396_v0 = vld [vmem:[%s6441_s1 + $0x280] sm:$0xff]  }
  0x94   : > { %4962 = vmatprep.subr.bf16.mxu1 %v5370_v3 }
  0x95   : > { %4943 = vmatpush3.bf16.msra.mxu0 %v5369_v1  ;;  %v1992_v1 = vrot.slane %v1990_v54, 3  ;;  %v2389_v54 = vrot.slane %v6034_v48, 3 }
  0x96   : > { %4944 = vmatprep.subr.bf16.mxu0 %v5371_v4 }
  0x97   : > { %4963 = vmatpush3.bf16.msra.mxu1 %v5370_v3  ;;  %v2129_v3 = vshrl.u32 %v4140_v53, 16 }
  0x98   : > { %4964 = vmatprep.subr.bf16.mxu1 %v5372_v5 }
  0x99   : > { %4945 = vmatpush3.bf16.msra.mxu0 %v5371_v4  ;;  %v2132_v4 = vshll.u32 %v4140_v53, 16  ;;  %v2131_v11 = vrot.slane %v2129_v3, 3  ;;  %v5425_v3 = vld [vmem:[%s6441_s1 + $0x3e8] sm:$0xff]  }
  0x9a   : > { %4946 = vmatprep.subr.bf16.mxu0 %v5373_v6 }
  0x9b   : > { %4965 = vmatpush3.bf16.msra.mxu1 %v5372_v5  ;;  %v5397_v5 = vld [vmem:[%s6441_s1 + $0x2c0] sm:$0xff]   ;;  %v2134_v12 = vrot.slane %v2132_v4, 4 }
  0x9c   : > { %4966 = vmatprep.subr.bf16.mxu1 %v5374_v7 }
  0x9d   : > { %4947 = vmatpush3.bf16.msra.mxu0 %v5373_v6  ;;  %v5400_v6 = vld [vmem:[%s6441_s1 + $0x338] sm:$0xff]   ;;  %v5985_v21 = vor.u32 %v2134_v12, %v2131_v11  ;;  %v6083_v11 = vld [vmem:[#allocation2 + $0x34] sm:$0x7] }
  0x9e   : > { %4948 = vmatprep.subr.bf16.mxu0 %v5375_v8  ;;  %v5431_v12 = vld [vmem:[%s6441_s1 + $0x3d0] sm:$0xff]  }
  0x9f   : > { %4967 = vmatpush3.bf16.msra.mxu1 %v5374_v7  ;;  %v2123_v7 = vrot.slane %v2121_v61, 3  ;;  %v5424_v61 = vld [vmem:[%s6441_s1 + $0x3a8] sm:$0xff]  }
  0xa0   : > { %4968 = vmatprep.subr.bf16.mxu1 %v5376_v9 }
  0xa1   : > { %4949 = vmatpush3.bf16.msra.mxu0 %v5375_v8  ;;  %v1988_v8 = vor.u32 %v1987_v59, %v1984_v58  ;;  %v5423_v58 = vld [vmem:[%s6441_s1 + $0x3f0] sm:$0xff]  }
  0xa2   : > { %4950 = vmatprep.subr.bf16.mxu0 %v5377_v10 }
  0xa3   : > { %4969 = vmatpush3.bf16.msra.mxu1 %v5376_v9  ;;  %v5967_v9 = vor.u32 %v1995_v2, %v1992_v1 }
  0xa4   : > { %4970 = vmatprep.subr.bf16.mxu1 %v5378_v14 }
  0xa5   : > { %4951 = vmatpush3.bf16.msra.mxu0 %v5377_v10  ;;  %v2126_v10 = vrot.slane %v2124_v62, 4 }
  0xa6   : > { %4952 = vmatprep.subr.bf16.mxu0 %v5379_v15 }
  0xa7   : > { %4971 = vmatpush3.bf16.msra.mxu1 %v5378_v14  ;;  %v5404_v14 = vld [vmem:[%s6441_s1 + $0x378] sm:$0xff]   ;;  %v2127_v20 = vor.u32 %v2126_v10, %v2123_v7  ;;  %v5430_v10 = vld [vmem:[%s6441_s1 + $0x390] sm:$0xff]  }
  0xa8   : > { %4972 = vmatprep.subr.bf16.mxu1 %v5380_v19  ;;  %v5428_v7 = vld [vmem:[%s6441_s1 + $0x398] sm:$0xff]  }
  0xa9   : > { %4953 = vmatpush3.bf16.msra.mxu0 %v5379_v15  ;;  %v5405_v15 = vld [vmem:[%s6441_s1 + $0x330] sm:$0xff]  }
  0xaa   : > { %4978 = vmatprep.subr.bf16.mxu0 %v5382_v22 }
  0xab   : > { %4973 = vmatpush3.bf16.msra.mxu1 %v5380_v19  ;;  %v1997_v19 = vsel %vm1980_vm3, %v1988_v8, %v5967_v9 }
  0xac   : > { %4955 = vmatmul.mubr.bf16.vlgmr.msra.gmra.mxu0 %v1461_v25  ;;  %4998 = vmatprep.subr.bf16.mxu1 %v5383_v27  ;;  %v2136_v25 = vsel %vm1980_vm3, %v2127_v20, %v5985_v21  ;;  %v5433_v20 = vld [vmem:[%s6441_s1 + $0x3c8] sm:$0xff]  }
  0xad   : > { %4979 = vmatpush3.bf16.msra.mxu0 %v5382_v22  ;;  %4994 = vmatprep.mubr.bf16.mxu0 %v1722_v29  ;;  %v5407_v22 = vld [vmem:[%s6441_s1 + $0x328] sm:$0xff]   ;;  %v5413_v29 = vld [vmem:[%s6441_s1 + $0x310] sm:$0xff]  }
  0xae   : > { %4980 = vmatprep.subr.bf16.mxu0 %v5384_v28  ;;  %4975 = vmatmul.mubr.bf16.vlgmr.msra.gmra.mxu1 %v1585_v63  ;;  %v5395_v63 = vld [vmem:[%s6441_s1 + $0x2c8] sm:$0xff]  }
  0xaf   : > { %4999 = vmatpush3.bf16.msra.mxu1 %v5383_v27  ;;  %5014 = vmatprep.mubr.bf16.mxu1 %v1857_v34  ;;  %v5411_v27 = vld [vmem:[%s6441_s1 + $0x318] sm:$0xff]  }
  0xb0   : > { %5000 = vmatprep.subr.bf16.mxu1 %v5385_v32 }
  0xb1   : > { %4981 = vmatpush3.bf16.msra.mxu0 %v5384_v28  ;;  %v5412_v28 = vld [vmem:[%s6441_s1 + $0x358] sm:$0xff]  }
  0xb2   : > { %4982 = vmatprep.subr.bf16.mxu0 %v5386_v33 }
  0xb3   : > { %5001 = vmatpush3.bf16.msra.mxu1 %v5385_v32  ;;  %v181_v32 = vld [vmem:[%s5597_s10 + $0x24] sm:$0x3] }
  0xb4   : > { %5002 = vmatprep.subr.bf16.mxu1 %v5387_v35 }
  0xb5   : > { %4983 = vmatpush3.bf16.msra.mxu0 %v5386_v33  ;;  %v5414_v33 = vld [vmem:[%s6441_s1 + $0x350] sm:$0xff]  }
  0xb6   : > { %4984 = vmatprep.subr.bf16.mxu0 %v5388_v36 }
  0xb7   : > { %5003 = vmatpush3.bf16.msra.mxu1 %v5387_v35  ;;  %v201_v35 = vunpack.c.l.bf16 %v181_v32 }
  0xb8   : > { %5004 = vmatprep.subr.bf16.mxu1 %v5389_v13 }
  0xb9   : > { %4985 = vmatpush3.bf16.msra.mxu0 %v5388_v36  ;;  %v5415_v36 = vld [vmem:[%s6441_s1 + $0x308] sm:$0xff]   ;;  %v241_v38 = vmul.f32 0.2, %v201_v35  ;;  %vm221_vm5 = vcmp.gt.f32.partialorder %v201_v35, 0.0 }
  0xba   : > { %4986 = vmatprep.subr.bf16.mxu0 %v5390_v39 }
  0xbb   : > { %5005 = vmatpush3.bf16.msra.mxu1 %v5389_v13  ;;  %v261_v42 = vsel %vm221_vm5, %v201_v35, %v241_v38 }
  0xbc   : > { %5006 = vmatprep.subr.bf16.mxu1 %v5391_v43 }
  0xbd   : > { %4987 = vmatpush3.bf16.msra.mxu0 %v5390_v39  ;;  %v5416_v39 = vld [vmem:[%s6441_s1 + $0x348] sm:$0xff]  }
  0xbe   : > { %4988 = vmatprep.subr.bf16.mxu0 %v5392_v45 }
  0xbf   : > { %5007 = vmatpush3.bf16.msra.mxu1 %v5391_v43  ;;  %v4445_v43 = vpack.c.bf16 %v261_v42, %v261_v42 }
  0xc0   : > { %5008 = vmatprep.subr.bf16.mxu1 %v5393_v50 }
  0xc1   : > { %4989 = vmatpush3.bf16.msra.mxu0 %v5392_v45  ;;  %v5420_v45 = vld [vmem:[%s6441_s1 + $0x3b8] sm:$0xff]   ;;  %365 = vst [vmem:[#allocation2 + $0x24] sm:$0x3] %v4445_v43 }
  0xc2   : > { %4990 = vmatprep.subr.bf16.mxu0 %v5394_v51 }
  0xc3   : > { %5009 = vmatpush3.bf16.msra.mxu1 %v5393_v50  ;;  %v5421_v50 = vld [vmem:[%s6441_s1 + $0x3f8] sm:$0xff]  }
  0xc4   : > { %5010 = vmatprep.subr.bf16.mxu1 %v5395_v63 }
  0xc5   : > { %4991 = vmatpush3.bf16.msra.mxu0 %v5394_v51  ;;  %v5422_v51 = vld [vmem:[%s6441_s1 + $0x3b0] sm:$0xff]  }
  0xc6   : > { %4992 = vmatprep.subr.bf16.mxu0 %v5396_v0 }
  0xc7   : > { %5011 = vmatpush3.bf16.msra.mxu1 %v5395_v63 }
  0xc8   : > { %5012 = vmatprep.subr.bf16.mxu1 %v5397_v5 }
  0xc9   : > { %4993 = vmatpush3.bf16.msra.mxu0 %v5396_v0  ;;  %v2391_v0 = vsel %vm1719_vm1, %v2389_v54, %v6045_v55  ;;  %v5445_v54 = vld [vmem:[%s6441_s1 + $0x468] sm:$0xff]  }
  0xca   : > { %5018 = vmatprep.subr.bf16.mxu0 %v5400_v6 }
  0xcb   : > { %5013 = vmatpush3.bf16.msra.mxu1 %v5397_v5 }
  0xcc   : > { %4995 = vmatmul.mubr.bf16.vlgmr.msra.gmra.mxu0 %v5894_v24  ;;  %5038 = vmatprep.subr.bf16.mxu1 %v5404_v14  ;;  %v5408_v24 = vld [vmem:[%s6441_s1 + $0x368] sm:$0xff]  }
  0xcd   : > { %5019 = vmatpush3.bf16.msra.mxu0 %v5400_v6  ;;  %5034 = vmatprep.mubr.bf16.mxu0 %v1997_v19  ;;  %v5427_v6 = vld [vmem:[%s6441_s1 + $0x3e0] sm:$0xff]   ;;  %v2496_v19 = vld [vmem:[#allocation2 + $0x48] sm:$0x3] }
  0xce   : > { %5020 = vmatprep.subr.bf16.mxu0 %v5405_v15  ;;  %5015 = vmatmul.mubr.bf16.vlgmr.msra.gmra.mxu1 %v5909_v31  ;;  %v196_v31 = vunpack.c.l.bf16 %v176_v30  ;;  %v4166_v30 = vcombine.low %v5934_v41, %v5934_v41  ;;  %v5442_v41 = vld [vmem:[%s6441_s1 + $0x430] sm:$0xff]  }
  0xcf   : > { %5039 = vmatpush3.bf16.msra.mxu1 %v5404_v14  ;;  %5054 = vmatprep.mubr.bf16.mxu1 %v2136_v25  ;;  %v5432_v14 = vld [vmem:[%s6441_s1 + $0x388] sm:$0xff]   ;;  %v6103_v25 = vld [vmem:[#allocation2 + $0x3c] sm:$0xf8]  }
  0xd0   : > { %5040 = vmatprep.subr.bf16.mxu1 %v5406_v18  ;;  %v236_v34 = vmul.f32 0.2, %v196_v31  ;;  %vm216_vm4 = vcmp.gt.f32.partialorder %v196_v31, 0.0 }
  0xd1   : > { %5021 = vmatpush3.bf16.msra.mxu0 %v5405_v15  ;;  %v4243_v15 = vcombine.low %v5977_v17, %v6083_v11  ;;  %v5470_v17 = vld [vmem:[%s6441_s1 + $0x490] sm:$0xff]  }
  0xd2   : > { %5022 = vmatprep.subr.bf16.mxu0 %v5407_v22  ;;  %v256_v37 = vsel %vm216_vm4, %v196_v31, %v236_v34 }
  0xd3   : > { %5041 = vmatpush3.bf16.msra.mxu1 %v5406_v18  ;;  %v4440_v13 = vpack.c.bf16 %v256_v37, %v256_v37  ;;  %v6093_v18 = vld [vmem:[#allocation2 + $0x44] sm:$0xf]  ;;  %v5441_v37 = vld [vmem:[%s6441_s1 + $0x478] sm:$0xff]  }
  0xd4   : > { %5042 = vmatprep.subr.bf16.mxu1 %v5408_v24 }
  0xd5   : > { %5023 = vmatpush3.bf16.msra.mxu0 %v5407_v22  ;;  %360 = vst [vmem:[#allocation2 + $0x10] sm:$0x3] %v4440_v13  ;;  %v2650_v22 = vshrl.u32 %v6034_v48, 16 }
  0xd6   : > { %5024 = vmatprep.subr.bf16.mxu0 %v5409_v26 }
  0xd7   : > { %5043 = vmatpush3.bf16.msra.mxu1 %v5408_v24  ;;  %v2653_v24 = vshll.u32 %v6034_v48, 16  ;;  %v2652_v31 = vrot.slane %v2650_v22, 3 }
  0xd8   : > { %5044 = vmatprep.subr.bf16.mxu1 %v5410_v60 }
  0xd9   : > { %5025 = vmatpush3.bf16.msra.mxu0 %v5409_v26  ;;  %v4218_v26 = vcombine.low %v6093_v18, %v2496_v19  ;;  %v2655_v32 = vrot.slane %v2653_v24, 4  ;;  %v5455_v19 = vld [vmem:[%s6441_s1 + $0x440] sm:$0xff]   ;;  %v5461_v24 = vld [vmem:[%s6441_s1 + $0x4f8] sm:$0xff]  }
  0xda   : > { %5026 = vmatprep.subr.bf16.mxu0 %v5411_v27 }
  0xdb   : > { %5045 = vmatpush3.bf16.msra.mxu1 %v5410_v60  ;;  %v2658_v60 = vshrl.u32 %v4243_v15, 16  ;;  %v6115_v34 = vrot.slane %v4218_v26, 3 }
  0xdc   : > { %5046 = vmatprep.subr.bf16.mxu1 %v5412_v28 }
  0xdd   : > { %5027 = vmatpush3.bf16.msra.mxu0 %v5411_v27  ;;  %v2661_v27 = vshll.u32 %v4243_v15, 16  ;;  %v2660_v35 = vrot.slane %v2658_v60, 3 }
  0xde   : > { %5028 = vmatprep.subr.bf16.mxu0 %v5413_v29 }
  0xdf   : > { %5047 = vmatpush3.bf16.msra.mxu1 %v5412_v28  ;;  %v5435_v28 = vld [vmem:[%s6441_s1 + $0x3c0] sm:$0xff]  }
  0xe0   : > { %5048 = vmatprep.subr.bf16.mxu1 %v5414_v33 }
  0xe1   : > { %5029 = vmatpush3.bf16.msra.mxu0 %v5413_v29  ;;  %v5438_v29 = vld [vmem:[%s6441_s1 + $0x438] sm:$0xff]  }
  0xe2   : > { %5030 = vmatprep.subr.bf16.mxu0 %v5415_v36 }
  0xe3   : > { %5049 = vmatpush3.bf16.msra.mxu1 %v5414_v33  ;;  %v2524_v33 = vrot.slane %v6103_v25, 3 }
  0xe4   : > { %5050 = vmatprep.subr.bf16.mxu1 %v5416_v39 }
  0xe5   : > { %5031 = vmatpush3.bf16.msra.mxu0 %v5415_v36  ;;  %v2663_v36 = vrot.slane %v2661_v27, 4  ;;  %v2526_v13 = vsel %vm1719_vm1, %v2524_v33, %v6115_v34 }
  0xe6   : > { %5032 = vmatprep.subr.bf16.mxu0 %v5417_v40 }
  0xe7   : > { %5051 = vmatpush3.bf16.msra.mxu1 %v5416_v39  ;;  %v2656_v39 = vor.u32 %v2655_v32, %v2652_v31 }
  0xe8   : > { %5052 = vmatprep.subr.bf16.mxu1 %v5418_v44 }
  0xe9   : > { %5033 = vmatpush3.bf16.msra.mxu0 %v5417_v40  ;;  %v6125_v40 = vor.u32 %v2663_v36, %v2660_v35 }
  0xea   : > { %5058 = vmatprep.subr.bf16.mxu0 %v5420_v45 }
  0xeb   : > { %5053 = vmatpush3.bf16.msra.mxu1 %v5418_v44  ;;  %v5443_v44 = vld [vmem:[%s6441_s1 + $0x470] sm:$0xff]   ;;  %v2665_v49 = vsel %vm1980_vm3, %v2656_v39, %v6125_v40 }
  0xec   : > { %v4796_v53 = vpop.f32.mrf.mxu0  ;;  %5035 = vmatmul.mubr.bf16.vlgmr.msra.gmra.mxu0 %v5967_v9  ;;  %5078 = vmatprep.subr.bf16.mxu1 %v5421_v50  ;;  %v5429_v9 = vld [vmem:[%s6441_s1 + $0x3d8] sm:$0xff]  }
  0xed   : > { %5059 = vmatpush3.bf16.msra.mxu0 %v5420_v45  ;;  %5074 = vmatprep.mubr.bf16.mxu0 %v4165_v52  ;;  %v4816_v62 = vpop.f32.mrf.mxu1  ;;  %v5444_v45 = vld [vmem:[%s6441_s1 + $0x428] sm:$0xff]  }
  0xee   : > { %v508_v59 = vpop.f32.mrf.mxu0  ;;  %5060 = vmatprep.subr.bf16.mxu0 %v5422_v51  ;;  %5055 = vmatmul.mubr.bf16.vlgmr.msra.gmra.mxu1 %v5985_v21  ;;  %v6059_v1 = vadd.f32 %v4816_v62, %v4796_v53  ;;  %v5434_v21 = vld [vmem:[%s6441_s1 + $0x380] sm:$0xff]  }
  0xef   : > { %5079 = vmatpush3.bf16.msra.mxu1 %v5421_v50  ;;  %v614_v2 = vpop.f32.mrf.mxu1  ;;  %5094 = vmatprep.mubr.bf16.mxu1 %v2391_v0  ;;  %v5448_v0 = vld [vmem:[%s6441_s1 + $0x418] sm:$0xff]  }
  0xf0   : > { %v4797_v63 = vpop.f32.mrf.mxu0  ;;  %5080 = vmatprep.subr.bf16.mxu1 %v5423_v58  ;;  %v6067_v57 = vadd.f32 %v614_v2, %v508_v59  ;;  %v2767_v2 = vld [vmem:[#allocation2 + $0x48] sm:$0x7] }
  0xf1   : > { %5061 = vmatpush3.bf16.msra.mxu0 %v5422_v51  ;;  %v4817_v52 = vpop.f32.mrf.mxu1  ;;  %v5447_v63 = vld [vmem:[%s6441_s1 + $0x460] sm:$0xff]  }
  0xf2   : > { %5062 = vmatprep.subr.bf16.mxu0 %v5424_v61  ;;  %v511_v4 = vpop.f32.mrf.mxu0  ;;  %v5451_v52 = vld [vmem:[%s6441_s1 + $0x450] sm:$0xff]  }
  0xf3   : > { %5081 = vmatpush3.bf16.msra.mxu1 %v5423_v58  ;;  %v617_v5 = vpop.f32.mrf.mxu1 }
  0xf4   : > { %5082 = vmatprep.subr.bf16.mxu1 %v5425_v3  ;;  %v6075_v8 = vadd.f32 %v617_v5, %v511_v4  ;;  %v5452_v4 = vld [vmem:[%s6441_s1 + $0x408] sm:$0xff]   ;;  %v2789_v5 = vshrl.u32 %v6103_v25, 16 }
  0xf5   : > { %5063 = vmatpush3.bf16.msra.mxu0 %v5424_v61 }
  0xf6   : > { %5064 = vmatprep.subr.bf16.mxu0 %v5426_v56 }
  0xf7   : > { %5083 = vmatpush3.bf16.msra.mxu1 %v5425_v3  ;;  %v5449_v3 = vld [vmem:[%s6441_s1 + $0x458] sm:$0xff]  }
  0xf8   : > { %5084 = vmatprep.subr.bf16.mxu1 %v5427_v6 }
  0xf9   : > { %5065 = vmatpush3.bf16.msra.mxu0 %v5426_v56  ;;  %v5450_v56 = vld [vmem:[%s6441_s1 + $0x410] sm:$0xff]  }
  0xfa   : > { %5066 = vmatprep.subr.bf16.mxu0 %v5428_v7 }
  0xfb   : > { %5085 = vmatpush3.bf16.msra.mxu1 %v5427_v6  ;;  %v2792_v6 = vshll.u32 %v6103_v25, 16  ;;  %v5462_v25 = vld [vmem:[%s6441_s1 + $0x4b0] sm:$0xff]  }
  0xfc   : > { %5086 = vmatprep.subr.bf16.mxu1 %v5429_v9 }
  0xfd   : > { %5067 = vmatpush3.bf16.msra.mxu0 %v5428_v7 }
  0xfe   : > { %5068 = vmatprep.subr.bf16.mxu0 %v5430_v10 }
  0xff   : > { %5087 = vmatpush3.bf16.msra.mxu1 %v5429_v9  ;;  %v5453_v9 = vld [vmem:[%s6441_s1 + $0x448] sm:$0xff]  }
 0x100   : > { %5088 = vmatprep.subr.bf16.mxu1 %v5431_v12 }
 0x101   : > { %5069 = vmatpush3.bf16.msra.mxu0 %v5430_v10  ;;  %v5454_v10 = vld [vmem:[%s6441_s1 + $0x400] sm:$0xff]  }
 0x102   : > { %5070 = vmatprep.subr.bf16.mxu0 %v5432_v14 }
 0x103   : > { %5089 = vmatpush3.bf16.msra.mxu1 %v5431_v12  ;;  %v2791_v12 = vrot.slane %v2789_v5, 3 }
 0x104   : > { %5090 = vmatprep.subr.bf16.mxu1 %v5433_v20 }
 0x105   : > { %5071 = vmatpush3.bf16.msra.mxu0 %v5432_v14  ;;  %v2794_v14 = vrot.slane %v2792_v6, 4 }
 0x106   : > { %5072 = vmatprep.subr.bf16.mxu0 %v5434_v21 }
 0x107   : > { %5091 = vmatpush3.bf16.msra.mxu1 %v5433_v20  ;;  %v5459_v20 = vld [vmem:[%s6441_s1 + $0x4b8] sm:$0xff]  }
 0x108   : > { %5092 = vmatprep.subr.bf16.mxu1 %v5435_v28 }
 0x109   : > { %5073 = vmatpush3.bf16.msra.mxu0 %v5434_v21  ;;  %v2795_v21 = vor.u32 %v2794_v14, %v2791_v12 }
 0x10a   : > { %5098 = vmatprep.subr.bf16.mxu0 %v5438_v29 }
 0x10b   : > { %5093 = vmatpush3.bf16.msra.mxu1 %v5435_v28 }
 0x10c   : > { %v4836_v38 = vpop.f32.mrf.mxu0  ;;  %5075 = vmatmul.mubr.bf16.vlgmr.msra.gmra.mxu0 %v4166_v30  ;;  %5118 = vmatprep.subr.bf16.mxu1 %v5441_v37  ;;  %v5464_v30 = vld [vmem:[%s6441_s1 + $0x4a8] sm:$0xff]  }
 0x10d   : > { %v765_v42 = vadd.f32 %v4836_v38, %v6059_v1  ;;  %5099 = vmatpush3.bf16.msra.mxu0 %v5438_v29  ;;  %5114 = vmatprep.mubr.bf16.mxu0 %v2526_v13  ;;  %v5463_v29 = vld [vmem:[%s6441_s1 + $0x4f0] sm:$0xff]  }
 0x10e   : > { %v749_v43 = vpop.f32.mrf.mxu0  ;;  %5100 = vmatprep.subr.bf16.mxu0 %v5442_v41  ;;  %v4856_v47 = vpop.f32.mrf.mxu1  ;;  %5095 = vmatmul.mubr.bf16.vlgmr.msra.gmra.mxu1 %v6045_v55  ;;  %v5446_v55 = vld [vmem:[%s6441_s1 + $0x420] sm:$0xff]  }
 0x10f   : > { %v763_v46 = vadd.f32 %v749_v43, %v6067_v57  ;;  %v6138_v50 = vadd.f32 %v4856_v47, %v765_v42  ;;  %5119 = vmatpush3.bf16.msra.mxu1 %v5441_v37  ;;  %5134 = vmatprep.mubr.bf16.mxu1 %v2665_v49  ;;  %v4268_v57 = vcombine.low %v6093_v18, %v2767_v2  ;;  %v5465_v37 = vld [vmem:[%s6441_s1 + $0x4e8] sm:$0xff]   ;;  %v5467_v42 = vld [vmem:[%s6441_s1 + $0x4e0] sm:$0xff]   ;;  %v5468_v43 = vld [vmem:[%s6441_s1 + $0x498] sm:$0xff]  }
 0x110   : > { %v4837_v48 = vpop.f32.mrf.mxu0  ;;  %v886_v51 = vpop.f32.mrf.mxu1  ;;  %5120 = vmatprep.subr.bf16.mxu1 %v5443_v44  ;;  %v6238_v47 = vld [vmem:[#allocation2 + $0x8] sm:$0xf]  ;;  %v3029_v49 = vld [vmem:[#allocation2 + $0x10] sm:$0x1]  ;;  %v5479_v2 = vld [vmem:[%s6441_s1 + $0x578] sm:$0xff]  }
 0x111   : > { %5101 = vmatpush3.bf16.msra.mxu0 %v5442_v41  ;;  %v6146_v58 = vadd.f32 %v886_v51, %v763_v46  ;;  %v2797_v7 = vshrl.u32 %v4268_v57, 16  ;;  %v5466_v41 = vld [vmem:[%s6441_s1 + $0x4a0] sm:$0xff]   ;;  %v6240_v48 = vld [vmem:[#allocation2 + $0xc] sm:$0xf] }
 0x112   : > { %v752_v53 = vpop.f32.mrf.mxu0  ;;  %5102 = vmatprep.subr.bf16.mxu0 %v5444_v45  ;;  %v4857_v61 = vpop.f32.mrf.mxu1  ;;  %v3026_v46 = vld [vmem:[#allocation2 + $0x4] sm:$0xc] }
 0x113   : > { %v764_v59 = vadd.f32 %v752_v53, %v6075_v8  ;;  %5121 = vmatpush3.bf16.msra.mxu1 %v5443_v44  ;;  %v2800_v8 = vshll.u32 %v4268_v57, 16  ;;  %v2799_v15 = vrot.slane %v2797_v7, 3  ;;  %v5474_v51 = vld [vmem:[%s6441_s1 + $0x480] sm:$0xff]   ;;  %v6249_v53 = vcombine.low %v3026_v46, %v6238_v47  ;;  %v5476_v61 = vld [vmem:[%s6441_s1 + $0x538] sm:$0xff]  }
 0x114   : > { %v889_v62 = vpop.f32.mrf.mxu1  ;;  %5122 = vmatprep.subr.bf16.mxu1 %v5445_v54  ;;  %v4294_v57 = vcombine.low %v6083_v11, %v6083_v11  ;;  %v5482_v11 = vld [vmem:[%s6441_s1 + $0x528] sm:$0xff]  }
 0x115   : > { %5103 = vmatpush3.bf16.msra.mxu0 %v5444_v45  ;;  %v6155_v1 = vadd.f32 %v889_v62, %v764_v59  ;;  %v2802_v18 = vrot.slane %v2800_v8, 4  ;;  %v5472_v45 = vld [vmem:[%s6441_s1 + $0x488] sm:$0xff]   ;;  %v5475_v59 = vld [vmem:[%s6441_s1 + $0x4c0] sm:$0xff]   ;;  %v3058_v62 = vrot.slane %v6249_v53, 2  ;;  %v5481_v8 = vld [vmem:[%s6441_s1 + $0x570] sm:$0xff]  }
 0x116   : > { %5104 = vmatprep.subr.bf16.mxu0 %v5446_v55 }
 0x117   : > { %5123 = vmatpush3.bf16.msra.mxu1 %v5445_v54  ;;  %v6184_v22 = vor.u32 %v2802_v18, %v2799_v15  ;;  %v4320_v54 = vcombine.low %v6240_v48, %v3029_v49  ;;  %v5497_v49 = vld [vmem:[%s6441_s1 + $0x5b8] sm:$0xff]  }
 0x118   : > { %5124 = vmatprep.subr.bf16.mxu1 %v5447_v63 }
 0x119   : > { %5105 = vmatpush3.bf16.msra.mxu0 %v5446_v55  ;;  %v2804_v60 = vsel %vm1980_vm3, %v2795_v21, %v6184_v22  ;;  %v6252_v55 = vld [vmem:[#allocation2 + $0x20] sm:$0xf] }
 0x11a   : > { %5106 = vmatprep.subr.bf16.mxu0 %v5448_v0  ;;  %v5484_v21 = vld [vmem:[%s6441_s1 + $0x520] sm:$0xff]  }
 0x11b   : > { %5125 = vmatpush3.bf16.msra.mxu1 %v5447_v63  ;;  %v6261_v63 = vrot.slane %v4320_v54, 2 }
 0x11c   : > { %5126 = vmatprep.subr.bf16.mxu1 %v5449_v3 }
 0x11d   : > { %5107 = vmatpush3.bf16.msra.mxu0 %v5448_v0  ;;  %v6263_v0 = vld [vmem:[#allocation2 + $0x18] sm:$0xfc]  }
 0x11e   : > { %5108 = vmatprep.subr.bf16.mxu0 %v5450_v56 }
 0x11f   : > { %5127 = vmatpush3.bf16.msra.mxu1 %v5449_v3  ;;  %v5480_v3 = vld [vmem:[%s6441_s1 + $0x530] sm:$0xff]  }
 0x120   : > { %5128 = vmatprep.subr.bf16.mxu1 %v5451_v52 }
 0x121   : > { %5109 = vmatpush3.bf16.msra.mxu0 %v5450_v56 }
 0x122   : > { %5110 = vmatprep.subr.bf16.mxu0 %v5452_v4 }
 0x123   : > { %5129 = vmatpush3.bf16.msra.mxu1 %v5451_v52  ;;  %v3060_v52 = vsel %vm3057_vm6, %v3058_v62, %v6261_v63 }
 0x124   : > { %5130 = vmatprep.subr.bf16.mxu1 %v5453_v9 }
 0x125   : > { %5111 = vmatpush3.bf16.msra.mxu0 %v5452_v4  ;;  %v3193_v4 = vrot.slane %v6263_v0, 2 }
 0x126   : > { %5112 = vmatprep.subr.bf16.mxu0 %v5454_v10 }
 0x127   : > { %5131 = vmatpush3.bf16.msra.mxu1 %v5453_v9 }
 0x128   : > { %5132 = vmatprep.subr.bf16.mxu1 %v5455_v19 }
 0x129   : > { %5113 = vmatpush3.bf16.msra.mxu0 %v5454_v10 }
 0x12a   : > { %5138 = vmatprep.subr.bf16.mxu0 %v5459_v20 }
 0x12b   : > { %5133 = vmatpush3.bf16.msra.mxu1 %v5455_v19 }
 0x12c   : > { %v4876_v26 = vpop.f32.mrf.mxu0  ;;  %5115 = vmatmul.mubr.bf16.vlgmr.msra.gmra.mxu0 %v6115_v34  ;;  %5158 = vmatprep.subr.bf16.mxu1 %v5461_v24 }
 0x12d   : > { %v1028_v27 = vadd.f32 %v4876_v26, %v6138_v50  ;;  %5139 = vmatpush3.bf16.msra.mxu0 %v5459_v20  ;;  %5154 = vmatprep.mubr.bf16.mxu0 %v2804_v60  ;;  %v5473_v50 = vld [vmem:[%s6441_s1 + $0x4c8] sm:$0xff]   ;;  %v5485_v60 = vld [vmem:[%s6441_s1 + $0x560] sm:$0xff]  }
 0x12e   : > { %v1012_v28 = vpop.f32.mrf.mxu0  ;;  %5140 = vmatprep.subr.bf16.mxu0 %v5462_v25  ;;  %v4896_v32 = vpop.f32.mrf.mxu1  ;;  %5135 = vmatmul.mubr.bf16.vlgmr.msra.gmra.mxu1 %v6125_v40  ;;  %v5483_v20 = vld [vmem:[%s6441_s1 + $0x568] sm:$0xff]  }
 0x12f   : > { %v1026_v31 = vadd.f32 %v1012_v28, %v6146_v58  ;;  %v6204_v34 = vadd.f32 %v4896_v32, %v1028_v27  ;;  %5159 = vmatpush3.bf16.msra.mxu1 %v5461_v24  ;;  %5174 = vmatprep.mubr.bf16.mxu1 %v4293_v23  ;;  %v5471_v23 = vld [vmem:[%s6441_s1 + $0x4d0] sm:$0xff]   ;;  %v3165_v58 = vld [vmem:[#allocation2 + $0x24] sm:$0x1]  ;;  %v5486_v27 = vld [vmem:[%s6441_s1 + $0x518] sm:$0xff]  }
 0x130   : > { %v4877_v33 = vpop.f32.mrf.mxu0  ;;  %v1142_v35 = vpop.f32.mrf.mxu1  ;;  %5160 = vmatprep.subr.bf16.mxu1 %v5463_v29 }
 0x131   : > { %5141 = vmatpush3.bf16.msra.mxu0 %v5462_v25  ;;  %v6212_v38 = vadd.f32 %v1142_v35, %v1026_v31  ;;  %v5488_v31 = vld [vmem:[%s6441_s1 + $0x510] sm:$0xff]   ;;  %v3437_v33 = vld [vmem:[#allocation2 + $0x24] sm:$0x3]  ;;  %v5490_v35 = vld [vmem:[%s6441_s1 + $0x508] sm:$0xff]  }
 0x132   : > { %v1015_v36 = vpop.f32.mrf.mxu0  ;;  %5142 = vmatprep.subr.bf16.mxu0 %v5464_v30  ;;  %v4897_v39 = vpop.f32.mrf.mxu1 }
 0x133   : > { %v1027_v13 = vadd.f32 %v1015_v36, %v6155_v1  ;;  %5161 = vmatpush3.bf16.msra.mxu1 %v5463_v29  ;;  %v4346_v1 = vcombine.low %v6252_v55, %v3165_v58  ;;  %v3297_v29 = vld [vmem:[#allocation2 + $0x10] sm:$0x3]  ;;  %v3320_v36 = vshrl.u32 %v6249_v53, 16  ;;  %v5491_v39 = vld [vmem:[%s6441_s1 + $0x548] sm:$0xff]  }
 0x134   : > { %v1145_v40 = vpop.f32.mrf.mxu1  ;;  %5162 = vmatprep.subr.bf16.mxu1 %v5465_v37  ;;  %v6316_v32 = vcombine.low %v6240_v48, %v3297_v29  ;;  %v5493_v48 = vld [vmem:[%s6441_s1 + $0x540] sm:$0xff]  }
 0x135   : > { %5143 = vmatpush3.bf16.msra.mxu0 %v5464_v30  ;;  %v6224_v44 = vadd.f32 %v1145_v40, %v1027_v13  ;;  %v6278_v5 = vrot.slane %v4346_v1, 2  ;;  %v5487_v30 = vld [vmem:[%s6441_s1 + $0x558] sm:$0xff]   ;;  %v4396_v13 = vcombine.low %v6252_v55, %v3437_v33  ;;  %v5492_v40 = vld [vmem:[%s6441_s1 + $0x500] sm:$0xff]  }
 0x136   : > { %5144 = vmatprep.subr.bf16.mxu0 %v5466_v41 }
 0x137   : > { %5163 = vmatpush3.bf16.msra.mxu1 %v5465_v37  ;;  %v3195_v14 = vsel %vm3057_vm6, %v3193_v4, %v6278_v5  ;;  %v3323_v37 = vshll.u32 %v6249_v53, 16  ;;  %v3470_v46 = vshll.u32 %v4396_v13, 16 }
 0x138   : > { %5164 = vmatprep.subr.bf16.mxu1 %v5467_v42 }
 0x139   : > { %5145 = vmatpush3.bf16.msra.mxu0 %v5466_v41  ;;  %v3328_v41 = vshrl.u32 %v6316_v32, 16  ;;  %v3472_v58 = vrot.slane %v3470_v46, 3  ;;  %v5520_v46 = vld [vmem:[%s6441_s1 + $0x618] sm:$0xff]  }
 0x13a   : > { %5146 = vmatprep.subr.bf16.mxu0 %v5468_v43 }
 0x13b   : > { %5165 = vmatpush3.bf16.msra.mxu1 %v5467_v42  ;;  %v3322_v42 = vrot.slane %v3320_v36, 2 }
 0x13c   : > { %5166 = vmatprep.subr.bf16.mxu1 %v5469_v16 }
 0x13d   : > { %5147 = vmatpush3.bf16.msra.mxu0 %v5468_v43  ;;  %v3325_v43 = vrot.slane %v3323_v37, 3 }
 0x13e   : > { %5148 = vmatprep.subr.bf16.mxu0 %v5470_v17 }
 0x13f   : > { %5167 = vmatpush3.bf16.msra.mxu1 %v5469_v16 }
 0x140   : > { %5168 = vmatprep.subr.bf16.mxu1 %v5471_v23 }
 0x141   : > { %5149 = vmatpush3.bf16.msra.mxu0 %v5470_v17  ;;  %v3459_v17 = vshrl.u32 %v6263_v0, 16 }
 0x142   : > { %5150 = vmatprep.subr.bf16.mxu0 %v5472_v45 }
 0x143   : > { %5169 = vmatpush3.bf16.msra.mxu1 %v5471_v23  ;;  %v3462_v23 = vshll.u32 %v6263_v0, 16  ;;  %v3461_v53 = vrot.slane %v3459_v17, 2 }
 0x144   : > { %5170 = vmatprep.subr.bf16.mxu1 %v5473_v50 }
 0x145   : > { %5151 = vmatpush3.bf16.msra.mxu0 %v5472_v45  ;;  %v3467_v45 = vshrl.u32 %v4396_v13, 16  ;;  %v3464_v54 = vrot.slane %v3462_v23, 3 }
 0x146   : > { %5152 = vmatprep.subr.bf16.mxu0 %v5474_v51 }
 0x147   : > { %5171 = vmatpush3.bf16.msra.mxu1 %v5473_v50  ;;  %v3326_v50 = vor.u32 %v3325_v43, %v3322_v42  ;;  %v3469_v55 = vrot.slane %v3467_v45, 2  ;;  %v3465_v1 = vor.u32 %v3464_v54, %v3461_v53 }
 0x148   : > { %5172 = vmatprep.subr.bf16.mxu1 %v5475_v59 }
 0x149   : > { %5153 = vmatpush3.bf16.msra.mxu0 %v5474_v51 }
 0x14a   : > { %5178 = vmatprep.subr.bf16.mxu0 %v5476_v61 }
 0x14b   : > { %5173 = vmatpush3.bf16.msra.mxu1 %v5475_v59  ;;  %v5501_v59 = vld [vmem:[%s6441_s1 + $0x5f8] sm:$0xff]  }
 0x14c   : > { %v4916_v56 = vpop.f32.mrf.mxu0  ;;  %5155 = vmatmul.mubr.bf16.vlgmr.msra.gmra.mxu0 %v6184_v22  ;;  %5198 = vmatprep.subr.bf16.mxu1 %v5479_v2 }
 0x14d   : > { %v1288_v6 = vadd.f32 %v4916_v56, %v6204_v34  ;;  %5179 = vmatpush3.bf16.msra.mxu0 %v5476_v61  ;;  %5194 = vmatprep.mubr.bf16.mxu0 %v3060_v52  ;;  %v5489_v34 = vld [vmem:[%s6441_s1 + $0x550] sm:$0xff]  }
 0x14e   : > { %v1272_v7 = vpop.f32.mrf.mxu0  ;;  %5180 = vmatprep.subr.bf16.mxu0 %v5480_v3  ;;  %v4936_v10 = vpop.f32.mrf.mxu1  ;;  %5175 = vmatmul.mubr.bf16.vlgmr.msra.gmra.mxu1 %v4294_v57  ;;  %v5502_v61 = vld [vmem:[%s6441_s1 + $0x5b0] sm:$0xff]  }
 0x14f   : > { %v1286_v9 = vadd.f32 %v1272_v7, %v6212_v38  ;;  %v6290_v15 = vadd.f32 %v4936_v10, %v1288_v6  ;;  %5199 = vmatpush3.bf16.msra.mxu1 %v5479_v2  ;;  %5214 = vmatprep.mubr.bf16.mxu1 %v3195_v14  ;;  %v3331_v38 = vshll.u32 %v6316_v32, 16  ;;  %v6354_v2 = vor.u32 %v3472_v58, %v3469_v55  ;;  %v5503_v57 = vld [vmem:[%s6441_s1 + $0x5f0] sm:$0xff]   ;;  %v5505_v10 = vld [vmem:[%s6441_s1 + $0x5e8] sm:$0xff]  }
 0x150   : > { %v4917_v12 = vpop.f32.mrf.mxu0  ;;  %v1409_v18 = vpop.f32.mrf.mxu1  ;;  %5200 = vmatprep.subr.bf16.mxu1 %v5481_v8 }
 0x151   : > { %5181 = vmatpush3.bf16.msra.mxu0 %v5480_v3  ;;  %v6298_v22 = vadd.f32 %v1409_v18, %v1286_v9  ;;  %v3333_v16 = vrot.slane %v3331_v38, 3  ;;  %v3474_v7 = vsel %vm3318_vm7, %v3465_v1, %v6354_v2  ;;  %v5506_v12 = vld [vmem:[%s6441_s1 + $0x5a0] sm:$0xff]  }
 0x152   : > { %v1275_v19 = vpop.f32.mrf.mxu0  ;;  %5182 = vmatprep.subr.bf16.mxu0 %v5482_v11  ;;  %v4937_v25 = vpop.f32.mrf.mxu1 }
 0x153   : > { %v1287_v24 = vadd.f32 %v1275_v19, %v6224_v44  ;;  %5201 = vmatpush3.bf16.msra.mxu1 %v5481_v8  ;;  %v3330_v44 = vrot.slane %v3328_v41, 2  ;;  %v5507_v19 = vld [vmem:[%s6441_s1 + $0x5e0] sm:$0xff]   ;;  %v5511_v25 = vld [vmem:[%s6441_s1 + $0x5d0] sm:$0xff]  }
 0x154   : > { %v1412_v26 = vpop.f32.mrf.mxu1  ;;  %5202 = vmatprep.subr.bf16.mxu1 %v5483_v20 }
 0x155   : > { %5183 = vmatpush3.bf16.msra.mxu0 %v5482_v11  ;;  %v6307_v28 = vadd.f32 %v1412_v26, %v1287_v24  ;;  %v6343_v51 = vor.u32 %v3333_v16, %v3330_v44  ;;  %v5510_v24 = vld [vmem:[%s6441_s1 + $0x590] sm:$0xff]   ;;  %v5512_v26 = vld [vmem:[%s6441_s1 + $0x588] sm:$0xff]   ;;  %v5519_v44 = vld [vmem:[%s6441_s1 + $0x620] sm:$0xff]  }
 0x156   : > { %5184 = vmatprep.subr.bf16.mxu0 %v5484_v21 }
 0x157   : > { %5203 = vmatpush3.bf16.msra.mxu1 %v5483_v20  ;;  %v3335_v0 = vsel %vm3318_vm7, %v3326_v50, %v6343_v51  ;;  %v5508_v20 = vld [vmem:[%s6441_s1 + $0x598] sm:$0xff]   ;;  %v5522_v50 = vld [vmem:[%s6441_s1 + $0x608] sm:$0xff]  }
 0x158   : > { %5204 = vmatprep.subr.bf16.mxu1 %v5485_v60 }
 0x159   : > { %5185 = vmatpush3.bf16.msra.mxu0 %v5484_v21 }
 0x15a   : > { %5186 = vmatprep.subr.bf16.mxu0 %v5486_v27 }
 0x15b   : > { %5205 = vmatpush3.bf16.msra.mxu1 %v5485_v60  ;;  %v3576_v60 = vld [vmem:[#allocation2 + $0x4] sm:$0x8] }
 0x15c   : > { %5206 = vmatprep.subr.bf16.mxu1 %v5487_v30  ;;  %v4421_v29 = vcombine.low %v3576_v60, %v6238_v47  ;;  %v5517_v47 = vld [vmem:[%s6441_s1 + $0x630] sm:$0xff]  }
 0x15d   : > { %5187 = vmatpush3.bf16.msra.mxu0 %v5486_v27  ;;  %v5513_v27 = vld [vmem:[%s6441_s1 + $0x5c8] sm:$0xff]  }
 0x15e   : > { %5188 = vmatprep.subr.bf16.mxu0 %v5488_v31  ;;  %v3597_v33 = vrot.slane %v4421_v29, 3 }
 0x15f   : > { %5207 = vmatpush3.bf16.msra.mxu1 %v5487_v30  ;;  %v5515_v30 = vld [vmem:[%s6441_s1 + $0x5c0] sm:$0xff]  }
 0x160   : > { %5208 = vmatprep.subr.bf16.mxu1 %v5489_v34 }
 0x161   : > { %5189 = vmatpush3.bf16.msra.mxu0 %v5488_v31  ;;  %v5516_v31 = vld [vmem:[%s6441_s1 + $0x638] sm:$0xff]  }
 0x162   : > { %5190 = vmatprep.subr.bf16.mxu0 %v5490_v35 }
 0x163   : > { %5209 = vmatpush3.bf16.msra.mxu1 %v5489_v34  ;;  %v3598_v34 = vrot.slane %v6316_v32, 3  ;;  %v5518_v32 = vld [vmem:[%s6441_s1 + $0x628] sm:$0xff]  }
 0x164   : > { %5210 = vmatprep.subr.bf16.mxu1 %v5491_v39 }
 0x165   : > { %5191 = vmatpush3.bf16.msra.mxu0 %v5490_v35  ;;  %v3599_v35 = vsel %vm1719_vm1, %v3597_v33, %v3598_v34 }
 0x166   : > { %5192 = vmatprep.subr.bf16.mxu0 %v5492_v40 }
 0x167   : > { %5211 = vmatpush3.bf16.msra.mxu1 %v5491_v39 }
 0x168   : > { %5212 = vmatprep.subr.bf16.mxu1 %v5493_v48 }
 0x169   : > { %5193 = vmatpush3.bf16.msra.mxu0 %v5492_v40 }
 0x16a   : > { %5218 = vmatprep.subr.bf16.mxu0 %v5497_v49 }
 0x16b   : > { %5213 = vmatpush3.bf16.msra.mxu1 %v5493_v48 }
 0x16c   : > { %v4956_v62 = vpop.f32.mrf.mxu0  ;;  %5195 = vmatmul.mubr.bf16.vlgmr.msra.gmra.mxu0 %v6261_v63  ;;  %5238 = vmatprep.subr.bf16.mxu1 %v5501_v59  ;;  %v5504_v63 = vld [vmem:[%s6441_s1 + $0x5a8] sm:$0xff]  }
 0x16d   : > { %v1562_v3 = vadd.f32 %v4956_v62, %v6290_v15  ;;  %5219 = vmatpush3.bf16.msra.mxu0 %v5497_v49  ;;  %5234 = vmatprep.mubr.bf16.mxu0 %v3335_v0  ;;  %v5521_v49 = vld [vmem:[%s6441_s1 + $0x610] sm:$0xff]  }
 0x16e   : > { %v1546_v56 = vpop.f32.mrf.mxu0  ;;  %5220 = vmatprep.subr.bf16.mxu0 %v5502_v61  ;;  %v4976_v4 = vpop.f32.mrf.mxu1  ;;  %5215 = vmatmul.mubr.bf16.vlgmr.msra.gmra.mxu1 %v6278_v5 }
 0x16f   : > { %v1560_v52 = vadd.f32 %v1546_v56, %v6298_v22  ;;  %v1687_v8 = vadd.f32 %v4976_v4, %v1562_v3  ;;  %5239 = vmatpush3.bf16.msra.mxu1 %v5501_v59  ;;  %5254 = vmatprep.mubr.bf16.mxu1 %v3474_v7  ;;  %v5509_v22 = vld [vmem:[%s6441_s1 + $0x5d8] sm:$0xff]  }
 0x170   : > { %v4957_v6 = vpop.f32.mrf.mxu0  ;;  %v1671_v11 = vpop.f32.mrf.mxu1  ;;  %5240 = vmatprep.subr.bf16.mxu1 %v5503_v57 }
 0x171   : > { %5221 = vmatpush3.bf16.msra.mxu0 %v5502_v61  ;;  %v1685_v5 = vadd.f32 %v1671_v11, %v1560_v52 }
 0x172   : > { %v1549_v9 = vpop.f32.mrf.mxu0  ;;  %5222 = vmatprep.subr.bf16.mxu0 %v5504_v63  ;;  %v4977_v15 = vpop.f32.mrf.mxu1 }
 0x173   : > { %v1561_v14 = vadd.f32 %v1549_v9, %v6307_v28  ;;  %5241 = vmatpush3.bf16.msra.mxu1 %v5503_v57  ;;  %v5514_v28 = vld [vmem:[%s6441_s1 + $0x580] sm:$0xff]  }
 0x174   : > { %v1674_v18 = vpop.f32.mrf.mxu1  ;;  %5242 = vmatprep.subr.bf16.mxu1 %v5505_v10 }
 0x175   : > { %5223 = vmatpush3.bf16.msra.mxu0 %v5504_v63  ;;  %v1686_v21 = vadd.f32 %v1674_v18, %v1561_v14 }
 0x176   : > { %5224 = vmatprep.subr.bf16.mxu0 %v5506_v12 }
 0x177   : > { %5243 = vmatpush3.bf16.msra.mxu1 %v5505_v10 }
 0x178   : > { %5244 = vmatprep.subr.bf16.mxu1 %v5507_v19 }
 0x179   : > { %5225 = vmatpush3.bf16.msra.mxu0 %v5506_v12 }
 0x17a   : > { %5226 = vmatprep.subr.bf16.mxu0 %v5508_v20 }
 0x17b   : > { %5245 = vmatpush3.bf16.msra.mxu1 %v5507_v19 }
 0x17c   : > { %5246 = vmatprep.subr.bf16.mxu1 %v5509_v22 }
 0x17d   : > { %5227 = vmatpush3.bf16.msra.mxu0 %v5508_v20 }
 0x17e   : > { %5228 = vmatprep.subr.bf16.mxu0 %v5510_v24 }
 0x17f   : > { %5247 = vmatpush3.bf16.msra.mxu1 %v5509_v22 }
 0x180   : > { %5248 = vmatprep.subr.bf16.mxu1 %v5511_v25 }
 0x181   : > { %5229 = vmatpush3.bf16.msra.mxu0 %v5510_v24 }
 0x182   : > { %5230 = vmatprep.subr.bf16.mxu0 %v5512_v26 }
 0x183   : > { %5249 = vmatpush3.bf16.msra.mxu1 %v5511_v25 }
 0x184   : > { %5250 = vmatprep.subr.bf16.mxu1 %v5513_v27 }
 0x185   : > { %5231 = vmatpush3.bf16.msra.mxu0 %v5512_v26 }
 0x186   : > { %5232 = vmatprep.subr.bf16.mxu0 %v5514_v28 }
 0x187   : > { %5251 = vmatpush3.bf16.msra.mxu1 %v5513_v27 }
 0x188   : > { %5252 = vmatprep.subr.bf16.mxu1 %v5515_v30 }
 0x189   : > { %5233 = vmatpush3.bf16.msra.mxu0 %v5514_v28 }
 0x18a   : > { %5258 = vmatprep.subr.bf16.mxu0 %v5516_v31 }
 0x18b   : > { %5253 = vmatpush3.bf16.msra.mxu1 %v5515_v30 }
 0x18c   : > { %v4996_v36 = vpop.f32.mrf.mxu0  ;;  %5235 = vmatmul.mubr.bf16.vlgmr.msra.gmra.mxu0 %v6343_v51  ;;  %v5523_v51 = vld [vmem:[%s6441_s1 + $0x600] sm:$0xff]  }
 0x18d   : > { %v1823_v37 = vadd.f32 %v4996_v36, %v1687_v8  ;;  %5259 = vmatpush3.bf16.msra.mxu0 %v5516_v31  ;;  %5274 = vmatprep.mubr.bf16.mxu0 %v3599_v35 }
 0x18e   : > { %v1807_v41 = vpop.f32.mrf.mxu0  ;;  %5260 = vmatprep.subr.bf16.mxu0 %v5517_v47  ;;  %v5016_v13 = vpop.f32.mrf.mxu1  ;;  %5255 = vmatmul.mubr.bf16.vlgmr.msra.gmra.mxu1 %v6354_v2 }
 0x18f   : > { %v1821_v38 = vadd.f32 %v1807_v41, %v1685_v5  ;;  %v1958_v40 = vadd.f32 %v5016_v13, %v1823_v37 }
 0x190   : > { %v4997_v39 = vpop.f32.mrf.mxu0  ;;  %v1942_v42 = vpop.f32.mrf.mxu1 }
 0x191   : > { %5261 = vmatpush3.bf16.msra.mxu0 %v5517_v47  ;;  %v1956_v16 = vadd.f32 %v1942_v42, %v1821_v38 }
 0x192   : > { %v1810_v43 = vpop.f32.mrf.mxu0  ;;  %5262 = vmatprep.subr.bf16.mxu0 %v5518_v32  ;;  %v5017_v23 = vpop.f32.mrf.mxu1 }
 0x193   : > { %v1822_v17 = vadd.f32 %v1810_v43, %v1686_v21 }
 0x194   : > { %v1945_v45 = vpop.f32.mrf.mxu1 }
 0x195   : > { %5263 = vmatpush3.bf16.msra.mxu0 %v5518_v32  ;;  %v1957_v48 = vadd.f32 %v1945_v45, %v1822_v17 }
 0x196   : > { %5264 = vmatprep.subr.bf16.mxu0 %v5519_v44 }
 0x199   : > { %5265 = vmatpush3.bf16.msra.mxu0 %v5519_v44 }
 0x19a   : > { %5266 = vmatprep.subr.bf16.mxu0 %v5520_v46 }
 0x19d   : > { %5267 = vmatpush3.bf16.msra.mxu0 %v5520_v46 }
 0x19e   : > { %5268 = vmatprep.subr.bf16.mxu0 %v5521_v49 }
 0x1a1   : > { %5269 = vmatpush3.bf16.msra.mxu0 %v5521_v49 }
 0x1a2   : > { %5270 = vmatprep.subr.bf16.mxu0 %v5522_v50 }
 0x1a5   : > { %5271 = vmatpush3.bf16.msra.mxu0 %v5522_v50 }
 0x1a6   : > { %5272 = vmatprep.subr.bf16.mxu0 %v5523_v51 }
 0x1a9   : > { %5273 = vmatpush3.bf16.msra.mxu0 %v5523_v51 }
 0x1ac   : > { %v5036_v53 = vpop.f32.mrf.mxu0  ;;  %5275 = vmatmul.mubr.bf16.vlgmr.msra.gmra.mxu0 %v3598_v34 }
 0x1ad   : > { %v2098_v54 = vadd.f32 %v5036_v53, %v1958_v40 }
 0x1ae   : > { %v2082_v55 = vpop.f32.mrf.mxu0  ;;  %v5056_v59 = vpop.f32.mrf.mxu1 }
 0x1af   : > { %v2096_v58 = vadd.f32 %v2082_v55, %v1956_v16  ;;  %v2237_v62 = vadd.f32 %v5056_v59, %v2098_v54 }
 0x1b0   : > { %v5037_v61 = vpop.f32.mrf.mxu0  ;;  %v2221_v0 = vpop.f32.mrf.mxu1 }
 0x1b1   : > { %v2235_v2 = vadd.f32 %v2221_v0, %v2096_v58 }
 0x1b2   : > { %v2085_v1 = vpop.f32.mrf.mxu0  ;;  %v5057_v56 = vpop.f32.mrf.mxu1 }
 0x1b3   : > { %v2097_v3 = vadd.f32 %v2085_v1, %v1957_v48 }
 0x1b4   : > { %v2224_v57 = vpop.f32.mrf.mxu1 }
 0x1b5   : > { %v2236_v63 = vadd.f32 %v2224_v57, %v2097_v3 }
 0x1cc   : > { %v5076_v52 = vpop.f32.mrf.mxu0 }
 0x1cd   : > { %v2357_v4 = vadd.f32 %v5076_v52, %v2237_v62 }
 0x1ce   : > { %v2341_v6 = vpop.f32.mrf.mxu0  ;;  %v5096_v8 = vpop.f32.mrf.mxu1 }
 0x1cf   : > { %v2355_v7 = vadd.f32 %v2341_v6, %v2235_v2  ;;  %v2492_v9 = vadd.f32 %v5096_v8, %v2357_v4 }
 0x1d0   : > { %v5077_v11 = vpop.f32.mrf.mxu0  ;;  %v2476_v10 = vpop.f32.mrf.mxu1 }
 0x1d1   : > { %v2490_v5 = vadd.f32 %v2476_v10, %v2355_v7  ;;  %v4430_v7 = vld [vmem:[%s6442_s2] ss:$0 sm:$0xff] }
 0x1d2   : > { %v2344_v12 = vpop.f32.mrf.mxu0  ;;  %v5097_v15 = vpop.f32.mrf.mxu1 }
 0x1d3   : > { %v2356_v14 = vadd.f32 %v2344_v12, %v2236_v63 }
 0x1d4   : > { %v2479_v18 = vpop.f32.mrf.mxu1 }
 0x1d5   : > { %v2491_v19 = vadd.f32 %v2479_v18, %v2356_v14 }
 0x1ec   : > { %v5116_v20 = vpop.f32.mrf.mxu0 }
 0x1ed   : > { %v2627_v21 = vadd.f32 %v5116_v20, %v2492_v9 }
 0x1ee   : > { %v2611_v22 = vpop.f32.mrf.mxu0  ;;  %v5136_v25 = vpop.f32.mrf.mxu1 }
 0x1ef   : > { %v2625_v24 = vadd.f32 %v2611_v22, %v2490_v5  ;;  %v2766_v60 = vadd.f32 %v5136_v25, %v2627_v21 }
 0x1f0   : > { %v5117_v26 = vpop.f32.mrf.mxu0  ;;  %v2750_v27 = vpop.f32.mrf.mxu1 }
 0x1f1   : > { %v2764_v29 = vadd.f32 %v2750_v27, %v2625_v24 }
 0x1f2   : > { %v2614_v28 = vpop.f32.mrf.mxu0  ;;  %v5137_v31 = vpop.f32.mrf.mxu1 }
 0x1f3   : > { %v2626_v30 = vadd.f32 %v2614_v28, %v2491_v19 }
 0x1f4   : > { %v2753_v33 = vpop.f32.mrf.mxu1 }
 0x1f5   : > { %v2765_v34 = vadd.f32 %v2753_v33, %v2626_v30 }
 0x20c   : > { %v5156_v47 = vpop.f32.mrf.mxu0 }
 0x20d   : > { %v2905_v35 = vadd.f32 %v5156_v47, %v2766_v60 }
 0x20e   : > { %v2889_v36 = vpop.f32.mrf.mxu0  ;;  %v5176_v41 = vpop.f32.mrf.mxu1 }
 0x20f   : > { %v2903_v37 = vadd.f32 %v2889_v36, %v2764_v29  ;;  %v3025_v38 = vadd.f32 %v5176_v41, %v2905_v35 }
 0x210   : > { %v5157_v32 = vpop.f32.mrf.mxu0  ;;  %v3009_v13 = vpop.f32.mrf.mxu1 }
 0x211   : > { %v3023_v39 = vadd.f32 %v3009_v13, %v2903_v37 }
 0x212   : > { %v5177_v40 = vpop.f32.mrf.mxu1  ;;  %v2892_v42 = vpop.f32.mrf.mxu0 }
 0x213   : > { %v2904_v59 = vadd.f32 %v2892_v42, %v2765_v34 }
 0x214   : > { %v3012_v44 = vpop.f32.mrf.mxu1 }
 0x215   : > { %v3024_v62 = vadd.f32 %v3012_v44, %v2904_v59 }
 0x22c   : > { %v5196_v43 = vpop.f32.mrf.mxu0 }
 0x22d   : > { %v3161_v61 = vadd.f32 %v5196_v43, %v3025_v38 }
 0x22e   : > { %v3145_v16 = vpop.f32.mrf.mxu0  ;;  %v5216_v17 = vpop.f32.mrf.mxu1 }
 0x22f   : > { %v3159_v0 = vadd.f32 %v3145_v16, %v3023_v39  ;;  %v3296_v1 = vadd.f32 %v5216_v17, %v3161_v61 }
 0x230   : > { %v5197_v23 = vpop.f32.mrf.mxu0  ;;  %v3280_v45 = vpop.f32.mrf.mxu1 }
 0x231   : > { %v3294_v56 = vadd.f32 %v3280_v45, %v3159_v0 }
 0x232   : > { %v5217_v46 = vpop.f32.mrf.mxu1  ;;  %v3148_v48 = vpop.f32.mrf.mxu0 }
 0x233   : > { %v3160_v2 = vadd.f32 %v3148_v48, %v3024_v62 }
 0x234   : > { %v3283_v50 = vpop.f32.mrf.mxu1 }
 0x235   : > { %v3295_v63 = vadd.f32 %v3283_v50, %v3160_v2 }
 0x24c   : > { %v5236_v49 = vpop.f32.mrf.mxu0 }
 0x24d   : > { %v3436_v3 = vadd.f32 %v5236_v49, %v3296_v1 }
 0x24e   : > { %v3420_v51 = vpop.f32.mrf.mxu0  ;;  %v5256_v53 = vpop.f32.mrf.mxu1 }
 0x24f   : > { %v3434_v52 = vadd.f32 %v3420_v51, %v3294_v56  ;;  %v3575_v4 = vadd.f32 %v5256_v53, %v3436_v3 }
 0x250   : > { %v5237_v54 = vpop.f32.mrf.mxu0  ;;  %v3559_v55 = vpop.f32.mrf.mxu1 }
 0x251   : > { %v3573_v12 = vadd.f32 %v3559_v55, %v3434_v52 }
 0x252   : > { %v5257_v58 = vpop.f32.mrf.mxu1  ;;  %v3423_v57 = vpop.f32.mrf.mxu0 }
 0x253   : > { %v3435_v8 = vadd.f32 %v3423_v57, %v3295_v63 }
 0x254   : > { %v3562_v9 = vpop.f32.mrf.mxu1 }
 0x255   : > { %v3574_v15 = vadd.f32 %v3562_v9, %v3435_v8 }
 0x26c   : > { %v5276_v6 = vpop.f32.mrf.mxu0 }
 0x26d   : > { %v3700_v11 = vadd.f32 %v5276_v6, %v3575_v4 }
 0x26e   : > { %v3684_v10 = vpop.f32.mrf.mxu0 }
 0x26f   : > { %v3710_v5 = vadd.f32 %v4430_v7, %v3700_v11  ;;  %v3698_v19 = vadd.f32 %v3684_v10, %v3573_v12 }
 0x270   : > { %v5277_v14 = vpop.f32.mrf.mxu0 }
 0x271   : > { %v4458_v18 = vpack.c.bf16 %v3710_v5, %v3710_v5  ;;  %v3708_v22 = vadd.f32 %v4430_v7, %v3698_v19 }
 0x272   : > { %v3687_v20 = vpop.f32.mrf.mxu0 }
 0x273   : > { %3726 = vst [vmem:[%s170_s30 + $0x8] sm:$0x7] %v4458_v18  ;;  %v3699_v21 = vadd.f32 %v3687_v20, %v3574_v15 }
 0x275   : > { %v3709_v24 = vadd.f32 %v4430_v7, %v3699_v21 }
 0x277   : > { %v4516_v25 = vpack.c.bf16 %v3709_v24, %v3708_v22 }
 0x279   : > { %4517 = vst [vmem:[%s170_s30] sm:$0xff] %v4516_v25  }
 0x27a PF: > { %s13_s12 = sadd.s32 1, %s5531_s12  }
 0x27b   : > { %p10_p4 = scmp.ge.s32.totalorder %s13_s12, 4  }
 0x27d   :  { %12 = sbr.rel (!%p10_p4) target bundleno = 1 (0x1), region = 89 }

// kernel: discriminator_forward.7
= control target key start
LH: loop header
LB: loop body
LE: loop exit
PB: predicated region body
PF: predicated region fallthrough
CT: control target
= control target key end

     0   :  { %s5633_s20 = smov 0   ;;  %s6964_s0 = inlined_call_operand.vmem [shape: bf16[2,1,36,128], index: 0, kind: input, shape index: {}]   ;;  %s6965_s1 = inlined_call_operand.vmem [shape: bf16[25,128,256], index: 1, kind: input, shape index: {}]   ;;  %s6966_s2 = inlined_call_operand.vmem [shape: f32[1,256], index: 2, kind: input, shape index: {}]   ;;  %s6967_s3 = inlined_call_operand.vmem [shape: f32[1,256], index: 3, kind: input, shape index: {}]   ;;  %s6968_s4 = inlined_call_operand.<no memory space> [shape: f32[1,1], index: 4, kind: input, shape index: {}]   ;;  %s6969_s5 = inlined_call_operand.vmem [shape: f32[2,1,1], index: 5, kind: output, shape index: {}]  }
   0x1   :  { %v10_v0 = vstv %s6968_s4 }
   0x2   :  { %11 = vst [vmem:[#allocation3] sm:$0x1] %v10_v0 }
   0x3 LB: > { %s4111_s21 = sadd.s32 4294967295, %s5597_s20   ;;  %p4115_p0 = scmp.ge.s32.totalorder %s5597_s20, 1  ;;  %s5597_s20 = sphi %s5633_s20, %s17_s20  }
   0x4   : > { %p189_p1 = scmp.lt.s32.totalorder %s5597_s20, 3 }
   0x6   : > { %p190_p2 = pnand %p4115_p0, %p189_p1 }
   0x7   : > { %p215_p3 = scmp.lt.s32.totalorder (!%p190_p2), %s4111_s21, 1 }
   0x8   : > { %193 = sbr.rel (%p190_p2) target bundleno = 827 (0x33b), region = 40 }
   0xd   : > { %v4966_v1 = vld [vmem:[%s6965_s1 + $0xf4] ss:$8 sps:$4 sm:$0xff]   ;;  %v5599_v3 = vmov 0   ;;  %v4970_v4 = vld [vmem:[%s6965_s1 + $0xf0] ss:$8 sps:$4 sm:$0xff]   ;;  %s6971_s21 = smov (!%p215_p3, %s4111_s21), 1 }
   0xe   : > { %v4968_v2 = vld [vmem:[%s6965_s1 + $0x74] ss:$8 sps:$4 sm:$0xff]   ;;  %435 = vmatprep.mubr.bf16.mxu0 %v5599_v3  ;;  %556 = vmatprep.mubr.bf16.mxu1 %v5599_v3  ;;  %v4971_v5 = vld [vmem:[%s6965_s1 + $0x70] ss:$8 sps:$4 sm:$0xff]   ;;  %v4972_v6 = vld [vmem:[%s6965_s1 + $0xe4] ss:$8 sps:$4 sm:$0xff]   ;;  %s222_s9 = scalar_lea.vmem %s6969_s5, %s6971_s21 }
   0xf   : > { %403 = vmatprep.subr.bf16.mxu0 %v4966_v1  ;;  %524 = vmatprep.subr.bf16.mxu1 %v4968_v2  ;;  %v4974_v7 = vld [vmem:[%s6965_s1 + $0x64] ss:$8 sps:$4 sm:$0xff]   ;;  %v4976_v8 = vld [vmem:[%s6965_s1 + $0xe0] ss:$8 sps:$4 sm:$0xff]   ;;  %v4978_v10 = vld [vmem:[%s6965_s1 + $0xd4] ss:$8 sps:$4 sm:$0xff]  }
  0x10   : > { %404 = vmatpush1.bf16.msra.mxu0 %v4970_v4  ;;  %525 = vmatpush1.bf16.msra.mxu1 %v4971_v5  ;;  %v4977_v9 = vld [vmem:[%s6965_s1 + $0x60] ss:$8 sps:$4 sm:$0xff]   ;;  %v4980_v11 = vld [vmem:[%s6965_s1 + $0x54] ss:$8 sps:$4 sm:$0xff]   ;;  %v4982_v12 = vld [vmem:[%s6965_s1 + $0xd0] ss:$8 sps:$4 sm:$0xff]  }
  0x11   : > { %405 = vmatprep.subr.bf16.mxu0 %v4972_v6  ;;  %526 = vmatprep.subr.bf16.mxu1 %v4974_v7  ;;  %v4983_v13 = vld [vmem:[%s6965_s1 + $0x50] ss:$8 sps:$4 sm:$0xff]   ;;  %v4984_v14 = vld [vmem:[%s6965_s1 + $0xc4] ss:$8 sps:$4 sm:$0xff]   ;;  %v4988_v16 = vld [vmem:[%s6965_s1 + $0xc0] ss:$8 sps:$4 sm:$0xff]  }
  0x12   : > { %v4986_v15 = vld [vmem:[%s6965_s1 + $0x44] ss:$8 sps:$4 sm:$0xff]   ;;  %v4989_v17 = vld [vmem:[%s6965_s1 + $0x40] ss:$8 sps:$4 sm:$0xff]   ;;  %v4990_v18 = vld [vmem:[%s6965_s1 + $0xb4] ss:$8 sps:$4 sm:$0xff]  }
  0x13   : > { %v4992_v19 = vld [vmem:[%s6965_s1 + $0x34] ss:$8 sps:$4 sm:$0xff]   ;;  %s4954_s8 = smul.u32 20, %s6971_s21  ;;  %v4994_v20 = vld [vmem:[%s6965_s1 + $0xb0] ss:$8 sps:$4 sm:$0xff]   ;;  %vm4048_vm9 = vcmask 1040384  }
  0x14   : > { %406 = vmatpush1.bf16.msra.mxu0 %v4976_v8  ;;  %527 = vmatpush1.bf16.msra.mxu1 %v4977_v9  ;;  %v4995_v21 = vld [vmem:[%s6965_s1 + $0x30] ss:$8 sps:$4 sm:$0xff]   ;;  %v4996_v22 = vld [vmem:[%s6965_s1 + $0xa4] ss:$8 sps:$4 sm:$0xff]   ;;  %v5000_v24 = vld [vmem:[%s6965_s1 + $0xa0] ss:$8 sps:$4 sm:$0xff]  }
  0x15   : > { %407 = vmatprep.subr.bf16.mxu0 %v4978_v10  ;;  %528 = vmatprep.subr.bf16.mxu1 %v4980_v11  ;;  %v4998_v23 = vld [vmem:[%s6965_s1 + $0x24] ss:$8 sps:$4 sm:$0xff]   ;;  %s5719_s19 = scalar_lea.vmem %s6964_s0, %s4954_s8  ;;  %v5001_v25 = vld [vmem:[%s6965_s1 + $0x20] ss:$8 sps:$4 sm:$0xff]   ;;  %v5002_v26 = vld [vmem:[%s6965_s1 + $0x94] ss:$8 sps:$4 sm:$0xff]  }
  0x16   : > { %v5004_v27 = vld [vmem:[%s6965_s1 + $0x14] ss:$8 sps:$4 sm:$0xff]   ;;  %v4935_v28 = vld [vmem:[%s5719_s19] sm:$0xff]   ;;  %v5006_v29 = vld [vmem:[%s6965_s1 + $0x90] ss:$8 sps:$4 sm:$0xff]   ;;  %vm4062_vm10 = vcmask 0  }
  0x17   : > { %v5007_v30 = vld [vmem:[%s6965_s1 + $0x10] ss:$8 sps:$4 sm:$0xff]   ;;  %v4936_v31 = vunpack.c.l.bf16 %v4935_v28  ;;  %v4937_v32 = vunpack.c.h.bf16 %v4935_v28  ;;  %v5008_v33 = vld [vmem:[%s6965_s1 + $0x84] ss:$8 sps:$4 sm:$0xff]   ;;  %v5012_v39 = vld [vmem:[%s6965_s1 + $0x80] ss:$8 sps:$4 sm:$0xff]  }
  0x18   : > { %408 = vmatpush1.bf16.msra.mxu0 %v4982_v12  ;;  %529 = vmatpush1.bf16.msra.mxu1 %v4983_v13  ;;  %v5010_v36 = vld [vmem:[%s6965_s1 + $0x4] ss:$8 sps:$4 sm:$0xff]   ;;  %v5013_v40 = vld [vmem:[%s6965_s1] ss:$8 sps:$4 sm:$0xff]   ;;  %v5017_v42 = vld [vmem:[%s6965_s1 + $0x174] ss:$8 sps:$4 sm:$0xff]  }
  0x19   : > { %409 = vmatprep.subr.bf16.mxu0 %v4984_v14  ;;  %530 = vmatprep.subr.bf16.mxu1 %v4986_v15  ;;  %vm234_vm0 = vcmp.gt.f32.partialorder %v4936_v31, 0.0  ;;  %vm235_vm1 = vcmp.gt.f32.partialorder %v4937_v32, 0.0  ;;  %v239_v34 = vmul.f32 0.2, %v4936_v31  ;;  %v240_v35 = vmul.f32 0.2, %v4937_v32 }
  0x1a   : > { %v5020_v43 = vld [vmem:[%s6965_s1 + $0x1f4] ss:$8 sps:$4 sm:$0xff]   ;;  %v5018_v44 = vld [vmem:[%s6965_s1 + $0x1f0] ss:$8 sps:$4 sm:$0xff]   ;;  %v5026_v45 = vld [vmem:[%s6965_s1 + $0x1e4] ss:$8 sps:$4 sm:$0xff]  }
  0x1b   : > { %v244_v37 = vsel %vm234_vm0, %v4936_v31, %v239_v34  ;;  %v245_v38 = vsel %vm235_vm1, %v4937_v32, %v240_v35  ;;  %v5024_v49 = vld [vmem:[%s6965_s1 + $0x1e0] ss:$8 sps:$4 sm:$0xff]   ;;  %v5032_v52 = vld [vmem:[%s6965_s1 + $0x1d4] ss:$8 sps:$4 sm:$0xff]   ;;  %v5015_v54 = vld [vmem:[%s6965_s1 + $0x170] ss:$8 sps:$4 sm:$0xff]  }
  0x1c   : > { %410 = vmatpush1.bf16.msra.mxu0 %v4988_v16  ;;  %531 = vmatpush1.bf16.msra.mxu1 %v4989_v17  ;;  %v4945_v41 = vpack.c.bf16 %v245_v38, %v244_v37  ;;  %v5023_v55 = vld [vmem:[%s6965_s1 + $0x164] ss:$8 sps:$4 sm:$0xff]   ;;  %v5030_v56 = vld [vmem:[%s6965_s1 + $0x1d0] ss:$8 sps:$4 sm:$0xff]   ;;  %v5021_v59 = vld [vmem:[%s6965_s1 + $0x160] ss:$8 sps:$4 sm:$0xff]  }
  0x1d   : > { %411 = vmatprep.subr.bf16.mxu0 %v4990_v18  ;;  %532 = vmatprep.subr.bf16.mxu1 %v4992_v19  ;;  %v5038_v58 = vld [vmem:[%s6965_s1 + $0x1c4] ss:$8 sps:$4 sm:$0xff]   ;;  %v5036_v60 = vld [vmem:[%s6965_s1 + $0x1c0] ss:$8 sps:$4 sm:$0xff]   ;;  %v5029_v61 = vld [vmem:[%s6965_s1 + $0x154] ss:$8 sps:$4 sm:$0xff]  }
  0x1e   : > { %4946 = vst [vmem:[#allocation2] sm:$0xff] %v4945_v41   ;;  %v5044_v62 = vld [vmem:[%s6965_s1 + $0x1b4] ss:$8 sps:$4 sm:$0xff]   ;;  %v5027_v63 = vld [vmem:[%s6965_s1 + $0x150] ss:$8 sps:$4 sm:$0xff]  }
  0x1f   : > { %v5035_v0 = vld [vmem:[%s6965_s1 + $0x144] ss:$8 sps:$4 sm:$0xff]   ;;  %v5042_v1 = vld [vmem:[%s6965_s1 + $0x1b0] ss:$8 sps:$4 sm:$0xff]   ;;  %v5033_v6 = vld [vmem:[%s6965_s1 + $0x140] ss:$8 sps:$4 sm:$0xff]  }
  0x20   : > { %412 = vmatpush1.bf16.msra.mxu0 %v4994_v20  ;;  %533 = vmatpush1.bf16.msra.mxu1 %v4995_v21  ;;  %v5050_v5 = vld [vmem:[%s6965_s1 + $0x1a4] ss:$8 sps:$4 sm:$0xff]   ;;  %v5041_v8 = vld [vmem:[%s6965_s1 + $0x134] ss:$8 sps:$4 sm:$0xff]   ;;  %v5048_v9 = vld [vmem:[%s6965_s1 + $0x1a0] ss:$8 sps:$4 sm:$0xff]  }
  0x21   : > { %413 = vmatprep.subr.bf16.mxu0 %v4996_v22  ;;  %534 = vmatprep.subr.bf16.mxu1 %v4998_v23  ;;  %v5056_v10 = vld [vmem:[%s6965_s1 + $0x194] ss:$8 sps:$4 sm:$0xff]   ;;  %v5039_v11 = vld [vmem:[%s6965_s1 + $0x130] ss:$8 sps:$4 sm:$0xff]   ;;  %v5047_v14 = vld [vmem:[%s6965_s1 + $0x124] ss:$8 sps:$4 sm:$0xff]  }
  0x22   : > { %v5054_v15 = vld [vmem:[%s6965_s1 + $0x190] ss:$8 sps:$4 sm:$0xff]   ;;  %v5062_v16 = vld [vmem:[%s6965_s1 + $0x184] ss:$8 sps:$4 sm:$0xff]   ;;  %v5045_v17 = vld [vmem:[%s6965_s1 + $0x120] ss:$8 sps:$4 sm:$0xff]  }
  0x23   : > { %v5053_v20 = vld [vmem:[%s6965_s1 + $0x114] ss:$8 sps:$4 sm:$0xff]   ;;  %v5060_v21 = vld [vmem:[%s6965_s1 + $0x180] ss:$8 sps:$4 sm:$0xff]   ;;  %v5051_v23 = vld [vmem:[%s6965_s1 + $0x110] ss:$8 sps:$4 sm:$0xff]  }
  0x24   : > { %414 = vmatpush1.bf16.msra.mxu0 %v5000_v24  ;;  %535 = vmatpush1.bf16.msra.mxu1 %v5001_v25  ;;  %v5070_v22 = vld [vmem:[%s6965_s1 + $0x2f4] ss:$8 sps:$4 sm:$0xff]   ;;  %v5059_v25 = vld [vmem:[%s6965_s1 + $0x104] ss:$8 sps:$4 sm:$0xff]   ;;  %v5057_v28 = vld [vmem:[%s6965_s1 + $0x100] ss:$8 sps:$4 sm:$0xff]  }
  0x25   : > { %415 = vmatprep.subr.bf16.mxu0 %v5002_v26  ;;  %536 = vmatprep.subr.bf16.mxu1 %v5004_v27  ;;  %v275_v46 = vld [vmem:[#allocation2] sm:$0xf]  ;;  %v5764_v47 = vld [vmem:[#allocation2 + $0x4] sm:$0x1]  ;;  %v5068_v26 = vld [vmem:[%s6965_s1 + $0x2f0] ss:$8 sps:$4 sm:$0xff]  }
  0x26   : > { %v4138_v48 = vcombine.low %v275_v46, %v5764_v47  ;;  %v565_v2 = vld [vmem:[#allocation2] sm:$0xe]  ;;  %v5808_v4 = vld [vmem:[#allocation2 + $0x4] sm:$0x3]  ;;  %v5082_v32 = vld [vmem:[%s6965_s1 + $0x2d4] ss:$8 sps:$4 sm:$0xff]  }
  0x27   : > { %v4220_v7 = vcombine.low %v565_v2, %v5808_v4  ;;  %v5076_v27 = vld [vmem:[%s6965_s1 + $0x2e4] ss:$8 sps:$4 sm:$0xff]   ;;  %v5074_v31 = vld [vmem:[%s6965_s1 + $0x2e0] ss:$8 sps:$4 sm:$0xff]   ;;  %v5065_v34 = vld [vmem:[%s6965_s1 + $0x270] ss:$8 sps:$4 sm:$0xff]  }
  0x28   : > { %416 = vmatpush1.bf16.msra.mxu0 %v5006_v29  ;;  %537 = vmatpush1.bf16.msra.mxu1 %v5007_v30  ;;  %v316_v50 = vshrl.u32 %v4138_v48, 16  ;;  %v318_v51 = vshll.u32 %v4138_v48, 16  ;;  %v4187_v29 = vcombine.low %v565_v2, %v5764_v47  ;;  %v5067_v30 = vld [vmem:[%s6965_s1 + $0x274] ss:$8 sps:$4 sm:$0xff]   ;;  %v5073_v35 = vld [vmem:[%s6965_s1 + $0x264] ss:$8 sps:$4 sm:$0xff]  }
  0x29   : > { %417 = vmatprep.subr.bf16.mxu0 %v5008_v33  ;;  %538 = vmatprep.subr.bf16.mxu1 %v5010_v36  ;;  %v733_v12 = vshrl.u32 %v4220_v7, 16  ;;  %v736_v13 = vshll.u32 %v4220_v7, 16  ;;  %v5080_v36 = vld [vmem:[%s6965_s1 + $0x2d0] ss:$8 sps:$4 sm:$0xff]   ;;  %v5088_v37 = vld [vmem:[%s6965_s1 + $0x2c4] ss:$8 sps:$4 sm:$0xff]  }
  0x2a   : > { %v320_v53 = vrot.slane %v318_v51, 1  ;;  %v586_v33 = vrot.slane %v4187_v29, 1  ;;  %v5071_v38 = vld [vmem:[%s6965_s1 + $0x260] ss:$8 sps:$4 sm:$0xff]   ;;  %v5094_v41 = vld [vmem:[%s6965_s1 + $0x2b4] ss:$8 sps:$4 sm:$0xff]  }
  0x2b   : > { %v735_v18 = vrot.slane %v733_v12, 1  ;;  %v738_v19 = vrot.slane %v736_v13, 2  ;;  %v5091_v47 = vld [vmem:[%s6965_s1 + $0x234] ss:$8 sps:$4 sm:$0xff]   ;;  %v5098_v48 = vld [vmem:[%s6965_s1 + $0x2a0] ss:$8 sps:$4 sm:$0xff]  }
  0x2c   : > { %418 = vmatpush1.bf16.msra.mxu0 %v5012_v39  ;;  %539 = vmatpush1.bf16.msra.mxu1 %v5013_v40  ;;  %v321_v57 = vor.u32 %v320_v53, %v316_v50  ;;  %v5079_v39 = vld [vmem:[%s6965_s1 + $0x254] ss:$8 sps:$4 sm:$0xff]   ;;  %v5086_v40 = vld [vmem:[%s6965_s1 + $0x2c0] ss:$8 sps:$4 sm:$0xff]   ;;  %v5089_v50 = vld [vmem:[%s6965_s1 + $0x230] ss:$8 sps:$4 sm:$0xff]  }
  0x2d   : > { %668 = vmatprep.subr.bf16.mxu0 %v5017_v42  ;;  %821 = vmatprep.subr.bf16.mxu1 %v5020_v43  ;;  %v739_v24 = vor.u32 %v738_v19, %v735_v18  ;;  %v5077_v42 = vld [vmem:[%s6965_s1 + $0x250] ss:$8 sps:$4 sm:$0xff]   ;;  %v5085_v43 = vld [vmem:[%s6965_s1 + $0x244] ss:$8 sps:$4 sm:$0xff]   ;;  %v5934_v53 = vld [vmem:[#allocation2] sm:$0x8] }
  0x2e   : > { %v5097_v51 = vld [vmem:[%s6965_s1 + $0x224] ss:$8 sps:$4 sm:$0xff]   ;;  %v5116_v7 = vld [vmem:[%s6965_s1 + $0x374] ss:$8 sps:$4 sm:$0xff]   ;;  %v5131_v12 = vld [vmem:[%s6965_s1 + $0x3d0] ss:$8 sps:$4 sm:$0xff]  }
  0x2f   : > { %557 = vmatmul.mubr.bf16.vlgmr.msra.gmra.mxu1 %v275_v46  ;;  %436 = vmatmul.mubr.bf16.vlgmr.msra.gmra.mxu0 %v321_v57  ;;  %v5083_v46 = vld [vmem:[%s6965_s1 + $0x240] ss:$8 sps:$4 sm:$0xff]   ;;  %v5127_v2 = vld [vmem:[%s6965_s1 + $0x3e4] ss:$8 sps:$4 sm:$0xff]   ;;  %v5128_v19 = vld [vmem:[%s6965_s1 + $0x350] ss:$8 sps:$4 sm:$0xff]  }
  0x30   : > { %822 = vmatpush1.bf16.msra.mxu1 %v5018_v44  ;;  %853 = vmatprep.mubr.bf16.mxu1 %v5599_v3  ;;  %v5092_v44 = vld [vmem:[%s6965_s1 + $0x2b0] ss:$8 sps:$4 sm:$0xff]   ;;  %v5139_v13 = vld [vmem:[%s6965_s1 + $0x3c4] ss:$8 sps:$4 sm:$0xff]   ;;  %v5134_v29 = vld [vmem:[%s6965_s1 + $0x340] ss:$8 sps:$4 sm:$0xff]  }
  0x31   : > { %823 = vmatprep.subr.bf16.mxu1 %v5026_v45  ;;  %669 = vmatpush1.bf16.msra.mxu0 %v5015_v54  ;;  %v5100_v45 = vld [vmem:[%s6965_s1 + $0x2a4] ss:$8 sps:$4 sm:$0xff]  }
  0x32   : > { %670 = vmatprep.subr.bf16.mxu0 %v5023_v55  ;;  %700 = vmatprep.mubr.bf16.mxu0 %v5599_v3  ;;  %v1011_v54 = vld [vmem:[#allocation2 + $0x4] sm:$0x7]  ;;  %v4952_v18 = vld [vmem:[%s5719_s19 + $0x8] sm:$0xff]  }
  0x33   : > { %v5112_v55 = vld [vmem:[%s6965_s1 + $0x284] ss:$8 sps:$4 sm:$0xff]   ;;  %v4286_v57 = vcombine.low %v5934_v53, %v1011_v54  ;;  %v5166_v54 = vld [vmem:[%s6965_s1 + $0x474] ss:$8 sps:$4 sm:$0xff]  }
  0x34   : > { %824 = vmatpush1.bf16.msra.mxu1 %v5024_v49  ;;  %v5106_v49 = vld [vmem:[%s6965_s1 + $0x294] ss:$8 sps:$4 sm:$0xff]  }
  0x35   : > { %825 = vmatprep.subr.bf16.mxu1 %v5032_v52  ;;  %671 = vmatpush1.bf16.msra.mxu0 %v5021_v59  ;;  %v5104_v52 = vld [vmem:[%s6965_s1 + $0x290] ss:$8 sps:$4 sm:$0xff]   ;;  %v5110_v59 = vld [vmem:[%s6965_s1 + $0x280] ss:$8 sps:$4 sm:$0xff]  }
  0x36   : > { %672 = vmatprep.subr.bf16.mxu0 %v5029_v61  ;;  %v5101_v61 = vld [vmem:[%s6965_s1 + $0x210] ss:$8 sps:$4 sm:$0xff]  }
  0x38   : > { %826 = vmatpush1.bf16.msra.mxu1 %v5030_v56  ;;  %v5095_v56 = vld [vmem:[%s6965_s1 + $0x220] ss:$8 sps:$4 sm:$0xff]  }
  0x39   : > { %827 = vmatprep.subr.bf16.mxu1 %v5038_v58  ;;  %673 = vmatpush1.bf16.msra.mxu0 %v5027_v63  ;;  %v5103_v58 = vld [vmem:[%s6965_s1 + $0x214] ss:$8 sps:$4 sm:$0xff]   ;;  %v1034_v63 = vrot.slane %v4286_v57, 3  ;;  %v5164_v57 = vld [vmem:[%s6965_s1 + $0x470] ss:$8 sps:$4 sm:$0xff]  }
  0x3a   : > { %674 = vmatprep.subr.bf16.mxu0 %v5035_v0  ;;  %v864_v0 = vld [vmem:[#allocation2] sm:$0xc] }
  0x3c   : > { %828 = vmatpush1.bf16.msra.mxu1 %v5036_v60  ;;  %v5121_v60 = vld [vmem:[%s6965_s1 + $0x3f4] ss:$8 sps:$4 sm:$0xff]  }
  0x3d   : > { %829 = vmatprep.subr.bf16.mxu1 %v5044_v62  ;;  %675 = vmatpush1.bf16.msra.mxu0 %v5033_v6  ;;  %v5109_v62 = vld [vmem:[%s6965_s1 + $0x204] ss:$8 sps:$4 sm:$0xff]   ;;  %v4253_v6 = vcombine.low %v864_v0, %v5808_v4  ;;  %v5193_v0 = vld [vmem:[%s6965_s1 + $0x4b4] ss:$8 sps:$4 sm:$0xff]  }
  0x3e   : > { %676 = vmatprep.subr.bf16.mxu0 %v5041_v8  ;;  %v5125_v8 = vld [vmem:[%s6965_s1 + $0x3e0] ss:$8 sps:$4 sm:$0xff]  }
  0x3f   : > { %v885_v4 = vrot.slane %v4253_v6, 2  ;;  %v5199_v6 = vld [vmem:[%s6965_s1 + $0x4a4] ss:$8 sps:$4 sm:$0xff]  }
  0x40   : > { %830 = vmatpush1.bf16.msra.mxu1 %v5042_v1  ;;  %v5119_v1 = vld [vmem:[%s6965_s1 + $0x3f0] ss:$8 sps:$4 sm:$0xff]  }
  0x41   : > { %831 = vmatprep.subr.bf16.mxu1 %v5050_v5  ;;  %677 = vmatpush1.bf16.msra.mxu0 %v5039_v11  ;;  %v5107_v5 = vld [vmem:[%s6965_s1 + $0x200] ss:$8 sps:$4 sm:$0xff]   ;;  %v5124_v11 = vld [vmem:[%s6965_s1 + $0x364] ss:$8 sps:$4 sm:$0xff]  }
  0x42   : > { %678 = vmatprep.subr.bf16.mxu0 %v5047_v14  ;;  %v5122_v14 = vld [vmem:[%s6965_s1 + $0x360] ss:$8 sps:$4 sm:$0xff]  }
  0x44   : > { %832 = vmatpush1.bf16.msra.mxu1 %v5048_v9  ;;  %v5133_v9 = vld [vmem:[%s6965_s1 + $0x3d4] ss:$8 sps:$4 sm:$0xff]  }
  0x45   : > { %833 = vmatprep.subr.bf16.mxu1 %v5056_v10  ;;  %679 = vmatpush1.bf16.msra.mxu0 %v5045_v17  ;;  %v5114_v10 = vld [vmem:[%s6965_s1 + $0x370] ss:$8 sps:$4 sm:$0xff]   ;;  %v5145_v17 = vld [vmem:[%s6965_s1 + $0x3b4] ss:$8 sps:$4 sm:$0xff]  }
  0x46   : > { %680 = vmatprep.subr.bf16.mxu0 %v5053_v20  ;;  %v4940_v20 = vunpack.c.l.bf16 %v4952_v18 }
  0x48   : > { %834 = vmatpush1.bf16.msra.mxu1 %v5054_v15  ;;  %v5130_v15 = vld [vmem:[%s6965_s1 + $0x354] ss:$8 sps:$4 sm:$0xff]   ;;  %vm236_vm2 = vcmp.gt.f32.partialorder %v4940_v20, 0.0 }
  0x49   : > { %835 = vmatprep.subr.bf16.mxu1 %v5062_v16  ;;  %681 = vmatpush1.bf16.msra.mxu0 %v5051_v23  ;;  %v5137_v16 = vld [vmem:[%s6965_s1 + $0x3c0] ss:$8 sps:$4 sm:$0xff]   ;;  %v241_v23 = vmul.f32 0.2, %v4940_v20 }
  0x4a   : > { %682 = vmatprep.subr.bf16.mxu0 %v5059_v25  ;;  %v5136_v25 = vld [vmem:[%s6965_s1 + $0x344] ss:$8 sps:$4 sm:$0xff]  }
  0x4c   : > { %836 = vmatpush1.bf16.msra.mxu1 %v5060_v21  ;;  %v4941_v21 = vunpack.c.h.bf16 %v4952_v18 }
  0x4d   : > { %1116 = vmatprep.subr.bf16.mxu1 %v5070_v22  ;;  %683 = vmatpush1.bf16.msra.mxu0 %v5057_v28  ;;  %v5143_v22 = vld [vmem:[%s6965_s1 + $0x3b0] ss:$8 sps:$4 sm:$0xff]  }
  0x4e   : > { %967 = vmatprep.subr.bf16.mxu0 %v5067_v30  ;;  %vm237_vm3 = vcmp.gt.f32.partialorder %v4941_v21, 0.0 }
  0x4f   : > { %854 = vmatmul.mubr.bf16.vlgmr.msra.gmra.mxu1 %v739_v24  ;;  %v242_v24 = vmul.f32 0.2, %v4941_v21 }
  0x50   : > { %1117 = vmatpush1.bf16.msra.mxu1 %v5068_v26  ;;  %1148 = vmatprep.mubr.bf16.mxu1 %v5599_v3  ;;  %v5151_v26 = vld [vmem:[%s6965_s1 + $0x3a4] ss:$8 sps:$4 sm:$0xff]  }
  0x51   : > { %1118 = vmatprep.subr.bf16.mxu1 %v5076_v27  ;;  %701 = vmatmul.mubr.bf16.vlgmr.msra.gmra.mxu0 %v586_v33  ;;  %v246_v27 = vsel %vm236_vm2, %v4940_v20, %v241_v23  ;;  %v247_v28 = vsel %vm237_vm3, %v4941_v21, %v242_v24  ;;  %v5157_v33 = vld [vmem:[%s6965_s1 + $0x394] ss:$8 sps:$4 sm:$0xff]   ;;  %v5209_v20 = vld [vmem:[%s6965_s1 + $0x480] ss:$8 sps:$4 sm:$0xff]   ;;  %v5200_v23 = vld [vmem:[%s6965_s1 + $0x410] ss:$8 sps:$4 sm:$0xff]  }
  0x52   : > { %968 = vmatpush1.bf16.msra.mxu0 %v5065_v34  ;;  %999 = vmatprep.mubr.bf16.mxu0 %v5599_v3  ;;  %v4950_v30 = vpack.c.bf16 %v247_v28, %v246_v27  ;;  %v1159_v34 = vld [vmem:[#allocation2 + $0x4] sm:$0xf]  ;;  %v5202_v21 = vld [vmem:[%s6965_s1 + $0x414] ss:$8 sps:$4 sm:$0xff]  }
  0x53   : > { %969 = vmatprep.subr.bf16.mxu0 %v5073_v35  ;;  %v5140_v35 = vld [vmem:[%s6965_s1 + $0x330] ss:$8 sps:$4 sm:$0xff]   ;;  %v5208_v27 = vld [vmem:[%s6965_s1 + $0x404] ss:$8 sps:$4 sm:$0xff]  }
  0x54   : > { %1119 = vmatpush1.bf16.msra.mxu1 %v5074_v31  ;;  %v5149_v31 = vld [vmem:[%s6965_s1 + $0x3a0] ss:$8 sps:$4 sm:$0xff]   ;;  %4953 = vst [vmem:[#allocation2 + $0x8] sm:$0xff] %v4950_v30   ;;  %v5225_v28 = vld [vmem:[%s6965_s1 + $0x5e4] ss:$8 sps:$4 sm:$0xff]  }
  0x55   : > { %1120 = vmatprep.subr.bf16.mxu1 %v5082_v32  ;;  %v5142_v32 = vld [vmem:[%s6965_s1 + $0x334] ss:$8 sps:$4 sm:$0xff]  }
  0x56   : > { %970 = vmatpush1.bf16.msra.mxu0 %v5071_v38  ;;  %v5163_v38 = vld [vmem:[%s6965_s1 + $0x384] ss:$8 sps:$4 sm:$0xff]  }
  0x57   : > { %971 = vmatprep.subr.bf16.mxu0 %v5079_v39  ;;  %v4319_v39 = vcombine.low %v5934_v53, %v1159_v34  ;;  %v5173_v53 = vld [vmem:[%s6965_s1 + $0x4e0] ss:$8 sps:$4 sm:$0xff]  }
  0x58   : > { %1121 = vmatpush1.bf16.msra.mxu1 %v5080_v36  ;;  %v5155_v36 = vld [vmem:[%s6965_s1 + $0x390] ss:$8 sps:$4 sm:$0xff]  }
  0x59   : > { %1122 = vmatprep.subr.bf16.mxu1 %v5088_v37  ;;  %v5148_v37 = vld [vmem:[%s6965_s1 + $0x324] ss:$8 sps:$4 sm:$0xff]  }
  0x5a   : > { %972 = vmatpush1.bf16.msra.mxu0 %v5077_v42  ;;  %v5154_v42 = vld [vmem:[%s6965_s1 + $0x314] ss:$8 sps:$4 sm:$0xff]  }
  0x5b   : > { %973 = vmatprep.subr.bf16.mxu0 %v5085_v43  ;;  %v5169_v43 = vld [vmem:[%s6965_s1 + $0x4f4] ss:$8 sps:$4 sm:$0xff]  }
  0x5c   : > { %1123 = vmatpush1.bf16.msra.mxu1 %v5086_v40  ;;  %v5146_v40 = vld [vmem:[%s6965_s1 + $0x320] ss:$8 sps:$4 sm:$0xff]  }
  0x5d   : > { %1124 = vmatprep.subr.bf16.mxu1 %v5094_v41  ;;  %v5161_v41 = vld [vmem:[%s6965_s1 + $0x380] ss:$8 sps:$4 sm:$0xff]  }
  0x5e   : > { %974 = vmatpush1.bf16.msra.mxu0 %v5083_v46  ;;  %v1184_v46 = vshll.u32 %v4319_v39, 16 }
  0x5f   : > { %975 = vmatprep.subr.bf16.mxu0 %v5091_v47  ;;  %v5160_v47 = vld [vmem:[%s6965_s1 + $0x304] ss:$8 sps:$4 sm:$0xff]  }
  0x60   : > { %1125 = vmatpush1.bf16.msra.mxu1 %v5092_v44  ;;  %v5152_v44 = vld [vmem:[%s6965_s1 + $0x310] ss:$8 sps:$4 sm:$0xff]  }
  0x61   : > { %1126 = vmatprep.subr.bf16.mxu1 %v5100_v45  ;;  %v1181_v45 = vshrl.u32 %v4319_v39, 16  ;;  %v5237_v39 = vld [vmem:[%s6965_s1 + $0x5c4] ss:$8 sps:$4 sm:$0xff]  }
  0x62   : > { %976 = vmatpush1.bf16.msra.mxu0 %v5089_v50 }
  0x63   : > { %977 = vmatprep.subr.bf16.mxu0 %v5097_v51  ;;  %v1183_v50 = vrot.slane %v1181_v45, 3  ;;  %v1186_v51 = vrot.slane %v1184_v46, 4  ;;  %v5241_v45 = vld [vmem:[%s6965_s1 + $0x5b0] ss:$8 sps:$4 sm:$0xff]   ;;  %v1753_v46 = vld [vmem:[#allocation2 + $0x4] sm:$0xc] }
  0x64   : > { %1127 = vmatpush1.bf16.msra.mxu1 %v5098_v48  ;;  %v5167_v48 = vld [vmem:[%s6965_s1 + $0x4f0] ss:$8 sps:$4 sm:$0xff]  }
  0x65   : > { %1128 = vmatprep.subr.bf16.mxu1 %v5106_v49  ;;  %v5175_v49 = vld [vmem:[%s6965_s1 + $0x4e4] ss:$8 sps:$4 sm:$0xff]  }
  0x66   : > { %978 = vmatpush1.bf16.msra.mxu0 %v5095_v56  ;;  %v1187_v56 = vor.u32 %v1186_v51, %v1183_v50  ;;  %v5232_v50 = vld [vmem:[%s6965_s1 + $0x540] ss:$8 sps:$4 sm:$0xff]  }
  0x67   : > { %979 = vmatprep.subr.bf16.mxu0 %v5103_v58  ;;  %v5179_v58 = vld [vmem:[%s6965_s1 + $0x4d0] ss:$8 sps:$4 sm:$0xff]  }
  0x68   : > { %1129 = vmatpush1.bf16.msra.mxu1 %v5104_v52  ;;  %v5158_v52 = vld [vmem:[%s6965_s1 + $0x300] ss:$8 sps:$4 sm:$0xff]  }
  0x69   : > { %1130 = vmatprep.subr.bf16.mxu1 %v5112_v55  ;;  %v5181_v55 = vld [vmem:[%s6965_s1 + $0x4d4] ss:$8 sps:$4 sm:$0xff]  }
  0x6a   : > { %980 = vmatpush1.bf16.msra.mxu0 %v5101_v61  ;;  %v5170_v61 = vld [vmem:[%s6965_s1 + $0x460] ss:$8 sps:$4 sm:$0xff]  }
  0x6b   : > { %981 = vmatprep.subr.bf16.mxu0 %v5109_v62  ;;  %v5178_v62 = vld [vmem:[%s6965_s1 + $0x454] ss:$8 sps:$4 sm:$0xff]  }
  0x6c   : > { %1131 = vmatpush1.bf16.msra.mxu1 %v5110_v59  ;;  %v5172_v59 = vld [vmem:[%s6965_s1 + $0x464] ss:$8 sps:$4 sm:$0xff]  }
  0x6d   : > { %1409 = vmatprep.subr.bf16.mxu1 %v5121_v60  ;;  %v5187_v60 = vld [vmem:[%s6965_s1 + $0x4c4] ss:$8 sps:$4 sm:$0xff]  }
  0x6e   : > { %982 = vmatpush1.bf16.msra.mxu0 %v5107_v5  ;;  %v5191_v5 = vld [vmem:[%s6965_s1 + $0x4b0] ss:$8 sps:$4 sm:$0xff]  }
  0x6f   : > { %1149 = vmatmul.mubr.bf16.vlgmr.msra.gmra.mxu1 %v1034_v63  ;;  %1269 = vmatprep.subr.bf16.mxu0 %v5116_v7  ;;  %v5185_v63 = vld [vmem:[%s6965_s1 + $0x4c0] ss:$8 sps:$4 sm:$0xff]  }
  0x70   : > { %1410 = vmatpush1.bf16.msra.mxu1 %v5119_v1  ;;  %1441 = vmatprep.mubr.bf16.mxu1 %v5599_v3  ;;  %v5176_v1 = vld [vmem:[%s6965_s1 + $0x450] ss:$8 sps:$4 sm:$0xff]   ;;  %v5182_v7 = vld [vmem:[%s6965_s1 + $0x440] ss:$8 sps:$4 sm:$0xff]  }
  0x71   : > { %1411 = vmatprep.subr.bf16.mxu1 %v5127_v2  ;;  %1000 = vmatmul.mubr.bf16.vlgmr.msra.gmra.mxu0 %v885_v4  ;;  %v5184_v2 = vld [vmem:[%s6965_s1 + $0x444] ss:$8 sps:$4 sm:$0xff]   ;;  %v5205_v4 = vld [vmem:[%s6965_s1 + $0x494] ss:$8 sps:$4 sm:$0xff]  }
  0x72   : > { %1270 = vmatpush1.bf16.msra.mxu0 %v5114_v10  ;;  %1301 = vmatprep.mubr.bf16.mxu0 %v5599_v3  ;;  %v5188_v10 = vld [vmem:[%s6965_s1 + $0x430] ss:$8 sps:$4 sm:$0xff]  }
  0x73   : > { %1271 = vmatprep.subr.bf16.mxu0 %v5124_v11  ;;  %v5196_v11 = vld [vmem:[%s6965_s1 + $0x424] ss:$8 sps:$4 sm:$0xff]  }
  0x74   : > { %1412 = vmatpush1.bf16.msra.mxu1 %v5125_v8  ;;  %v5190_v8 = vld [vmem:[%s6965_s1 + $0x434] ss:$8 sps:$4 sm:$0xff]  }
  0x75   : > { %1413 = vmatprep.subr.bf16.mxu1 %v5133_v9  ;;  %v5197_v9 = vld [vmem:[%s6965_s1 + $0x4a0] ss:$8 sps:$4 sm:$0xff]  }
  0x76   : > { %1272 = vmatpush1.bf16.msra.mxu0 %v5122_v14  ;;  %v1453_v14 = vld [vmem:[#allocation2 + $0x8] sm:$0x1] }
  0x77   : > { %1273 = vmatprep.subr.bf16.mxu0 %v5130_v15  ;;  %v1607_v15 = vld [vmem:[#allocation2 + $0x4] sm:$0xe] }
  0x78   : > { %1414 = vmatpush1.bf16.msra.mxu1 %v5131_v12  ;;  %v5203_v12 = vld [vmem:[%s6965_s1 + $0x490] ss:$8 sps:$4 sm:$0xff]  }
  0x79   : > { %1415 = vmatprep.subr.bf16.mxu1 %v5139_v13  ;;  %v1452_v13 = vld [vmem:[#allocation2 + $0x4] sm:$0xf] }
  0x7a   : > { %1274 = vmatpush1.bf16.msra.mxu0 %v5128_v19  ;;  %v4384_v18 = vcombine.low %v1452_v13, %v1453_v14  ;;  %v4417_v19 = vcombine.low %v1607_v15, %v1453_v14  ;;  %v5266_v13 = vld [vmem:[%s6965_s1 + $0x674] ss:$8 sps:$4 sm:$0xff]  }
  0x7b   : > { %1275 = vmatprep.subr.bf16.mxu0 %v5136_v25  ;;  %v5281_v14 = vld [vmem:[%s6965_s1 + $0x6d4] ss:$8 sps:$4 sm:$0xff]  }
  0x7c   : > { %1416 = vmatpush1.bf16.msra.mxu1 %v5137_v16  ;;  %v5211_v16 = vld [vmem:[%s6965_s1 + $0x484] ss:$8 sps:$4 sm:$0xff]   ;;  %v1479_v24 = vshll.u32 %v4384_v18, 16  ;;  %v1628_v25 = vrot.slane %v4417_v19, 1 }
  0x7d   : > { %1417 = vmatprep.subr.bf16.mxu1 %v5145_v17  ;;  %v5194_v17 = vld [vmem:[%s6965_s1 + $0x420] ss:$8 sps:$4 sm:$0xff]   ;;  %v5287_v19 = vld [vmem:[%s6965_s1 + $0x6c4] ss:$8 sps:$4 sm:$0xff]  }
  0x7e   : > { %1276 = vmatpush1.bf16.msra.mxu0 %v5134_v29  ;;  %v1477_v29 = vshrl.u32 %v4384_v18, 16  ;;  %v1481_v30 = vrot.slane %v1479_v24, 1  ;;  %v5272_v18 = vld [vmem:[%s6965_s1 + $0x664] ss:$8 sps:$4 sm:$0xff]   ;;  %v5276_v24 = vld [vmem:[%s6965_s1 + $0x650] ss:$8 sps:$4 sm:$0xff]  }
  0x7f   : > { %1277 = vmatprep.subr.bf16.mxu0 %v5142_v32  ;;  %v5223_v32 = vld [vmem:[%s6965_s1 + $0x5e0] ss:$8 sps:$4 sm:$0xff]  }
  0x80   : > { %1418 = vmatpush1.bf16.msra.mxu1 %v5143_v22  ;;  %v5219_v22 = vld [vmem:[%s6965_s1 + $0x5f4] ss:$8 sps:$4 sm:$0xff]  }
  0x81   : > { %1419 = vmatprep.subr.bf16.mxu1 %v5151_v26  ;;  %v5217_v26 = vld [vmem:[%s6965_s1 + $0x5f0] ss:$8 sps:$4 sm:$0xff]  }
  0x82   : > { %1278 = vmatpush1.bf16.msra.mxu0 %v5140_v35  ;;  %v1482_v35 = vor.u32 %v1481_v30, %v1477_v29  ;;  %v5299_v29 = vld [vmem:[%s6965_s1 + $0x6a4] ss:$8 sps:$4 sm:$0xff]   ;;  %v5282_v30 = vld [vmem:[%s6965_s1 + $0x640] ss:$8 sps:$4 sm:$0xff]  }
  0x83   : > { %1279 = vmatprep.subr.bf16.mxu0 %v5148_v37  ;;  %v5229_v37 = vld [vmem:[%s6965_s1 + $0x5d0] ss:$8 sps:$4 sm:$0xff]  }
  0x84   : > { %1420 = vmatpush1.bf16.msra.mxu1 %v5149_v31  ;;  %v5206_v31 = vld [vmem:[%s6965_s1 + $0x400] ss:$8 sps:$4 sm:$0xff]  }
  0x85   : > { %1421 = vmatprep.subr.bf16.mxu1 %v5157_v33  ;;  %v5215_v33 = vld [vmem:[%s6965_s1 + $0x574] ss:$8 sps:$4 sm:$0xff]  }
  0x86   : > { %1280 = vmatpush1.bf16.msra.mxu0 %v5146_v40  ;;  %v5220_v40 = vld [vmem:[%s6965_s1 + $0x560] ss:$8 sps:$4 sm:$0xff]  }
  0x87   : > { %1281 = vmatprep.subr.bf16.mxu0 %v5154_v42  ;;  %v5228_v42 = vld [vmem:[%s6965_s1 + $0x554] ss:$8 sps:$4 sm:$0xff]  }
  0x88   : > { %1422 = vmatpush1.bf16.msra.mxu1 %v5155_v36  ;;  %v5213_v36 = vld [vmem:[%s6965_s1 + $0x570] ss:$8 sps:$4 sm:$0xff]  }
  0x89   : > { %1423 = vmatprep.subr.bf16.mxu1 %v5163_v38  ;;  %v5222_v38 = vld [vmem:[%s6965_s1 + $0x564] ss:$8 sps:$4 sm:$0xff]  }
  0x8a   : > { %1282 = vmatpush1.bf16.msra.mxu0 %v5152_v44  ;;  %v5226_v44 = vld [vmem:[%s6965_s1 + $0x550] ss:$8 sps:$4 sm:$0xff]  }
  0x8b   : > { %1283 = vmatprep.subr.bf16.mxu0 %v5160_v47  ;;  %v6207_v47 = vld [vmem:[#allocation2 + $0x8] sm:$0x7] }
  0x8c   : > { %1424 = vmatpush1.bf16.msra.mxu1 %v5161_v41  ;;  %v5235_v41 = vld [vmem:[%s6965_s1 + $0x5c0] ss:$8 sps:$4 sm:$0xff]   ;;  %v4483_v51 = vcombine.low %v1753_v46, %v6207_v47 }
  0x8d   : > { %1710 = vmatprep.subr.bf16.mxu1 %v5169_v43  ;;  %v5243_v43 = vld [vmem:[%s6965_s1 + $0x5b4] ss:$8 sps:$4 sm:$0xff]  }
  0x8e   : > { %1284 = vmatpush1.bf16.msra.mxu0 %v5158_v52  ;;  %v5247_v52 = vld [vmem:[%s6965_s1 + $0x5a0] ss:$8 sps:$4 sm:$0xff]  }
  0x8f   : > { %1442 = vmatmul.mubr.bf16.vlgmr.msra.gmra.mxu1 %v1159_v34  ;;  %1564 = vmatprep.subr.bf16.mxu0 %v5166_v54  ;;  %v5231_v34 = vld [vmem:[%s6965_s1 + $0x5d4] ss:$8 sps:$4 sm:$0xff]  }
  0x90   : > { %1711 = vmatpush1.bf16.msra.mxu1 %v5167_v48  ;;  %1742 = vmatprep.mubr.bf16.mxu1 %v5599_v3  ;;  %v5234_v48 = vld [vmem:[%s6965_s1 + $0x544] ss:$8 sps:$4 sm:$0xff]   ;;  %v5255_v54 = vld [vmem:[%s6965_s1 + $0x594] ss:$8 sps:$4 sm:$0xff]  }
  0x91   : > { %1712 = vmatprep.subr.bf16.mxu1 %v5175_v49  ;;  %1302 = vmatmul.mubr.bf16.vlgmr.msra.gmra.mxu0 %v1187_v56  ;;  %v5249_v49 = vld [vmem:[%s6965_s1 + $0x5a4] ss:$8 sps:$4 sm:$0xff]   ;;  %v1924_v56 = vshrl.u32 %v4483_v51, 16 }
  0x92   : > { %1565 = vmatpush1.bf16.msra.mxu0 %v5164_v57  ;;  %1596 = vmatprep.mubr.bf16.mxu0 %v5599_v3  ;;  %v1927_v57 = vshll.u32 %v4483_v51, 16  ;;  %v5317_v51 = vld [vmem:[%s6965_s1 + $0x7f0] ss:$8 sps:$4 sm:$0xff]  }
  0x93   : > { %1566 = vmatprep.subr.bf16.mxu0 %v5172_v59  ;;  %v5246_v59 = vld [vmem:[%s6965_s1 + $0x524] ss:$8 sps:$4 sm:$0xff]  }
  0x94   : > { %1713 = vmatpush1.bf16.msra.mxu1 %v5173_v53  ;;  %v5240_v53 = vld [vmem:[%s6965_s1 + $0x534] ss:$8 sps:$4 sm:$0xff]  }
  0x95   : > { %1714 = vmatprep.subr.bf16.mxu1 %v5181_v55  ;;  %v5238_v55 = vld [vmem:[%s6965_s1 + $0x530] ss:$8 sps:$4 sm:$0xff]  }
  0x96   : > { %1567 = vmatpush1.bf16.msra.mxu0 %v5170_v61  ;;  %v5244_v61 = vld [vmem:[%s6965_s1 + $0x520] ss:$8 sps:$4 sm:$0xff]  }
  0x97   : > { %1568 = vmatprep.subr.bf16.mxu0 %v5178_v62  ;;  %v1926_v62 = vrot.slane %v1924_v56, 2  ;;  %v5316_v56 = vld [vmem:[%s6965_s1 + $0x774] ss:$8 sps:$4 sm:$0xff]  }
  0x98   : > { %1715 = vmatpush1.bf16.msra.mxu1 %v5179_v58  ;;  %v5253_v58 = vld [vmem:[%s6965_s1 + $0x590] ss:$8 sps:$4 sm:$0xff]  }
  0x99   : > { %1716 = vmatprep.subr.bf16.mxu1 %v5187_v60  ;;  %v5261_v60 = vld [vmem:[%s6965_s1 + $0x584] ss:$8 sps:$4 sm:$0xff]  }
  0x9a   : > { %1569 = vmatpush1.bf16.msra.mxu0 %v5176_v1  ;;  %v5252_v1 = vld [vmem:[%s6965_s1 + $0x514] ss:$8 sps:$4 sm:$0xff]  }
  0x9b   : > { %1570 = vmatprep.subr.bf16.mxu0 %v5184_v2  ;;  %v5269_v2 = vld [vmem:[%s6965_s1 + $0x6f4] ss:$8 sps:$4 sm:$0xff]  }
  0x9c   : > { %1717 = vmatpush1.bf16.msra.mxu1 %v5185_v63  ;;  %v1929_v63 = vrot.slane %v1927_v57, 3  ;;  %v5323_v57 = vld [vmem:[%s6965_s1 + $0x7e0] ss:$8 sps:$4 sm:$0xff]  }
  0x9d   : > { %1718 = vmatprep.subr.bf16.mxu1 %v5193_v0  ;;  %v5259_v0 = vld [vmem:[%s6965_s1 + $0x580] ss:$8 sps:$4 sm:$0xff]  }
  0x9e   : > { %1571 = vmatpush1.bf16.msra.mxu0 %v5182_v7  ;;  %v1930_v7 = vor.u32 %v1929_v63, %v1926_v62  ;;  %v5329_v63 = vld [vmem:[%s6965_s1 + $0x7d0] ss:$8 sps:$4 sm:$0xff]  }
  0x9f   : > { %1572 = vmatprep.subr.bf16.mxu0 %v5190_v8  ;;  %v5267_v8 = vld [vmem:[%s6965_s1 + $0x6f0] ss:$8 sps:$4 sm:$0xff]  }
  0xa0   : > { %1719 = vmatpush1.bf16.msra.mxu1 %v5191_v5  ;;  %v5250_v5 = vld [vmem:[%s6965_s1 + $0x510] ss:$8 sps:$4 sm:$0xff]  }
  0xa1   : > { %1720 = vmatprep.subr.bf16.mxu1 %v5199_v6  ;;  %v1754_v6 = vld [vmem:[#allocation2 + $0x8] sm:$0x3] }
  0xa2   : > { %1573 = vmatpush1.bf16.msra.mxu0 %v5188_v10  ;;  %v5256_v10 = vld [vmem:[%s6965_s1 + $0x500] ss:$8 sps:$4 sm:$0xff]  }
  0xa3   : > { %1574 = vmatprep.subr.bf16.mxu0 %v5196_v11  ;;  %v4450_v11 = vcombine.low %v1753_v46, %v1754_v6  ;;  %v5319_v46 = vld [vmem:[%s6965_s1 + $0x7f4] ss:$8 sps:$4 sm:$0xff]  }
  0xa4   : > { %1721 = vmatpush1.bf16.msra.mxu1 %v5197_v9  ;;  %v5258_v9 = vld [vmem:[%s6965_s1 + $0x504] ss:$8 sps:$4 sm:$0xff]   ;;  %v5328_v6 = vld [vmem:[%s6965_s1 + $0x754] ss:$8 sps:$4 sm:$0xff]  }
  0xa5   : > { %1722 = vmatprep.subr.bf16.mxu1 %v5205_v4  ;;  %v5275_v4 = vld [vmem:[%s6965_s1 + $0x6e4] ss:$8 sps:$4 sm:$0xff]   ;;  %v1777_v15 = vrot.slane %v4450_v11, 2 }
  0xa6   : > { %1575 = vmatpush1.bf16.msra.mxu0 %v5194_v17  ;;  %v5279_v17 = vld [vmem:[%s6965_s1 + $0x6d0] ss:$8 sps:$4 sm:$0xff]  }
  0xa7   : > { %1576 = vmatprep.subr.bf16.mxu0 %v5202_v21  ;;  %v5278_v21 = vld [vmem:[%s6965_s1 + $0x654] ss:$8 sps:$4 sm:$0xff]  }
  0xa8   : > { %1723 = vmatpush1.bf16.msra.mxu1 %v5203_v12  ;;  %v5273_v12 = vld [vmem:[%s6965_s1 + $0x6e0] ss:$8 sps:$4 sm:$0xff]  }
  0xa9   : > { %1724 = vmatprep.subr.bf16.mxu1 %v5211_v16  ;;  %v5264_v16 = vld [vmem:[%s6965_s1 + $0x670] ss:$8 sps:$4 sm:$0xff]  }
  0xaa   : > { %1577 = vmatpush1.bf16.msra.mxu0 %v5200_v23  ;;  %v5293_v23 = vld [vmem:[%s6965_s1 + $0x6b4] ss:$8 sps:$4 sm:$0xff]  }
  0xab   : > { %1578 = vmatprep.subr.bf16.mxu0 %v5208_v27  ;;  %v2055_v27 = vld [vmem:[#allocation2 + $0x4] sm:$0x8] }
  0xac   : > { %1725 = vmatpush1.bf16.msra.mxu1 %v5209_v20  ;;  %v5270_v20 = vld [vmem:[%s6965_s1 + $0x660] ss:$8 sps:$4 sm:$0xff]  }
  0xad   : > { %2012 = vmatprep.subr.bf16.mxu1 %v5219_v22  ;;  %v5285_v22 = vld [vmem:[%s6965_s1 + $0x6c0] ss:$8 sps:$4 sm:$0xff]  }
  0xae   : > { %1579 = vmatpush1.bf16.msra.mxu0 %v5206_v31 }
  0xaf   : > { %1743 = vmatmul.mubr.bf16.vlgmr.msra.gmra.mxu1 %v1628_v25  ;;  %1859 = vmatprep.subr.bf16.mxu0 %v5215_v33  ;;  %v5284_v25 = vld [vmem:[%s6965_s1 + $0x644] ss:$8 sps:$4 sm:$0xff]   ;;  %v5297_v33 = vld [vmem:[%s6965_s1 + $0x6a0] ss:$8 sps:$4 sm:$0xff]  }
  0xb0   : > { %2013 = vmatpush1.bf16.msra.mxu1 %v5217_v26  ;;  %2044 = vmatprep.mubr.bf16.mxu1 %v5599_v3  ;;  %v5291_v26 = vld [vmem:[%s6965_s1 + $0x6b0] ss:$8 sps:$4 sm:$0xff]  }
  0xb1   : > { %2014 = vmatprep.subr.bf16.mxu1 %v5225_v28  ;;  %1597 = vmatmul.mubr.bf16.vlgmr.msra.gmra.mxu0 %v1482_v35  ;;  %v6311_v28 = vld [vmem:[#allocation2 + $0x8] sm:$0xf]  ;;  %v5288_v35 = vld [vmem:[%s6965_s1 + $0x630] ss:$8 sps:$4 sm:$0xff]  }
  0xb2   : > { %1860 = vmatpush1.bf16.msra.mxu0 %v5213_v36  ;;  %1891 = vmatprep.mubr.bf16.mxu0 %v5599_v3  ;;  %v4549_v31 = vcombine.low %v2055_v27, %v6311_v28 }
  0xb3   : > { %1861 = vmatprep.subr.bf16.mxu0 %v5222_v38  ;;  %v5296_v38 = vld [vmem:[%s6965_s1 + $0x624] ss:$8 sps:$4 sm:$0xff]  }
  0xb4   : > { %2015 = vmatpush1.bf16.msra.mxu1 %v5223_v32  ;;  %v5290_v32 = vld [vmem:[%s6965_s1 + $0x634] ss:$8 sps:$4 sm:$0xff]   ;;  %v2223_v36 = vshrl.u32 %v4549_v31, 16 }
  0xb5   : > { %2016 = vmatprep.subr.bf16.mxu1 %v5231_v34  ;;  %v5305_v34 = vld [vmem:[%s6965_s1 + $0x694] ss:$8 sps:$4 sm:$0xff]  }
  0xb6   : > { %1862 = vmatpush1.bf16.msra.mxu0 %v5220_v40  ;;  %v5311_v40 = vld [vmem:[%s6965_s1 + $0x684] ss:$8 sps:$4 sm:$0xff]  }
  0xb7   : > { %1863 = vmatprep.subr.bf16.mxu0 %v5228_v42  ;;  %v2225_v42 = vrot.slane %v2223_v36, 3  ;;  %v5359_v36 = vld [vmem:[%s6965_s1 + $0x780] ss:$8 sps:$4 sm:$0xff]  }
  0xb8   : > { %2017 = vmatpush1.bf16.msra.mxu1 %v5229_v37  ;;  %v2226_v37 = vshll.u32 %v4549_v31, 16 }
  0xb9   : > { %2018 = vmatprep.subr.bf16.mxu1 %v5237_v39  ;;  %v5303_v39 = vld [vmem:[%s6965_s1 + $0x690] ss:$8 sps:$4 sm:$0xff]  }
  0xba   : > { %1864 = vmatpush1.bf16.msra.mxu0 %v5226_v44  ;;  %v5302_v44 = vld [vmem:[%s6965_s1 + $0x614] ss:$8 sps:$4 sm:$0xff]  }
  0xbb   : > { %1865 = vmatprep.subr.bf16.mxu0 %v5234_v48  ;;  %v5300_v48 = vld [vmem:[%s6965_s1 + $0x610] ss:$8 sps:$4 sm:$0xff]  }
  0xbc   : > { %2019 = vmatpush1.bf16.msra.mxu1 %v5235_v41  ;;  %v5294_v41 = vld [vmem:[%s6965_s1 + $0x620] ss:$8 sps:$4 sm:$0xff]  }
  0xbd   : > { %2020 = vmatprep.subr.bf16.mxu1 %v5243_v43  ;;  %v2228_v43 = vrot.slane %v2226_v37, 4  ;;  %v5369_v37 = vld [vmem:[%s6965_s1 + $0x8f4] ss:$8 sps:$4 sm:$0xff]  }
  0xbe   : > { %1866 = vmatpush1.bf16.msra.mxu0 %v5232_v50 }
  0xbf   : > { %1867 = vmatprep.subr.bf16.mxu0 %v5240_v53  ;;  %v2229_v50 = vor.u32 %v2228_v43, %v2225_v42  ;;  %v5306_v53 = vld [vmem:[%s6965_s1 + $0x600] ss:$8 sps:$4 sm:$0xff]   ;;  %v5375_v42 = vld [vmem:[%s6965_s1 + $0x8e4] ss:$8 sps:$4 sm:$0xff]  }
  0xc0   : > { %2021 = vmatpush1.bf16.msra.mxu1 %v5241_v45  ;;  %v5309_v45 = vld [vmem:[%s6965_s1 + $0x680] ss:$8 sps:$4 sm:$0xff]  }
  0xc1   : > { %2022 = vmatprep.subr.bf16.mxu1 %v5249_v49  ;;  %v5308_v49 = vld [vmem:[%s6965_s1 + $0x604] ss:$8 sps:$4 sm:$0xff]   ;;  %v5356_v43 = vld [vmem:[%s6965_s1 + $0x700] ss:$8 sps:$4 sm:$0xff]  }
  0xc2   : > { %1868 = vmatpush1.bf16.msra.mxu0 %v5238_v55  ;;  %v4516_v55 = vcombine.low %v2055_v27, %v6207_v47  ;;  %v2495_v27 = vld [vmem:[#allocation2 + $0xc] sm:$0x1] }
  0xc3   : > { %1869 = vmatprep.subr.bf16.mxu0 %v5246_v59  ;;  %v5331_v59 = vld [vmem:[%s6965_s1 + $0x7d4] ss:$8 sps:$4 sm:$0xff]  }
  0xc4   : > { %2023 = vmatpush1.bf16.msra.mxu1 %v5247_v52  ;;  %v5325_v52 = vld [vmem:[%s6965_s1 + $0x7e4] ss:$8 sps:$4 sm:$0xff]   ;;  %v2076_v47 = vrot.slane %v4516_v55, 3 }
  0xc5   : > { %2024 = vmatprep.subr.bf16.mxu1 %v5255_v54 }
  0xc6   : > { %1870 = vmatpush1.bf16.msra.mxu0 %v5244_v61  ;;  %v5322_v61 = vld [vmem:[%s6965_s1 + $0x764] ss:$8 sps:$4 sm:$0xff]  }
  0xc7   : > { %1871 = vmatprep.subr.bf16.mxu0 %v5252_v1 }
  0xc8   : > { %2025 = vmatpush1.bf16.msra.mxu1 %v5253_v58 }
  0xc9   : > { %2026 = vmatprep.subr.bf16.mxu1 %v5261_v60  ;;  %v5314_v60 = vld [vmem:[%s6965_s1 + $0x770] ss:$8 sps:$4 sm:$0xff]  }
  0xca   : > { %1872 = vmatpush1.bf16.msra.mxu0 %v5250_v5  ;;  %v5320_v5 = vld [vmem:[%s6965_s1 + $0x760] ss:$8 sps:$4 sm:$0xff]  }
  0xcb   : > { %1873 = vmatprep.subr.bf16.mxu0 %v5258_v9 }
  0xcc   : > { %2027 = vmatpush1.bf16.msra.mxu1 %v5259_v0  ;;  %v5337_v0 = vld [vmem:[%s6965_s1 + $0x7c4] ss:$8 sps:$4 sm:$0xff]  }
  0xcd   : > { %2311 = vmatprep.subr.bf16.mxu1 %v5269_v2 }
  0xce   : > { %1874 = vmatpush1.bf16.msra.mxu0 %v5256_v10 }
  0xcf   : > { %2045 = vmatmul.mubr.bf16.vlgmr.msra.gmra.mxu1 %v1930_v7  ;;  %2158 = vmatprep.subr.bf16.mxu0 %v5266_v13  ;;  %v5334_v13 = vld [vmem:[%s6965_s1 + $0x744] ss:$8 sps:$4 sm:$0xff]  }
  0xd0   : > { %2312 = vmatpush1.bf16.msra.mxu1 %v5267_v8  ;;  %2343 = vmatprep.mubr.bf16.mxu1 %v5599_v3  ;;  %v5335_v8 = vld [vmem:[%s6965_s1 + $0x7c0] ss:$8 sps:$4 sm:$0xff]  }
  0xd1   : > { %2313 = vmatprep.subr.bf16.mxu1 %v5275_v4  ;;  %1892 = vmatmul.mubr.bf16.vlgmr.msra.gmra.mxu0 %v1777_v15  ;;  %v5343_v4 = vld [vmem:[%s6965_s1 + $0x7b4] ss:$8 sps:$4 sm:$0xff]  }
  0xd2   : > { %2159 = vmatpush1.bf16.msra.mxu0 %v5264_v16  ;;  %2190 = vmatprep.mubr.bf16.mxu0 %v5599_v3  ;;  %v5349_v16 = vld [vmem:[%s6965_s1 + $0x7a4] ss:$8 sps:$4 sm:$0xff]  }
  0xd3   : > { %2160 = vmatprep.subr.bf16.mxu0 %v5272_v18  ;;  %v5347_v18 = vld [vmem:[%s6965_s1 + $0x7a0] ss:$8 sps:$4 sm:$0xff]  }
  0xd4   : > { %2314 = vmatpush1.bf16.msra.mxu1 %v5273_v12  ;;  %v5326_v12 = vld [vmem:[%s6965_s1 + $0x750] ss:$8 sps:$4 sm:$0xff]  }
  0xd5   : > { %2315 = vmatprep.subr.bf16.mxu1 %v5281_v14  ;;  %v5341_v14 = vld [vmem:[%s6965_s1 + $0x7b0] ss:$8 sps:$4 sm:$0xff]  }
  0xd6   : > { %2161 = vmatpush1.bf16.msra.mxu0 %v5270_v20  ;;  %v5355_v20 = vld [vmem:[%s6965_s1 + $0x794] ss:$8 sps:$4 sm:$0xff]  }
  0xd7   : > { %2162 = vmatprep.subr.bf16.mxu0 %v5278_v21  ;;  %v228_v21 = vld [vmem:[%s5719_s19 + $0x10] sm:$0x3] }
  0xd8   : > { %2316 = vmatpush1.bf16.msra.mxu1 %v5279_v17  ;;  %v5332_v17 = vld [vmem:[%s6965_s1 + $0x740] ss:$8 sps:$4 sm:$0xff]  }
  0xd9   : > { %2317 = vmatprep.subr.bf16.mxu1 %v5287_v19  ;;  %v5340_v19 = vld [vmem:[%s6965_s1 + $0x734] ss:$8 sps:$4 sm:$0xff]  }
  0xda   : > { %2163 = vmatpush1.bf16.msra.mxu0 %v5276_v24  ;;  %v5346_v24 = vld [vmem:[%s6965_s1 + $0x724] ss:$8 sps:$4 sm:$0xff]  }
  0xdb   : > { %2164 = vmatprep.subr.bf16.mxu0 %v5284_v25  ;;  %v5353_v25 = vld [vmem:[%s6965_s1 + $0x790] ss:$8 sps:$4 sm:$0xff]  }
  0xdc   : > { %2318 = vmatpush1.bf16.msra.mxu1 %v5285_v22  ;;  %v5338_v22 = vld [vmem:[%s6965_s1 + $0x730] ss:$8 sps:$4 sm:$0xff]  }
  0xdd   : > { %2319 = vmatprep.subr.bf16.mxu1 %v5293_v23  ;;  %v233_v23 = vunpack.c.l.bf16 %v228_v21  ;;  %v5402_v21 = vld [vmem:[%s6965_s1 + $0x814] ss:$8 sps:$4 sm:$0xff]  }
  0xde   : > { %2165 = vmatpush1.bf16.msra.mxu0 %v5282_v30  ;;  %v5361_v30 = vld [vmem:[%s6965_s1 + $0x784] ss:$8 sps:$4 sm:$0xff]  }
  0xdf   : > { %2166 = vmatprep.subr.bf16.mxu0 %v5290_v32  ;;  %vm238_vm4 = vcmp.gt.f32.partialorder %v233_v23, 0.0  ;;  %v5344_v32 = vld [vmem:[%s6965_s1 + $0x720] ss:$8 sps:$4 sm:$0xff]  }
  0xe0   : > { %2320 = vmatpush1.bf16.msra.mxu1 %v5291_v26  ;;  %v6442_v26 = vld [vmem:[#allocation2 + $0x8] sm:$0xe] }
  0xe1   : > { %2321 = vmatprep.subr.bf16.mxu1 %v5299_v29  ;;  %v243_v29 = vmul.f32 0.2, %v233_v23 }
  0xe2   : > { %2167 = vmatpush1.bf16.msra.mxu0 %v5288_v35 }
  0xe3   : > { %2168 = vmatprep.subr.bf16.mxu0 %v5296_v38  ;;  %v248_v31 = vsel %vm238_vm4, %v233_v23, %v243_v29  ;;  %v5350_v38 = vld [vmem:[%s6965_s1 + $0x710] ss:$8 sps:$4 sm:$0xff]   ;;  %v5408_v29 = vld [vmem:[%s6965_s1 + $0x804] ss:$8 sps:$4 sm:$0xff]  }
  0xe4   : > { %2322 = vmatpush1.bf16.msra.mxu1 %v5297_v33  ;;  %v5352_v33 = vld [vmem:[%s6965_s1 + $0x714] ss:$8 sps:$4 sm:$0xff]   ;;  %v4933_v35 = vpack.c.bf16 %v248_v31, %v248_v31 }
  0xe5   : > { %2323 = vmatprep.subr.bf16.mxu1 %v5305_v34  ;;  %v4614_v34 = vcombine.low %v6442_v26, %v2495_v27  ;;  %v5417_v27 = vld [vmem:[%s6965_s1 + $0x9f0] ss:$8 sps:$4 sm:$0xff]  }
  0xe6   : > { %2169 = vmatpush1.bf16.msra.mxu0 %v5294_v41  ;;  %274 = vst [vmem:[#allocation2 + $0x10] sm:$0x3] %v4933_v35  ;;  %v5367_v41 = vld [vmem:[%s6965_s1 + $0x8f0] ss:$8 sps:$4 sm:$0xff]   ;;  %v5423_v35 = vld [vmem:[%s6965_s1 + $0x9e0] ss:$8 sps:$4 sm:$0xff]  }
  0xe7   : > { %2170 = vmatprep.subr.bf16.mxu0 %v5302_v44 }
  0xe8   : > { %2324 = vmatpush1.bf16.msra.mxu1 %v5303_v39  ;;  %v5358_v39 = vld [vmem:[%s6965_s1 + $0x704] ss:$8 sps:$4 sm:$0xff]  }
  0xe9   : > { %2325 = vmatprep.subr.bf16.mxu1 %v5311_v40  ;;  %v2518_v40 = vrot.slane %v4614_v34, 1  ;;  %v5406_v34 = vld [vmem:[%s6965_s1 + $0x800] ss:$8 sps:$4 sm:$0xff]  }
  0xea   : > { %2171 = vmatpush1.bf16.msra.mxu0 %v5300_v48 }
  0xeb   : > { %2172 = vmatprep.subr.bf16.mxu0 %v5308_v49  ;;  %v5381_v49 = vld [vmem:[%s6965_s1 + $0x8d4] ss:$8 sps:$4 sm:$0xff]  }
  0xec   : > { %2326 = vmatpush1.bf16.msra.mxu1 %v5309_v45  ;;  %v5373_v45 = vld [vmem:[%s6965_s1 + $0x8e0] ss:$8 sps:$4 sm:$0xff]  }
  0xed   : > { %2600 = vmatprep.subr.bf16.mxu1 %v5319_v46  ;;  %v5364_v46 = vld [vmem:[%s6965_s1 + $0x874] ss:$8 sps:$4 sm:$0xff]  }
  0xee   : > { %2173 = vmatpush1.bf16.msra.mxu0 %v5306_v53  ;;  %v5372_v53 = vld [vmem:[%s6965_s1 + $0x864] ss:$8 sps:$4 sm:$0xff]  }
  0xef   : > { %v558_v54 = vpop.f32.mrf.mxu1  ;;  %2344 = vmatmul.mubr.bf16.vlgmr.msra.gmra.mxu1 %v2229_v50  ;;  %2451 = vmatprep.subr.bf16.mxu0 %v5316_v56  ;;  %v437_v2 = vpop.f32.mrf.mxu0  ;;  %v5362_v50 = vld [vmem:[%s6965_s1 + $0x870] ss:$8 sps:$4 sm:$0xff]  }
  0xf0   : > { %2601 = vmatpush1.bf16.msra.mxu1 %v5317_v51  ;;  %2632 = vmatprep.mubr.bf16.mxu1 %v5599_v3  ;;  %v6397_v7 = vadd.f32 %v558_v54, %v437_v2  ;;  %v5387_v54 = vld [vmem:[%s6965_s1 + $0x8c4] ss:$8 sps:$4 sm:$0xff]  }
  0xf1   : > { %v560_v58 = vpop.f32.mrf.mxu1  ;;  %2602 = vmatprep.subr.bf16.mxu1 %v5325_v52  ;;  %2191 = vmatmul.mubr.bf16.vlgmr.msra.gmra.mxu0 %v2076_v47  ;;  %v439_v9 = vpop.f32.mrf.mxu0  ;;  %v5379_v52 = vld [vmem:[%s6965_s1 + $0x8d0] ss:$8 sps:$4 sm:$0xff]   ;;  %v5385_v47 = vld [vmem:[%s6965_s1 + $0x8c0] ss:$8 sps:$4 sm:$0xff]  }
  0xf2   : > { %2452 = vmatpush1.bf16.msra.mxu0 %v5314_v60  ;;  %v6405_v10 = vadd.f32 %v560_v58, %v439_v9  ;;  %2483 = vmatprep.mubr.bf16.mxu0 %v5599_v3  ;;  %v5397_v9 = vld [vmem:[%s6965_s1 + $0x8a0] ss:$8 sps:$4 sm:$0xff]  }
  0xf3   : > { %v562_v62 = vpop.f32.mrf.mxu1  ;;  %2453 = vmatprep.subr.bf16.mxu0 %v5322_v61  ;;  %v441_v11 = vpop.f32.mrf.mxu0 }
  0xf4   : > { %2603 = vmatpush1.bf16.msra.mxu1 %v5323_v57  ;;  %v5370_v57 = vld [vmem:[%s6965_s1 + $0x860] ss:$8 sps:$4 sm:$0xff]   ;;  %v2643_v11 = vld [vmem:[#allocation2 + $0xc] sm:$0x3] }
  0xf5   : > { %2604 = vmatprep.subr.bf16.mxu1 %v5331_v59  ;;  %v563_v1 = vpop.f32.mrf.mxu1  ;;  %v442_v15 = vpop.f32.mrf.mxu0  ;;  %v5378_v59 = vld [vmem:[%s6965_s1 + $0x854] ss:$8 sps:$4 sm:$0xff]  }
  0xf6   : > { %2454 = vmatpush1.bf16.msra.mxu0 %v5320_v5  ;;  %v5396_v15 = vld [vmem:[%s6965_s1 + $0x824] ss:$8 sps:$4 sm:$0xff]  }
  0xf7   : > { %2455 = vmatprep.subr.bf16.mxu0 %v5328_v6  ;;  %v5384_v6 = vld [vmem:[%s6965_s1 + $0x844] ss:$8 sps:$4 sm:$0xff]  }
  0xf8   : > { %2605 = vmatpush1.bf16.msra.mxu1 %v5329_v63  ;;  %v5376_v63 = vld [vmem:[%s6965_s1 + $0x850] ss:$8 sps:$4 sm:$0xff]  }
  0xf9   : > { %2606 = vmatprep.subr.bf16.mxu1 %v5337_v0  ;;  %v5391_v0 = vld [vmem:[%s6965_s1 + $0x8b0] ss:$8 sps:$4 sm:$0xff]  }
  0xfa   : > { %2456 = vmatpush1.bf16.msra.mxu0 %v5326_v12  ;;  %v5388_v12 = vld [vmem:[%s6965_s1 + $0x830] ss:$8 sps:$4 sm:$0xff]  }
  0xfb   : > { %2457 = vmatprep.subr.bf16.mxu0 %v5334_v13  ;;  %v5403_v13 = vld [vmem:[%s6965_s1 + $0x890] ss:$8 sps:$4 sm:$0xff]  }
  0xfc   : > { %2607 = vmatpush1.bf16.msra.mxu1 %v5335_v8  ;;  %v5382_v8 = vld [vmem:[%s6965_s1 + $0x840] ss:$8 sps:$4 sm:$0xff]  }
  0xfd   : > { %2608 = vmatprep.subr.bf16.mxu1 %v5343_v4  ;;  %v5390_v4 = vld [vmem:[%s6965_s1 + $0x834] ss:$8 sps:$4 sm:$0xff]  }
  0xfe   : > { %2458 = vmatpush1.bf16.msra.mxu0 %v5332_v17  ;;  %v4647_v17 = vcombine.low %v6442_v26, %v2643_v11  ;;  %v5400_v26 = vld [vmem:[%s6965_s1 + $0x810] ss:$8 sps:$4 sm:$0xff]  }
  0xff   : > { %2459 = vmatprep.subr.bf16.mxu0 %v5340_v19  ;;  %v5394_v19 = vld [vmem:[%s6965_s1 + $0x820] ss:$8 sps:$4 sm:$0xff]  }
 0x100   : > { %2609 = vmatpush1.bf16.msra.mxu1 %v5341_v14  ;;  %v6547_v14 = vld [vmem:[#allocation2 + $0x8] sm:$0xc]  ;;  %v2665_v23 = vshrl.u32 %v4647_v17, 16 }
 0x101   : > { %2610 = vmatprep.subr.bf16.mxu1 %v5349_v16  ;;  %v5411_v16 = vld [vmem:[%s6965_s1 + $0x884] ss:$8 sps:$4 sm:$0xff]  }
 0x102   : > { %2460 = vmatpush1.bf16.msra.mxu0 %v5338_v22  ;;  %v5419_v22 = vld [vmem:[%s6965_s1 + $0x9f4] ss:$8 sps:$4 sm:$0xff]   ;;  %v2667_v31 = vrot.slane %v2665_v23, 1 }
 0x103   : > { %2461 = vmatprep.subr.bf16.mxu0 %v5346_v24  ;;  %v2668_v24 = vshll.u32 %v4647_v17, 16  ;;  %v5450_v17 = vld [vmem:[%s6965_s1 + $0x910] ss:$8 sps:$4 sm:$0xff]  }
 0x104   : > { %2611 = vmatpush1.bf16.msra.mxu1 %v5347_v18  ;;  %v4680_v18 = vcombine.low %v6547_v14, %v2643_v11  ;;  %v5459_v11 = vld [vmem:[%s6965_s1 + $0x980] ss:$8 sps:$4 sm:$0xff]  }
 0x105   : > { %2612 = vmatprep.subr.bf16.mxu1 %v5355_v20  ;;  %v5409_v20 = vld [vmem:[%s6965_s1 + $0x880] ss:$8 sps:$4 sm:$0xff]  }
 0x106   : > { %2462 = vmatpush1.bf16.msra.mxu0 %v5344_v32  ;;  %v2670_v32 = vrot.slane %v2668_v24, 2  ;;  %v5456_v24 = vld [vmem:[%s6965_s1 + $0x900] ss:$8 sps:$4 sm:$0xff]  }
 0x107   : > { %2463 = vmatprep.subr.bf16.mxu0 %v5352_v33 }
 0x108   : > { %2613 = vmatpush1.bf16.msra.mxu1 %v5353_v25  ;;  %v2817_v25 = vrot.slane %v4680_v18, 2  ;;  %v5466_v18 = vld [vmem:[%s6965_s1 + $0xaf0] ss:$8 sps:$4 sm:$0xff]  }
 0x109   : > { %2614 = vmatprep.subr.bf16.mxu1 %v5361_v30  ;;  %v5425_v30 = vld [vmem:[%s6965_s1 + $0x9e4] ss:$8 sps:$4 sm:$0xff]  }
 0x10a   : > { %2464 = vmatpush1.bf16.msra.mxu0 %v5350_v38  ;;  %v5431_v38 = vld [vmem:[%s6965_s1 + $0x9d4] ss:$8 sps:$4 sm:$0xff]  }
 0x10b   : > { %2465 = vmatprep.subr.bf16.mxu0 %v5358_v39  ;;  %v2671_v39 = vor.u32 %v2670_v32, %v2667_v31  ;;  %v5462_v32 = vld [vmem:[%s6965_s1 + $0xa70] ss:$8 sps:$4 sm:$0xff]  }
 0x10c   : > { %2615 = vmatpush1.bf16.msra.mxu1 %v5359_v36  ;;  %v5414_v36 = vld [vmem:[%s6965_s1 + $0x974] ss:$8 sps:$4 sm:$0xff]  }
 0x10d   : > { %2899 = vmatprep.subr.bf16.mxu1 %v5369_v37 }
 0x10e   : > { %2466 = vmatpush1.bf16.msra.mxu0 %v5356_v43  ;;  %v5422_v43 = vld [vmem:[%s6965_s1 + $0x964] ss:$8 sps:$4 sm:$0xff]  }
 0x10f   : > { %v855_v44 = vpop.f32.mrf.mxu1  ;;  %2633 = vmatmul.mubr.bf16.vlgmr.msra.gmra.mxu1 %v2518_v40  ;;  %2753 = vmatprep.subr.bf16.mxu0 %v5364_v46 }
 0x110   : > { %2900 = vmatpush1.bf16.msra.mxu1 %v5367_v41  ;;  %2931 = vmatprep.mubr.bf16.mxu1 %v5599_v3  ;;  %v5412_v41 = vld [vmem:[%s6965_s1 + $0x970] ss:$8 sps:$4 sm:$0xff]  }
 0x111   : > { %v857_v48 = vpop.f32.mrf.mxu1  ;;  %2901 = vmatprep.subr.bf16.mxu1 %v5375_v42  ;;  %v702_v56 = vpop.f32.mrf.mxu0  ;;  %2484 = vmatmul.mubr.bf16.vlgmr.msra.gmra.mxu0 %v6311_v28  ;;  %v5393_v28 = vld [vmem:[%s6965_s1 + $0x8b4] ss:$8 sps:$4 sm:$0xff]   ;;  %v5429_v42 = vld [vmem:[%s6965_s1 + $0x9d0] ss:$8 sps:$4 sm:$0xff]  }
 0x112   : > { %v709_v58 = vadd.f32 %v702_v56, %v6397_v7  ;;  %2754 = vmatpush1.bf16.msra.mxu0 %v5362_v50  ;;  %2785 = vmatprep.mubr.bf16.mxu0 %v5599_v3  ;;  %v5399_v7 = vld [vmem:[%s6965_s1 + $0x8a4] ss:$8 sps:$4 sm:$0xff]   ;;  %v5435_v50 = vld [vmem:[%s6965_s1 + $0x9c0] ss:$8 sps:$4 sm:$0xff]  }
 0x113   : > { %v859_v51 = vpop.f32.mrf.mxu1  ;;  %v704_v60 = vpop.f32.mrf.mxu0  ;;  %2755 = vmatprep.subr.bf16.mxu0 %v5372_v53  ;;  %v5443_v53 = vld [vmem:[%s6965_s1 + $0x9b4] ss:$8 sps:$4 sm:$0xff]  }
 0x114   : > { %2902 = vmatpush1.bf16.msra.mxu1 %v5373_v45  ;;  %v710_v61 = vadd.f32 %v704_v60, %v6405_v10  ;;  %v6512_v62 = vadd.f32 %v855_v44, %v709_v58  ;;  %v5405_v10 = vld [vmem:[%s6965_s1 + $0x894] ss:$8 sps:$4 sm:$0xff]   ;;  %v5437_v44 = vld [vmem:[%s6965_s1 + $0x9c4] ss:$8 sps:$4 sm:$0xff]   ;;  %v5426_v58 = vld [vmem:[%s6965_s1 + $0x950] ss:$8 sps:$4 sm:$0xff]  }
 0x115   : > { %2903 = vmatprep.subr.bf16.mxu1 %v5381_v49  ;;  %v860_v55 = vpop.f32.mrf.mxu1  ;;  %v706_v1 = vpop.f32.mrf.mxu0  ;;  %v5420_v49 = vld [vmem:[%s6965_s1 + $0x960] ss:$8 sps:$4 sm:$0xff]   ;;  %v5434_v60 = vld [vmem:[%s6965_s1 + $0x944] ss:$8 sps:$4 sm:$0xff]  }
 0x116   : > { %v6521_v2 = vadd.f32 %v857_v48, %v710_v61  ;;  %2756 = vmatpush1.bf16.msra.mxu0 %v5370_v57  ;;  %v5432_v61 = vld [vmem:[%s6965_s1 + $0x940] ss:$8 sps:$4 sm:$0xff]   ;;  %v2942_v1 = vld [vmem:[#allocation2 + $0xc] sm:$0x7] }
 0x117   : > { %v707_v5 = vpop.f32.mrf.mxu0  ;;  %2757 = vmatprep.subr.bf16.mxu0 %v5378_v59  ;;  %v5441_v59 = vld [vmem:[%s6965_s1 + $0x9b0] ss:$8 sps:$4 sm:$0xff]  }
 0x118   : > { %2904 = vmatpush1.bf16.msra.mxu1 %v5379_v52  ;;  %v5428_v52 = vld [vmem:[%s6965_s1 + $0x954] ss:$8 sps:$4 sm:$0xff]   ;;  %v5453_v5 = vld [vmem:[%s6965_s1 + $0x990] ss:$8 sps:$4 sm:$0xff]  }
 0x119   : > { %2905 = vmatprep.subr.bf16.mxu1 %v5387_v54 }
 0x11a   : > { %2758 = vmatpush1.bf16.msra.mxu0 %v5376_v63  ;;  %v5440_v63 = vld [vmem:[%s6965_s1 + $0x934] ss:$8 sps:$4 sm:$0xff]  }
 0x11b   : > { %2759 = vmatprep.subr.bf16.mxu0 %v5384_v6  ;;  %v3095_v6 = vld [vmem:[#allocation2 + $0x8] sm:$0x8] }
 0x11c   : > { %2906 = vmatpush1.bf16.msra.mxu1 %v5385_v47 }
 0x11d   : > { %2907 = vmatprep.subr.bf16.mxu1 %v5393_v28  ;;  %v5449_v28 = vld [vmem:[%s6965_s1 + $0x9a4] ss:$8 sps:$4 sm:$0xff]  }
 0x11e   : > { %2760 = vmatpush1.bf16.msra.mxu0 %v5382_v8  ;;  %v5461_v8 = vld [vmem:[%s6965_s1 + $0x984] ss:$8 sps:$4 sm:$0xff]  }
 0x11f   : > { %2761 = vmatprep.subr.bf16.mxu0 %v5390_v4  ;;  %v4746_v4 = vcombine.low %v3095_v6, %v2942_v1  ;;  %v5501_v6 = vld [vmem:[%s6965_s1 + $0xa14] ss:$8 sps:$4 sm:$0xff]  }
 0x120   : > { %2908 = vmatpush1.bf16.msra.mxu1 %v5391_v0  ;;  %v5455_v0 = vld [vmem:[%s6965_s1 + $0x994] ss:$8 sps:$4 sm:$0xff]  }
 0x121   : > { %2909 = vmatprep.subr.bf16.mxu1 %v5399_v7  ;;  %v5446_v7 = vld [vmem:[%s6965_s1 + $0x924] ss:$8 sps:$4 sm:$0xff]  }
 0x122   : > { %2762 = vmatpush1.bf16.msra.mxu0 %v5388_v12  ;;  %v5452_v12 = vld [vmem:[%s6965_s1 + $0x914] ss:$8 sps:$4 sm:$0xff]  }
 0x123   : > { %2763 = vmatprep.subr.bf16.mxu0 %v5396_v15 }
 0x124   : > { %2910 = vmatpush1.bf16.msra.mxu1 %v5397_v9  ;;  %v4713_v9 = vcombine.low %v6547_v14, %v2942_v1 }
 0x125   : > { %2911 = vmatprep.subr.bf16.mxu1 %v5405_v10  ;;  %v5444_v10 = vld [vmem:[%s6965_s1 + $0x920] ss:$8 sps:$4 sm:$0xff]  }
 0x126   : > { %2764 = vmatpush1.bf16.msra.mxu0 %v5394_v19  ;;  %v2964_v14 = vshrl.u32 %v4713_v9, 16  ;;  %v2967_v15 = vshll.u32 %v4713_v9, 16  ;;  %v5458_v19 = vld [vmem:[%s6965_s1 + $0x904] ss:$8 sps:$4 sm:$0xff]   ;;  %v5499_v9 = vld [vmem:[%s6965_s1 + $0xa10] ss:$8 sps:$4 sm:$0xff]  }
 0x127   : > { %2765 = vmatprep.subr.bf16.mxu0 %v5402_v21 }
 0x128   : > { %2912 = vmatpush1.bf16.msra.mxu1 %v5403_v13  ;;  %v5468_v13 = vld [vmem:[%s6965_s1 + $0xaf4] ss:$8 sps:$4 sm:$0xff]   ;;  %v2966_v21 = vrot.slane %v2964_v14, 2  ;;  %v5521_v14 = vld [vmem:[%s6965_s1 + $0xbe0] ss:$8 sps:$4 sm:$0xff]  }
 0x129   : > { %2913 = vmatprep.subr.bf16.mxu1 %v5411_v16  ;;  %v3116_v16 = vrot.slane %v4746_v4, 3  ;;  %v5515_v4 = vld [vmem:[%s6965_s1 + $0xbf0] ss:$8 sps:$4 sm:$0xff]  }
 0x12a   : > { %2766 = vmatpush1.bf16.msra.mxu0 %v5400_v26  ;;  %v5464_v26 = vld [vmem:[%s6965_s1 + $0xa74] ss:$8 sps:$4 sm:$0xff]  }
 0x12b   : > { %2767 = vmatprep.subr.bf16.mxu0 %v5408_v29  ;;  %v5480_v29 = vld [vmem:[%s6965_s1 + $0xad4] ss:$8 sps:$4 sm:$0xff]  }
 0x12c   : > { %2914 = vmatpush1.bf16.msra.mxu1 %v5409_v20  ;;  %v5474_v20 = vld [vmem:[%s6965_s1 + $0xae4] ss:$8 sps:$4 sm:$0xff]  }
 0x12d   : > { %3198 = vmatprep.subr.bf16.mxu1 %v5419_v22  ;;  %v2969_v22 = vrot.slane %v2967_v15, 3  ;;  %v5513_v15 = vld [vmem:[%s6965_s1 + $0xb74] ss:$8 sps:$4 sm:$0xff]  }
 0x12e   : > { %2768 = vmatpush1.bf16.msra.mxu0 %v5406_v34  ;;  %v5471_v34 = vld [vmem:[%s6965_s1 + $0xa64] ss:$8 sps:$4 sm:$0xff]  }
 0x12f   : > { %v1150_v33 = vpop.f32.mrf.mxu1  ;;  %2932 = vmatmul.mubr.bf16.vlgmr.msra.gmra.mxu1 %v2817_v25  ;;  %3052 = vmatprep.subr.bf16.mxu0 %v5414_v36  ;;  %v5472_v25 = vld [vmem:[%s6965_s1 + $0xae0] ss:$8 sps:$4 sm:$0xff]  }
 0x130   : > { %3199 = vmatpush1.bf16.msra.mxu1 %v5417_v27  ;;  %3230 = vmatprep.mubr.bf16.mxu1 %v5599_v3 }
 0x131   : > { %v1152_v37 = vpop.f32.mrf.mxu1  ;;  %3200 = vmatprep.subr.bf16.mxu1 %v5425_v30  ;;  %v1001_v46 = vpop.f32.mrf.mxu0  ;;  %2786 = vmatmul.mubr.bf16.vlgmr.msra.gmra.mxu0 %v2671_v39  ;;  %v2970_v30 = vor.u32 %v2969_v22, %v2966_v21  ;;  %v5469_v39 = vld [vmem:[%s6965_s1 + $0xa60] ss:$8 sps:$4 sm:$0xff]   ;;  %v5527_v21 = vld [vmem:[%s6965_s1 + $0xbd0] ss:$8 sps:$4 sm:$0xff]   ;;  %v5520_v22 = vld [vmem:[%s6965_s1 + $0xb64] ss:$8 sps:$4 sm:$0xff]  }
 0x132   : > { %v1008_v48 = vadd.f32 %v1001_v46, %v6512_v62  ;;  %3053 = vmatpush1.bf16.msra.mxu0 %v5412_v41  ;;  %3084 = vmatprep.mubr.bf16.mxu0 %v5599_v3  ;;  %v5447_v62 = vld [vmem:[%s6965_s1 + $0x9a0] ss:$8 sps:$4 sm:$0xff]  }
 0x133   : > { %v1154_v40 = vpop.f32.mrf.mxu1  ;;  %v1003_v51 = vpop.f32.mrf.mxu0  ;;  %3054 = vmatprep.subr.bf16.mxu0 %v5422_v43  ;;  %v5492_v43 = vld [vmem:[%s6965_s1 + $0xab4] ss:$8 sps:$4 sm:$0xff]  }
 0x134   : > { %3201 = vmatpush1.bf16.msra.mxu1 %v5423_v35  ;;  %v1009_v54 = vadd.f32 %v1003_v51, %v6521_v2  ;;  %v6620_v55 = vadd.f32 %v1150_v33, %v1008_v48  ;;  %v5438_v2 = vld [vmem:[%s6965_s1 + $0x930] ss:$8 sps:$4 sm:$0xff]   ;;  %v5486_v35 = vld [vmem:[%s6965_s1 + $0xac4] ss:$8 sps:$4 sm:$0xff]   ;;  %v5484_v40 = vld [vmem:[%s6965_s1 + $0xac0] ss:$8 sps:$4 sm:$0xff]  }
 0x135   : > { %3202 = vmatprep.subr.bf16.mxu1 %v5431_v38  ;;  %v1155_v45 = vpop.f32.mrf.mxu1  ;;  %v1005_v56 = vpop.f32.mrf.mxu0  ;;  %v5478_v33 = vld [vmem:[%s6965_s1 + $0xad0] ss:$8 sps:$4 sm:$0xff]   ;;  %v3382_v51 = vld [vmem:[#allocation2 + $0xc] sm:$0xf] }
 0x136   : > { %v6623_v57 = vadd.f32 %v1152_v37, %v1009_v54  ;;  %3055 = vmatpush1.bf16.msra.mxu0 %v5420_v49  ;;  %v5475_v48 = vld [vmem:[%s6965_s1 + $0xa50] ss:$8 sps:$4 sm:$0xff]   ;;  %v5483_v54 = vld [vmem:[%s6965_s1 + $0xa44] ss:$8 sps:$4 sm:$0xff]  }
 0x137   : > { %v1006_v47 = vpop.f32.mrf.mxu0  ;;  %3056 = vmatprep.subr.bf16.mxu0 %v5428_v52  ;;  %v6736_v52 = vld [vmem:[#allocation2 + $0x10] sm:$0x1] }
 0x138   : > { %3203 = vmatpush1.bf16.msra.mxu1 %v5429_v42  ;;  %v5477_v42 = vld [vmem:[%s6965_s1 + $0xa54] ss:$8 sps:$4 sm:$0xff]   ;;  %v4811_v56 = vcombine.low %v3382_v51, %v6736_v52 }
 0x139   : > { %3204 = vmatprep.subr.bf16.mxu1 %v5437_v44  ;;  %v5504_v47 = vld [vmem:[%s6965_s1 + $0xa94] ss:$8 sps:$4 sm:$0xff]  }
 0x13a   : > { %3057 = vmatpush1.bf16.msra.mxu0 %v5426_v58  ;;  %v5496_v58 = vld [vmem:[%s6965_s1 + $0xaa0] ss:$8 sps:$4 sm:$0xff]  }
 0x13b   : > { %3058 = vmatprep.subr.bf16.mxu0 %v5434_v60  ;;  %v3409_v60 = vshll.u32 %v4811_v56, 16 }
 0x13c   : > { %3205 = vmatpush1.bf16.msra.mxu1 %v5435_v50  ;;  %v5490_v50 = vld [vmem:[%s6965_s1 + $0xab0] ss:$8 sps:$4 sm:$0xff]  }
 0x13d   : > { %3206 = vmatprep.subr.bf16.mxu1 %v5443_v53  ;;  %v3411_v1 = vrot.slane %v3409_v60, 1  ;;  %v5550_v60 = vld [vmem:[%s6965_s1 + $0xb14] ss:$8 sps:$4 sm:$0xff]  }
 0x13e   : > { %3059 = vmatpush1.bf16.msra.mxu0 %v5432_v61  ;;  %v5502_v61 = vld [vmem:[%s6965_s1 + $0xa90] ss:$8 sps:$4 sm:$0xff]  }
 0x13f   : > { %3060 = vmatprep.subr.bf16.mxu0 %v5440_v63  ;;  %v5510_v63 = vld [vmem:[%s6965_s1 + $0xa84] ss:$8 sps:$4 sm:$0xff]  }
 0x140   : > { %3207 = vmatpush1.bf16.msra.mxu1 %v5441_v59  ;;  %v5489_v59 = vld [vmem:[%s6965_s1 + $0xa34] ss:$8 sps:$4 sm:$0xff]  }
 0x141   : > { %3208 = vmatprep.subr.bf16.mxu1 %v5449_v28  ;;  %v5487_v28 = vld [vmem:[%s6965_s1 + $0xa30] ss:$8 sps:$4 sm:$0xff]  }
 0x142   : > { %3061 = vmatpush1.bf16.msra.mxu0 %v5438_v2  ;;  %v5493_v2 = vld [vmem:[%s6965_s1 + $0xa20] ss:$8 sps:$4 sm:$0xff]  }
 0x143   : > { %3062 = vmatprep.subr.bf16.mxu0 %v5446_v7  ;;  %v5517_v7 = vld [vmem:[%s6965_s1 + $0xbf4] ss:$8 sps:$4 sm:$0xff]  }
 0x144   : > { %3209 = vmatpush1.bf16.msra.mxu1 %v5447_v62  ;;  %v5495_v62 = vld [vmem:[%s6965_s1 + $0xa24] ss:$8 sps:$4 sm:$0xff]  }
 0x145   : > { %3210 = vmatprep.subr.bf16.mxu1 %v5455_v0  ;;  %v3407_v0 = vshrl.u32 %v4811_v56, 16  ;;  %v5559_v56 = vld [vmem:[%s6965_s1 + $0xb84] ss:$8 sps:$4 sm:$0xff]  }
 0x146   : > { %3063 = vmatpush1.bf16.msra.mxu0 %v5444_v10  ;;  %v5507_v10 = vld [vmem:[%s6965_s1 + $0xa04] ss:$8 sps:$4 sm:$0xff]  }
 0x147   : > { %3064 = vmatprep.subr.bf16.mxu0 %v5452_v12 }
 0x148   : > { %3211 = vmatpush1.bf16.msra.mxu1 %v5453_v5  ;;  %v5508_v5 = vld [vmem:[%s6965_s1 + $0xa80] ss:$8 sps:$4 sm:$0xff]  }
 0x149   : > { %3212 = vmatprep.subr.bf16.mxu1 %v5461_v8  ;;  %v3412_v8 = vor.u32 %v3411_v1, %v3407_v0  ;;  %v5554_v1 = vld [vmem:[%s6965_s1 + $0xb00] ss:$8 sps:$4 sm:$0xff]  }
 0x14a   : > { %3065 = vmatpush1.bf16.msra.mxu0 %v5450_v17  ;;  %v5529_v17 = vld [vmem:[%s6965_s1 + $0xbd4] ss:$8 sps:$4 sm:$0xff]  }
 0x14b   : > { %3066 = vmatprep.subr.bf16.mxu0 %v5458_v19  ;;  %v3241_v19 = vld [vmem:[#allocation2 + $0xc] sm:$0xf] }
 0x14c   : > { %3213 = vmatpush1.bf16.msra.mxu1 %v5459_v11  ;;  %v5523_v11 = vld [vmem:[%s6965_s1 + $0xbe4] ss:$8 sps:$4 sm:$0xff]  }
 0x14d   : > { %3494 = vmatprep.subr.bf16.mxu1 %v5468_v13  ;;  %v5505_v13 = vld [vmem:[%s6965_s1 + $0xa00] ss:$8 sps:$4 sm:$0xff]  }
 0x14e   : > { %3067 = vmatpush1.bf16.msra.mxu0 %v5456_v24 }
 0x14f   : > { %v1443_v23 = vpop.f32.mrf.mxu1  ;;  %3231 = vmatmul.mubr.bf16.vlgmr.msra.gmra.mxu1 %v3116_v16  ;;  %3339 = vmatprep.subr.bf16.mxu0 %v5464_v26 }
 0x150   : > { %3495 = vmatpush1.bf16.msra.mxu1 %v5466_v18  ;;  %3526 = vmatprep.mubr.bf16.mxu1 %v5599_v3 }
 0x151   : > { %v1445_v27 = vpop.f32.mrf.mxu1  ;;  %3496 = vmatprep.subr.bf16.mxu1 %v5474_v20  ;;  %v1303_v37 = vpop.f32.mrf.mxu0  ;;  %3085 = vmatmul.mubr.bf16.vlgmr.msra.gmra.mxu0 %v2970_v30  ;;  %v5511_v20 = vld [vmem:[%s6965_s1 + $0xb70] ss:$8 sps:$4 sm:$0xff]  }
 0x152   : > { %v1310_v38 = vadd.f32 %v1303_v37, %v6620_v55  ;;  %3340 = vmatpush1.bf16.msra.mxu0 %v5462_v32  ;;  %3371 = vmatprep.mubr.bf16.mxu0 %v5599_v3  ;;  %v5498_v55 = vld [vmem:[%s6965_s1 + $0xaa4] ss:$8 sps:$4 sm:$0xff]   ;;  %v5541_v32 = vld [vmem:[%s6965_s1 + $0xbb4] ss:$8 sps:$4 sm:$0xff]  }
 0x153   : > { %v1447_v31 = vpop.f32.mrf.mxu1  ;;  %v1305_v41 = vpop.f32.mrf.mxu0  ;;  %3341 = vmatprep.subr.bf16.mxu0 %v5471_v34 }
 0x154   : > { %3497 = vmatpush1.bf16.msra.mxu1 %v5472_v25  ;;  %v1311_v44 = vadd.f32 %v1305_v41, %v6623_v57  ;;  %v6725_v45 = vadd.f32 %v1443_v23, %v1310_v38  ;;  %v5481_v57 = vld [vmem:[%s6965_s1 + $0xa40] ss:$8 sps:$4 sm:$0xff]   ;;  %v5535_v23 = vld [vmem:[%s6965_s1 + $0xbc4] ss:$8 sps:$4 sm:$0xff]   ;;  %v5526_v31 = vld [vmem:[%s6965_s1 + $0xb54] ss:$8 sps:$4 sm:$0xff]  }
 0x155   : > { %3498 = vmatprep.subr.bf16.mxu1 %v5480_v29  ;;  %v1448_v36 = vpop.f32.mrf.mxu1  ;;  %v1307_v46 = vpop.f32.mrf.mxu0  ;;  %v5533_v29 = vld [vmem:[%s6965_s1 + $0xbc0] ss:$8 sps:$4 sm:$0xff]   ;;  %v5539_v38 = vld [vmem:[%s6965_s1 + $0xbb0] ss:$8 sps:$4 sm:$0xff]  }
 0x156   : > { %v6731_v49 = vadd.f32 %v1445_v27, %v1311_v44  ;;  %3342 = vmatpush1.bf16.msra.mxu0 %v5469_v39  ;;  %v5518_v27 = vld [vmem:[%s6965_s1 + $0xb60] ss:$8 sps:$4 sm:$0xff]   ;;  %v5524_v36 = vld [vmem:[%s6965_s1 + $0xb50] ss:$8 sps:$4 sm:$0xff]   ;;  %v3537_v39 = vld [vmem:[#allocation2 + $0xc] sm:$0xe] }
 0x157   : > { %v1308_v53 = vpop.f32.mrf.mxu0  ;;  %3343 = vmatprep.subr.bf16.mxu0 %v5477_v42  ;;  %v5532_v42 = vld [vmem:[%s6965_s1 + $0xb44] ss:$8 sps:$4 sm:$0xff]   ;;  %v5545_v46 = vld [vmem:[%s6965_s1 + $0xba0] ss:$8 sps:$4 sm:$0xff]  }
 0x158   : > { %3499 = vmatpush1.bf16.msra.mxu1 %v5478_v33  ;;  %v5536_v53 = vld [vmem:[%s6965_s1 + $0xb30] ss:$8 sps:$4 sm:$0xff]  }
 0x159   : > { %3500 = vmatprep.subr.bf16.mxu1 %v5486_v35 }
 0x15a   : > { %3344 = vmatpush1.bf16.msra.mxu0 %v5475_v48  ;;  %v5538_v48 = vld [vmem:[%s6965_s1 + $0xb34] ss:$8 sps:$4 sm:$0xff]  }
 0x15b   : > { %3345 = vmatprep.subr.bf16.mxu0 %v5483_v54  ;;  %v5551_v54 = vld [vmem:[%s6965_s1 + $0xb90] ss:$8 sps:$4 sm:$0xff]  }
 0x15c   : > { %3501 = vmatpush1.bf16.msra.mxu1 %v5484_v40  ;;  %v6843_v40 = vld [vmem:[#allocation2 + $0x10] sm:$0x3] }
 0x15d   : > { %3502 = vmatprep.subr.bf16.mxu1 %v5492_v43  ;;  %v5547_v43 = vld [vmem:[%s6965_s1 + $0xba4] ss:$8 sps:$4 sm:$0xff]   ;;  %v4877_v44 = vcombine.low %v3537_v39, %v6843_v40 }
 0x15e   : > { %3346 = vmatpush1.bf16.msra.mxu0 %v5481_v57 }
 0x15f   : > { %3347 = vmatprep.subr.bf16.mxu0 %v5489_v59  ;;  %v3708_v51 = vshll.u32 %v4877_v44, 16  ;;  %v5542_v59 = vld [vmem:[%s6965_s1 + $0xb20] ss:$8 sps:$4 sm:$0xff]  }
 0x160   : > { %3503 = vmatpush1.bf16.msra.mxu1 %v5490_v50  ;;  %v3705_v50 = vshrl.u32 %v4877_v44, 16 }
 0x161   : > { %3504 = vmatprep.subr.bf16.mxu1 %v5498_v55  ;;  %v5544_v55 = vld [vmem:[%s6965_s1 + $0xb24] ss:$8 sps:$4 sm:$0xff]  }
 0x162   : > { %3348 = vmatpush1.bf16.msra.mxu0 %v5487_v28  ;;  %v3707_v57 = vrot.slane %v3705_v50, 1 }
 0x163   : > { %3349 = vmatprep.subr.bf16.mxu0 %v5495_v62  ;;  %v5556_v62 = vld [vmem:[%s6965_s1 + $0xb04] ss:$8 sps:$4 sm:$0xff]  }
 0x164   : > { %3505 = vmatpush1.bf16.msra.mxu1 %v5496_v58  ;;  %v3710_v58 = vrot.slane %v3708_v51, 2 }
 0x165   : > { %3506 = vmatprep.subr.bf16.mxu1 %v5504_v47  ;;  %v5557_v47 = vld [vmem:[%s6965_s1 + $0xb80] ss:$8 sps:$4 sm:$0xff]  }
 0x166   : > { %3350 = vmatpush1.bf16.msra.mxu0 %v5493_v2  ;;  %v3711_v28 = vor.u32 %v3710_v58, %v3707_v57  ;;  %v5564_v2 = vld [vmem:[%s6965_s1 + $0xc74] ss:$8 sps:$4 sm:$0xff]  }
 0x167   : > { %3351 = vmatprep.subr.bf16.mxu0 %v5501_v6 }
 0x168   : > { %3507 = vmatpush1.bf16.msra.mxu1 %v5502_v61  ;;  %v5548_v61 = vld [vmem:[%s6965_s1 + $0xb10] ss:$8 sps:$4 sm:$0xff]  }
 0x169   : > { %3508 = vmatprep.subr.bf16.mxu1 %v5510_v63  ;;  %v4844_v63 = vcombine.low %v3537_v39, %v6736_v52  ;;  %v5562_v52 = vld [vmem:[%s6965_s1 + $0xc70] ss:$8 sps:$4 sm:$0xff]  }
 0x16a   : > { %3352 = vmatpush1.bf16.msra.mxu0 %v5499_v9 }
 0x16b   : > { %3353 = vmatprep.subr.bf16.mxu0 %v5507_v10  ;;  %v3558_v6 = vrot.slane %v4844_v63, 1 }
 0x16c   : > { %3509 = vmatpush1.bf16.msra.mxu1 %v5508_v5 }
 0x16d   : > { %3793 = vmatprep.subr.bf16.mxu1 %v5517_v7 }
 0x16e   : > { %3354 = vmatpush1.bf16.msra.mxu0 %v5505_v13  ;;  %v5570_v13 = vld [vmem:[%s6965_s1 + $0xc54] ss:$8 sps:$4 sm:$0xff]  }
 0x16f   : > { %v1744_v12 = vpop.f32.mrf.mxu1  ;;  %3527 = vmatmul.mubr.bf16.vlgmr.msra.gmra.mxu1 %v3412_v8  ;;  %3640 = vmatprep.subr.bf16.mxu0 %v5513_v15  ;;  %v5567_v8 = vld [vmem:[%s6965_s1 + $0xc64] ss:$8 sps:$4 sm:$0xff]  }
 0x170   : > { %3794 = vmatpush1.bf16.msra.mxu1 %v5515_v4  ;;  %3825 = vmatprep.mubr.bf16.mxu1 %v5599_v3 }
 0x171   : > { %v1746_v16 = vpop.f32.mrf.mxu1  ;;  %3795 = vmatprep.subr.bf16.mxu1 %v5523_v11  ;;  %v1598_v25 = vpop.f32.mrf.mxu0  ;;  %3372 = vmatmul.mubr.bf16.vlgmr.msra.gmra.mxu0 %v3241_v19  ;;  %v5565_v11 = vld [vmem:[%s6965_s1 + $0xc60] ss:$8 sps:$4 sm:$0xff]  }
 0x172   : > { %v1605_v26 = vadd.f32 %v1598_v25, %v6725_v45  ;;  %3641 = vmatpush1.bf16.msra.mxu0 %v5511_v20  ;;  %3672 = vmatprep.mubr.bf16.mxu0 %v5599_v3  ;;  %v5530_v45 = vld [vmem:[%s6965_s1 + $0xb40] ss:$8 sps:$4 sm:$0xff]   ;;  %v5582_v25 = vld [vmem:[%s6965_s1 + $0xc14] ss:$8 sps:$4 sm:$0xff]  }
 0x173   : > { %v1748_v18 = vpop.f32.mrf.mxu1  ;;  %v1600_v30 = vpop.f32.mrf.mxu0  ;;  %3642 = vmatprep.subr.bf16.mxu0 %v5520_v22  ;;  %v5571_v20 = vld [vmem:[%s6965_s1 + $0xc40] ss:$8 sps:$4 sm:$0xff]   ;;  %v5574_v22 = vld [vmem:[%s6965_s1 + $0xc30] ss:$8 sps:$4 sm:$0xff]  }
 0x174   : > { %3796 = vmatpush1.bf16.msra.mxu1 %v5521_v14  ;;  %v1606_v33 = vadd.f32 %v1600_v30, %v6731_v49  ;;  %v6832_v34 = vadd.f32 %v1744_v12, %v1605_v26  ;;  %v5553_v49 = vld [vmem:[%s6965_s1 + $0xb94] ss:$8 sps:$4 sm:$0xff]   ;;  %v5568_v18 = vld [vmem:[%s6965_s1 + $0xc50] ss:$8 sps:$4 sm:$0xff]  }
 0x175   : > { %3797 = vmatprep.subr.bf16.mxu1 %v5529_v17  ;;  %v1749_v24 = vpop.f32.mrf.mxu1  ;;  %v1602_v35 = vpop.f32.mrf.mxu0  ;;  %v5580_v26 = vld [vmem:[%s6965_s1 + $0xc10] ss:$8 sps:$4 sm:$0xff]  }
 0x176   : > { %v6838_v37 = vadd.f32 %v1746_v16, %v1606_v33  ;;  %3643 = vmatpush1.bf16.msra.mxu0 %v5518_v27  ;;  %v5577_v24 = vld [vmem:[%s6965_s1 + $0xc20] ss:$8 sps:$4 sm:$0xff]   ;;  %v3836_v27 = vld [vmem:[#allocation2 + $0xc] sm:$0xc] }
 0x177   : > { %v1603_v41 = vpop.f32.mrf.mxu0  ;;  %3644 = vmatprep.subr.bf16.mxu0 %v5526_v31  ;;  %v4910_v30 = vcombine.low %v3836_v27, %v6843_v40 }
 0x178   : > { %3798 = vmatpush1.bf16.msra.mxu1 %v5527_v21  ;;  %v5576_v21 = vld [vmem:[%s6965_s1 + $0xc34] ss:$8 sps:$4 sm:$0xff]  }
 0x179   : > { %3799 = vmatprep.subr.bf16.mxu1 %v5535_v23  ;;  %v5579_v23 = vld [vmem:[%s6965_s1 + $0xc24] ss:$8 sps:$4 sm:$0xff]  }
 0x17a   : > { %3645 = vmatpush1.bf16.msra.mxu0 %v5524_v36 }
 0x17b   : > { %3646 = vmatprep.subr.bf16.mxu0 %v5532_v42 }
 0x17c   : > { %3800 = vmatpush1.bf16.msra.mxu1 %v5533_v29  ;;  %v5585_v29 = vld [vmem:[%s6965_s1 + $0xc04] ss:$8 sps:$4 sm:$0xff]  }
 0x17d   : > { %3801 = vmatprep.subr.bf16.mxu1 %v5541_v32  ;;  %v5583_v32 = vld [vmem:[%s6965_s1 + $0xc00] ss:$8 sps:$4 sm:$0xff]  }
 0x17e   : > { %3647 = vmatpush1.bf16.msra.mxu0 %v5530_v45 }
 0x17f   : > { %3648 = vmatprep.subr.bf16.mxu0 %v5538_v48 }
 0x180   : > { %3802 = vmatpush1.bf16.msra.mxu1 %v5539_v38 }
 0x181   : > { %3803 = vmatprep.subr.bf16.mxu1 %v5547_v43 }
 0x182   : > { %3649 = vmatpush1.bf16.msra.mxu0 %v5536_v53 }
 0x183   : > { %3650 = vmatprep.subr.bf16.mxu0 %v5544_v55 }
 0x184   : > { %3804 = vmatpush1.bf16.msra.mxu1 %v5545_v46 }
 0x185   : > { %3805 = vmatprep.subr.bf16.mxu1 %v5553_v49 }
 0x186   : > { %3651 = vmatpush1.bf16.msra.mxu0 %v5542_v59 }
 0x187   : > { %3652 = vmatprep.subr.bf16.mxu0 %v5550_v60 }
 0x188   : > { %3806 = vmatpush1.bf16.msra.mxu1 %v5551_v54 }
 0x189   : > { %3807 = vmatprep.subr.bf16.mxu1 %v5559_v56 }
 0x18a   : > { %3653 = vmatpush1.bf16.msra.mxu0 %v5548_v61 }
 0x18b   : > { %3654 = vmatprep.subr.bf16.mxu0 %v5556_v62 }
 0x18c   : > { %3808 = vmatpush1.bf16.msra.mxu1 %v5557_v47 }
 0x18e   : > { %3655 = vmatpush1.bf16.msra.mxu0 %v5554_v1 }
 0x18f   : > { %v2046_v0 = vpop.f32.mrf.mxu1  ;;  %3826 = vmatmul.mubr.bf16.vlgmr.msra.gmra.mxu1 %v3711_v28  ;;  %3939 = vmatprep.subr.bf16.mxu0 %v5564_v2 }
 0x191   : > { %v2048_v5 = vpop.f32.mrf.mxu1  ;;  %v1893_v4 = vpop.f32.mrf.mxu0  ;;  %3673 = vmatmul.mubr.bf16.vlgmr.msra.gmra.mxu0 %v3558_v6 }
 0x192   : > { %v1900_v10 = vadd.f32 %v1893_v4, %v6832_v34  ;;  %3940 = vmatpush1.bf16.msra.mxu0 %v5562_v52  ;;  %3971 = vmatprep.mubr.bf16.mxu0 %v5599_v3  ;;  %v5573_v3 = vld [vmem:[%s6965_s1 + $0xc44] ss:$8 sps:$4 sm:$0xff]   ;;  %v3857_v34 = vrot.slane %v4910_v30, 2 }
 0x193   : > { %v2050_v7 = vpop.f32.mrf.mxu1  ;;  %v1895_v12 = vpop.f32.mrf.mxu0  ;;  %3941 = vmatprep.subr.bf16.mxu0 %v5567_v8 }
 0x194   : > { %v1901_v14 = vadd.f32 %v1895_v12, %v6838_v37  ;;  %v2053_v15 = vadd.f32 %v2046_v0, %v1900_v10 }
 0x195   : > { %v2051_v9 = vpop.f32.mrf.mxu1  ;;  %v1897_v16 = vpop.f32.mrf.mxu0 }
 0x196   : > { %v2054_v17 = vadd.f32 %v2048_v5, %v1901_v14  ;;  %3942 = vmatpush1.bf16.msra.mxu0 %v5565_v11 }
 0x197   : > { %v1898_v19 = vpop.f32.mrf.mxu0  ;;  %3943 = vmatprep.subr.bf16.mxu0 %v5570_v13 }
 0x19a   : > { %3944 = vmatpush1.bf16.msra.mxu0 %v5568_v18 }
 0x19b   : > { %3945 = vmatprep.subr.bf16.mxu0 %v5573_v3 }
 0x19e   : > { %3946 = vmatpush1.bf16.msra.mxu0 %v5571_v20 }
 0x19f   : > { %3947 = vmatprep.subr.bf16.mxu0 %v5576_v21 }
 0x1a2   : > { %3948 = vmatpush1.bf16.msra.mxu0 %v5574_v22 }
 0x1a3   : > { %3949 = vmatprep.subr.bf16.mxu0 %v5579_v23 }
 0x1a6   : > { %3950 = vmatpush1.bf16.msra.mxu0 %v5577_v24 }
 0x1a7   : > { %3951 = vmatprep.subr.bf16.mxu0 %v5582_v25 }
 0x1aa   : > { %3952 = vmatpush1.bf16.msra.mxu0 %v5580_v26 }
 0x1ab   : > { %3953 = vmatprep.subr.bf16.mxu0 %v5585_v29 }
 0x1ae   : > { %3954 = vmatpush1.bf16.msra.mxu0 %v5583_v32  ;;  %v3984_v32 = vlaneseq }
 0x1af   : > { %v2345_v31 = vpop.f32.mrf.mxu1 }
 0x1b1   : > { %v2347_v33 = vpop.f32.mrf.mxu1  ;;  %v2192_v37 = vpop.f32.mrf.mxu0  ;;  %3972 = vmatmul.mubr.bf16.vlgmr.msra.gmra.mxu0 %v3857_v34 }
 0x1b2   : > { %v2199_v38 = vadd.f32 %v2192_v37, %v2053_v15 }
 0x1b3   : > { %v2349_v35 = vpop.f32.mrf.mxu1  ;;  %v2194_v39 = vpop.f32.mrf.mxu0 }
 0x1b4   : > { %v2200_v41 = vadd.f32 %v2194_v39, %v2054_v17  ;;  %v2352_v42 = vadd.f32 %v2345_v31, %v2199_v38  ;;  %v3985_v35 = vshrl.u32 %v3984_v32, 7 }
 0x1b5   : > { %v2350_v36 = vpop.f32.mrf.mxu1  ;;  %v2196_v43 = vpop.f32.mrf.mxu0 }
 0x1b6   : > { %v2353_v40 = vadd.f32 %v2347_v33, %v2200_v41  ;;  %v6947_v38 = vmul.u32.u64.low 2863311531, %v3985_v35  ;;  %v6948_v39 = vmul.u32.u64.high 2863311531, %v3985_v35, %v6947_v38 }
 0x1b7   : > { %v2197_v44 = vpop.f32.mrf.mxu0 }
 0x1cf   : > { %v2634_v45 = vpop.f32.mrf.mxu1 }
 0x1d1   : > { %v2636_v46 = vpop.f32.mrf.mxu1  ;;  %v2485_v50 = vpop.f32.mrf.mxu0 }
 0x1d2   : > { %v2492_v51 = vadd.f32 %v2485_v50, %v2352_v42  ;;  %v4004_v42 = vshrl.u32 %v6948_v39, 2  ;;  %v3990_v50 = vsub.s32 1, %v3985_v35 }
 0x1d3   : > { %v2638_v48 = vpop.f32.mrf.mxu1  ;;  %v2487_v53 = vpop.f32.mrf.mxu0 }
 0x1d4   : > { %v2493_v54 = vadd.f32 %v2487_v53, %v2353_v40  ;;  %v2641_v55 = vadd.f32 %v2634_v45, %v2492_v51  ;;  %v4005_v43 = vmul.u32 6, %v4004_v42  ;;  %v3986_v45 = vsub.s32 0, %v3985_v35  ;;  %v3982_v48 = vld [vmem:[%s6966_s2] sm:$0x3] }
 0x1d5   : > { %v2639_v49 = vpop.f32.mrf.mxu1  ;;  %v2489_v56 = vpop.f32.mrf.mxu0 }
 0x1d6   : > { %v2642_v57 = vadd.f32 %v2636_v46, %v2493_v54  ;;  %v4006_v40 = vsub.s32 %v3985_v35, %v4005_v43  ;;  %v3987_v53 = vrot.slane %v3982_v48, %v3986_v45 }
 0x1d7   : > { %v2490_v58 = vpop.f32.mrf.mxu0 }
 0x1d8   : > { %vm4009_vm5 = vcmp.ne.s32.totalorder %v4006_v40, 0  ;;  %vm4010_vm6 = vcmp.lt.s32.totalorder %v4006_v40, 0  ;;  %v4012_v46 = vadd.s32 6, %v4006_v40  ;;  %v3991_v58 = vrot.slane %v3982_v48, %v3990_v50 }
 0x1d9   : > { %vm4011_vm7 = vmand %vm4010_vm6, %vm4009_vm5 }
 0x1da   : > { %v4013_v54 = vsel %vm4011_vm7, %v4012_v46, %v4006_v40 }
 0x1db   : > { %vm4014_vm8 = vcmp.lt.s32.totalorder %v4013_v54, 2 }
 0x1ef   : > { %v2933_v59 = vpop.f32.mrf.mxu1 }
 0x1f1   : > { %v2935_v47 = vpop.f32.mrf.mxu1  ;;  %v2787_v61 = vpop.f32.mrf.mxu0 }
 0x1f2   : > { %v2794_v62 = vadd.f32 %v2787_v61, %v2641_v55 }
 0x1f3   : > { %v2937_v60 = vpop.f32.mrf.mxu1  ;;  %v2789_v63 = vpop.f32.mrf.mxu0 }
 0x1f4   : > { %v2795_v0 = vadd.f32 %v2789_v63, %v2642_v57  ;;  %v2940_v1 = vadd.f32 %v2933_v59, %v2794_v62 }
 0x1f5   : > { %v2938_v28 = vpop.f32.mrf.mxu1  ;;  %v2791_v2 = vpop.f32.mrf.mxu0 }
 0x1f6   : > { %v2941_v5 = vadd.f32 %v2935_v47, %v2795_v0 }
 0x1f7   : > { %v2792_v6 = vpop.f32.mrf.mxu0 }
 0x20f   : > { %v3232_v7 = vpop.f32.mrf.mxu1 }
 0x211   : > { %v3234_v52 = vpop.f32.mrf.mxu1  ;;  %v3086_v4 = vpop.f32.mrf.mxu0 }
 0x212   : > { %v3093_v10 = vadd.f32 %v3086_v4, %v2940_v1 }
 0x213   : > { %v3236_v8 = vpop.f32.mrf.mxu1  ;;  %v3088_v11 = vpop.f32.mrf.mxu0 }
 0x214   : > { %v3094_v12 = vadd.f32 %v3088_v11, %v2941_v5  ;;  %v3239_v13 = vadd.f32 %v3232_v7, %v3093_v10 }
 0x215   : > { %v3237_v9 = vpop.f32.mrf.mxu1  ;;  %v3090_v14 = vpop.f32.mrf.mxu0 }
 0x216   : > { %v3240_v15 = vadd.f32 %v3234_v52, %v3094_v12  ;;  %v4034_v9 = vld [vmem:[%s6967_s3] sm:$0x3] }
 0x217   : > { %v3091_v16 = vpop.f32.mrf.mxu0 }
 0x218   : > { %v4043_v16 = vrot.slane %v4034_v9, %v3990_v50 }
 0x22f   : > { %v3528_v17 = vpop.f32.mrf.mxu1 }
 0x231   : > { %v3530_v18 = vpop.f32.mrf.mxu1  ;;  %v3373_v20 = vpop.f32.mrf.mxu0 }
 0x232   : > { %v3380_v21 = vadd.f32 %v3373_v20, %v3239_v13  ;;  %v4039_v13 = vrot.slane %v4034_v9, %v3986_v45 }
 0x233   : > { %v3532_v19 = vpop.f32.mrf.mxu1  ;;  %v3375_v22 = vpop.f32.mrf.mxu0 }
 0x234   : > { %v3381_v23 = vadd.f32 %v3375_v22, %v3240_v15  ;;  %v3535_v24 = vadd.f32 %v3528_v17, %v3380_v21  ;;  %v4054_v22 = vld [vmem:[#allocation3] sm:$0x1] }
 0x235   : > { %v3533_v3 = vpop.f32.mrf.mxu1  ;;  %v3377_v25 = vpop.f32.mrf.mxu0 }
 0x236   : > { %v3536_v26 = vadd.f32 %v3530_v18, %v3381_v23 }
 0x237   : > { %v3378_v27 = vpop.f32.mrf.mxu0 }
 0x24f   : > { %v3827_v29 = vpop.f32.mrf.mxu1 }
 0x251   : > { %v3829_v30 = vpop.f32.mrf.mxu1  ;;  %v3674_v34 = vpop.f32.mrf.mxu0 }
 0x252   : > { %v3681_v44 = vadd.f32 %v3674_v34, %v3535_v24 }
 0x253   : > { %v3831_v31 = vpop.f32.mrf.mxu1  ;;  %v3676_v36 = vpop.f32.mrf.mxu0 }
 0x254   : > { %v3682_v49 = vadd.f32 %v3676_v36, %v3536_v26  ;;  %v3834_v51 = vadd.f32 %v3827_v29, %v3681_v44 }
 0x255   : > { %v3832_v33 = vpop.f32.mrf.mxu1  ;;  %v3678_v37 = vpop.f32.mrf.mxu0 }
 0x256   : > { %v3835_v56 = vadd.f32 %v3829_v30, %v3682_v49 }
 0x257   : > { %v3679_v41 = vpop.f32.mrf.mxu0 }
 0x271   : > { %v3973_v55 = vpop.f32.mrf.mxu0 }
 0x272   : > { %v3980_v57 = vadd.f32 %v3973_v55, %v3834_v51 }
 0x273   : > { %v3975_v59 = vpop.f32.mrf.mxu0 }
 0x274   : > { %v3994_v47 = vadd.f32 %v3987_v53, %v3980_v57  ;;  %v3981_v60 = vadd.f32 %v3975_v59, %v3835_v56 }
 0x275   : > { %v3977_v28 = vpop.f32.mrf.mxu0 }
 0x276   : > { %v4017_v61 = vsel %vm4014_vm8, %v3994_v47, 0.0  ;;  %v3995_v62 = vadd.f32 %v3991_v58, %v3981_v60 }
 0x277   : > { %v4019_v63 = vrot.slane %v4017_v61, 4  ;;  %v3978_v0 = vpop.f32.mrf.mxu0 }
 0x278   : > { %v4018_v1 = vsel %vm4014_vm8, %v3995_v62, 0.0 }
 0x279   : > { %v4020_v2 = vadd.f32 %v4019_v63, %v4017_v61  ;;  %v4025_v5 = vrot.slane %v4018_v1, 4 }
 0x27b   : > { %v4021_v6 = vrot.slane %v4020_v2, 2  ;;  %v4026_v7 = vadd.f32 %v4025_v5, %v4018_v1 }
 0x27d   : > { %v4027_v52 = vrot.slane %v4026_v7, 2  ;;  %v4022_v8 = vadd.f32 %v4021_v6, %v4020_v2 }
 0x27f   : > { %v4023_v4 = vrot.slane %v4022_v8, 1  ;;  %v4028_v10 = vadd.f32 %v4027_v52, %v4026_v7 }
 0x281   : > { %v4024_v11 = vadd.f32 %v4023_v4, %v4022_v8  ;;  %v4029_v12 = vrot.slane %v4028_v10, 1 }
 0x283   : > { %v4030_v14 = vadd.f32 %v4029_v12, %v4028_v10  ;;  %v4032_v15 = vmul.f32 0.25, %v4024_v11 }
 0x285   : > { %v4033_v17 = vmul.f32 0.25, %v4030_v14  ;;  %v4046_v18 = vmul.f32 %v4039_v13, %v4032_v15 }
 0x287   : > { %v4047_v19 = vmul.f32 %v4043_v16, %v4033_v17  ;;  %v4049_v3 = vsel %vm4048_vm9, %v4046_v18, 0.0 }
 0x289   : > { %v4050_v20 = vsel %vm4048_vm9, %v4047_v19, 0.0 }
 0x28a   : > { %v4051_v21 = vadd.f32 %v4050_v20, %v4049_v3 }
 0x28c   : > { %4052 = vadd.xlane.f32.xlu0 %v4051_v21 }
 0x315   : > { %v4053_v23 = vpop.xlane.xlu0 %4052 }
 0x316   : > { %v4055_v24 = vadd.f32 %v4054_v22, %v4053_v23 }
 0x318   : > { %v4056_v25 = vsub.f32 0.0, %v4055_v24 }
 0x31a   : > { %v4057_v26 = vmul.f32 1.442695, %v4056_v25 }
 0x31c   : > { %5587 = vpow2.f32 %v4057_v26 }
 0x329   : > { %v5588_v27 = vpop.eup %5587 }
 0x32a   : > { %v4059_v29 = vadd.f32 1.0, %v5588_v27 }
 0x32c   : > { %5589 = vrcp.f32 %v4059_v29 }
 0x339   : > { %v5590_v30 = vpop.eup %5589 }
 0x33a   : > { %4063 = vst.msk [vmem:[%s222_s9] sm:$0x1] %vm4062_vm10, %v5590_v30 }
 0x33b PF: > { %s17_s20 = sadd.s32 1, %s5597_s20  }
 0x33c   : > { %p14_p4 = scmp.ge.s32.totalorder %s17_s20, 4  }
 0x33e   :  { %16 = sbr.rel (!%p14_p4) target bundleno = 3 (0x3), region = 94 }

</bundles_post_ra>
